<compile_context>
chip_gen: v7x
topology: tpu7x:2x2x1
jax: 0.10.0
libtpu: 0.0.40
codegen_flags: <defaults>
</compile_context>

<pallas_src>
from functools import partial

import jax
import jax.numpy as jnp
from jax.experimental import pallas as pl
from jax.experimental.pallas import tpu as pltpu

IN_C = 8                 # SpecialBlock in_channels
OUTC = 32                # SpecialBlock out_channels
NUM_CLASSES = 14
N_OUT = 2 * NUM_CLASSES  # 28
BN_EPS = 1e-5


# --------------------------------- kernel ------------------------------------

def soundnet_kernel(x_ref, t0_ref, tl_ref, tm_ref, th_ref,
                    pc_ref, fcw_ref, fcb_ref, out_ref):
    # x_ref: (IN_C * L, Bt)  rows = (channel, position), cols = batch (lanes)
    x = x_ref[...]
    rows, bt = x.shape
    L = rows // IN_C

    # ---- NormBlock: per-sample (x - min) / (max - min), one column per sample
    mx = jnp.max(x, axis=0, keepdims=True)                 # (1, Bt)
    mn = jnp.min(x, axis=0, keepdims=True)                 # (1, Bt)
    rng = mx - mn
    rng = jnp.where(rng == 0.0, 1.0, rng)                  # guard constant sample (0/0)
    inv = pl.reciprocal(rng, approx=False)                 # one recip per sample, exact
    xn = (x - mn) * inv                                    # (IN_C*L, Bt)

    # ---- packed per-row params (OUTC*L, 7): [b0, sl, bl, sm, bm, sh, bh] -----
    pc = pc_ref[...]
    b0 = pc[:, 0:1]
    sl, bl = pc[:, 1:2], pc[:, 2:3]
    sm, bm = pc[:, 3:4], pc[:, 4:5]
    sh, bh = pc[:, 5:6], pc[:, 6:7]

    # ---- SpecialBlock entry conv: Conv1d(8,32,k=3,pad=1) as one Toeplitz matmul
    out0 = jnp.dot(t0_ref[...], xn,
                   preferred_element_type=jnp.float32) + b0        # (OUTC*L, Bt)

    def seg_max(a):
        # per-sample, per-channel max over length: (OUTC*L, Bt) -> (OUTC, Bt)
        return jnp.max(a.reshape(OUTC, L, bt), axis=1)

    def branch(scale, bias, t_ref):
        # folded BN(eval) + ReLU, then Conv1d (Toeplitz matmul), then length-max.
        h = jnp.maximum(scale * out0 + bias, 0.0)                  # (OUTC*L, Bt)
        c = jnp.dot(t_ref[...], h, preferred_element_type=jnp.float32)
        return seg_max(c)                                          # (OUTC, Bt)

    # Feature order [low, out0, mid, high]; the wrapper pre-summed the three
    # out0 fc-weight slices and folded the branch conv biases into the fc bias.
    feat = jnp.concatenate([branch(sl, bl, tl_ref),
                            seg_max(out0),
                            branch(sm, bm, tm_ref),
                            branch(sh, bh, th_ref)], axis=0)       # (4*OUTC, Bt)

    # ---- fc head (Dropout eval = id, Linear(192, 28)) as an MXU matmul -------
    out_ref[...] = (jnp.dot(fcw_ref[...], feat,
                            preferred_element_type=jnp.float32) + fcb_ref[...])


# ----------------------------- parameter plumbing -----------------------------

def init_raw_params(key):
    """Deterministic synthetic parameters in PyTorch layouts."""
    keys = iter(jax.random.split(key, 32))

    def nrm(shape, scale=0.1):
        return scale * jax.random.normal(next(keys), shape, jnp.float32)

    raw = {"w0": nrm((OUTC, IN_C, 3)), "b0": nrm((OUTC,), 0.05)}
    for name, k in (("low", 3), ("mid", 5), ("high", 7)):
        raw[name + "_g"] = 1.0 + nrm((OUTC,))
        raw[name + "_b"] = nrm((OUTC,))
        raw[name + "_m"] = nrm((OUTC,))
        raw[name + "_v"] = 1.0 + jnp.abs(nrm((OUTC,)))
        raw[name + "_w"] = nrm((OUTC, OUTC, k))
        raw[name + "_cb"] = nrm((OUTC,), 0.05)
    raw["fcw"] = nrm((N_OUT, 6 * OUTC), 0.05)   # nn.Linear weight (out, in)
    raw["fcb"] = nrm((N_OUT,), 0.05)
    return raw


def _fold_bn(gamma, beta, mean, var, eps=BN_EPS):
    scale = gamma / jnp.sqrt(var + eps)
    return scale, beta - mean * scale


def _conv_toeplitz(w, L):
    """PyTorch Conv1d weight (Cout, Cin, K) with 'same' padding p=(K-1)//2 as a
    (Cout*L, Cin*L) matrix acting on (Cin*L, B) columns. Zero padding is
    implicit: out-of-range taps simply have no column."""
    Cout, Cin, K = w.shape
    p = (K - 1) // 2
    l = jnp.arange(L)[:, None]            # output position
    j = jnp.arange(L)[None, :]            # input position
    k = j - l + p                         # tap index, (L, L)
    valid = ((k >= 0) & (k < K)).astype(w.dtype)
    kc = jnp.clip(k, 0, K - 1)
    t = w[:, :, kc] * valid[None, None]   # (Cout, Cin, L, L) = (co, ci, l, j)
    return jnp.transpose(t, (0, 2, 1, 3)).reshape(Cout * L, Cin * L)


def prepare_params(raw, L):
    rep = lambda v: jnp.repeat(v, L)      # per-channel -> per-(channel, pos) row

    t0 = _conv_toeplitz(raw["w0"], L)     # (OUTC*L, IN_C*L)
    tl = _conv_toeplitz(raw["low_w"], L)  # (OUTC*L, OUTC*L)
    tm = _conv_toeplitz(raw["mid_w"], L)
    th = _conv_toeplitz(raw["high_w"], L)

    sl, bl = _fold_bn(raw["low_g"], raw["low_b"], raw["low_m"], raw["low_v"])
    sm, bm = _fold_bn(raw["mid_g"], raw["mid_b"], raw["mid_m"], raw["mid_v"])
    sh, bh = _fold_bn(raw["high_g"], raw["high_b"], raw["high_m"], raw["high_v"])

    pc = jnp.stack([rep(raw["b0"]), rep(sl), rep(bl), rep(sm), rep(bm),
                    rep(sh), rep(bh)], axis=1)                      # (OUTC*L, 7)

    # fc weight: features are [low, out0, mid, out0, high, out0]; pre-sum the
    # three out0 slices -> grouped columns [low, out0, mid, high].
    fcw = raw["fcw"]                                                # (28, 192)
    g = lambda i: fcw[:, i * OUTC:(i + 1) * OUTC]
    fcw_g = jnp.concatenate([g(0), g(1) + g(3) + g(5), g(2), g(4)], axis=1)  # (28,128)

    # Branch conv biases commute with the length-max -> fold into the fc bias.
    cbvec = jnp.concatenate([raw["low_cb"], jnp.zeros((OUTC,), jnp.float32),
                             raw["mid_cb"], raw["high_cb"]])        # (128,)
    fcb_eff = (raw["fcb"] + fcw_g @ cbvec).reshape(N_OUT, 1)        # (28, 1)
    return (t0, tl, tm, th, pc, fcw_g, fcb_eff)


# ---------------------------------- forward -----------------------------------

@partial(jax.jit, static_argnames=("bt",))
def soundnet_forward(x, prep, *, bt=128):
    B, C, L = x.shape
    assert C == IN_C
    assert L % 4 == 0, "MaxPool1d(4)+AdaptiveMaxPool1d(1) == global max needs L % 4 == 0"
    t0, tl, tm, th, pc, fcw_g, fcb_eff = prep
    assert t0.shape == (OUTC * L, IN_C * L), "prepare_params was built for a different L"

    # Lay samples out along the lane axis: (C, L, B) -> (C*L, Bpad).
    x2 = jnp.transpose(x, (1, 2, 0)).reshape(C * L, B)
    n_steps = (B + bt - 1) // bt
    bpad = n_steps * bt
    if bpad != B:
        x2 = jnp.pad(x2, ((0, 0), (0, bpad - B)))   # zero samples -> rng guard, discarded

    const = lambda g: (0, 0)
    out = pl.pallas_call(
        soundnet_kernel,
        out_shape=jax.ShapeDtypeStruct((N_OUT, bpad), jnp.float32),
        grid=(n_steps,),
        in_specs=[
            pl.BlockSpec((C * L, bt), lambda g: (0, g)),   # per-step batch slab
            pl.BlockSpec(t0.shape, const),                 # Toeplitz weights: resident
            pl.BlockSpec(tl.shape, const),
            pl.BlockSpec(tm.shape, const),
            pl.BlockSpec(th.shape, const),
            pl.BlockSpec(pc.shape, const),
            pl.BlockSpec(fcw_g.shape, const),
            pl.BlockSpec(fcb_eff.shape, const),
        ],
        out_specs=pl.BlockSpec((N_OUT, bt), lambda g: (0, g)),
        compiler_params=pltpu.CompilerParams(
            dimension_semantics=("parallel",)),
    )(x2, t0, tl, tm, th, pc, fcw_g, fcb_eff)

    logits = out.T[:B].reshape(B, 2, NUM_CLASSES)
    return logits[:, 0, :], logits[:, 1, :]


# ------------------------- pure-JAX reference (eval mode) ----------------------

def soundnet_reference(x, raw):
    mx = jnp.max(x, axis=(1, 2), keepdims=True)
    mn = jnp.min(x, axis=(1, 2), keepdims=True)
    rng = jnp.where(mx - mn == 0.0, 1.0, mx - mn)
    xn = (x - mn) / rng

    def conv1d(h, w, b, pad):
        K, L = w.shape[2], h.shape[2]
        hp = jnp.pad(h, ((0, 0), (0, 0), (pad, pad)))
        out = jnp.broadcast_to(b[None, :, None], (h.shape[0], w.shape[0], L))
        for k in range(K):
            out = out + jnp.einsum("oi,bil->bol", w[:, :, k], hp[:, :, k:k + L])
        return out

    def bn(h, g, b, m, v):
        return (g[None, :, None] * (h - m[None, :, None])
                / jnp.sqrt(v[None, :, None] + BN_EPS) + b[None, :, None])

    out0 = conv1d(xn, raw["w0"], raw["b0"], 1)

    def branch(prefix, pad):
        h = jax.nn.relu(bn(out0, raw[prefix + "_g"], raw[prefix + "_b"],
                           raw[prefix + "_m"], raw[prefix + "_v"]))
        return conv1d(h, raw[prefix + "_w"], raw[prefix + "_cb"], pad)

    low, mid, high = branch("low", 1), branch("mid", 2), branch("high", 3)
    gmax = lambda t: jnp.max(t, axis=2)
    feat = jnp.concatenate([gmax(low), gmax(out0), gmax(mid), gmax(out0),
                            gmax(high), gmax(out0)], axis=1)       # (B, 192)
    logits = feat @ raw["fcw"].T + raw["fcb"][None, :]
    logits = logits.reshape(-1, 2, NUM_CLASSES)
    return logits[:, 0, :], logits[:, 1, :]


if __name__ == "__main__":
    key = jax.random.PRNGKey(0)
    kx, kp = jax.random.split(key)

    B, L = 200, 16                      # B not a multiple of Bt: exercises padding; grid=2
    x = jax.random.normal(kx, (B, IN_C, L), jnp.float32)
    raw = init_raw_params(kp)
    prep = prepare_params(raw, L)

    out_a, out_b = soundnet_forward(x, prep, bt=128)
    jax.block_until_ready((out_a, out_b))

    ref_a, ref_b = soundnet_reference(x, raw)
    assert out_a.shape == (B, NUM_CLASSES) and out_b.shape == (B, NUM_CLASSES)
    assert jnp.allclose(out_a, ref_a, atol=1e-3, rtol=1e-3)
    assert jnp.allclose(out_b, ref_b, atol=1e-3, rtol=1e-3)
    print("KERNEL_OK")
</pallas_src>

<mosaic_0001>
module attributes {stable_mosaic.version = 11 : i64} {
  func.func @soundnet_kernel(%arg0: i32, %arg1: memref<128x128xf32, #tpu.memory_space<vmem>>, %arg2: memref<512x128xf32, #tpu.memory_space<vmem>>, %arg3: memref<512x512xf32, #tpu.memory_space<vmem>>, %arg4: memref<512x512xf32, #tpu.memory_space<vmem>>, %arg5: memref<512x512xf32, #tpu.memory_space<vmem>>, %arg6: memref<512x7xf32, #tpu.memory_space<vmem>>, %arg7: memref<28x128xf32, #tpu.memory_space<vmem>>, %arg8: memref<28x1xf32, #tpu.memory_space<vmem>>, %arg9: memref<28x128xf32, #tpu.memory_space<vmem>>) attributes {dimension_semantics = [#tpu.dimension_semantics<parallel>], iteration_bounds = array<i64: 2>, scalar_prefetch = 0 : i64, scratch_operands = 0 : i64, tpu.core_type = #tpu.core_type<tc>, window_params = [{transform_indices = @transform_0, window_bounds = array<i64: 128, 128>}, {pipeline_mode = #tpu.pipeline_mode<synchronous>, transform_indices = @transform_1, window_bounds = array<i64: 512, 128>}, {pipeline_mode = #tpu.pipeline_mode<synchronous>, transform_indices = @transform_2, window_bounds = array<i64: 512, 512>}, {pipeline_mode = #tpu.pipeline_mode<synchronous>, transform_indices = @transform_3, window_bounds = array<i64: 512, 512>}, {pipeline_mode = #tpu.pipeline_mode<synchronous>, transform_indices = @transform_4, window_bounds = array<i64: 512, 512>}, {pipeline_mode = #tpu.pipeline_mode<synchronous>, transform_indices = @transform_5, window_bounds = array<i64: 512, 7>}, {pipeline_mode = #tpu.pipeline_mode<synchronous>, transform_indices = @transform_6, window_bounds = array<i64: 28, 128>}, {pipeline_mode = #tpu.pipeline_mode<synchronous>, transform_indices = @transform_7, window_bounds = array<i64: 28, 1>}, {transform_indices = @transform_8, window_bounds = array<i64: 28, 128>}]} {
    %c0 = arith.constant 0 : index
    %c0_0 = arith.constant 0 : index
    %0 = vector.load %arg1[%c0, %c0_0] : memref<128x128xf32, #tpu.memory_space<vmem>>, vector<128x128xf32>
    %cst = arith.constant dense<0xFF800000> : vector<128xf32>
    %1 = vector.multi_reduction <maximumf>, %0, %cst [0] : vector<128x128xf32> to vector<128xf32>
    %2 = vector.shape_cast %1 : vector<128xf32> to vector<1x128xf32>
    %cst_1 = arith.constant dense<0x7F800000> : vector<128xf32>
    %3 = vector.multi_reduction <minimumf>, %0, %cst_1 [0] : vector<128x128xf32> to vector<128xf32>
    %4 = vector.shape_cast %3 : vector<128xf32> to vector<1x128xf32>
    %5 = arith.subf %2, %4 : vector<1x128xf32>
    %cst_2 = arith.constant 0.000000e+00 : f32
    %6 = vector.broadcast %cst_2 : f32 to vector<1x128xf32>
    %7 = arith.cmpf oeq, %5, %6 : vector<1x128xf32>
    %cst_3 = arith.constant 1.000000e+00 : f32
    %8 = vector.broadcast %cst_3 : f32 to vector<1x128xf32>
    %9 = arith.select %7, %8, %5 : vector<1x128xi1>, vector<1x128xf32>
    %10 = tpu.reciprocal %9 : vector<1x128xf32> -> vector<1x128xf32>
    %11 = vector.broadcast %4 : vector<1x128xf32> to vector<128x128xf32>
    %12 = arith.subf %0, %11 : vector<128x128xf32>
    %13 = vector.broadcast %10 : vector<1x128xf32> to vector<128x128xf32>
    %14 = arith.mulf %12, %13 : vector<128x128xf32>
    %c0_4 = arith.constant 0 : index
    %c0_5 = arith.constant 0 : index
    %15 = vector.load %arg6[%c0_4, %c0_5] : memref<512x7xf32, #tpu.memory_space<vmem>>, vector<512x7xf32>
    %16 = vector.extract_strided_slice %15 {offsets = [0, 0], sizes = [512, 1], strides = [1, 1]} : vector<512x7xf32> to vector<512x1xf32>
    %17 = vector.extract_strided_slice %15 {offsets = [0, 1], sizes = [512, 1], strides = [1, 1]} : vector<512x7xf32> to vector<512x1xf32>
    %18 = vector.extract_strided_slice %15 {offsets = [0, 2], sizes = [512, 1], strides = [1, 1]} : vector<512x7xf32> to vector<512x1xf32>
    %19 = vector.extract_strided_slice %15 {offsets = [0, 3], sizes = [512, 1], strides = [1, 1]} : vector<512x7xf32> to vector<512x1xf32>
    %20 = vector.extract_strided_slice %15 {offsets = [0, 4], sizes = [512, 1], strides = [1, 1]} : vector<512x7xf32> to vector<512x1xf32>
    %21 = vector.extract_strided_slice %15 {offsets = [0, 5], sizes = [512, 1], strides = [1, 1]} : vector<512x7xf32> to vector<512x1xf32>
    %22 = vector.extract_strided_slice %15 {offsets = [0, 6], sizes = [512, 1], strides = [1, 1]} : vector<512x7xf32> to vector<512x1xf32>
    %c0_6 = arith.constant 0 : index
    %c0_7 = arith.constant 0 : index
    %23 = vector.load %arg2[%c0_6, %c0_7] : memref<512x128xf32, #tpu.memory_space<vmem>>, vector<512x128xf32>
    %cst_8 = arith.constant dense<0.000000e+00> : vector<512x128xf32>
    %24 = tpu.matmul %23, %14, %cst_8 {dimension_numbers = #tpu.dot_dimension_numbers<[1], [0], [0], [1], [0, 0, 1, 1], [], []>} : vector<512x128xf32>, vector<128x128xf32>, vector<512x128xf32> -> vector<512x128xf32>
    %25 = vector.broadcast %16 : vector<512x1xf32> to vector<512x128xf32>
    %26 = arith.addf %24, %25 : vector<512x128xf32>
    %27 = vector.broadcast %17 : vector<512x1xf32> to vector<512x128xf32>
    %28 = arith.mulf %27, %26 : vector<512x128xf32>
    %29 = vector.broadcast %18 : vector<512x1xf32> to vector<512x128xf32>
    %30 = arith.addf %28, %29 : vector<512x128xf32>
    %cst_9 = arith.constant 0.000000e+00 : f32
    %31 = vector.broadcast %cst_9 : f32 to vector<512x128xf32>
    %32 = arith.maximumf %30, %31 : vector<512x128xf32>
    %c0_10 = arith.constant 0 : index
    %c0_11 = arith.constant 0 : index
    %33 = vector.load %arg3[%c0_10, %c0_11] : memref<512x512xf32, #tpu.memory_space<vmem>>, vector<512x512xf32>
    %cst_12 = arith.constant dense<0.000000e+00> : vector<512x128xf32>
    %34 = tpu.matmul %33, %32, %cst_12 {dimension_numbers = #tpu.dot_dimension_numbers<[1], [0], [0], [1], [0, 0, 1, 1], [], []>} : vector<512x512xf32>, vector<512x128xf32>, vector<512x128xf32> -> vector<512x128xf32>
    %35 = vector.shape_cast %34 : vector<512x128xf32> to vector<32x16x128xf32>
    %cst_13 = arith.constant dense<0xFF800000> : vector<32x128xf32>
    %36 = vector.multi_reduction <maximumf>, %35, %cst_13 [1] : vector<32x16x128xf32> to vector<32x128xf32>
    %37 = vector.shape_cast %26 : vector<512x128xf32> to vector<32x16x128xf32>
    %cst_14 = arith.constant dense<0xFF800000> : vector<32x128xf32>
    %38 = vector.multi_reduction <maximumf>, %37, %cst_14 [1] : vector<32x16x128xf32> to vector<32x128xf32>
    %39 = vector.broadcast %19 : vector<512x1xf32> to vector<512x128xf32>
    %40 = arith.mulf %39, %26 : vector<512x128xf32>
    %41 = vector.broadcast %20 : vector<512x1xf32> to vector<512x128xf32>
    %42 = arith.addf %40, %41 : vector<512x128xf32>
    %cst_15 = arith.constant 0.000000e+00 : f32
    %43 = vector.broadcast %cst_15 : f32 to vector<512x128xf32>
    %44 = arith.maximumf %42, %43 : vector<512x128xf32>
    %c0_16 = arith.constant 0 : index
    %c0_17 = arith.constant 0 : index
    %45 = vector.load %arg4[%c0_16, %c0_17] : memref<512x512xf32, #tpu.memory_space<vmem>>, vector<512x512xf32>
    %cst_18 = arith.constant dense<0.000000e+00> : vector<512x128xf32>
    %46 = tpu.matmul %45, %44, %cst_18 {dimension_numbers = #tpu.dot_dimension_numbers<[1], [0], [0], [1], [0, 0, 1, 1], [], []>} : vector<512x512xf32>, vector<512x128xf32>, vector<512x128xf32> -> vector<512x128xf32>
    %47 = vector.shape_cast %46 : vector<512x128xf32> to vector<32x16x128xf32>
    %cst_19 = arith.constant dense<0xFF800000> : vector<32x128xf32>
    %48 = vector.multi_reduction <maximumf>, %47, %cst_19 [1] : vector<32x16x128xf32> to vector<32x128xf32>
    %49 = vector.broadcast %21 : vector<512x1xf32> to vector<512x128xf32>
    %50 = arith.mulf %49, %26 : vector<512x128xf32>
    %51 = vector.broadcast %22 : vector<512x1xf32> to vector<512x128xf32>
    %52 = arith.addf %50, %51 : vector<512x128xf32>
    %cst_20 = arith.constant 0.000000e+00 : f32
    %53 = vector.broadcast %cst_20 : f32 to vector<512x128xf32>
    %54 = arith.maximumf %52, %53 : vector<512x128xf32>
    %c0_21 = arith.constant 0 : index
    %c0_22 = arith.constant 0 : index
    %55 = vector.load %arg5[%c0_21, %c0_22] : memref<512x512xf32, #tpu.memory_space<vmem>>, vector<512x512xf32>
    %cst_23 = arith.constant dense<0.000000e+00> : vector<512x128xf32>
    %56 = tpu.matmul %55, %54, %cst_23 {dimension_numbers = #tpu.dot_dimension_numbers<[1], [0], [0], [1], [0, 0, 1, 1], [], []>} : vector<512x512xf32>, vector<512x128xf32>, vector<512x128xf32> -> vector<512x128xf32>
    %57 = vector.shape_cast %56 : vector<512x128xf32> to vector<32x16x128xf32>
    %cst_24 = arith.constant dense<0xFF800000> : vector<32x128xf32>
    %58 = vector.multi_reduction <maximumf>, %57, %cst_24 [1] : vector<32x16x128xf32> to vector<32x128xf32>
    %59 = tpu.concatenate %36, %38, %48, %58 in 0 : vector<32x128xf32>, vector<32x128xf32>, vector<32x128xf32>, vector<32x128xf32> -> vector<128x128xf32>
    %c0_25 = arith.constant 0 : index
    %c0_26 = arith.constant 0 : index
    %60 = vector.load %arg7[%c0_25, %c0_26] : memref<28x128xf32, #tpu.memory_space<vmem>>, vector<28x128xf32>
    %cst_27 = arith.constant dense<0.000000e+00> : vector<28x128xf32>
    %61 = tpu.matmul %60, %59, %cst_27 {dimension_numbers = #tpu.dot_dimension_numbers<[1], [0], [0], [1], [0, 0, 1, 1], [], []>} : vector<28x128xf32>, vector<128x128xf32>, vector<28x128xf32> -> vector<28x128xf32>
    %c0_28 = arith.constant 0 : index
    %c0_29 = arith.constant 0 : index
    %62 = vector.load %arg8[%c0_28, %c0_29] : memref<28x1xf32, #tpu.memory_space<vmem>>, vector<28x1xf32>
    %63 = vector.broadcast %62 : vector<28x1xf32> to vector<28x128xf32>
    %64 = arith.addf %61, %63 : vector<28x128xf32>
    %c0_30 = arith.constant 0 : index
    %c0_31 = arith.constant 0 : index
    %65 = vector.load %arg9[%c0_30, %c0_31] : memref<28x128xf32, #tpu.memory_space<vmem>>, vector<28x128xf32>
    tpu.vector_store %arg9[%c0_30, %c0_31], %64 {strides = array<i32>} : memref<28x128xf32, #tpu.memory_space<vmem>>, vector<28x128xf32>,
    return
  }
  func.func @transform_0(%arg0: i32) -> (i32, i32) {
    %c0_i32 = arith.constant 0 : i32
    %c0_i32_0 = arith.constant 0 : i32
    return %c0_i32, %arg0 : i32, i32
  }
  func.func @transform_1(%arg0: i32) -> (i32, i32) {
    %c0_i32 = arith.constant 0 : i32
    %c0_i32_0 = arith.constant 0 : i32
    %c0_i32_1 = arith.constant 0 : i32
    return %c0_i32, %c0_i32_0 : i32, i32
  }
  func.func @transform_2(%arg0: i32) -> (i32, i32) {
    %c0_i32 = arith.constant 0 : i32
    %c0_i32_0 = arith.constant 0 : i32
    %c0_i32_1 = arith.constant 0 : i32
    return %c0_i32, %c0_i32_0 : i32, i32
  }
  func.func @transform_3(%arg0: i32) -> (i32, i32) {
    %c0_i32 = arith.constant 0 : i32
    %c0_i32_0 = arith.constant 0 : i32
    %c0_i32_1 = arith.constant 0 : i32
    return %c0_i32, %c0_i32_0 : i32, i32
  }
  func.func @transform_4(%arg0: i32) -> (i32, i32) {
    %c0_i32 = arith.constant 0 : i32
    %c0_i32_0 = arith.constant 0 : i32
    %c0_i32_1 = arith.constant 0 : i32
    return %c0_i32, %c0_i32_0 : i32, i32
  }
  func.func @transform_5(%arg0: i32) -> (i32, i32) {
    %c0_i32 = arith.constant 0 : i32
    %c0_i32_0 = arith.constant 0 : i32
    %c0_i32_1 = arith.constant 0 : i32
    return %c0_i32, %c0_i32_0 : i32, i32
  }
  func.func @transform_6(%arg0: i32) -> (i32, i32) {
    %c0_i32 = arith.constant 0 : i32
    %c0_i32_0 = arith.constant 0 : i32
    %c0_i32_1 = arith.constant 0 : i32
    return %c0_i32, %c0_i32_0 : i32, i32
  }
  func.func @transform_7(%arg0: i32) -> (i32, i32) {
    %c0_i32 = arith.constant 0 : i32
    %c0_i32_0 = arith.constant 0 : i32
    %c0_i32_1 = arith.constant 0 : i32
    return %c0_i32, %c0_i32_0 : i32, i32
  }
  func.func @transform_8(%arg0: i32) -> (i32, i32) {
    %c0_i32 = arith.constant 0 : i32
    %c0_i32_0 = arith.constant 0 : i32
    return %c0_i32, %arg0 : i32, i32
  }
}

</mosaic_0001>

<bundles_post_ra>
// kernel: soundnet_forward.1
= control target key start
LH: loop header
LB: loop body
LE: loop exit
PB: predicated region body
PF: predicated region fallthrough
CT: control target
= control target key end

     0   :  { %s13107_s0 = inlined_call_operand.vmem [shape: f32[128,256], index: 0, kind: input, shape index: {}]   ;;  %s13108_s1 = inlined_call_operand.vmem [shape: f32[512,128], index: 1, kind: input, shape index: {}]   ;;  %s13109_s2 = inlined_call_operand.hbm [shape: f32[512,512], index: 2, kind: input, shape index: {}]   ;;  %s13110_s3 = inlined_call_operand.hbm [shape: f32[512,512], index: 3, kind: input, shape index: {}]   ;;  %s13111_s4 = inlined_call_operand.hbm [shape: f32[512,512], index: 4, kind: input, shape index: {}]   ;;  %s13112_s5 = inlined_call_operand.vmem [shape: f32[512,7], index: 5, kind: input, shape index: {}]   ;;  %s13113_s6 = inlined_call_operand.vmem [shape: f32[28,128], index: 6, kind: input, shape index: {}]   ;;  %s13114_s7 = inlined_call_operand.vmem [shape: f32[28,1], index: 7, kind: input, shape index: {}]   ;;  %s13115_s8 = inlined_call_operand.vmem [shape: f32[28,256], index: 8, kind: output, shape index: {}]  }
   0x1   :  { %13251 = sst [smem:[#allocation114_spill]] %s13115_s8 }
   0x2   :  { %13 = vsyncpa [#allocation4], 0 }
   0x3   :  { %14 = vsyncpa [#allocation6], 0  ;;  %s9569_s27 = smov 0   ;;  %s9571_s28 = smov 0  }
   0x4   :  { %s9573_s29 = smov 0  }
   0x5 LB: > { %s9585_s30 = sadd.s32 4294967295, %s9509_s29   ;;  %s9588_s9 = sadd.s32 1, %s9509_s29   ;;  %s9509_s29 = sphi %s9573_s29, %s13667_s29   ;;  %s9505_s28 = sphi %s9571_s28, %s13670_s28   ;;  %s9501_s27 = sphi %s9569_s27, %s13669_s27  }
   0x6   : > { %13252 = sst [smem:[#allocation11_spill]] %s9588_s9  ;;  %s24_s10 = ssub.s32 %s9509_s29, %s9588_s9 }
   0x7   : > { %s27_s11 = sadd.s32 1, %s9505_s28  ;;  %p25_p0 = scmp.eq.s32.totalorder %s24_s10, 0 }
   0x8   : > { %p34_p1 = scmp.ne.s32.totalorder %s9505_s28, %s9501_s27  ;;  %p35_p2 = scmp.eq.s32.totalorder %s9509_s29, 0 }
   0x9   : > { %p211_p3 = scmp.eq.s32.totalorder %s9585_s30, 1  ;;  %p7973_p6 = scmp.ge.s32.totalorder %s9509_s29, 1 }
   0xa   : > { %s9598_s12 = scalar_select %p25_p0, %s9505_s28, %s27_s11  }
   0xb   : > { %p9600_p4 = por %p35_p2, %p34_p1  ;;  %p9604_p5 = por %p211_p3, %p34_p1 }
   0xc   : > { %13253 = sst [smem:[#allocation12_spill]] %s9598_s12  ;;  %p224_p7 = scmp.lt.s32.totalorder %s9509_s29, 3 }
   0xd   : > { %s13254_s13 = scalar_select %p9600_p4, 1, 0 }
   0xe   : > { %s13255_s14 = scalar_select %p9604_p5, 1, 0 }
   0xf   : > { %p13116_p8 = scmp.eq.s32.totalorder %s9585_s30, 0  ;;  %p9611_p9 = pnand %p7973_p6, %p224_p7 }
  0x10   : > { %s9511_s16 = smov [#allocation5]   ;;  %s9512_s19 = smov [#allocation3]  }
  0x11   : > { %s13256_s15 = scalar_select %p9611_p9, 1, 0 }
  0x12   : > { %p8985_p10 = pneg %p9611_p9  ;;  %s252_s17 = sshll.u32 %s9511_s16, 4  ;;  %s9617_s17 = int_to_ptr.vmem [resolvable:$true] %s252_s17 }
  0x13   : > { %s239_s20 = sshll.u32 %s9512_s19, 4  ;;  %s9513_s21 = smov [#allocation7]   ;;  %s9625_s20 = int_to_ptr.vmem [resolvable:$true] %s239_s20 }
  0x14   : > { %p9621_p11 = pnand %p13116_p8, %p8985_p10  ;;  %s9627_s22 = sshll.u32 %s9513_s21, 4  ;;  %s266_s22 = int_to_ptr.vmem [resolvable:$true] %s9627_s22 }
  0x15   : > { %s9395_s25 = scalar_lea.hbm %s13110_s3, 32768 }
  0x16   : > { %p9396_p12 = scmp.ne.s32.totalorder %s13110_s3, %s9395_s25  ;;  %p9637_p13 = pneg %p9621_p11 }
  0x17   : > { %p9402_p2 = scmp.lt.u32.totalorder %s9395_s25, %s13110_s3 }
  0x18   : > { %p9398_p0 = pnand %p9637_p13, %p9396_p12 }
  0x1a   : > { %p9399_p1 = pneg %p9398_p0 }
  0x1c   : > { %p9404_p3 = pnand %p9402_p2, %p9399_p1 }
  0x1e   : > { %9407 = shalt.err (!%p9404_p3)
}
  0x1f   : > { %s9408_s21 = scalar_lea.vmem %s9617_s17, 32768  ;;  %p9416_p8 = scmp.lt.s32.totalorder %s9617_s17, %s9617_s17 }
  0x20   : > { %p9409_p6 = scmp.ne.s32.totalorder %s9617_s17, %s9408_s21  ;;  %p9417_p5 = scmp.lt.s32.totalorder %s9408_s21, %s9408_s21 }
  0x22   : > { %p9411_p7 = pnand %p9409_p6, %p9637_p13  ;;  %p9418_p12 = por %p9417_p5, %p9416_p8 }
  0x24   : > { %p9412_p10 = pneg %p9411_p7 }
  0x26   : > { %p9419_p0 = pnand %p9418_p12, %p9412_p10 }
  0x28   : > { %9422 = shalt.err (!%p9419_p0)
}
  0x29   : > { %s9514_s23 = smov 512   ;;  %s9515_s24 = smov 32  }
  0x2a   : > { %8991 = dma.hbm_to_vmem [thread:$0]  (!%p9621_p11), %s13110_s3, 32768, %s9617_s17, [#allocation6], %s9514_s23, %s9514_s23, %s9515_s24  }
  0x2b   : > { %s9423_s19 = scalar_lea.hbm %s13109_s2, 32768 }
  0x2c   : > { %p9424_p5 = scmp.ne.s32.totalorder %s13109_s2, %s9423_s19  ;;  %p9430_p2 = scmp.lt.u32.totalorder %s9423_s19, %s13109_s2 }
  0x2e   : > { %p9426_p8 = pnand %p9424_p5, %p9637_p13 }
  0x30   : > { %p9427_p1 = pneg %p9426_p8 }
  0x32   : > { %p9432_p3 = pnand %p9430_p2, %p9427_p1 }
  0x34   : > { %9435 = shalt.err (!%p9432_p3)
}
  0x35   : > { %s9436_s17 = scalar_lea.vmem %s9625_s20, 32768  ;;  %p9444_p12 = scmp.lt.s32.totalorder %s9625_s20, %s9625_s20 }
  0x36   : > { %p9437_p6 = scmp.ne.s32.totalorder %s9625_s20, %s9436_s17  ;;  %p9445_p0 = scmp.lt.s32.totalorder %s9436_s17, %s9436_s17 }
  0x38   : > { %p9439_p7 = pnand %p9437_p6, %p9637_p13  ;;  %p9446_p5 = por %p9445_p0, %p9444_p12 }
  0x3a   : > { %p9440_p10 = pneg %p9439_p7 }
  0x3c   : > { %p9447_p8 = pnand %p9446_p5, %p9440_p10 }
  0x3e   : > { %9450 = shalt.err (!%p9447_p8)
}
  0x3f   : > { %8988 = dma.hbm_to_vmem [thread:$0]  (!%p9621_p11), %s13109_s2, 32768, %s9625_s20, [#allocation4], %s9514_s23, %s9514_s23, %s9515_s24  }
  0x40   : > { %s9451_s26 = scalar_lea.hbm %s13111_s4, 32768 }
  0x41   : > { %p9452_p1 = scmp.ne.s32.totalorder %s13111_s4, %s9451_s26  ;;  %p9458_p6 = scmp.lt.u32.totalorder %s9451_s26, %s13111_s4 }
  0x43   : > { %p9454_p2 = pnand %p9452_p1, %p9637_p13 }
  0x45   : > { %p9455_p3 = pneg %p9454_p2 }
  0x47   : > { %p9460_p7 = pnand %p9458_p6, %p9455_p3 }
  0x49   : > { %9463 = shalt.err (!%p9460_p7)
}
  0x4a   : > { %s9464_s17 = scalar_lea.vmem %s266_s22, 32768  ;;  %p9472_p5 = scmp.lt.s32.totalorder %s266_s22, %s266_s22 }
  0x4b   : > { %p9465_p10 = scmp.ne.s32.totalorder %s266_s22, %s9464_s17  ;;  %p9473_p8 = scmp.lt.s32.totalorder %s9464_s17, %s9464_s17 }
  0x4d   : > { %p9467_p12 = pnand %p9465_p10, %p9637_p13  ;;  %p9474_p9 = por %p9473_p8, %p9472_p5 }
  0x4f   : > { %p9468_p0 = pneg %p9467_p12 }
  0x51   : > { %p9475_p4 = pnand %p9474_p9, %p9468_p0 }
  0x53   : > { %9478 = shalt.err (!%p9475_p4)
}
  0x54   : > { %8994 = dma.hbm_to_vmem [thread:$0]  (!%p9621_p11), %s13111_s4, 32768, %s266_s22, [#allocation6], %s9514_s23, %s9514_s23, %s9515_s24  }
  0x55   : > { %p7977_p1 = scmp.ge.s32.totalorder %s9509_s29, 2 }
  0x56   : > { %p13259_p13 = scmp.ne.s32.totalorder (!%p7977_p1), %s13254_s13, 0 }
  0x57   : > { %284 = sbr.rel (%p7977_p1) target bundleno = 106 (0x6a), region = 44 }
  0x5e   : > { %287 = sbr.rel (!%p13259_p13) target bundleno = 106 (0x6a), region = 48  ;;  %s289_s11 = sand.u32 (%p13259_p13), 1, %s9505_s28  }
  0x5f   : > { %s7979_s9 = sshll.u32 (%p13259_p13), %s9509_s29, 3  ;;  %s7978_s12 = sshll.u32 (%p13259_p13), %s289_s11, 7 }
  0x60   : > { %s9717_s26 = scalar_lea.vmem (%p13259_p13), %s13107_s0, %s7979_s9  ;;  %s291_s13 = scalar_lea.vmem (%p13259_p13), [#allocation2], %s7978_s12 }
  0x61   : > { %v351_v0 = vld [vmem:[%s9717_s26] sm:$0xff] (%p13259_p13)  ;;  %v353_v1 = vld [vmem:[%s9717_s26 + $0x10] sm:$0xff] (%p13259_p13) }
  0x62   : > { %v355_v2 = vld [vmem:[%s9717_s26 + $0x20] sm:$0xff] (%p13259_p13)  ;;  %352 = vst [vmem:[%s291_s13] sm:$0xff] (%p13259_p13), %v351_v0  ;;  %354 = vst [vmem:[%s291_s13 + $0x8] sm:$0xff] (%p13259_p13), %v353_v1  ;;  %v357_v3 = vld [vmem:[%s9717_s26 + $0x30] sm:$0xff] (%p13259_p13) }
  0x63   : > { %356 = vst [vmem:[%s291_s13 + $0x10] sm:$0xff] (%p13259_p13), %v355_v2  ;;  %v359_v4 = vld [vmem:[%s9717_s26 + $0x40] sm:$0xff] (%p13259_p13)  ;;  %v361_v5 = vld [vmem:[%s9717_s26 + $0x50] sm:$0xff] (%p13259_p13)  ;;  %358 = vst [vmem:[%s291_s13 + $0x18] sm:$0xff] (%p13259_p13), %v357_v3 }
  0x64   : > { %360 = vst [vmem:[%s291_s13 + $0x20] sm:$0xff] (%p13259_p13), %v359_v4  ;;  %362 = vst [vmem:[%s291_s13 + $0x28] sm:$0xff] (%p13259_p13), %v361_v5  ;;  %v363_v6 = vld [vmem:[%s9717_s26 + $0x60] sm:$0xff] (%p13259_p13)  ;;  %v365_v7 = vld [vmem:[%s9717_s26 + $0x70] sm:$0xff] (%p13259_p13) }
  0x65   : > { %v367_v8 = vld [vmem:[%s9717_s26 + $0x80] sm:$0xff]  ;;  %364 = vst [vmem:[%s291_s13 + $0x30] sm:$0xff] %v363_v6  ;;  %366 = vst [vmem:[%s291_s13 + $0x38] sm:$0xff] %v365_v7  ;;  %v369_v9 = vld [vmem:[%s9717_s26 + $0x90] sm:$0xff] }
  0x66   : > { %368 = vst [vmem:[%s291_s13 + $0x40] sm:$0xff] %v367_v8  ;;  %v371_v10 = vld [vmem:[%s9717_s26 + $0xa0] sm:$0xff]  ;;  %v373_v11 = vld [vmem:[%s9717_s26 + $0xb0] sm:$0xff]  ;;  %370 = vst [vmem:[%s291_s13 + $0x48] sm:$0xff] %v369_v9 }
  0x67   : > { %372 = vst [vmem:[%s291_s13 + $0x50] sm:$0xff] %v371_v10  ;;  %374 = vst [vmem:[%s291_s13 + $0x58] sm:$0xff] %v373_v11  ;;  %v375_v12 = vld [vmem:[%s9717_s26 + $0xc0] sm:$0xff]  ;;  %v377_v13 = vld [vmem:[%s9717_s26 + $0xd0] sm:$0xff] }
  0x68   : > { %v379_v14 = vld [vmem:[%s9717_s26 + $0xe0] sm:$0xff]  ;;  %376 = vst [vmem:[%s291_s13 + $0x60] sm:$0xff] %v375_v12  ;;  %378 = vst [vmem:[%s291_s13 + $0x68] sm:$0xff] %v377_v13  ;;  %v381_v15 = vld [vmem:[%s9717_s26 + $0xf0] sm:$0xff] }
  0x69   : > { %380 = vst [vmem:[%s291_s13 + $0x70] sm:$0xff] %v379_v14  ;;  %382 = vst [vmem:[%s291_s13 + $0x78] sm:$0xff] %v381_v15 }
  0x6a PF: > { %p13260_p4 = scmp.ne.s32.totalorder %s13256_s15, 0 }
  0x6c   : > { %391 = sbr.rel (%p13260_p4) target bundleno = 2142 (0x85e), region = 86 }
  0x73   : > { %s394_s29 = sand.u32 1, %s9501_s27   ;;  %p13261_p9 = scmp.eq.s32.totalorder %s9585_s30, 0 }
  0x74   : > { %s7981_s22 = sshll.u32 %s394_s29, 7 }
  0x75   : > { %s9740_s23 = scalar_lea.vmem [#allocation2], %s7981_s22 }
  0x76   : > { %9492 = dma.done.wait (%p13261_p9), [#allocation4], 32768   ;;  %p13262_p11 = pmov %p13261_p9 }
  0x77   : > { %p13263_p2 = pmov %p13261_p9 }
  0x78   : > { %9494 = vsyncadd (%p13262_p11), [#allocation4], 4294934528 }
  0x79   : > { %9496 = dma.done.wait (%p13263_p2), [#allocation6], 65536   ;;  %p13264_p3 = pmov %p13263_p2 }
  0x7a   : > { %v13120_v16 = vmov 0   ;;  %v9755_v17 = vld [vmem:[%s13112_s5 + $0x10] sm:$0xff]  ;;  %v9760_v18 = vld [vmem:[%s13112_s5] sm:$0xff]  ;;  %v9767_v19 = vld [vmem:[%s13112_s5 + $0x18] sm:$0xff]  ;;  %vm7483_vm1 = vcmask 1041409   ;;  %vm7485_vm2 = vcmask 1042434  }
  0x7b   : > { %9498 = vsyncadd (%p13264_p3), [#allocation6], 4294901760  ;;  %9039 = vset.pattern.permute.xlu1 %v13120_v16  ;;  %9038 = vset.pattern.permute.xlu0 %v13120_v16  ;;  %v9772_v20 = vld [vmem:[%s13112_s5 + $0x8] sm:$0xff]  ;;  %v9784_v22 = vld [vmem:[%s13112_s5 + $0x20] sm:$0xff]  ;;  %vm7487_vm3 = vcmask 1043459   ;;  %vm7489_vm4 = vcmask 1044484  }
  0x7c   : > { %672 = vperm.xlu1 %9039, %v9755_v17   ;;  %662 = vperm.xlu0 %9038, %v9760_v18   ;;  %v9779_v21 = vld [vmem:[%s13112_s5 + $0x28] sm:$0xff]  ;;  %v9787_v23 = vld [vmem:[%s9740_s23] sm:$0xff]  ;;  %v9795_v25 = vld [vmem:[%s13112_s5 + $0x38] sm:$0xff]  ;;  %vm7491_vm5 = vcmask 1045509   ;;  %vm7493_vm6 = vcmask 1046534   ;;  %vm7495_vm7 = vcmask 1047559  }
  0x7d   : > { %v9790_v24 = vld [vmem:[%s9740_s23 + $0x8] sm:$0xff]  ;;  %v9800_v26 = vld [vmem:[%s13112_s5 + $0x30] sm:$0xff]  ;;  %v9806_v28 = vld [vmem:[%s9740_s23 + $0x18] sm:$0xff]  ;;  %s7985_s17 = sshll.u32 %s394_s29, 5  ;;  %p13665_p6 = scmp.ne.s32.totalorder %s13255_s14, 0 }
  0x7e   : > { %v9803_v27 = vld [vmem:[%s9740_s23 + $0x10] sm:$0xff]  ;;  %v9809_v29 = vld [vmem:[%s9740_s23 + $0x20] sm:$0xff]  ;;  %v9814_v30 = vld [vmem:[%s9740_s23 + $0x28] sm:$0xff]  ;;  %s437_s20 = scalar_lea.vmem [#allocation8], %s7985_s17  ;;  %s7987_s27 = sshll.u32 (%p13665_p6), %s9585_s30, 3 }
  0x7f   : > { %v9817_v31 = vld [vmem:[%s9740_s23 + $0x30] sm:$0xff]  ;;  %v9820_v32 = vld [vmem:[%s9740_s23 + $0x38] sm:$0xff]  ;;  %v454_v33 = vmax.f32 %v9787_v23, %v9809_v29  ;;  %v475_v34 = vmin.f32 %v9787_v23, %v9809_v29  ;;  %v9827_v35 = vld [vmem:[%s9740_s23 + $0x40] sm:$0xff]  ;;  %v455_v38 = vmax.f32 %v9790_v24, %v9814_v30  ;;  %v476_v41 = vmin.f32 %v9790_v24, %v9814_v30  ;;  %s13666_s11 = sld [smem:[#allocation114_spill]] (%p13665_p6) }
  0x80   : > { %677 = vperm.xlu1 %9039, %v9767_v19   ;;  %667 = vperm.xlu0 %9038, %v9772_v20   ;;  %v9830_v36 = vld [vmem:[%s9740_s23 + $0x48] sm:$0xff]  ;;  %v9833_v37 = vld [vmem:[%s9740_s23 + $0x50] sm:$0xff]  ;;  %v456_v39 = vmax.f32 %v9803_v27, %v9817_v31  ;;  %v457_v40 = vmax.f32 %v9806_v28, %v9820_v32  ;;  %v9844_v42 = vld [vmem:[%s9740_s23 + $0x58] sm:$0xff]  ;;  %v477_v46 = vmin.f32 %v9803_v27, %v9817_v31 }
  0x81   : > { %v9847_v43 = vld [vmem:[%s9740_s23 + $0x60] sm:$0xff]  ;;  %v9850_v44 = vld [vmem:[%s9740_s23 + $0x68] sm:$0xff]  ;;  %v458_v45 = vmax.f32 %v454_v33, %v9827_v35  ;;  %v478_v47 = vmin.f32 %v9806_v28, %v9820_v32  ;;  %v479_v48 = vmin.f32 %v475_v34, %v9827_v35  ;;  %v9859_v49 = vld [vmem:[%s9740_s23 + $0x70] sm:$0xff]  ;;  %v459_v51 = vmax.f32 %v455_v38, %v9830_v36 }
  0x82   : > { %v9862_v50 = vld [vmem:[%s9740_s23 + $0x78] sm:$0xff]  ;;  %v460_v52 = vmax.f32 %v456_v39, %v9833_v37  ;;  %v461_v53 = vmax.f32 %v457_v40, %v9844_v42  ;;  %v480_v54 = vmin.f32 %v476_v41, %v9830_v36  ;;  %v481_v56 = vmin.f32 %v477_v46, %v9833_v37  ;;  %v9876_v58 = vld [vmem:[%s13112_s5 + $0x48] sm:$0xff]  ;;  %v9881_v59 = vld [vmem:[%s13112_s5 + $0x40] sm:$0xff] }
  0x83   : > { %v462_v55 = vmax.f32 %v458_v45, %v9847_v43  ;;  %v482_v57 = vmin.f32 %v478_v47, %v9844_v42  ;;  %v463_v60 = vmax.f32 %v459_v51, %v9850_v44  ;;  %v483_v63 = vmin.f32 %v479_v48, %v9847_v43  ;;  %v596_v7 = vld [vmem:[%s13108_s1] sm:$0xff]  ;;  %v9898_v8 = vld [vmem:[%s13112_s5 + $0x58] sm:$0xff]  ;;  %v9903_v9 = vld [vmem:[%s13112_s5 + $0x50] sm:$0xff] }
  0x84   : > { %687 = vperm.xlu1 %9039, %v9779_v21   ;;  %682 = vperm.xlu0 %9038, %v9784_v22   ;;  %v464_v61 = vmax.f32 %v460_v52, %v9859_v49  ;;  %v465_v62 = vmax.f32 %v461_v53, %v9862_v50  ;;  %v484_v0 = vmin.f32 %v480_v54, %v9850_v44  ;;  %v9910_v14 = vld [vmem:[%s13112_s5 + $0x68] sm:$0xff]  ;;  %v9915_v15 = vld [vmem:[%s13112_s5 + $0x60] sm:$0xff]  ;;  %v9922_v40 = vld [vmem:[%s13112_s5 + $0x78] sm:$0xff] }
  0x85   : > { %v485_v1 = vmin.f32 %v481_v56, %v9859_v49  ;;  %v486_v2 = vmin.f32 %v482_v57, %v9862_v50  ;;  %v466_v3 = vmax.f32 %v462_v55, %v463_v60  ;;  %8122 = vmatprep.mubr.f32.mxu0 %v596_v7  ;;  %v9927_v41 = vld [vmem:[%s13112_s5 + $0x70] sm:$0xff]  ;;  %v9934_v51 = vld [vmem:[%s13112_s5 + $0x88] sm:$0xff]  ;;  %v9939_v52 = vld [vmem:[%s13112_s5 + $0x80] sm:$0xff]  ;;  %s7839_s9 = scalar_lea.vmem (%p13665_p6), %s13666_s11, %s7987_s27 }
  0x86   : > { %v467_v4 = vmax.f32 %v464_v61, %v465_v62  ;;  %v487_v5 = vmin.f32 %v483_v63, %v484_v0  ;;  %v9949_v56 = vld [vmem:[%s13112_s5 + $0x98] sm:$0xff]  ;;  %v9954_v57 = vld [vmem:[%s13112_s5 + $0x90] sm:$0xff]  ;;  %v9961_v61 = vld [vmem:[%s13112_s5 + $0xa8] sm:$0xff] }
  0x87   : > { %v488_v6 = vmin.f32 %v485_v1, %v486_v2  ;;  %v9966_v62 = vld [vmem:[%s13112_s5 + $0xa0] sm:$0xff]  ;;  %v9973_v63 = vld [vmem:[%s13112_s5 + $0xb8] sm:$0xff]  ;;  %v9978_v0 = vld [vmem:[%s13112_s5 + $0xb0] sm:$0xff] }
  0x88   : > { %697 = vperm.xlu1 %9039, %v9795_v25   ;;  %692 = vperm.xlu0 %9038, %v9800_v26   ;;  %v468_v10 = vmax.f32 %v466_v3, %v467_v4  ;;  %v644_v16 = vld [vmem:[%s13108_s1 + $0x180] sm:$0xff] }
  0x89   : > { %v489_v11 = vmin.f32 %v487_v5, %v488_v6  ;;  %v9993_v5 = vld [vmem:[%s13112_s5 + $0xc8] sm:$0xff] }
  0x8a   : > { %v469_v12 = vrot.slane %v468_v10, 4 }
  0x8b   : > { %v490_v13 = vrot.slane %v489_v11, 4 }
  0x8c   : > { %707 = vperm.xlu1 %9039, %v9876_v58   ;;  %702 = vperm.xlu0 %9038, %v9881_v59   ;;  %v470_v33 = vmax.f32 %v468_v10, %v469_v12 }
  0x8d   : > { %v491_v34 = vmin.f32 %v489_v11, %v490_v13 }
  0x8e   : > { %v471_v38 = vrot.slane %v470_v33, 2 }
  0x8f   : > { %v492_v39 = vrot.slane %v491_v34, 2 }
  0x90   : > { %717 = vperm.xlu1 %9039, %v9898_v8   ;;  %712 = vperm.xlu0 %9038, %v9903_v9   ;;  %v472_v45 = vmax.f32 %v470_v33, %v471_v38  ;;  %v10021_v38 = vld [vmem:[%s13112_s5 + $0xd8] sm:$0xff] }
  0x91   : > { %v493_v46 = vmin.f32 %v491_v34, %v492_v39  ;;  %v10026_v39 = vld [vmem:[%s13112_s5 + $0xd0] sm:$0xff] }
  0x92   : > { %v473_v47 = vrot.slane %v472_v45, 1 }
  0x93   : > { %v494_v48 = vrot.slane %v493_v46, 1 }
  0x94   : > { %727 = vperm.xlu1 %9039, %v9910_v14   ;;  %722 = vperm.xlu0 %9038, %v9915_v15   ;;  %v474_v53 = vmax.f32 %v472_v45, %v473_v47 }
  0x95   : > { %v9941_v54 = vmin.f32 %v493_v46, %v494_v48  ;;  %v10039_v48 = vld [vmem:[%s13112_s5 + $0xe8] sm:$0xff] }
  0x97   : > { %v496_v55 = vsub.f32 %v474_v53, %v9941_v54  ;;  %v500_v1 = vsub.f32 %v9787_v23, %v9941_v54  ;;  %v501_v2 = vsub.f32 %v9790_v24, %v9941_v54  ;;  %v502_v3 = vsub.f32 %v9803_v27, %v9941_v54  ;;  %v9998_v23 = vld [vmem:[%s13112_s5 + $0xc0] sm:$0xff] }
  0x98   : > { %737 = vperm.xlu1 %9039, %v9922_v40   ;;  %732 = vperm.xlu0 %9038, %v9927_v41   ;;  %v503_v4 = vsub.f32 %v9806_v28, %v9941_v54  ;;  %v504_v24 = vsub.f32 %v9809_v29, %v9941_v54  ;;  %v505_v27 = vsub.f32 %v9814_v30, %v9941_v54 }
  0x99   : > { %vm497_vm0 = vcmp.eq.f32.partialorder %v496_v55, 0.0  ;;  %v506_v29 = vsub.f32 %v9817_v31, %v9941_v54  ;;  %v507_v30 = vsub.f32 %v9820_v32, %v9941_v54  ;;  %v508_v31 = vsub.f32 %v9827_v35, %v9941_v54  ;;  %v10044_v35 = vld [vmem:[%s13112_s5 + $0xe0] sm:$0xff] }
  0x9a   : > { %v498_v60 = vsel %vm497_vm0, 1.0, %v496_v55  ;;  %v509_v32 = vsub.f32 %v9830_v36, %v9941_v54  ;;  %v510_v36 = vsub.f32 %v9833_v37, %v9941_v54  ;;  %v511_v53 = vsub.f32 %v9844_v42, %v9941_v54  ;;  %v10062_v37 = vld [vmem:[%s13112_s5 + $0xf0] sm:$0xff] }
  0x9b   : > { %9211 = vrcp.f32 %v498_v60  ;;  %v512_v42 = vsub.f32 %v9847_v43, %v9941_v54  ;;  %v514_v43 = vsub.f32 %v9859_v49, %v9941_v54 }
  0x9c   : > { %747 = vperm.xlu1 %9039, %v9934_v51   ;;  %742 = vperm.xlu0 %9038, %v9939_v52  }
  0xa0   : > { %757 = vperm.xlu1 %9039, %v9949_v56   ;;  %752 = vperm.xlu0 %9038, %v9954_v57  }
  0xa4   : > { %767 = vperm.xlu1 %9039, %v9961_v61   ;;  %762 = vperm.xlu0 %9038, %v9966_v62  }
  0xa5   : > { %v10004_v28 = vpop.eup %9211 }
  0xa6   : > { %v516_v6 = vmul.f32 %v10004_v28, %v500_v1  ;;  %v517_v7 = vmul.f32 %v10004_v28, %v501_v2  ;;  %v518_v10 = vmul.f32 %v10004_v28, %v502_v3  ;;  %v519_v11 = vmul.f32 %v10004_v28, %v503_v4  ;;  %v10057_v2 = vld [vmem:[%s13112_s5 + $0xf8] sm:$0xff] }
  0xa7   : > { %v520_v33 = vmul.f32 %v10004_v28, %v504_v24  ;;  %v521_v34 = vmul.f32 %v10004_v28, %v505_v27  ;;  %v522_v46 = vmul.f32 %v10004_v28, %v506_v29  ;;  %v523_v47 = vmul.f32 %v10004_v28, %v507_v30  ;;  %v567_v30 = vld [vmem:[%s13112_s5 + $0x118] sm:$0xff] }
  0xa8   : > { %777 = vperm.xlu1 %9039, %v9973_v63   ;;  %772 = vperm.xlu0 %9038, %v9978_v0   ;;  %v8256_v12 = vpack.c.bf16 %v517_v7, %v516_v6  ;;  %v8260_v13 = vpack.c.bf16 %v519_v11, %v518_v10  ;;  %v524_v60 = vmul.f32 %v10004_v28, %v508_v31  ;;  %v565_v6 = vld [vmem:[%s13112_s5 + $0x108] sm:$0xff]  ;;  %v10078_v7 = vld [vmem:[%s13112_s5 + $0x100] sm:$0xff]  ;;  %v571_v31 = vld [vmem:[%s13112_s5 + $0x138] sm:$0xff] }
  0xa9   : > { %v8264_v45 = vpack.c.bf16 %v521_v34, %v520_v33  ;;  %v8268_v55 = vpack.c.bf16 %v523_v47, %v522_v46  ;;  %v525_v1 = vmul.f32 %v10004_v28, %v509_v32  ;;  %v513_v3 = vsub.f32 %v9850_v44, %v9941_v54  ;;  %v10104_v33 = vld [vmem:[%s13112_s5 + $0x120] sm:$0xff]  ;;  %v573_v32 = vld [vmem:[%s13112_s5 + $0x148] sm:$0xff]  ;;  %v598_v47 = vld [vmem:[%s13108_s1 + $0x10] sm:$0xff] }
  0xaa   : > { %8257 = vmatprep.subr.bf16.mxu0 %v8256_v12  ;;  %v526_v24 = vmul.f32 %v10004_v28, %v510_v36  ;;  %v527_v27 = vmul.f32 %v10004_v28, %v511_v53  ;;  %v515_v44 = vsub.f32 %v9862_v50, %v9941_v54  ;;  %v528_v11 = vmul.f32 %v10004_v28, %v512_v42  ;;  %v597_v46 = vld [vmem:[%s13108_s1 + $0x8] sm:$0xff]  ;;  %v575_v36 = vld [vmem:[%s13112_s5 + $0x158] sm:$0xff]  ;;  %v574_v53 = vld [vmem:[%s13112_s5 + $0x150] sm:$0xff] }
  0xab   : > { %8259 = vmatpush3.bf16.msra.mxu0 %v8256_v12  ;;  %v8272_v4 = vpack.c.bf16 %v525_v1, %v524_v60  ;;  %v529_v29 = vmul.f32 %v10004_v28, %v513_v3  ;;  %v10093_v12 = vld [vmem:[%s13112_s5 + $0x110] sm:$0xff]  ;;  %v530_v50 = vmul.f32 %v10004_v28, %v514_v43  ;;  %v600_v60 = vld [vmem:[%s13108_s1 + $0x20] sm:$0xff]  ;;  %v577_v1 = vld [vmem:[%s13112_s5 + $0x168] sm:$0xff] }
  0xac   : > { %787 = vperm.xlu1 %9039, %v9993_v5   ;;  %782 = vperm.xlu0 %9038, %v9998_v23   ;;  %v8276_v10 = vpack.c.bf16 %v527_v27, %v526_v24  ;;  %v531_v54 = vmul.f32 %v10004_v28, %v515_v44  ;;  %v570_v28 = vld [vmem:[%s13112_s5 + $0x130] sm:$0xff]  ;;  %v576_v42 = vld [vmem:[%s13112_s5 + $0x160] sm:$0xff]  ;;  %v601_v3 = vld [vmem:[%s13108_s1 + $0x28] sm:$0xff] }
  0xad   : > { %8261 = vmatprep.subr.bf16.mxu0 %v8260_v13  ;;  %v8280_v49 = vpack.c.bf16 %v529_v29, %v528_v11  ;;  %v579_v24 = vld [vmem:[%s13112_s5 + $0x178] sm:$0xff]  ;;  %v578_v27 = vld [vmem:[%s13112_s5 + $0x170] sm:$0xff]  ;;  %v604_v43 = vld [vmem:[%s13108_s1 + $0x40] sm:$0xff] }
  0xae   : > { %v8284_v34 = vpack.c.bf16 %v531_v54, %v530_v50  ;;  %v581_v44 = vld [vmem:[%s13112_s5 + $0x188] sm:$0xff]  ;;  %v606_v29 = vld [vmem:[%s13108_s1 + $0x50] sm:$0xff]  ;;  %v607_v50 = vld [vmem:[%s13108_s1 + $0x58] sm:$0xff] }
  0xaf   : > { %8263 = vmatpush3.bf16.msra.mxu0 %v8260_v13  ;;  %v569_v13 = vld [vmem:[%s13112_s5 + $0x128] sm:$0xff]  ;;  %v608_v54 = vld [vmem:[%s13108_s1 + $0x60] sm:$0xff] }
  0xb0   : > { %797 = vperm.xlu1 %9039, %v10021_v38   ;;  %792 = vperm.xlu0 %9038, %v10026_v39   ;;  %v605_v11 = vld [vmem:[%s13108_s1 + $0x48] sm:$0xff] }
  0xb1   : > { %8265 = vmatprep.subr.bf16.mxu0 %v8264_v45 }
  0xb3   : > { %8267 = vmatpush3.bf16.msra.mxu0 %v8264_v45  ;;  %v572_v45 = vld [vmem:[%s13112_s5 + $0x140] sm:$0xff] }
  0xb4   : > { %807 = vperm.xlu1 %9039, %v10039_v48   ;;  %802 = vperm.xlu0 %9038, %v10044_v35  }
  0xb5   : > { %8269 = vmatprep.subr.bf16.mxu0 %v8268_v55 }
  0xb7   : > { %8271 = vmatpush3.bf16.msra.mxu0 %v8268_v55  ;;  %v599_v55 = vld [vmem:[%s13108_s1 + $0x18] sm:$0xff] }
  0xb8   : > { %817 = vperm.xlu1 %9039, %v10057_v2   ;;  %812 = vperm.xlu0 %9038, %v10062_v37  }
  0xb9   : > { %8273 = vmatprep.subr.bf16.mxu0 %v8272_v4 }
  0xbb   : > { %8275 = vmatpush3.bf16.msra.mxu0 %v8272_v4  ;;  %v602_v4 = vld [vmem:[%s13108_s1 + $0x30] sm:$0xff] }
  0xbc   : > { %827 = vperm.xlu1 %9039, %v565_v6   ;;  %822 = vperm.xlu0 %9038, %v10078_v7   ;;  %v603_v6 = vld [vmem:[%s13108_s1 + $0x38] sm:$0xff] }
  0xbd   : > { %8277 = vmatprep.subr.bf16.mxu0 %v8276_v10 }
  0xbf   : > { %8279 = vmatpush3.bf16.msra.mxu0 %v8276_v10  ;;  %v580_v10 = vld [vmem:[%s13112_s5 + $0x180] sm:$0xff] }
  0xc0   : > { %837 = vperm.xlu1 %9039, %v567_v30   ;;  %832 = vperm.xlu0 %9038, %v10093_v12   ;;  %v583_v30 = vld [vmem:[%s13112_s5 + $0x198] sm:$0xff] }
  0xc1   : > { %8281 = vmatprep.subr.bf16.mxu0 %v8280_v49 }
  0xc3   : > { %8283 = vmatpush3.bf16.msra.mxu0 %v8280_v49  ;;  %v582_v49 = vld [vmem:[%s13112_s5 + $0x190] sm:$0xff] }
  0xc4   : > { %847 = vperm.xlu1 %9039, %v569_v13   ;;  %842 = vperm.xlu0 %9038, %v10104_v33   ;;  %v585_v13 = vld [vmem:[%s13112_s5 + $0x1a8] sm:$0xff] }
  0xc5   : > { %8285 = vmatprep.subr.bf16.mxu0 %v8284_v34 }
  0xc7   : > { %8287 = vmatpush3.bf16.msra.mxu0 %v8284_v34  ;;  %v584_v34 = vld [vmem:[%s13112_s5 + $0x1a0] sm:$0xff] }
  0xc8   : > { %857 = vperm.xlu1 %9039, %v571_v31   ;;  %852 = vperm.xlu0 %9038, %v570_v28   ;;  %v609_v31 = vld [vmem:[%s13108_s1 + $0x68] sm:$0xff]  ;;  %v610_v28 = vld [vmem:[%s13108_s1 + $0x70] sm:$0xff] }
  0xca   : > { %8123 = vmatmul.mubr.f32.vlgmr.msra.gmra.mrb[0].mxu0 %v597_v46  ;;  %v611_v46 = vld [vmem:[%s13108_s1 + $0x78] sm:$0xff] }
  0xcb   : > { %8125 = vmatprep.mubr.f32.mxu0 %v598_v47  ;;  %v612_v47 = vld [vmem:[%s13108_s1 + $0x80] sm:$0xff] }
  0xcc   : > { %867 = vperm.xlu1 %9039, %v573_v32   ;;  %862 = vperm.xlu0 %9038, %v572_v45   ;;  %v587_v32 = vld [vmem:[%s13112_s5 + $0x1b8] sm:$0xff]  ;;  %v586_v45 = vld [vmem:[%s13112_s5 + $0x1b0] sm:$0xff] }
  0xce   : > { %8126 = vmatmul.mubr.f32.gmra.mrb[2].mxu0 %v599_v55  ;;  %v613_v55 = vld [vmem:[%s13108_s1 + $0x88] sm:$0xff] }
  0xcf   : > { %8128 = vmatprep.mubr.f32.mxu0 %v600_v60  ;;  %v614_v60 = vld [vmem:[%s13108_s1 + $0x90] sm:$0xff] }
  0xd0   : > { %877 = vperm.xlu1 %9039, %v575_v36   ;;  %872 = vperm.xlu0 %9038, %v574_v53   ;;  %v589_v36 = vld [vmem:[%s13112_s5 + $0x1c8] sm:$0xff]  ;;  %v588_v53 = vld [vmem:[%s13112_s5 + $0x1c0] sm:$0xff] }
  0xd2   : > { %8129 = vmatmul.mubr.f32.gmra.mrb[4].mxu0 %v601_v3  ;;  %v615_v3 = vld [vmem:[%s13108_s1 + $0x98] sm:$0xff] }
  0xd3   : > { %8131 = vmatprep.mubr.f32.mxu0 %v602_v4  ;;  %v616_v4 = vld [vmem:[%s13108_s1 + $0xa0] sm:$0xff] }
  0xd4   : > { %887 = vperm.xlu1 %9039, %v577_v1   ;;  %882 = vperm.xlu0 %9038, %v576_v42   ;;  %v591_v1 = vld [vmem:[%s13112_s5 + $0x1d8] sm:$0xff]  ;;  %v590_v42 = vld [vmem:[%s13112_s5 + $0x1d0] sm:$0xff] }
  0xd6   : > { %8132 = vmatmul.mubr.f32.gmra.mrb[6].mxu0 %v603_v6  ;;  %v617_v6 = vld [vmem:[%s13108_s1 + $0xa8] sm:$0xff] }
  0xd7   : > { %8134 = vmatprep.mubr.f32.mxu0 %v604_v43  ;;  %v618_v43 = vld [vmem:[%s13108_s1 + $0xb0] sm:$0xff] }
  0xd8   : > { %897 = vperm.xlu1 %9039, %v579_v24   ;;  %892 = vperm.xlu0 %9038, %v578_v27   ;;  %v593_v24 = vld [vmem:[%s13112_s5 + $0x1e8] sm:$0xff]  ;;  %v592_v27 = vld [vmem:[%s13112_s5 + $0x1e0] sm:$0xff] }
  0xda   : > { %8135 = vmatmul.mubr.f32.gmra.mrb[8].mxu0 %v605_v11  ;;  %v619_v11 = vld [vmem:[%s13108_s1 + $0xb8] sm:$0xff] }
  0xdb   : > { %8137 = vmatprep.mubr.f32.mxu0 %v606_v29  ;;  %v620_v29 = vld [vmem:[%s13108_s1 + $0xc0] sm:$0xff] }
  0xdc   : > { %907 = vperm.xlu1 %9039, %v581_v44   ;;  %902 = vperm.xlu0 %9038, %v580_v10   ;;  %v595_v44 = vld [vmem:[%s13112_s5 + $0x1f8] sm:$0xff]  ;;  %v594_v10 = vld [vmem:[%s13112_s5 + $0x1f0] sm:$0xff] }
  0xde   : > { %8138 = vmatmul.mubr.f32.gmra.mrb[10].mxu0 %v607_v50  ;;  %v621_v50 = vld [vmem:[%s13108_s1 + $0xc8] sm:$0xff] }
  0xdf   : > { %8140 = vmatprep.mubr.f32.mxu0 %v608_v54  ;;  %v13122_v54 = vmov 1  }
  0xe0   : > { %917 = vperm.xlu1 %9039, %v583_v30   ;;  %912 = vperm.xlu0 %9038, %v582_v49  }
  0xe2   : > { %8141 = vmatmul.mubr.f32.gmra.mrb[12].mxu0 %v609_v31 }
  0xe3   : > { %8143 = vmatprep.mubr.f32.mxu0 %v610_v28  ;;  %v623_v28 = vld [vmem:[%s13108_s1 + $0xd8] sm:$0xff] }
  0xe4   : > { %927 = vperm.xlu1 %9039, %v585_v13   ;;  %922 = vperm.xlu0 %9038, %v584_v34   ;;  %v622_v13 = vld [vmem:[%s13108_s1 + $0xd0] sm:$0xff] }
  0xe6   : > { %8144 = vmatmul.mubr.f32.gmra.mrb[14].mxu0 %v611_v46 }
  0xe7   : > { %8146 = vmatprep.mubr.f32.mxu0 %v612_v47  ;;  %v625_v47 = vld [vmem:[%s13108_s1 + $0xe8] sm:$0xff] }
  0xe8   : > { %937 = vperm.xlu1 %9039, %v587_v32   ;;  %932 = vperm.xlu0 %9038, %v586_v45   ;;  %v624_v32 = vld [vmem:[%s13108_s1 + $0xe0] sm:$0xff] }
  0xea   : > { %8147 = vmatmul.mubr.f32.gmra.mrb[16].mxu0 %v613_v55 }
  0xeb   : > { %8149 = vmatprep.mubr.f32.mxu0 %v614_v60  ;;  %v627_v60 = vld [vmem:[%s13108_s1 + $0xf8] sm:$0xff] }
  0xec   : > { %947 = vperm.xlu1 %9039, %v589_v36   ;;  %942 = vperm.xlu0 %9038, %v588_v53   ;;  %v626_v36 = vld [vmem:[%s13108_s1 + $0xf0] sm:$0xff] }
  0xee   : > { %8150 = vmatmul.mubr.f32.gmra.mrb[18].mxu0 %v615_v3 }
  0xef   : > { %8152 = vmatprep.mubr.f32.mxu0 %v616_v4  ;;  %v629_v4 = vld [vmem:[%s13108_s1 + $0x108] sm:$0xff] }
  0xf0   : > { %957 = vperm.xlu1 %9039, %v591_v1   ;;  %952 = vperm.xlu0 %9038, %v590_v42   ;;  %v628_v1 = vld [vmem:[%s13108_s1 + $0x100] sm:$0xff] }
  0xf2   : > { %8153 = vmatmul.mubr.f32.gmra.mrb[20].mxu0 %v617_v6 }
  0xf3   : > { %8155 = vmatprep.mubr.f32.mxu0 %v618_v43  ;;  %v631_v43 = vld [vmem:[%s13108_s1 + $0x118] sm:$0xff] }
  0xf4   : > { %967 = vperm.xlu1 %9039, %v593_v24   ;;  %962 = vperm.xlu0 %9038, %v592_v27   ;;  %v630_v24 = vld [vmem:[%s13108_s1 + $0x110] sm:$0xff] }
  0xf6   : > { %8156 = vmatmul.mubr.f32.gmra.mrb[22].mxu0 %v619_v11 }
  0xf7   : > { %8158 = vmatprep.mubr.f32.mxu0 %v620_v29  ;;  %v633_v29 = vld [vmem:[%s13108_s1 + $0x128] sm:$0xff] }
  0xf8   : > { %977 = vperm.xlu1 %9039, %v595_v44   ;;  %972 = vperm.xlu0 %9038, %v594_v10   ;;  %v632_v44 = vld [vmem:[%s13108_s1 + $0x120] sm:$0xff] }
  0xfa   : > { %8159 = vmatmul.mubr.f32.gmra.mrb[24].mxu0 %v621_v50  ;;  %v634_v50 = vld [vmem:[%s13108_s1 + $0x130] sm:$0xff] }
  0xfb   : > { %v10257_v30 = vpop.permute.xlu1 %672  ;;  %v10259_v49 = vpop.permute.xlu0 %662  ;;  %8161 = vmatprep.mubr.f32.mxu0 %v622_v13 }
  0xfc   : > { %9041 = vset.pattern.permute.xlu1 %v13122_v54  ;;  %9040 = vset.pattern.permute.xlu0 %v13122_v54 }
  0xfd   : > { %1370 = vperm.xlu1 %9041, %v9772_v20   ;;  %1366 = vperm.xlu0 %9040, %v9760_v18  }
  0xfe   : > { %8162 = vmatmul.mubr.f32.gmra.mrb[26].mxu0 %v623_v28 }
  0xff   : > { %v10271_v34 = vpop.permute.xlu1 %677  ;;  %v10273_v31 = vpop.permute.xlu0 %667  ;;  %8164 = vmatprep.mubr.f32.mxu0 %v624_v32  ;;  %v635_v32 = vld [vmem:[%s13108_s1 + $0x138] sm:$0xff] }
 0x101   : > { %1374 = vperm.xlu1 %9041, %v9755_v17   ;;  %1378 = vperm.xlu0 %9040, %v9767_v19  }
 0x102   : > { %8165 = vmatmul.mubr.f32.gmra.mrb[28].mxu0 %v625_v47  ;;  %v636_v47 = vld [vmem:[%s13108_s1 + $0x140] sm:$0xff] }
 0x103   : > { %v10283_v45 = vpop.permute.xlu1 %687  ;;  %v10285_v46 = vpop.permute.xlu0 %682  ;;  %8167 = vmatprep.mubr.f32.mxu0 %v626_v36 }
 0x105   : > { %1382 = vperm.xlu1 %9041, %v9784_v22   ;;  %1386 = vperm.xlu0 %9040, %v9779_v21  }
 0x106   : > { %8168 = vmatmul.mubr.f32.gmra.mrb[30].mxu0 %v627_v60 }
 0x107   : > { %v10295_v53 = vpop.permute.xlu1 %697  ;;  %v10297_v55 = vpop.permute.xlu0 %692  ;;  %8170 = vmatprep.mubr.f32.mxu0 %v628_v1  ;;  %v637_v1 = vld [vmem:[%s13108_s1 + $0x148] sm:$0xff] }
 0x109   : > { %1390 = vperm.xlu1 %9041, %v9800_v26   ;;  %1394 = vperm.xlu0 %9040, %v9795_v25  }
 0x10a   : > { %8171 = vmatmul.mubr.f32.gmra.mrb[32].mxu0 %v629_v4  ;;  %v638_v4 = vld [vmem:[%s13108_s1 + $0x150] sm:$0xff] }
 0x10b   : > { %v10307_v42 = vpop.permute.xlu1 %707  ;;  %v10309_v3 = vpop.permute.xlu0 %702  ;;  %8173 = vmatprep.mubr.f32.mxu0 %v630_v24 }
 0x10d   : > { %1398 = vperm.xlu1 %9041, %v9881_v59   ;;  %1402 = vperm.xlu0 %9040, %v9876_v58  }
 0x10e   : > { %8174 = vmatmul.mubr.f32.gmra.mrb[34].mxu0 %v631_v43 }
 0x10f   : > { %v10319_v27 = vpop.permute.xlu1 %717  ;;  %v10321_v6 = vpop.permute.xlu0 %712  ;;  %8176 = vmatprep.mubr.f32.mxu0 %v632_v44  ;;  %v639_v44 = vld [vmem:[%s13108_s1 + $0x158] sm:$0xff] }
 0x111   : > { %1406 = vperm.xlu1 %9041, %v9903_v9   ;;  %1410 = vperm.xlu0 %9040, %v9898_v8  }
 0x112   : > { %8177 = vmatmul.mubr.f32.gmra.mrb[36].mxu0 %v633_v29  ;;  %v640_v29 = vld [vmem:[%s13108_s1 + $0x160] sm:$0xff] }
 0x113   : > { %v10331_v10 = vpop.permute.xlu1 %727  ;;  %v10333_v11 = vpop.permute.xlu0 %722  ;;  %8179 = vmatprep.mubr.f32.mxu0 %v634_v50 }
 0x115   : > { %1414 = vperm.xlu1 %9041, %v9915_v15   ;;  %1418 = vperm.xlu0 %9040, %v9910_v14  }
 0x116   : > { %8180 = vmatmul.mubr.f32.gmra.mrb[38].mxu0 %v635_v32 }
 0x117   : > { %v10343_v13 = vpop.permute.xlu1 %737  ;;  %v10345_v28 = vpop.permute.xlu0 %732  ;;  %8182 = vmatprep.mubr.f32.mxu0 %v636_v47  ;;  %v641_v47 = vld [vmem:[%s13108_s1 + $0x168] sm:$0xff] }
 0x119   : > { %1422 = vperm.xlu1 %9041, %v9927_v41   ;;  %1426 = vperm.xlu0 %9040, %v9922_v40  }
 0x11a   : > { %8183 = vmatmul.mubr.f32.gmra.mrb[40].mxu0 %v637_v1  ;;  %v642_v1 = vld [vmem:[%s13108_s1 + $0x170] sm:$0xff] }
 0x11b   : > { %v10355_v36 = vpop.permute.xlu1 %747  ;;  %v10357_v60 = vpop.permute.xlu0 %742  ;;  %8185 = vmatprep.mubr.f32.mxu0 %v638_v4 }
 0x11d   : > { %1430 = vperm.xlu1 %9041, %v9939_v52   ;;  %1434 = vperm.xlu0 %9040, %v9934_v51  }
 0x11e   : > { %8186 = vmatmul.mubr.f32.gmra.mrb[42].mxu0 %v639_v44 }
 0x11f   : > { %v10367_v24 = vpop.permute.xlu1 %757  ;;  %v10369_v43 = vpop.permute.xlu0 %752  ;;  %8188 = vmatprep.mubr.f32.mxu0 %v640_v29  ;;  %v643_v29 = vld [vmem:[%s13108_s1 + $0x178] sm:$0xff] }
 0x120   : > { %13265 = vst [vmem:[#allocation13_spill] sm:$0xff] %v10367_v24  ;;  %13266 = vst [vmem:[#allocation14_spill] sm:$0xff] %v10369_v43 }
 0x121   : > { %1438 = vperm.xlu1 %9041, %v9954_v57   ;;  %1442 = vperm.xlu0 %9040, %v9949_v56  }
 0x122   : > { %8189 = vmatmul.mubr.f32.gmra.mrb[44].mxu0 %v641_v47 }
 0x123   : > { %v10379_v50 = vpop.permute.xlu1 %767  ;;  %v10381_v32 = vpop.permute.xlu0 %762  ;;  %8191 = vmatprep.mubr.f32.mxu0 %v642_v1  ;;  %v645_v1 = vld [vmem:[%s13108_s1 + $0x188] sm:$0xff] }
 0x124   : > { %13267 = vst [vmem:[#allocation15_spill] sm:$0xff] %v10379_v50  ;;  %13268 = vst [vmem:[#allocation16_spill] sm:$0xff] %v10381_v32 }
 0x125   : > { %1446 = vperm.xlu1 %9041, %v9966_v62   ;;  %1450 = vperm.xlu0 %9040, %v9961_v61  }
 0x126   : > { %8192 = vmatmul.mubr.f32.gmra.mrb[46].mxu0 %v643_v29 }
 0x127   : > { %v10391_v4 = vpop.permute.xlu1 %777  ;;  %v10393_v44 = vpop.permute.xlu0 %772  ;;  %8194 = vmatprep.mubr.f32.mxu0 %v644_v16  ;;  %v647_v16 = vld [vmem:[%s13108_s1 + $0x198] sm:$0xff] }
 0x128   : > { %13269 = vst [vmem:[#allocation17_spill] sm:$0xff] %v10391_v4  ;;  %13270 = vst [vmem:[#allocation18_spill] sm:$0xff] %v10393_v44  ;;  %v646_v4 = vld [vmem:[%s13108_s1 + $0x190] sm:$0xff] }
 0x129   : > { %1454 = vperm.xlu1 %9041, %v9978_v0   ;;  %1458 = vperm.xlu0 %9040, %v9973_v63  }
 0x12a   : > { %8195 = vmatmul.mubr.f32.gmra.mrb[48].mxu0 %v645_v1 }
 0x12b   : > { %v10403_v54 = vpop.permute.xlu1 %787  ;;  %v10405_v47 = vpop.permute.xlu0 %782  ;;  %8197 = vmatprep.mubr.f32.mxu0 %v646_v4  ;;  %v649_v4 = vld [vmem:[%s13108_s1 + $0x1a8] sm:$0xff] }
 0x12c   : > { %13271 = vst [vmem:[#allocation19_spill] sm:$0xff] %v10403_v54  ;;  %13272 = vst [vmem:[#allocation20_spill] sm:$0xff] %v10405_v47  ;;  %v648_v54 = vld [vmem:[%s13108_s1 + $0x1a0] sm:$0xff] }
 0x12d   : > { %1462 = vperm.xlu1 %9041, %v9998_v23   ;;  %1466 = vperm.xlu0 %9040, %v9993_v5  }
 0x12e   : > { %8198 = vmatmul.mubr.f32.gmra.mrb[50].mxu0 %v647_v16 }
 0x12f   : > { %v10415_v44 = vpop.permute.xlu1 %797  ;;  %v10420_v29 = vpop.permute.xlu0 %792  ;;  %8200 = vmatprep.mubr.f32.mxu0 %v648_v54  ;;  %v651_v54 = vld [vmem:[%s13108_s1 + $0x1b8] sm:$0xff] }
 0x130   : > { %13273 = vst [vmem:[#allocation21_spill] sm:$0xff] %v10415_v44  ;;  %13274 = vst [vmem:[#allocation22_spill] sm:$0xff] %v10420_v29  ;;  %v650_v44 = vld [vmem:[%s13108_s1 + $0x1b0] sm:$0xff] }
 0x131   : > { %1470 = vperm.xlu1 %9041, %v10026_v39   ;;  %1474 = vperm.xlu0 %9040, %v10021_v38  }
 0x132   : > { %8201 = vmatmul.mubr.f32.gmra.mrb[52].mxu0 %v649_v4 }
 0x133   : > { %v10427_v47 = vpop.permute.xlu1 %807  ;;  %v10432_v1 = vpop.permute.xlu0 %802  ;;  %8203 = vmatprep.mubr.f32.mxu0 %v650_v44  ;;  %v653_v44 = vld [vmem:[%s13108_s1 + $0x1c8] sm:$0xff] }
 0x134   : > { %13275 = vst [vmem:[#allocation23_spill] sm:$0xff] %v10427_v47  ;;  %13276 = vst [vmem:[#allocation24_spill] sm:$0xff] %v10432_v1  ;;  %v652_v47 = vld [vmem:[%s13108_s1 + $0x1c0] sm:$0xff] }
 0x135   : > { %1478 = vperm.xlu1 %9041, %v10044_v35   ;;  %1482 = vperm.xlu0 %9040, %v10039_v48  }
 0x136   : > { %8204 = vmatmul.mubr.f32.gmra.mrb[54].mxu0 %v651_v54 }
 0x137   : > { %v10439_v29 = vpop.permute.xlu1 %817  ;;  %v10444_v16 = vpop.permute.xlu0 %812  ;;  %8206 = vmatprep.mubr.f32.mxu0 %v652_v47  ;;  %v655_v47 = vld [vmem:[%s13108_s1 + $0x1d8] sm:$0xff] }
 0x138   : > { %13277 = vst [vmem:[#allocation25_spill] sm:$0xff] %v10439_v29  ;;  %13278 = vst [vmem:[#allocation26_spill] sm:$0xff] %v10444_v16  ;;  %v654_v29 = vld [vmem:[%s13108_s1 + $0x1d0] sm:$0xff]  ;;  %v13124_v16 = vmov 2  }
 0x139   : > { %1486 = vperm.xlu1 %9041, %v10062_v37   ;;  %1490 = vperm.xlu0 %9040, %v10057_v2  }
 0x13a   : > { %8207 = vmatmul.mubr.f32.gmra.mrb[56].mxu0 %v653_v44  ;;  %v658_v44 = vld [vmem:[%s13108_s1 + $0x1f0] sm:$0xff] }
 0x13b   : > { %v10451_v1 = vpop.permute.xlu1 %827  ;;  %v10456_v4 = vpop.permute.xlu0 %822  ;;  %8209 = vmatprep.mubr.f32.mxu0 %v654_v29 }
 0x13c   : > { %13279 = vst [vmem:[#allocation27_spill] sm:$0xff] %v10451_v1  ;;  %13280 = vst [vmem:[#allocation28_spill] sm:$0xff] %v10456_v4  ;;  %v656_v4 = vld [vmem:[%s13108_s1 + $0x1e0] sm:$0xff] }
 0x13d   : > { %1494 = vperm.xlu1 %9041, %v10078_v7   ;;  %9043 = vset.pattern.permute.xlu0 %v13124_v16 }
 0x13e   : > { %1690 = vperm.xlu0 %9043, %v9772_v20   ;;  %8210 = vmatmul.mubr.f32.gmra.mrb[58].mxu0 %v655_v47  ;;  %v657_v20 = vld [vmem:[%s13108_s1 + $0x1e8] sm:$0xff] }
 0x13f   : > { %v10464_v54 = vpop.permute.xlu1 %837  ;;  %v10469_v1 = vpop.permute.xlu0 %832  ;;  %8212 = vmatprep.mubr.f32.mxu0 %v656_v4  ;;  %v659_v4 = vld [vmem:[%s13108_s1 + $0x1f8] sm:$0xff] }
 0x140   : > { %13281 = vst [vmem:[#allocation29_spill] sm:$0xff] %v10464_v54  ;;  %13282 = vst [vmem:[#allocation30_spill] sm:$0xff] %v10469_v1 }
 0x141   : > { %1502 = vperm.xlu1 %9041, %v10093_v12  }
 0x142   : > { %1702 = vperm.xlu0 %9043, %v9784_v22   ;;  %8213 = vmatmul.mubr.f32.gmra.mrb[60].mxu0 %v657_v20 }
 0x143   : > { %v10476_v7 = vpop.permute.xlu1 %847  ;;  %v10481_v29 = vpop.permute.xlu0 %842  ;;  %8215 = vmatprep.mubr.f32.mxu0 %v658_v44 }
 0x144   : > { %13283 = vst [vmem:[#allocation31_spill] sm:$0xff] %v10476_v7  ;;  %13284 = vst [vmem:[#allocation32_spill] sm:$0xff] %v10481_v29  ;;  %v9220_v29 = vld [vmem:[%s13112_s5 + $0x48] sm:$0xff] }
 0x145   : > { %1510 = vperm.xlu1 %9041, %v10104_v33  }
 0x146   : > { %1710 = vperm.xlu0 %9043, %v9800_v26   ;;  %8216 = vmatmul.mubr.f32.gmra.mrb[62].mxu0 %v659_v4 }
 0x147   : > { %v10488_v12 = vpop.permute.xlu1 %857  ;;  %v10493_v47 = vpop.permute.xlu0 %852 }
 0x148   : > { %13285 = vst [vmem:[#allocation33_spill] sm:$0xff] %v10488_v12  ;;  %13286 = vst [vmem:[#allocation34_spill] sm:$0xff] %v10493_v47  ;;  %v13320_v12 = vmov 4  }
 0x149   : > { %9042 = vset.pattern.permute.xlu1 %v13124_v16 }
 0x14a   : > { %1686 = vperm.xlu1 %9042, %v9760_v18   ;;  %1718 = vperm.xlu0 %9043, %v9881_v59  }
 0x14b   : > { %v10498_v33 = vpop.permute.xlu1 %867  ;;  %v10500_v20 = vpop.permute.xlu0 %862 }
 0x14c   : > { %13287 = vst [vmem:[#allocation35_spill] sm:$0xff] %v10498_v33  ;;  %13288 = vst [vmem:[#allocation36_spill] sm:$0xff] %v10500_v20 }
 0x14e   : > { %1694 = vperm.xlu1 %9042, %v9755_v17   ;;  %1726 = vperm.xlu0 %9043, %v9903_v9   ;;  %v13126_v9 = vmov 0.0|0.0  }
 0x14f   : > { %v10504_v26 = vpop.permute.xlu1 %877  ;;  %v10506_v44 = vpop.permute.xlu0 %872  ;;  %8288 = vmatprep.subr.bf16.mxu1 %v13126_v9  ;;  %8384 = vmatprep.subr.bf16.mxu0 %v13126_v9 }
 0x150   : > { %13289 = vst [vmem:[#allocation37_spill] sm:$0xff] %v10504_v26  ;;  %13290 = vst [vmem:[#allocation38_spill] sm:$0xff] %v10506_v44 }
 0x152   : > { %1698 = vperm.xlu1 %9042, %v9767_v19   ;;  %1734 = vperm.xlu0 %9043, %v9915_v15  }
 0x153   : > { %v10510_v18 = vpop.permute.xlu1 %887  ;;  %v10512_v4 = vpop.permute.xlu0 %882 }
 0x154   : > { %13291 = vst [vmem:[#allocation39_spill] sm:$0xff] %v10510_v18  ;;  %13292 = vst [vmem:[#allocation40_spill] sm:$0xff] %v10512_v4 }
 0x156   : > { %1706 = vperm.xlu1 %9042, %v9779_v21   ;;  %1742 = vperm.xlu0 %9043, %v9927_v41  }
 0x157   : > { %v10516_v16 = vpop.permute.xlu1 %897  ;;  %v10518_v17 = vpop.permute.xlu0 %892 }
 0x158   : > { %13293 = vst [vmem:[#allocation41_spill] sm:$0xff] %v10516_v16  ;;  %13294 = vst [vmem:[#allocation42_spill] sm:$0xff] %v10518_v17 }
 0x15a   : > { %1714 = vperm.xlu1 %9042, %v9795_v25   ;;  %1750 = vperm.xlu0 %9043, %v9939_v52  }
 0x15b   : > { %v10523_v19 = vpop.permute.xlu1 %907  ;;  %v10526_v18 = vpop.permute.xlu0 %902 }
 0x15c   : > { %13295 = vst [vmem:[#allocation43_spill] sm:$0xff] %v10523_v19  ;;  %13296 = vst [vmem:[#allocation44_spill] sm:$0xff] %v10526_v18 }
 0x15e   : > { %1722 = vperm.xlu1 %9042, %v9876_v58   ;;  %1758 = vperm.xlu0 %9043, %v9954_v57  }
 0x15f   : > { %v10530_v21 = vpop.permute.xlu1 %917  ;;  %v10532_v16 = vpop.permute.xlu0 %912 }
 0x160   : > { %13297 = vst [vmem:[#allocation45_spill] sm:$0xff] %v10530_v21  ;;  %13298 = vst [vmem:[#allocation46_spill] sm:$0xff] %v10532_v16 }
 0x162   : > { %1730 = vperm.xlu1 %9042, %v9898_v8   ;;  %1766 = vperm.xlu0 %9043, %v9966_v62  }
 0x163   : > { %v10536_v25 = vpop.permute.xlu1 %927  ;;  %v10538_v17 = vpop.permute.xlu0 %922 }
 0x164   : > { %13299 = vst [vmem:[#allocation47_spill] sm:$0xff] %v10536_v25  ;;  %13300 = vst [vmem:[#allocation48_spill] sm:$0xff] %v10538_v17 }
 0x166   : > { %1738 = vperm.xlu1 %9042, %v9910_v14   ;;  %1774 = vperm.xlu0 %9043, %v9978_v0  }
 0x167   : > { %v10542_v9 = vpop.permute.xlu1 %937  ;;  %v10544_v58 = vpop.permute.xlu0 %932 }
 0x168   : > { %13301 = vst [vmem:[#allocation49_spill] sm:$0xff] %v10542_v9  ;;  %13302 = vst [vmem:[#allocation50_spill] sm:$0xff] %v10544_v58 }
 0x16a   : > { %1746 = vperm.xlu1 %9042, %v9922_v40   ;;  %1782 = vperm.xlu0 %9043, %v9998_v23  }
 0x16b   : > { %v10548_v21 = vpop.permute.xlu1 %947  ;;  %v10550_v8 = vpop.permute.xlu0 %942 }
 0x16c   : > { %13303 = vst [vmem:[#allocation51_spill] sm:$0xff] %v10548_v21  ;;  %13304 = vst [vmem:[#allocation52_spill] sm:$0xff] %v10550_v8 }
 0x16e   : > { %1754 = vperm.xlu1 %9042, %v9934_v51   ;;  %1790 = vperm.xlu0 %9043, %v10026_v39   ;;  %v13128_v39 = vmov 3  }
 0x16f   : > { %v10554_v25 = vpop.permute.xlu1 %957  ;;  %v10556_v14 = vpop.permute.xlu0 %952 }
 0x170   : > { %13305 = vst [vmem:[#allocation53_spill] sm:$0xff] %v10554_v25  ;;  %13306 = vst [vmem:[#allocation54_spill] sm:$0xff] %v10556_v14 }
 0x172   : > { %1762 = vperm.xlu1 %9042, %v9949_v56   ;;  %1798 = vperm.xlu0 %9043, %v10044_v35   ;;  %v9213_v56 = vld [vmem:[%s13112_s5] sm:$0xff] }
 0x173   : > { %v10560_v0 = vpop.permute.xlu1 %967  ;;  %v10562_v40 = vpop.permute.xlu0 %962 }
 0x174   : > { %13307 = vst [vmem:[#allocation55_spill] sm:$0xff] %v10560_v0  ;;  %13308 = vst [vmem:[#allocation56_spill] sm:$0xff] %v10562_v40 }
 0x176   : > { %1770 = vperm.xlu1 %9042, %v9961_v61   ;;  %1806 = vperm.xlu0 %9043, %v10062_v37  }
 0x177   : > { %v10566_v21 = vpop.permute.xlu1 %977  ;;  %v10568_v8 = vpop.permute.xlu0 %972 }
 0x178   : > { %13309 = vst [vmem:[#allocation57_spill] sm:$0xff] %v10566_v21  ;;  %13310 = vst [vmem:[#allocation58_spill] sm:$0xff] %v10568_v8 }
 0x17a   : > { %1778 = vperm.xlu1 %9042, %v9973_v63   ;;  %9044 = vset.pattern.permute.xlu0 %v13128_v39 }
 0x17b   : > { %3544 = vperm.xlu0 %9044, %v9213_v56  }
 0x17c   : > { %v10575_v0 = vpop.permute.xlu1 %1370  ;;  %v10577_v40 = vpop.permute.xlu0 %1366 }
 0x17e   : > { %1786 = vperm.xlu1 %9042, %v9993_v5  }
 0x17f   : > { %3560 = vperm.xlu0 %9044, %v9784_v22  }
 0x180   : > { %v10581_v61 = vpop.permute.xlu1 %1374  ;;  %v10583_v37 = vpop.permute.xlu0 %1378 }
 0x182   : > { %1794 = vperm.xlu1 %9042, %v10021_v38  }
 0x183   : > { %3576 = vperm.xlu0 %9044, %v9881_v59   ;;  %v13311_v59 = vmov 3  }
 0x184   : > { %v10587_v63 = vpop.permute.xlu1 %1382  ;;  %v10589_v39 = vpop.permute.xlu0 %1386 }
 0x186   : > { %1802 = vperm.xlu1 %9042, %v10039_v48   ;;  %v9214_v48 = vld [vmem:[%s13112_s5 + $0x8] sm:$0xff] }
 0x187   : > { %3592 = vperm.xlu0 %9044, %v9915_v15  }
 0x188   : > { %v10593_v21 = vpop.permute.xlu1 %1390  ;;  %v10595_v5 = vpop.permute.xlu0 %1394 }
 0x18a   : > { %1810 = vperm.xlu1 %9042, %v10057_v2   ;;  %v13130_v2 = vmov 4  }
 0x18b   : > { %3608 = vperm.xlu0 %9044, %v9939_v52  }
 0x18c   : > { %v10599_v22 = vpop.permute.xlu1 %1398  ;;  %v10601_v38 = vpop.permute.xlu0 %1402 }
 0x18e   : > { %9045 = vset.pattern.permute.xlu1 %v13311_v59 }
 0x18f   : > { %3548 = vperm.xlu1 %9045, %v9214_v48   ;;  %3624 = vperm.xlu0 %9044, %v9966_v62   ;;  %v9215_v62 = vld [vmem:[%s13112_s5 + $0x10] sm:$0xff] }
 0x190   : > { %v10608_v15 = vpop.permute.xlu1 %1406  ;;  %v10610_v8 = vpop.permute.xlu0 %1410 }
 0x193   : > { %9046 = vset.pattern.permute.xlu1 %v13130_v2  ;;  %3640 = vperm.xlu0 %9044, %v9998_v23  }
 0x194   : > { %v10614_v52 = vpop.permute.xlu1 %1414  ;;  %3864 = vperm.xlu1 %9046, %v9213_v56   ;;  %v10616_v25 = vpop.permute.xlu0 %1418 }
 0x197   : > { %3656 = vperm.xlu0 %9044, %v10044_v35   ;;  %v9216_v35 = vld [vmem:[%s13112_s5 + $0x18] sm:$0xff] }
 0x198   : > { %v10619_v14 = vpop.permute.xlu1 %1422  ;;  %9047 = vset.pattern.permute.xlu1 %v13311_v59  ;;  %v10625_v9 = vpop.permute.xlu0 %1426 }
 0x199   : > { %3552 = vperm.xlu1 %9047, %v9215_v62  }
 0x19b   : > { %9073 = vset.pattern.permute.xlu0 %v13130_v2 }
 0x19c   : > { %v10628_v23 = vpop.permute.xlu1 %1430  ;;  %3868 = vperm.xlu0 %9073, %v9214_v48   ;;  %v10633_v56 = vpop.permute.xlu0 %1434  ;;  %v9217_v48 = vld [vmem:[%s13112_s5 + $0x28] sm:$0xff] }
 0x19d   : > { %13312 = vst [vmem:[#allocation59_spill] sm:$0xff] %v10628_v23  ;;  %3556 = vperm.xlu1 %9047, %v9216_v35   ;;  %13313 = vst [vmem:[#allocation60_spill] sm:$0xff] %v10633_v56  ;;  %v8124_v16 = vpop.f32.mrb[0].mxu0 }
 0x19e   : > { %v1046_v19 = vpop.f32.mrb[1].mxu0  ;;  %v10731_v24 = vadd.f32 %v8124_v16, %v10273_v31 }
 0x1a0   : > { %v10635_v58 = vpop.permute.xlu1 %1438  ;;  %3872 = vperm.xlu0 %9073, %v9215_v62   ;;  %v10638_v17 = vpop.permute.xlu0 %1442  ;;  %13331 = vst [vmem:[#allocation77_spill] sm:$0xff] %v10731_v24 }
 0x1a1   : > { %13314 = vst [vmem:[#allocation61_spill] sm:$0xff] %v10635_v58  ;;  %9048 = vset.pattern.permute.xlu1 %v13130_v2  ;;  %13315 = vst [vmem:[#allocation62_spill] sm:$0xff] %v10638_v17  ;;  %v10647_v26 = vpop.f32.mrb[2].mxu0 }
 0x1a2   : > { %3876 = vperm.xlu1 %9048, %v9216_v35   ;;  %v10650_v62 = vpop.f32.mrb[3].mxu0  ;;  %v9218_v35 = vld [vmem:[%s13112_s5 + $0x30] sm:$0xff] }
 0x1a4   : > { %v10640_v18 = vpop.permute.xlu1 %1446  ;;  %3884 = vperm.xlu0 %9073, %v9217_v48   ;;  %v10645_v4 = vpop.permute.xlu0 %1450 }
 0x1a5   : > { %13316 = vst [vmem:[#allocation63_spill] sm:$0xff] %v10640_v18  ;;  %13317 = vst [vmem:[#allocation64_spill] sm:$0xff] %v10645_v4  ;;  %v10659_v33 = vpop.f32.mrb[4].mxu0  ;;  %v9223_v18 = vld [vmem:[%s13112_s5 + $0x38] sm:$0xff] }
 0x1a6   : > { %9049 = vset.pattern.permute.xlu1 %v13311_v59  ;;  %v10661_v20 = vpop.f32.mrb[5].mxu0 }
 0x1a7   : > { %3564 = vperm.xlu1 %9049, %v9217_v48   ;;  %v9219_v48 = vld [vmem:[%s13112_s5 + $0x20] sm:$0xff] }
 0x1a8   : > { %v10652_v2 = vpop.permute.xlu1 %1454  ;;  %3888 = vperm.xlu0 %9073, %v9218_v35   ;;  %v10657_v44 = vpop.permute.xlu0 %1458 }
 0x1a9   : > { %13318 = vst [vmem:[#allocation65_spill] sm:$0xff] %v10652_v2  ;;  %13319 = vst [vmem:[#allocation66_spill] sm:$0xff] %v10657_v44  ;;  %v10674_v1 = vpop.f32.mrb[6].mxu0 }
 0x1aa   : > { %v10676_v54 = vpop.f32.mrb[7].mxu0 }
 0x1ab   : > { %9050 = vset.pattern.permute.xlu1 %v13320_v12 }
 0x1ac   : > { %v10664_v47 = vpop.permute.xlu1 %1462  ;;  %3880 = vperm.xlu1 %9050, %v9219_v48   ;;  %3900 = vperm.xlu0 %9073, %v9220_v29   ;;  %v10672_v7 = vpop.permute.xlu0 %1466 }
 0x1ad   : > { %13321 = vst [vmem:[#allocation67_spill] sm:$0xff] %v10664_v47  ;;  %13322 = vst [vmem:[#allocation68_spill] sm:$0xff] %v10672_v7  ;;  %v9221_v47 = vld [vmem:[%s13112_s5 + $0x50] sm:$0xff]  ;;  %v10686_v2 = vpop.f32.mrb[8].mxu0 }
 0x1ae   : > { %v10688_v4 = vpop.f32.mrb[9].mxu0 }
 0x1b0   : > { %v10678_v44 = vpop.permute.xlu1 %1470  ;;  %9051 = vset.pattern.permute.xlu1 %v13311_v59  ;;  %3904 = vperm.xlu0 %9073, %v9221_v47   ;;  %v10684_v48 = vpop.permute.xlu0 %1474 }
 0x1b1   : > { %13323 = vst [vmem:[#allocation69_spill] sm:$0xff] %v10678_v44  ;;  %3568 = vperm.xlu1 %9051, %v9218_v35   ;;  %13324 = vst [vmem:[#allocation70_spill] sm:$0xff] %v10684_v48  ;;  %v10695_v44 = vld [vmem:[%s13112_s5 + $0x68] sm:$0xff]  ;;  %v10703_v48 = vpop.f32.mrb[10].mxu0 }
 0x1b2   : > { %v10705_v17 = vpop.f32.mrb[11].mxu0 }
 0x1b4   : > { %v10690_v7 = vpop.permute.xlu1 %1478  ;;  %3916 = vperm.xlu0 %9073, %v10695_v44   ;;  %v10701_v35 = vpop.permute.xlu0 %1482 }
 0x1b5   : > { %13325 = vst [vmem:[#allocation71_spill] sm:$0xff] %v10690_v7  ;;  %3572 = vperm.xlu1 %9051, %v9223_v18   ;;  %13326 = vst [vmem:[#allocation72_spill] sm:$0xff] %v10701_v35  ;;  %v10713_v50 = vpop.f32.mrb[12].mxu0 }
 0x1b6   : > { %v10715_v32 = vpop.f32.mrb[13].mxu0 }
 0x1b8   : > { %v10707_v58 = vpop.permute.xlu1 %1486  ;;  %3920 = vperm.xlu0 %9073, %v9927_v41   ;;  %v10711_v7 = vpop.permute.xlu0 %1490 }
 0x1b9   : > { %13327 = vst [vmem:[#allocation73_spill] sm:$0xff] %v10707_v58  ;;  %9052 = vset.pattern.permute.xlu1 %v13320_v12  ;;  %13328 = vst [vmem:[#allocation74_spill] sm:$0xff] %v10711_v7  ;;  %v10720_v35 = vpop.f32.mrb[14].mxu0 }
 0x1ba   : > { %3892 = vperm.xlu1 %9052, %v9223_v18   ;;  %v10723_v58 = vpop.f32.mrb[15].mxu0 }
 0x1bc   : > { %v10717_v23 = vpop.permute.xlu1 %1494  ;;  %3932 = vperm.xlu0 %9073, %v9934_v51   ;;  %v10737_v51 = vadd.f32 %v1046_v19, %v10259_v49  ;;  %v1622_v19 = vmul.f32 %v10575_v0, %v10731_v24  ;;  %v10773_v0 = vadd.f32 %v10650_v62, %v10257_v30  ;;  %v9228_v30 = vld [vmem:[%s13112_s5 + $0x58] sm:$0xff] }
 0x1bd   : > { %13329 = vst [vmem:[#allocation75_spill] sm:$0xff] %v10717_v23  ;;  %v1691_v43 = vpop.permute.xlu0 %1690  ;;  %v10728_v7 = vpop.f32.mrb[16].mxu0 }
 0x1be   : > { %9053 = vset.pattern.permute.xlu1 %v13311_v59  ;;  %v10733_v23 = vpop.f32.mrb[17].mxu0  ;;  %13332 = vst [vmem:[#allocation78_spill] sm:$0xff] %v10737_v51  ;;  %v1621_v49 = vmul.f32 %v10577_v40, %v10737_v51  ;;  %13338 = vst [vmem:[#allocation84_spill] sm:$0xff] %v10773_v0 }
 0x1bf   : > { %3580 = vperm.xlu1 %9053, %v9220_v29   ;;  %v9224_v29 = vld [vmem:[%s13112_s5 + $0x40] sm:$0xff] }
 0x1c0   : > { %v10725_v41 = vpop.permute.xlu1 %1502  ;;  %3936 = vperm.xlu0 %9073, %v9954_v57   ;;  %v10747_v57 = vld [vmem:[%s13112_s5 + $0xa8] sm:$0xff] }
 0x1c1   : > { %13330 = vst [vmem:[#allocation76_spill] sm:$0xff] %v10725_v41  ;;  %v1703_v18 = vpop.permute.xlu0 %1702  ;;  %13334 = vst [vmem:[#allocation80_spill] sm:$0xff] %v10747_v57  ;;  %v10750_v31 = vpop.f32.mrb[18].mxu0  ;;  %v10764_v41 = vld [vmem:[%s13112_s5 + $0xb0] sm:$0xff] }
 0x1c2   : > { %13335 = vst [vmem:[#allocation81_spill] sm:$0xff] %v10750_v31  ;;  %13337 = vst [vmem:[#allocation83_spill] sm:$0xff] %v10764_v41 }
 0x1c3   : > { %9054 = vset.pattern.permute.xlu1 %v13320_v12 }
 0x1c4   : > { %v10739_v56 = vpop.permute.xlu1 %1510  ;;  %3896 = vperm.xlu1 %9054, %v9224_v29   ;;  %3948 = vperm.xlu0 %9073, %v10747_v57   ;;  %v1942_v29 = vadd.f32 %v1691_v43, %v1622_v19  ;;  %v10779_v19 = vadd.f32 %v10647_v26, %v10271_v34  ;;  %v10796_v34 = vadd.f32 %v10661_v20, %v10285_v46 }
 0x1c5   : > { %13333 = vst [vmem:[#allocation79_spill] sm:$0xff] %v10739_v56  ;;  %v10752_v16 = vpop.permute.xlu0 %1710  ;;  %v10758_v56 = vpop.f32.mrb[19].mxu0 }
 0x1c6   : > { %13336 = vst [vmem:[#allocation82_spill] sm:$0xff] %v10758_v56  ;;  %v10767_v31 = vpop.f32.mrb[20].mxu0  ;;  %13339 = vst [vmem:[#allocation85_spill] sm:$0xff] %v10779_v19  ;;  %v2006_v56 = vmax.f32 %v1942_v29, 0.0  ;;  %v1623_v29 = vmul.f32 %v10581_v61, %v10773_v0  ;;  %v1624_v20 = vmul.f32 %v10583_v37, %v10779_v19 }
 0x1c7   : > { %v10775_v24 = vpop.f32.mrb[21].mxu0  ;;  %13342 = vst [vmem:[#allocation88_spill] sm:$0xff] %v10796_v34 }
 0x1c8   : > { %9055 = vset.pattern.permute.xlu1 %v13311_v59  ;;  %3952 = vperm.xlu0 %9073, %v10764_v41  }
 0x1c9   : > { %3584 = vperm.xlu1 %9055, %v9221_v47   ;;  %v1687_v57 = vpop.permute.xlu1 %1686  ;;  %v10769_v51 = vpop.permute.xlu0 %1718  ;;  %v10784_v47 = vld [vmem:[%s13112_s5 + $0xc8] sm:$0xff] }
 0x1ca   : > { %v1941_v40 = vadd.f32 %v1687_v57, %v1621_v49  ;;  %13340 = vst [vmem:[#allocation86_spill] sm:$0xff] %v10784_v47  ;;  %v10790_v57 = vpop.f32.mrb[22].mxu0 }
 0x1cb   : > { %13341 = vst [vmem:[#allocation87_spill] sm:$0xff] %v10790_v57  ;;  %v10798_v26 = vpop.f32.mrb[23].mxu0  ;;  %v10809_v57 = vld [vmem:[%s13112_s5 + $0xd0] sm:$0xff] }
 0x1cc   : > { %v2005_v43 = vmax.f32 %v1941_v40, 0.0  ;;  %3964 = vperm.xlu0 %9073, %v10784_v47   ;;  %13343 = vst [vmem:[#allocation89_spill] sm:$0xff] %v10798_v26  ;;  %v10804_v47 = vadd.f32 %v10659_v33, %v10283_v45  ;;  %13345 = vst [vmem:[#allocation91_spill] sm:$0xff] %v10809_v57  ;;  %v1625_v45 = vmul.f32 %v10587_v63, %v10796_v34 }
 0x1cd   : > { %3588 = vperm.xlu1 %9055, %v9228_v30   ;;  %v1695_v62 = vpop.permute.xlu1 %1694  ;;  %v10792_v49 = vpop.permute.xlu0 %1726 }
 0x1ce   : > { %v8289_v40 = vpack.c.bf16 %v2006_v56, %v2005_v43  ;;  %13344 = vst [vmem:[#allocation90_spill] sm:$0xff] %v10804_v47  ;;  %v1943_v41 = vadd.f32 %v1695_v62, %v1623_v29  ;;  %v10814_v26 = vpop.f32.mrb[24].mxu0  ;;  %v13346_v43 = vmov 0.0|0.0   ;;  %v10826_v62 = vadd.f32 %v10674_v1, %v10295_v53 }
 0x1cf   : > { %v10821_v33 = vpop.f32.mrb[25].mxu0  ;;  %v1626_v37 = vmul.f32 %v10589_v39, %v10804_v47  ;;  %v10832_v29 = vadd.f32 %v10676_v54, %v10297_v55  ;;  %v10842_v53 = vadd.f32 %v10688_v4, %v10309_v3 }
 0x1d0   : > { %3968 = vperm.xlu0 %9073, %v10809_v57   ;;  %8290 = vmatpush1.bf16.msra.mxu1 %v8289_v40  ;;  %13347 = vst [vmem:[#allocation92_spill] sm:$0xff] %v10826_v62  ;;  %v1945_v40 = vadd.f32 %v1703_v18, %v1625_v45  ;;  %v2007_v57 = vmax.f32 %v1943_v41, 0.0  ;;  %v1628_v18 = vmul.f32 %v10595_v5, %v10826_v62 }
 0x1d1   : > { %v1699_v46 = vpop.permute.xlu1 %1698  ;;  %9056 = vset.pattern.permute.xlu1 %v13320_v12  ;;  %v10817_v61 = vpop.permute.xlu0 %1734  ;;  %8291 = vmatprep.subr.bf16.mxu1 %v13346_v43  ;;  %13348 = vst [vmem:[#allocation93_spill] sm:$0xff] %v10832_v29  ;;  %13349 = vst [vmem:[#allocation94_spill] sm:$0xff] %v10842_v53  ;;  %v1627_v4 = vmul.f32 %v10593_v21, %v10832_v29  ;;  %v1629_v5 = vmul.f32 %v10599_v22, %v10842_v53 }
 0x1d2   : > { %v1944_v56 = vadd.f32 %v1699_v46, %v1624_v20  ;;  %3908 = vperm.xlu1 %9056, %v9228_v30   ;;  %v10837_v30 = vld [vmem:[%s13112_s5 + $0xe8] sm:$0xff]  ;;  %v10844_v1 = vpop.f32.mrb[26].mxu0  ;;  %v10856_v20 = vadd.f32 %v10686_v2, %v10307_v42  ;;  %v2009_v3 = vmax.f32 %v1945_v40, 0.0  ;;  %v10875_v21 = vadd.f32 %v10705_v17, %v10321_v6  ;;  %v9232_v6 = vld [vmem:[%s13112_s5 + $0x60] sm:$0xff] }
 0x1d3   : > { %v10848_v55 = vpop.f32.mrb[27].mxu0  ;;  %v1947_v2 = vadd.f32 %v10752_v16, %v1627_v4  ;;  %v1949_v22 = vadd.f32 %v10769_v51, %v1629_v5  ;;  %v13353_v17 = vmov 2  }
 0x1d4   : > { %v2008_v63 = vmax.f32 %v1944_v56, 0.0  ;;  %3980 = vperm.xlu0 %9073, %v10837_v30   ;;  %13350 = vst [vmem:[#allocation95_spill] sm:$0xff] %v10856_v20  ;;  %v10863_v56 = vld [vmem:[%s13112_s5 + $0xf0] sm:$0xff]  ;;  %13351 = vst [vmem:[#allocation96_spill] sm:$0xff] %v10875_v21 }
 0x1d5   : > { %v1707_v46 = vpop.permute.xlu1 %1706  ;;  %v10846_v39 = vpop.permute.xlu0 %1742  ;;  %v2011_v51 = vmax.f32 %v1947_v2, 0.0 }
 0x1d6   : > { %v1946_v54 = vadd.f32 %v1707_v46, %v1626_v37  ;;  %9057 = vset.pattern.permute.xlu1 %v13311_v59  ;;  %v8292_v41 = vpack.c.bf16 %v2008_v63, %v2007_v57  ;;  %v10868_v57 = vpop.f32.mrb[28].mxu0  ;;  %v10882_v46 = vadd.f32 %v10703_v48, %v10319_v27  ;;  %v10898_v48 = vadd.f32 %v10715_v32, %v10333_v11 }
 0x1d7   : > { %3596 = vperm.xlu1 %9057, %v10695_v44   ;;  %v10878_v37 = vpop.f32.mrb[29].mxu0  ;;  %v10913_v11 = vadd.f32 %v10713_v50, %v10331_v10 }
 0x1d8   : > { %v2010_v45 = vmax.f32 %v1946_v54, 0.0  ;;  %3984 = vperm.xlu0 %9073, %v10863_v56   ;;  %8293 = vmatpush1.bf16.msra.mxu1 %v8292_v41  ;;  %13352 = vst [vmem:[#allocation97_spill] sm:$0xff] %v10882_v46  ;;  %v1630_v41 = vmul.f32 %v10601_v38, %v10856_v20  ;;  %13354 = vst [vmem:[#allocation98_spill] sm:$0xff] %v10898_v48  ;;  %v10907_v38 = vld [vmem:[%s13112_s5 + $0x100] sm:$0xff]  ;;  %v1632_v32 = vmul.f32 %v10610_v8, %v10882_v46 }
 0x1d9   : > { %v1715_v44 = vpop.permute.xlu1 %1714  ;;  %v10870_v42 = vpop.permute.xlu0 %1750  ;;  %8294 = vmatprep.subr.bf16.mxu1 %v13346_v43  ;;  %13355 = vst [vmem:[#allocation99_spill] sm:$0xff] %v10913_v11  ;;  %v10928_v8 = vadd.f32 %v10723_v58, %v10345_v28  ;;  %v1634_v58 = vmul.f32 %v10616_v25, %v10913_v11  ;;  %v10962_v25 = vld [vmem:[%s13112_s5 + $0x128] sm:$0xff] }
 0x1da   : > { %v1948_v40 = vadd.f32 %v1715_v44, %v1628_v18  ;;  %v8295_v63 = vpack.c.bf16 %v2010_v45, %v2009_v3  ;;  %v10892_v18 = vpop.f32.mrb[30].mxu0  ;;  %v1631_v3 = vmul.f32 %v10608_v15, %v10875_v21  ;;  %v2013_v15 = vmax.f32 %v1949_v22, 0.0 }
 0x1db   : > { %9058 = vset.pattern.permute.xlu1 %v13320_v12  ;;  %v10902_v4 = vpop.f32.mrb[31].mxu0  ;;  %13357 = vst [vmem:[#allocation101_spill] sm:$0xff] %v10928_v8 }
 0x1dc   : > { %v2012_v54 = vmax.f32 %v1948_v40, 0.0  ;;  %3912 = vperm.xlu1 %9058, %v9232_v6   ;;  %9078 = vset.pattern.permute.xlu0 %v13353_v17  ;;  %v1951_v44 = vadd.f32 %v10792_v49, %v1631_v3  ;;  %v9234_v6 = vld [vmem:[%s13112_s5 + $0x70] sm:$0xff]  ;;  %v1633_v49 = vmul.f32 %v10614_v52, %v10898_v48 }
 0x1dd   : > { %v1723_v16 = vpop.permute.xlu1 %1722  ;;  %8296 = vmatpush1.bf16.msra.mxu1 %v8295_v63  ;;  %v10894_v27 = vpop.permute.xlu0 %1758  ;;  %1814 = vperm.xlu0 %9078, %v10907_v38  }
 0x1de   : > { %v1950_v45 = vadd.f32 %v1723_v16, %v1630_v41  ;;  %8297 = vmatprep.subr.bf16.mxu1 %v13346_v43  ;;  %v8298_v2 = vpack.c.bf16 %v2012_v54, %v2011_v51  ;;  %v10919_v63 = vpop.f32.mrb[32].mxu0  ;;  %v10937_v54 = vld [vmem:[%s13112_s5 + $0x118] sm:$0xff]  ;;  %v10942_v41 = vadd.f32 %v10720_v35, %v10343_v13  ;;  %v2015_v52 = vmax.f32 %v1951_v44, 0.0 }
 0x1df   : > { %13356 = vst [vmem:[#allocation100_spill] sm:$0xff] %v10919_v63  ;;  %v10932_v22 = vpop.f32.mrb[33].mxu0  ;;  %v1953_v51 = vadd.f32 %v10817_v61, %v1633_v49  ;;  %v1635_v35 = vmul.f32 %v10619_v14, %v10928_v8  ;;  %v10967_v44 = vadd.f32 %v10728_v7, %v10355_v36 }
 0x1e0   : > { %v2014_v5 = vmax.f32 %v1950_v45, 0.0  ;;  %9059 = vset.pattern.permute.xlu1 %v13311_v59  ;;  %13358 = vst [vmem:[#allocation102_spill] sm:$0xff] %v10932_v22  ;;  %13359 = vst [vmem:[#allocation103_spill] sm:$0xff] %v10942_v41  ;;  %v1636_v14 = vmul.f32 %v10625_v9, %v10942_v41  ;;  %v10987_v9 = vld [vmem:[%s13112_s5 + $0x140] sm:$0xff] }
 0x1e1   : > { %v1731_v40 = vpop.permute.xlu1 %1730  ;;  %3600 = vperm.xlu1 %9059, %v9234_v6   ;;  %v10924_v50 = vpop.permute.xlu0 %1766  ;;  %8299 = vmatpush1.bf16.msra.mxu1 %v8298_v2  ;;  %13362 = vst [vmem:[#allocation106_spill] sm:$0xff] %v10967_v44  ;;  %v2017_v6 = vmax.f32 %v1953_v51, 0.0  ;;  %v13368_v51 = vld [vmem:[#allocation81_spill] sm:$0xff] }
 0x1e2   : > { %v1952_v10 = vadd.f32 %v1731_v40, %v1632_v32  ;;  %1826 = vperm.xlu0 %9078, %v10937_v54   ;;  %v8301_v16 = vpack.c.bf16 %v2014_v5, %v2013_v15  ;;  %8300 = vmatprep.subr.bf16.mxu1 %v13346_v43  ;;  %v10948_v45 = vpop.f32.mrb[34].mxu0  ;;  %v9236_v32 = vld [vmem:[%s13112_s5 + $0x78] sm:$0xff]  ;;  %v10974_v40 = vadd.f32 %v10733_v23, %v10357_v60 }
 0x1e3   : > { %13360 = vst [vmem:[#allocation104_spill] sm:$0xff] %v10948_v45  ;;  %v10957_v5 = vpop.f32.mrb[35].mxu0 }
 0x1e4   : > { %v2016_v28 = vmax.f32 %v1952_v10, 0.0  ;;  %13361 = vst [vmem:[#allocation105_spill] sm:$0xff] %v10957_v5  ;;  %13363 = vst [vmem:[#allocation107_spill] sm:$0xff] %v10974_v40  ;;  %v1955_v10 = vadd.f32 %v10846_v39, %v1635_v35  ;;  %v13366_v39 = vld [vmem:[#allocation60_spill] sm:$0xff]  ;;  %v13371_v35 = vld [vmem:[#allocation82_spill] sm:$0xff] }
 0x1e5   : > { %v1739_v3 = vpop.permute.xlu1 %1738  ;;  %3604 = vperm.xlu1 %9059, %v9236_v32   ;;  %v10953_v13 = vpop.permute.xlu0 %1774  ;;  %8302 = vmatpush1.bf16.msra.mxu1 %v8301_v16 }
 0x1e6   : > { %v1954_v15 = vadd.f32 %v1739_v3, %v1634_v58  ;;  %1834 = vperm.xlu0 %9078, %v10962_v25   ;;  %v8304_v61 = vpack.c.bf16 %v2016_v28, %v2015_v52  ;;  %8303 = vmatprep.subr.bf16.mxu1 %v13346_v43  ;;  %v10977_v16 = vpop.f32.mrb[36].mxu0  ;;  %v1638_v58 = vmul.f32 %v13366_v39, %v10967_v44  ;;  %v13367_v52 = vld [vmem:[#allocation13_spill] sm:$0xff] }
 0x1e7   : > { %13364 = vst [vmem:[#allocation108_spill] sm:$0xff] %v10977_v16  ;;  %v10982_v28 = vpop.f32.mrb[37].mxu0  ;;  %v10995_v3 = vadd.f32 %v13368_v51, %v13367_v52 }
 0x1e8   : > { %v2018_v2 = vmax.f32 %v1954_v15, 0.0  ;;  %13365 = vst [vmem:[#allocation109_spill] sm:$0xff] %v10982_v28  ;;  %v13370_v15 = vld [vmem:[#allocation14_spill] sm:$0xff] }
 0x1e9   : > { %v1747_v49 = vpop.permute.xlu1 %1746  ;;  %9060 = vset.pattern.permute.xlu1 %v13320_v12  ;;  %v10980_v7 = vpop.permute.xlu0 %1782  ;;  %8305 = vmatpush1.bf16.msra.mxu1 %v8304_v61  ;;  %13369 = vst [vmem:[#allocation60_spill] sm:$0xff] %v10995_v3  ;;  %v10999_v61 = vadd.f32 %v13371_v35, %v13370_v15  ;;  %v9240_v35 = vld [vmem:[%s13112_s5 + $0x88] sm:$0xff] }
 0x1ea   : > { %v1956_v36 = vadd.f32 %v1747_v49, %v1636_v14  ;;  %1846 = vperm.xlu0 %9078, %v10987_v9   ;;  %v8307_v60 = vpack.c.bf16 %v2018_v2, %v2017_v6  ;;  %3924 = vperm.xlu1 %9060, %v9236_v32   ;;  %v2019_v14 = vmax.f32 %v1955_v10, 0.0  ;;  %v13373_v49 = vld [vmem:[#allocation59_spill] sm:$0xff]  ;;  %v13374_v6 = vld [vmem:[#allocation16_spill] sm:$0xff]  ;;  %v11017_v10 = vld [vmem:[%s13112_s5 + $0x160] sm:$0xff] }
 0x1eb   : > { %8306 = vmatprep.subr.bf16.mxu1 %v13346_v43  ;;  %13372 = vst [vmem:[#allocation13_spill] sm:$0xff] %v10999_v61  ;;  %v1637_v28 = vmul.f32 %v13373_v49, %v10974_v40  ;;  %v11005_v32 = vadd.f32 %v10775_v24, %v13374_v6  ;;  %v13378_v24 = vld [vmem:[#allocation15_spill] sm:$0xff] }
 0x1ec   : > { %v2020_v23 = vmax.f32 %v1956_v36, 0.0  ;;  %v11007_v36 = vpop.f32.mrb[38].mxu0 }
 0x1ed   : > { %v1755_v2 = vpop.permute.xlu1 %1754  ;;  %13375 = vst [vmem:[#allocation81_spill] sm:$0xff] %v11005_v32  ;;  %13376 = vst [vmem:[#allocation14_spill] sm:$0xff] %v11007_v36  ;;  %v11009_v16 = vpop.permute.xlu0 %1790  ;;  %v1957_v52 = vadd.f32 %v10870_v42, %v1637_v28  ;;  %8308 = vmatpush1.bf16.msra.mxu1 %v8307_v60  ;;  %v13380_v42 = vld [vmem:[#allocation61_spill] sm:$0xff] }
 0x1ee   : > { %v1958_v39 = vadd.f32 %v1755_v2, %v1638_v58  ;;  %v11012_v51 = vpop.f32.mrb[39].mxu0  ;;  %1862 = vperm.xlu0 %9078, %v11017_v10   ;;  %v8310_v15 = vpack.c.bf16 %v2020_v23, %v2019_v14  ;;  %9061 = vset.pattern.permute.xlu1 %v13311_v59  ;;  %v11024_v58 = vadd.f32 %v10767_v31, %v13378_v24  ;;  %v13381_v23 = vld [vmem:[#allocation62_spill] sm:$0xff]  ;;  %v13382_v2 = vld [vmem:[#allocation63_spill] sm:$0xff] }
 0x1ef   : > { %13377 = vst [vmem:[#allocation82_spill] sm:$0xff] %v11012_v51  ;;  %8309 = vmatprep.subr.bf16.mxu1 %v13346_v43  ;;  %v1639_v28 = vmul.f32 %v13380_v42, %v10999_v61  ;;  %3612 = vperm.xlu1 %9061, %v9240_v35   ;;  %v1640_v14 = vmul.f32 %v13381_v23, %v10995_v3  ;;  %v11035_v36 = vpop.f32.mrb[40].mxu0  ;;  %v13384_v24 = vld [vmem:[#allocation18_spill] sm:$0xff]  ;;  %v13385_v51 = vld [vmem:[#allocation89_spill] sm:$0xff] }
 0x1f0   : > { %13379 = vst [vmem:[#allocation59_spill] sm:$0xff] %v11024_v58  ;;  %v2022_v60 = vmax.f32 %v1958_v39, 0.0  ;;  %v1641_v6 = vmul.f32 %v13382_v2, %v11005_v32  ;;  %13383 = vst [vmem:[#allocation16_spill] sm:$0xff] %v11035_v36  ;;  %v11041_v42 = vadd.f32 %v13385_v51, %v13384_v24  ;;  %v2021_v39 = vmax.f32 %v1957_v52, 0.0  ;;  %v11044_v45 = vpop.f32.mrb[41].mxu0  ;;  %v11049_v23 = vld [vmem:[%s13112_s5 + $0x180] sm:$0xff] }
 0x1f1   : > { %v1763_v49 = vpop.permute.xlu1 %1762  ;;  %v11037_v31 = vpop.permute.xlu0 %1798  ;;  %v1959_v5 = vadd.f32 %v10894_v27, %v1639_v28  ;;  %13387 = vst [vmem:[#allocation61_spill] sm:$0xff] %v11044_v45  ;;  %8311 = vmatpush1.bf16.msra.mxu1 %v8310_v15  ;;  %v13388_v2 = vld [vmem:[#allocation17_spill] sm:$0xff]  ;;  %v13389_v36 = vld [vmem:[#allocation87_spill] sm:$0xff]  ;;  %v13391_v28 = vld [vmem:[#allocation64_spill] sm:$0xff] }
 0x1f2   : > { %13386 = vst [vmem:[#allocation15_spill] sm:$0xff] %v11041_v42  ;;  %v1960_v35 = vadd.f32 %v1763_v49, %v1640_v14  ;;  %1878 = vperm.xlu0 %9078, %v11049_v23   ;;  %v11054_v63 = vadd.f32 %v13389_v36, %v13388_v2  ;;  %8312 = vmatprep.subr.bf16.mxu1 %v13346_v43  ;;  %v11061_v14 = vpop.f32.mrb[42].mxu0  ;;  %v9242_v24 = vld [vmem:[%s13112_s5 + $0x80] sm:$0xff]  ;;  %v13393_v36 = vld [vmem:[#allocation20_spill] sm:$0xff]  ;;  %v13400_v45 = vld [vmem:[#allocation22_spill] sm:$0xff] }
 0x1f3   : > { %v1961_v52 = vadd.f32 %v10924_v50, %v1641_v6  ;;  %9062 = vset.pattern.permute.xlu1 %v13320_v12  ;;  %v8313_v51 = vpack.c.bf16 %v2022_v60, %v2021_v39  ;;  %v1642_v49 = vmul.f32 %v13391_v28, %v11024_v58  ;;  %13392 = vst [vmem:[#allocation63_spill] sm:$0xff] %v11061_v14  ;;  %v2023_v50 = vmax.f32 %v1959_v5, 0.0  ;;  %v13395_v6 = vld [vmem:[#allocation65_spill] sm:$0xff]  ;;  %v11072_v60 = vpop.f32.mrb[43].mxu0  ;;  %v13397_v14 = vld [vmem:[#allocation19_spill] sm:$0xff]  ;;  %v13399_v5 = vld [vmem:[#allocation66_spill] sm:$0xff] }
 0x1f4   : > { %13390 = vst [vmem:[#allocation62_spill] sm:$0xff] %v11054_v63  ;;  %v2024_v27 = vmax.f32 %v1960_v35, 0.0  ;;  %3928 = vperm.xlu1 %9062, %v9242_v24   ;;  %v11068_v2 = vadd.f32 %v10821_v33, %v13393_v36  ;;  %v1643_v35 = vmul.f32 %v13395_v6, %v11041_v42  ;;  %13396 = vst [vmem:[#allocation89_spill] sm:$0xff] %v11072_v60  ;;  %v11077_v28 = vld [vmem:[%s13112_s5 + $0x1a0] sm:$0xff] }
 0x1f5   : > { %v1771_v15 = vpop.permute.xlu1 %1770  ;;  %8314 = vmatpush1.bf16.msra.mxu1 %v8313_v51  ;;  %v11080_v24 = vpop.permute.xlu0 %1806  ;;  %v11084_v33 = vadd.f32 %v10814_v26, %v13397_v14  ;;  %v1644_v36 = vmul.f32 %v13399_v5, %v11054_v63  ;;  %v2025_v51 = vmax.f32 %v1961_v52, 0.0  ;;  %v11092_v22 = vadd.f32 %v10848_v55, %v13400_v45  ;;  %v13403_v26 = vld [vmem:[#allocation67_spill] sm:$0xff]  ;;  %v13405_v45 = vld [vmem:[#allocation21_spill] sm:$0xff] }
 0x1f6   : > { %13394 = vst [vmem:[#allocation18_spill] sm:$0xff] %v11068_v2  ;;  %v1962_v39 = vadd.f32 %v1771_v15, %v1642_v49  ;;  %1894 = vperm.xlu0 %9078, %v11077_v28   ;;  %8315 = vmatprep.subr.bf16.mxu1 %v13346_v43  ;;  %v1963_v15 = vadd.f32 %v10953_v13, %v1643_v35  ;;  %v11094_v42 = vpop.f32.mrb[44].mxu0  ;;  %v9244_v13 = vld [vmem:[%s13112_s5 + $0x90] sm:$0xff]  ;;  %v11113_v35 = vld [vmem:[%s13112_s5 + $0x1c0] sm:$0xff] }
 0x1f7   : > { %13398 = vst [vmem:[#allocation17_spill] sm:$0xff] %v11084_v33  ;;  %v8316_v6 = vpack.c.bf16 %v2024_v27, %v2023_v50  ;;  %13401 = vst [vmem:[#allocation87_spill] sm:$0xff] %v11092_v22  ;;  %v1645_v14 = vmul.f32 %v13403_v26, %v11068_v2  ;;  %v11099_v32 = vpop.f32.mrb[45].mxu0  ;;  %v11108_v50 = vadd.f32 %v10844_v1, %v13405_v45 }
 0x1f8   : > { %v2026_v49 = vmax.f32 %v1962_v39, 0.0  ;;  %13402 = vst [vmem:[#allocation64_spill] sm:$0xff] %v11094_v42  ;;  %9063 = vset.pattern.permute.xlu1 %v13311_v59  ;;  %13404 = vst [vmem:[#allocation20_spill] sm:$0xff] %v11099_v32  ;;  %v2027_v39 = vmax.f32 %v1963_v15, 0.0 }
 0x1f9   : > { %v1779_v60 = vpop.permute.xlu1 %1778  ;;  %8317 = vmatpush1.bf16.msra.mxu1 %v8316_v6  ;;  %3616 = vperm.xlu1 %9063, %v9244_v13   ;;  %13406 = vst [vmem:[#allocation65_spill] sm:$0xff] %v11108_v50  ;;  %v1965_v5 = vadd.f32 %v10980_v7, %v1645_v14  ;;  %v13408_v6 = vld [vmem:[#allocation24_spill] sm:$0xff]  ;;  %v11124_v26 = vpop.f32.mrb[46].mxu0  ;;  %v13411_v13 = vld [vmem:[#allocation69_spill] sm:$0xff] }
 0x1fa   : > { %v1964_v52 = vadd.f32 %v1779_v60, %v1644_v36  ;;  %v11104_v27 = vpop.permute.xlu0 %3544  ;;  %v8319_v55 = vpack.c.bf16 %v2026_v49, %v2025_v51  ;;  %1910 = vperm.xlu0 %9078, %v11113_v35   ;;  %8318 = vmatprep.subr.bf16.mxu1 %v13346_v43  ;;  %v13407_v51 = vld [vmem:[#allocation68_spill] sm:$0xff]  ;;  %v11122_v1 = vadd.f32 %v10878_v37, %v13408_v6  ;;  %v11128_v42 = vpop.f32.mrb[47].mxu0  ;;  %v13413_v37 = vld [vmem:[#allocation23_spill] sm:$0xff] }
 0x1fb   : > { %v1646_v49 = vmul.f32 %v13407_v51, %v11084_v33  ;;  %13410 = vst [vmem:[#allocation66_spill] sm:$0xff] %v11124_v26  ;;  %v1647_v45 = vmul.f32 %v13411_v13, %v11092_v22  ;;  %13412 = vst [vmem:[#allocation22_spill] sm:$0xff] %v11128_v42  ;;  %v9246_v7 = vld [vmem:[%s13112_s5 + $0x98] sm:$0xff]  ;;  %v2070_v51 = vld [vmem:[#allocation3 + $0x8] sm:$0xff]  ;;  %v11137_v6 = vadd.f32 %v10868_v57, %v13413_v37 }
 0x1fc   : > { %v2028_v60 = vmax.f32 %v1964_v52, 0.0  ;;  %13409 = vst [vmem:[#allocation19_spill] sm:$0xff] %v11122_v1  ;;  %v11142_v13 = vld [vmem:[%s13112_s5 + $0x1e0] sm:$0xff]  ;;  %2389 = vmatprep.mubr.f32.mxu1 %v2070_v51  ;;  %v13417_v42 = vld [vmem:[#allocation26_spill] sm:$0xff]  ;;  %v13419_v22 = vld [vmem:[#allocation71_spill] sm:$0xff] }
 0x1fd   : > { %v1787_v36 = vpop.permute.xlu1 %1786  ;;  %8320 = vmatpush1.bf16.msra.mxu1 %v8319_v55  ;;  %3620 = vperm.xlu1 %9063, %v9246_v7   ;;  %13414 = vst [vmem:[#allocation67_spill] sm:$0xff] %v11137_v6  ;;  %v13415_v55 = vld [vmem:[#allocation70_spill] sm:$0xff]  ;;  %v11149_v57 = vpop.f32.mrb[48].mxu0  ;;  %v11153_v32 = vadd.f32 %v10902_v4, %v13417_v42  ;;  %v1649_v2 = vmul.f32 %v13419_v22, %v11122_v1  ;;  %v13424_v4 = vld [vmem:[#allocation72_spill] sm:$0xff] }
 0x1fe   : > { %v1966_v15 = vadd.f32 %v1787_v36, %v1646_v49  ;;  %v11133_v14 = vpop.permute.xlu0 %3560  ;;  %v8322_v52 = vpack.c.bf16 %v2028_v60, %v2027_v39  ;;  %1926 = vperm.xlu0 %9078, %v11142_v13   ;;  %8321 = vmatprep.subr.bf16.mxu1 %v13346_v43  ;;  %v1648_v36 = vmul.f32 %v13415_v55, %v11108_v50  ;;  %v2029_v49 = vmax.f32 %v1965_v5, 0.0  ;;  %v11157_v33 = vpop.f32.mrb[49].mxu0 }
 0x1ff   : > { %v1967_v39 = vadd.f32 %v11009_v16, %v1647_v45  ;;  %13416 = vst [vmem:[#allocation21_spill] sm:$0xff] %v11149_v57  ;;  %13418 = vst [vmem:[#allocation68_spill] sm:$0xff] %v11153_v32  ;;  %v13421_v45 = vld [vmem:[#allocation25_spill] sm:$0xff]  ;;  %v1650_v42 = vmul.f32 %v13424_v4, %v11137_v6  ;;  %v1969_v22 = vadd.f32 %v11037_v31, %v1649_v2 }
 0x200   : > { %v2030_v60 = vmax.f32 %v1966_v15, 0.0  ;;  %13420 = vst [vmem:[#allocation24_spill] sm:$0xff] %v11157_v33  ;;  %v11164_v15 = vadd.f32 %v10892_v18, %v13421_v45  ;;  %v13428_v45 = vld [vmem:[#allocation74_spill] sm:$0xff]  ;;  %v2077_v33 = vld [vmem:[#allocation3 + $0x40] sm:$0xff] }
 0x201   : > { %v1795_v26 = vpop.permute.xlu1 %1794  ;;  %8323 = vmatpush1.bf16.msra.mxu1 %v8322_v52  ;;  %9064 = vset.pattern.permute.xlu1 %v13320_v12  ;;  %v2031_v51 = vmax.f32 %v1967_v39, 0.0  ;;  %v11173_v52 = vld [vmem:[%s13112_s5 + $0x108] sm:$0xff]  ;;  %v2033_v57 = vmax.f32 %v1969_v22, 0.0 }
 0x202   : > { %v1968_v37 = vadd.f32 %v1795_v26, %v1648_v36  ;;  %v11160_v5 = vpop.permute.xlu0 %3576  ;;  %v8325_v16 = vpack.c.bf16 %v2030_v60, %v2029_v49  ;;  %13422 = vst [vmem:[#allocation69_spill] sm:$0xff] %v11164_v15  ;;  %v13423_v26 = vmov 1   ;;  %3940 = vperm.xlu1 %9064, %v9246_v7   ;;  %8324 = vmatprep.subr.bf16.mxu1 %v13346_v43  ;;  %v11177_v36 = vpop.f32.mrb[50].mxu0  ;;  %v13426_v49 = vld [vmem:[#allocation73_spill] sm:$0xff] }
 0x203   : > { %9103 = vset.pattern.permute.xlu0 %v13423_v26  ;;  %13425 = vst [vmem:[#allocation23_spill] sm:$0xff] %v11177_v36  ;;  %v1651_v60 = vmul.f32 %v13426_v49, %v11153_v32  ;;  %v11181_v39 = vpop.f32.mrb[51].mxu0  ;;  %v1652_v4 = vmul.f32 %v13428_v45, %v11164_v15 }
 0x204   : > { %v2032_v55 = vmax.f32 %v1968_v37, 0.0  ;;  %1498 = vperm.xlu0 %9103, %v11173_v52   ;;  %13427 = vst [vmem:[#allocation70_spill] sm:$0xff] %v11181_v39 }
 0x205   : > { %v1803_v18 = vpop.permute.xlu1 %1802  ;;  %8326 = vmatpush1.bf16.msra.mxu1 %v8325_v16  ;;  %v11192_v16 = vpop.f32.mrb[52].mxu0 }
 0x206   : > { %v1970_v7 = vadd.f32 %v1803_v18, %v1650_v42  ;;  %v11183_v31 = vpop.permute.xlu0 %3592  ;;  %v8328_v2 = vpack.c.bf16 %v2032_v55, %v2031_v51  ;;  %9065 = vset.pattern.permute.xlu1 %v13311_v59  ;;  %8327 = vmatprep.subr.bf16.mxu1 %v13346_v43  ;;  %v1971_v42 = vadd.f32 %v11080_v24, %v1651_v60  ;;  %v13429_v18 = vld [vmem:[#allocation80_spill] sm:$0xff]  ;;  %v11194_v51 = vpop.f32.mrb[53].mxu0  ;;  %v11206_v24 = vld [vmem:[%s13112_s5 + $0xa0] sm:$0xff] }
 0x207   : > { %3628 = vperm.xlu1 %9065, %v13429_v18   ;;  %13430 = vst [vmem:[#allocation26_spill] sm:$0xff] %v11192_v16  ;;  %13431 = vst [vmem:[#allocation71_spill] sm:$0xff] %v11194_v51  ;;  %v2078_v51 = vld [vmem:[#allocation3 + $0x48] sm:$0xff] }
 0x208   : > { %v2034_v37 = vmax.f32 %v1970_v7, 0.0  ;;  %1506 = vperm.xlu0 %9103, %v10937_v54   ;;  %v2035_v22 = vmax.f32 %v1971_v42, 0.0  ;;  %13433 = vst [vmem:[#allocation72_spill] sm:$0xff] %v11206_v24  ;;  %v13437_v42 = vld [vmem:[#allocation83_spill] sm:$0xff] }
 0x209   : > { %v1811_v49 = vpop.permute.xlu1 %1810  ;;  %8329 = vmatpush1.bf16.msra.mxu1 %v8328_v2  ;;  %v11201_v54 = vpop.f32.mrb[54].mxu0 }
 0x20a   : > { %v1972_v36 = vadd.f32 %v1811_v49, %v1652_v4  ;;  %v11196_v55 = vpop.permute.xlu0 %3608  ;;  %v8331_v7 = vpack.c.bf16 %v2034_v37, %v2033_v57  ;;  %8330 = vmatprep.subr.bf16.mxu1 %v13346_v43  ;;  %13432 = vst [vmem:[#allocation25_spill] sm:$0xff] %v11201_v54  ;;  %v11209_v2 = vpop.f32.mrb[55].mxu0  ;;  %v11217_v37 = vld [vmem:[%s13112_s5 + $0x138] sm:$0xff] }
 0x20b   : > { %9066 = vset.pattern.permute.xlu1 %v13320_v12  ;;  %13434 = vst [vmem:[#allocation73_spill] sm:$0xff] %v11209_v2 }
 0x20c   : > { %v2036_v39 = vmax.f32 %v1972_v36, 0.0  ;;  %1514 = vperm.xlu0 %9103, %v10962_v25   ;;  %3944 = vperm.xlu1 %9066, %v11206_v24   ;;  %v2082_v24 = vld [vmem:[#allocation3 + $0x68] sm:$0xff] }
 0x20d   : > { %8332 = vmatpush1.bf16.msra.mxu1 %v8331_v7  ;;  %v11220_v45 = vpop.f32.mrb[56].mxu0  ;;  %v2074_v7 = vld [vmem:[#allocation3 + $0x28] sm:$0xff] }
 0x20e   : > { %v3549_v60 = vpop.permute.xlu1 %3548  ;;  %v11211_v57 = vpop.permute.xlu0 %3624  ;;  %v8334_v36 = vpack.c.bf16 %v2036_v39, %v2035_v22  ;;  %8333 = vmatprep.subr.bf16.mxu1 %v13346_v43  ;;  %13435 = vst [vmem:[#allocation74_spill] sm:$0xff] %v11220_v45  ;;  %v2069_v39 = vld [vmem:[#allocation3] sm:$0xff]  ;;  %v13439_v45 = vld [vmem:[#allocation78_spill] sm:$0xff] }
 0x20f   : > { %v11223_v4 = vpop.f32.mrb[57].mxu0  ;;  %v3799_v54 = vmul.f32 %v11104_v27, %v13439_v45  ;;  %v13443_v45 = vld [vmem:[#allocation77_spill] sm:$0xff] }
 0x210   : > { %1522 = vperm.xlu0 %9103, %v11217_v37   ;;  %9067 = vset.pattern.permute.xlu1 %v13311_v59  ;;  %13436 = vst [vmem:[#allocation80_spill] sm:$0xff] %v11223_v4 }
 0x211   : > { %8335 = vmatpush1.bf16.msra.mxu1 %v8334_v36  ;;  %3632 = vperm.xlu1 %9067, %v13437_v42   ;;  %v11230_v22 = vpop.f32.mrb[58].mxu0  ;;  %v9251_v36 = vld [vmem:[%s13112_s5 + $0xb8] sm:$0xff]  ;;  %v2073_v42 = vld [vmem:[#allocation3 + $0x20] sm:$0xff] }
 0x212   : > { %v11226_v49 = vpop.permute.xlu0 %3640  ;;  %8336 = vmatprep.subr.bf16.mxu1 %v13346_v43  ;;  %13438 = vst [vmem:[#allocation83_spill] sm:$0xff] %v11230_v22  ;;  %v11234_v2 = vpop.f32.mrb[59].mxu0  ;;  %v3800_v22 = vmul.f32 %v3549_v60, %v13443_v45 }
 0x213   : > { %v3865_v18 = vpop.permute.xlu1 %3864  ;;  %13440 = vst [vmem:[#allocation110_spill] sm:$0xff] %v11234_v2 }
 0x214   : > { %1526 = vperm.xlu0 %9103, %v10987_v9   ;;  %2390 = vmatmul.mubr.f32.vlgmr.msra.gmra.mrb[0].mxu1 %v2069_v39  ;;  %v11244_v39 = vld [vmem:[%s13112_s5 + $0x158] sm:$0xff] }
 0x215   : > { %3636 = vperm.xlu1 %9067, %v9251_v36   ;;  %2394 = vmatprep.mubr.f32.mxu1 %v2074_v7  ;;  %v11247_v27 = vpop.f32.mrb[60].mxu0  ;;  %v4119_v7 = vadd.f32 %v3865_v18, %v3799_v54  ;;  %v2081_v18 = vld [vmem:[#allocation3 + $0x60] sm:$0xff] }
 0x216   : > { %v11239_v4 = vpop.permute.xlu0 %3656  ;;  %13442 = vst [vmem:[#allocation112_spill] sm:$0xff] %v11247_v27  ;;  %v11250_v2 = vpop.f32.mrb[61].mxu0 }
 0x217   : > { %13441 = vst [vmem:[#allocation111_spill] sm:$0xff] %v11239_v4  ;;  %13444 = vst [vmem:[#allocation113_spill] sm:$0xff] %v11250_v2 }
 0x218   : > { %v3553_v16 = vpop.permute.xlu1 %3552  ;;  %1538 = vperm.xlu0 %9103, %v11244_v39   ;;  %2395 = vmatmul.mubr.f32.gmra.mrb[2].mxu1 %v2073_v42  ;;  %v4183_v42 = vmax.f32 %v4119_v7, 0.0 }
 0x219   : > { %9068 = vset.pattern.permute.xlu1 %v13320_v12  ;;  %2399 = vmatprep.mubr.f32.mxu1 %v2078_v51  ;;  %v11254_v1 = vpop.f32.mrb[62].mxu0  ;;  %v3801_v60 = vmul.f32 %v3553_v16, %v10773_v0  ;;  %v4307_v0 = vld [vmem:[#allocation5 + $0x1e0] sm:$0xff] }
 0x21a   : > { %3956 = vperm.xlu1 %9068, %v9251_v36   ;;  %v11256_v27 = vpop.f32.mrb[63].mxu0  ;;  %v2086_v36 = vld [vmem:[#allocation3 + $0x88] sm:$0xff] }
 0x21b   : > { %v3869_v15 = vpop.permute.xlu0 %3868 }
 0x21c   : > { %v3557_v32 = vpop.permute.xlu1 %3556  ;;  %1542 = vperm.xlu0 %9103, %v11017_v10   ;;  %v4120_v4 = vadd.f32 %v3869_v15, %v3800_v22  ;;  %2400 = vmatmul.mubr.f32.gmra.mrb[4].mxu1 %v2077_v33  ;;  %v11264_v15 = vld [vmem:[%s13112_s5 + $0x178] sm:$0xff]  ;;  %v13445_v33 = vld [vmem:[#allocation86_spill] sm:$0xff]  ;;  %v2085_v22 = vld [vmem:[#allocation3 + $0x80] sm:$0xff] }
 0x21d   : > { %2404 = vmatprep.mubr.f32.mxu1 %v2082_v24  ;;  %v3802_v2 = vmul.f32 %v3557_v32, %v10779_v19  ;;  %v2090_v32 = vld [vmem:[#allocation3 + $0xa8] sm:$0xff] }
 0x21e   : > { %v4184_v54 = vmax.f32 %v4120_v4, 0.0  ;;  %9069 = vset.pattern.permute.xlu1 %v13311_v59 }
 0x21f   : > { %v3873_v51 = vpop.permute.xlu0 %3872  ;;  %3644 = vperm.xlu1 %9069, %v13445_v33   ;;  %v2089_v33 = vld [vmem:[#allocation3 + $0xa0] sm:$0xff] }
 0x220   : > { %v8385_v45 = vpack.c.bf16 %v4184_v54, %v4183_v42  ;;  %1554 = vperm.xlu0 %9103, %v11264_v15   ;;  %v4121_v16 = vadd.f32 %v3873_v51, %v3801_v60  ;;  %2405 = vmatmul.mubr.f32.gmra.mrb[6].mxu1 %v2081_v18  ;;  %v11274_v60 = vld [vmem:[%s13112_s5 + $0xc0] sm:$0xff]  ;;  %v3803_v51 = vmul.f32 %v11133_v14, %v10796_v34 }
 0x221   : > { %v3877_v4 = vpop.permute.xlu1 %3876  ;;  %2409 = vmatprep.mubr.f32.mxu1 %v2086_v36 }
 0x222   : > { %v4122_v24 = vadd.f32 %v3877_v4, %v3802_v2  ;;  %8386 = vmatpush1.bf16.msra.mxu0 %v8385_v45  ;;  %v4185_v42 = vmax.f32 %v4121_v16, 0.0  ;;  %v11283_v16 = vld [vmem:[%s13112_s5 + $0x198] sm:$0xff]  ;;  %v2094_v4 = vld [vmem:[#allocation3 + $0xc8] sm:$0xff] }
 0x223   : > { %v3885_v7 = vpop.permute.xlu0 %3884  ;;  %8387 = vmatprep.subr.bf16.mxu0 %v13346_v43  ;;  %9070 = vset.pattern.permute.xlu1 %v13320_v12 }
 0x224   : > { %v4186_v54 = vmax.f32 %v4122_v24, 0.0  ;;  %1558 = vperm.xlu0 %9103, %v11049_v23   ;;  %3960 = vperm.xlu1 %9070, %v11274_v60  }
 0x225   : > { %2410 = vmatmul.mubr.f32.gmra.mrb[8].mxu1 %v2085_v22  ;;  %v13446_v22 = vld [vmem:[#allocation91_spill] sm:$0xff] }
 0x226   : > { %v3565_v2 = vpop.permute.xlu1 %3564  ;;  %v8388_v45 = vpack.c.bf16 %v4186_v54, %v4185_v42  ;;  %2414 = vmatprep.mubr.f32.mxu1 %v2090_v32  ;;  %v2093_v54 = vld [vmem:[#allocation3 + $0xc0] sm:$0xff] }
 0x227   : > { %v3804_v18 = vmul.f32 %v3565_v2, %v10804_v47  ;;  %v3889_v36 = vpop.permute.xlu0 %3888  ;;  %v2098_v2 = vld [vmem:[#allocation3 + $0xe8] sm:$0xff] }
 0x228   : > { %1570 = vperm.xlu0 %9103, %v11283_v16   ;;  %8389 = vmatpush1.bf16.msra.mxu0 %v8388_v45 }
 0x229   : > { %v4124_v24 = vadd.f32 %v3885_v7, %v3804_v18  ;;  %9071 = vset.pattern.permute.xlu1 %v13311_v59  ;;  %8390 = vmatprep.subr.bf16.mxu0 %v13346_v43  ;;  %v9256_v7 = vld [vmem:[%s13112_s5 + $0xd8] sm:$0xff] }
 0x22a   : > { %3648 = vperm.xlu1 %9071, %v13446_v22   ;;  %2415 = vmatmul.mubr.f32.gmra.mrb[10].mxu1 %v2089_v33  ;;  %v2097_v33 = vld [vmem:[#allocation3 + $0xe0] sm:$0xff] }
 0x22b   : > { %v3881_v32 = vpop.permute.xlu1 %3880  ;;  %v11289_v42 = vpop.permute.xlu0 %3900  ;;  %2419 = vmatprep.mubr.f32.mxu1 %v2094_v4  ;;  %v4188_v34 = vmax.f32 %v4124_v24, 0.0  ;;  %v2102_v4 = vld [vmem:[#allocation3 + $0x108] sm:$0xff] }
 0x22c   : > { %v4123_v14 = vadd.f32 %v3881_v32, %v3803_v51  ;;  %1574 = vperm.xlu0 %9103, %v11077_v28   ;;  %v11300_v51 = vld [vmem:[%s13112_s5 + $0x1b8] sm:$0xff] }
 0x22e   : > { %v4187_v45 = vmax.f32 %v4123_v14, 0.0  ;;  %3652 = vperm.xlu1 %9071, %v9256_v7   ;;  %2420 = vmatmul.mubr.f32.gmra.mrb[12].mxu1 %v2093_v54  ;;  %v2101_v14 = vld [vmem:[#allocation3 + $0x100] sm:$0xff]  ;;  %v2106_v54 = vld [vmem:[#allocation3 + $0x128] sm:$0xff] }
 0x22f   : > { %v11295_v47 = vpop.permute.xlu0 %3904  ;;  %2424 = vmatprep.mubr.f32.mxu1 %v2098_v2 }
 0x230   : > { %v8391_v18 = vpack.c.bf16 %v4188_v34, %v4187_v45  ;;  %v3569_v22 = vpop.permute.xlu1 %3568  ;;  %1586 = vperm.xlu0 %9103, %v11300_v51  }
 0x231   : > { %v3805_v34 = vmul.f32 %v3569_v22, %v10832_v29 }
 0x232   : > { %8392 = vmatpush1.bf16.msra.mxu0 %v8391_v18  ;;  %9072 = vset.pattern.permute.xlu1 %v13320_v12 }
 0x233   : > { %8393 = vmatprep.subr.bf16.mxu0 %v13346_v43  ;;  %3972 = vperm.xlu1 %9072, %v9256_v7   ;;  %v11306_v32 = vpop.permute.xlu0 %3916  ;;  %v4125_v2 = vadd.f32 %v3889_v36, %v3805_v34  ;;  %v11316_v7 = vld [vmem:[%s13112_s5 + $0x1d8] sm:$0xff]  ;;  %v2110_v36 = vld [vmem:[#allocation3 + $0x148] sm:$0xff] }
 0x234   : > { %v3573_v24 = vpop.permute.xlu1 %3572  ;;  %2425 = vmatmul.mubr.f32.gmra.mrb[14].mxu1 %v2097_v33  ;;  %1590 = vperm.xlu0 %9103, %v11113_v35   ;;  %v2105_v33 = vld [vmem:[#allocation3 + $0x120] sm:$0xff] }
 0x235   : > { %2429 = vmatprep.mubr.f32.mxu1 %v2102_v4  ;;  %v3806_v45 = vmul.f32 %v3573_v24, %v10826_v62  ;;  %v4189_v34 = vmax.f32 %v4125_v2, 0.0 }
 0x237   : > { %9074 = vset.pattern.permute.xlu1 %v13311_v59  ;;  %v11311_v18 = vpop.permute.xlu0 %3920 }
 0x238   : > { %2430 = vmatmul.mubr.f32.gmra.mrb[16].mxu1 %v2101_v14  ;;  %1602 = vperm.xlu0 %9103, %v11316_v7   ;;  %v2109_v14 = vld [vmem:[#allocation3 + $0x140] sm:$0xff] }
 0x239   : > { %3660 = vperm.xlu1 %9074, %v10837_v30   ;;  %v3893_v22 = vpop.permute.xlu1 %3892  ;;  %2434 = vmatprep.mubr.f32.mxu1 %v2106_v54  ;;  %v11327_v30 = vld [vmem:[%s13112_s5 + $0xe0] sm:$0xff] }
 0x23a   : > { %v4126_v4 = vadd.f32 %v3893_v22, %v3806_v45  ;;  %v2114_v45 = vld [vmem:[#allocation3 + $0x168] sm:$0xff]  ;;  %v3807_v22 = vmul.f32 %v11160_v5, %v10842_v53 }
 0x23b   : > { %v11320_v62 = vpop.permute.xlu0 %3932 }
 0x23c   : > { %v4190_v24 = vmax.f32 %v4126_v4, 0.0  ;;  %2435 = vmatmul.mubr.f32.gmra.mrb[18].mxu1 %v2105_v33  ;;  %1606 = vperm.xlu0 %9103, %v11142_v13   ;;  %v9260_v4 = vld [vmem:[%s13112_s5 + $0x1f8] sm:$0xff] }
 0x23d   : > { %9075 = vset.pattern.permute.xlu1 %v13320_v12  ;;  %2439 = vmatprep.mubr.f32.mxu1 %v2110_v36 }
 0x23e   : > { %v8394_v29 = vpack.c.bf16 %v4190_v24, %v4189_v34  ;;  %3976 = vperm.xlu1 %9075, %v11327_v30   ;;  %v3581_v54 = vpop.permute.xlu1 %3580  ;;  %v2113_v34 = vld [vmem:[#allocation3 + $0x160] sm:$0xff]  ;;  %v2118_v24 = vld [vmem:[#allocation3 + $0x188] sm:$0xff] }
 0x23f   : > { %v3808_v2 = vmul.f32 %v3581_v54, %v10856_v20  ;;  %v11333_v33 = vpop.permute.xlu0 %3936 }
 0x240   : > { %8395 = vmatpush1.bf16.msra.mxu0 %v8394_v29  ;;  %2440 = vmatmul.mubr.f32.gmra.mrb[20].mxu1 %v2109_v14  ;;  %v2117_v14 = vld [vmem:[#allocation3 + $0x180] sm:$0xff] }
 0x241   : > { %1618 = vperm.xlu0 %9103, %v9260_v4   ;;  %8396 = vmatprep.subr.bf16.mxu0 %v13346_v43  ;;  %v4128_v36 = vadd.f32 %v11289_v42, %v3808_v2  ;;  %v2122_v42 = vld [vmem:[#allocation3 + $0x1a8] sm:$0xff]  ;;  %v9261_v2 = vld [vmem:[%s13112_s5 + $0xf8] sm:$0xff] }
 0x242   : > { %9076 = vset.pattern.permute.xlu1 %v13311_v59  ;;  %2444 = vmatprep.mubr.f32.mxu1 %v2114_v45 }
 0x243   : > { %3664 = vperm.xlu1 %9076, %v10863_v56   ;;  %v3897_v5 = vpop.permute.xlu1 %3896  ;;  %v11342_v29 = vpop.permute.xlu0 %3948  ;;  %v4192_v4 = vmax.f32 %v4128_v36, 0.0  ;;  %v9262_v36 = vld [vmem:[%s13112_s5 + $0x120] sm:$0xff] }
 0x244   : > { %v4127_v54 = vadd.f32 %v3897_v5, %v3807_v22  ;;  %2445 = vmatmul.mubr.f32.gmra.mrb[22].mxu1 %v2113_v34  ;;  %v2121_v34 = vld [vmem:[#allocation3 + $0x1a0] sm:$0xff] }
 0x245   : > { %9107 = vset.pattern.permute.xlu0 %v13311_v59  ;;  %2449 = vmatprep.mubr.f32.mxu1 %v2118_v24 }
 0x246   : > { %v4191_v53 = vmax.f32 %v4127_v54, 0.0  ;;  %3672 = vperm.xlu0 %9107, %v10907_v38   ;;  %v2126_v38 = vld [vmem:[#allocation3 + $0x1c8] sm:$0xff]  ;;  %v2125_v54 = vld [vmem:[#allocation3 + $0x1c0] sm:$0xff] }
 0x247   : > { %3668 = vperm.xlu1 %9076, %v9261_v2   ;;  %v11349_v22 = vpop.permute.xlu0 %3952 }
 0x248   : > { %v8397_v56 = vpack.c.bf16 %v4192_v4, %v4191_v53  ;;  %v3585_v45 = vpop.permute.xlu1 %3584  ;;  %2450 = vmatmul.mubr.f32.gmra.mrb[24].mxu1 %v2117_v14  ;;  %v2130_v14 = vld [vmem:[#allocation3 + $0x1e8] sm:$0xff] }
 0x249   : > { %2454 = vmatprep.mubr.f32.mxu1 %v2122_v42  ;;  %v3809_v5 = vmul.f32 %v3585_v45, %v10875_v21 }
 0x24a   : > { %3688 = vperm.xlu0 %9107, %v9262_v36   ;;  %8398 = vmatpush1.bf16.msra.mxu0 %v8397_v56  ;;  %v2129_v56 = vld [vmem:[#allocation3 + $0x1e0] sm:$0xff] }
 0x24b   : > { %9077 = vset.pattern.permute.xlu1 %v13320_v12  ;;  %8399 = vmatprep.subr.bf16.mxu0 %v13346_v43  ;;  %v11356_v53 = vpop.permute.xlu0 %3964  ;;  %v4129_v42 = vadd.f32 %v11295_v47, %v3809_v5  ;;  %v9263_v47 = vld [vmem:[%s13112_s5 + $0x110] sm:$0xff] }
 0x24c   : > { %3988 = vperm.xlu1 %9077, %v9261_v2   ;;  %v3589_v24 = vpop.permute.xlu1 %3588  ;;  %2455 = vmatmul.mubr.f32.gmra.mrb[26].mxu1 %v2121_v34  ;;  %v2134_v34 = vld [vmem:[#allocation3 + $0x208] sm:$0xff] }
 0x24d   : > { %2459 = vmatprep.mubr.f32.mxu1 %v2126_v38  ;;  %v3810_v2 = vmul.f32 %v3589_v24, %v10882_v46  ;;  %v4193_v21 = vmax.f32 %v4129_v42, 0.0  ;;  %v2133_v24 = vld [vmem:[#allocation3 + $0x200] sm:$0xff]  ;;  %v3811_v42 = vmul.f32 %v11183_v31, %v10898_v48  ;;  %v9264_v31 = vld [vmem:[%s13112_s5 + $0x130] sm:$0xff] }
 0x24e   : > { %3704 = vperm.xlu0 %9107, %v10987_v9  }
 0x24f   : > { %v11361_v4 = vpop.permute.xlu0 %3968 }
 0x250   : > { %9079 = vset.pattern.permute.xlu1 %v13353_v17  ;;  %2460 = vmatmul.mubr.f32.gmra.mrb[28].mxu1 %v2125_v54 }
 0x251   : > { %1818 = vperm.xlu1 %9079, %v11173_v52   ;;  %2464 = vmatprep.mubr.f32.mxu1 %v2130_v14  ;;  %v3909_v45 = vpop.permute.xlu1 %3908 }
 0x252   : > { %3720 = vperm.xlu0 %9107, %v11017_v10   ;;  %v4130_v38 = vadd.f32 %v3909_v45, %v3810_v2  ;;  %v2138_v2 = vld [vmem:[#allocation3 + $0x228] sm:$0xff] }
 0x253   : > { %v11367_v9 = vpop.permute.xlu0 %3980  ;;  %v2142_v45 = vld [vmem:[#allocation3 + $0x248] sm:$0xff] }
 0x254   : > { %2465 = vmatmul.mubr.f32.gmra.mrb[30].mxu1 %v2129_v56  ;;  %v4194_v20 = vmax.f32 %v4130_v38, 0.0  ;;  %v2137_v56 = vld [vmem:[#allocation3 + $0x220] sm:$0xff] }
 0x255   : > { %1822 = vperm.xlu1 %9079, %v9263_v47   ;;  %2469 = vmatprep.mubr.f32.mxu1 %v2134_v34  ;;  %v2141_v34 = vld [vmem:[#allocation3 + $0x240] sm:$0xff] }
 0x256   : > { %3736 = vperm.xlu0 %9107, %v11049_v23   ;;  %v8400_v5 = vpack.c.bf16 %v4194_v20, %v4193_v21  ;;  %v3597_v54 = vpop.permute.xlu1 %3596 }
 0x257   : > { %v3812_v10 = vmul.f32 %v3597_v54, %v10913_v11  ;;  %v11374_v14 = vpop.permute.xlu0 %3984  ;;  %v2145_v54 = vld [vmem:[#allocation3 + $0x260] sm:$0xff] }
 0x258   : > { %2470 = vmatmul.mubr.f32.gmra.mrb[32].mxu1 %v2133_v24  ;;  %8401 = vmatpush1.bf16.msra.mxu0 %v8400_v5 }
 0x259   : > { %1830 = vperm.xlu1 %9079, %v9262_v36   ;;  %8402 = vmatprep.subr.bf16.mxu0 %v13346_v43  ;;  %v4132_v20 = vadd.f32 %v11306_v32, %v3812_v10  ;;  %v2146_v36 = vld [vmem:[#allocation3 + $0x268] sm:$0xff] }
 0x25a   : > { %3752 = vperm.xlu0 %9107, %v11077_v28   ;;  %2474 = vmatprep.mubr.f32.mxu1 %v2138_v2  ;;  %v2150_v10 = vld [vmem:[#allocation3 + $0x288] sm:$0xff] }
 0x25b   : > { %v3913_v21 = vpop.permute.xlu1 %3912  ;;  %v4196_v38 = vmax.f32 %v4132_v20, 0.0  ;;  %v2153_v20 = vld [vmem:[#allocation3 + $0x2a0] sm:$0xff] }
 0x25c   : > { %2475 = vmatmul.mubr.f32.gmra.mrb[34].mxu1 %v2137_v56  ;;  %v4131_v23 = vadd.f32 %v3913_v21, %v3811_v42  ;;  %v11386_v28 = vpop.permute.xlu0 %1814  ;;  %v2149_v42 = vld [vmem:[#allocation3 + $0x280] sm:$0xff] }
 0x25d   : > { %9080 = vset.pattern.permute.xlu1 %v13423_v26  ;;  %2479 = vmatprep.mubr.f32.mxu1 %v2142_v45 }
 0x25e   : > { %3768 = vperm.xlu0 %9107, %v11113_v35   ;;  %1518 = vperm.xlu1 %9080, %v9264_v31   ;;  %v4195_v32 = vmax.f32 %v4131_v23, 0.0 }
 0x260   : > { %2480 = vmatmul.mubr.f32.gmra.mrb[36].mxu1 %v2141_v34  ;;  %v8403_v24 = vpack.c.bf16 %v4196_v38, %v4195_v32  ;;  %v3601_v5 = vpop.permute.xlu1 %3600  ;;  %v2158_v34 = vld [vmem:[#allocation3 + $0x2c8] sm:$0xff] }
 0x261   : > { %2484 = vmatprep.mubr.f32.mxu1 %v2146_v36  ;;  %v11390_v35 = vpop.permute.xlu0 %1826  ;;  %v3813_v56 = vmul.f32 %v3601_v5, %v10928_v8  ;;  %v2162_v5 = vld [vmem:[#allocation3 + $0x2e8] sm:$0xff] }
 0x262   : > { %3784 = vperm.xlu0 %9107, %v11142_v13   ;;  %9081 = vset.pattern.permute.xlu1 %v13353_v17  ;;  %v2154_v13 = vld [vmem:[#allocation3 + $0x2a8] sm:$0xff] }
 0x263   : > { %1838 = vperm.xlu1 %9081, %v9264_v31   ;;  %8404 = vmatpush1.bf16.msra.mxu0 %v8403_v24  ;;  %v4133_v21 = vadd.f32 %v11311_v18, %v3813_v56  ;;  %v2166_v56 = vld [vmem:[#allocation3 + $0x308] sm:$0xff] }
 0x264   : > { %8405 = vmatprep.subr.bf16.mxu0 %v13346_v43  ;;  %2485 = vmatmul.mubr.f32.gmra.mrb[38].mxu1 %v2145_v54  ;;  %v3605_v2 = vpop.permute.xlu1 %3604  ;;  %v4308_v8 = vld [vmem:[#allocation5 + $0x1e8] sm:$0xff] }
 0x265   : > { %2489 = vmatprep.mubr.f32.mxu1 %v2150_v10  ;;  %v11395_v45 = vpop.permute.xlu0 %1834  ;;  %v3814_v23 = vmul.f32 %v3605_v2, %v10942_v41  ;;  %v4197_v24 = vmax.f32 %v4133_v21, 0.0  ;;  %v2165_v21 = vld [vmem:[#allocation3 + $0x300] sm:$0xff] }
 0x266   : > { %9136 = vset.pattern.permute.xlu0 %v13320_v12 }
 0x267   : > { %3996 = vperm.xlu0 %9136, %v11173_v52   ;;  %1842 = vperm.xlu1 %9081, %v11217_v37   ;;  %v9265_v52 = vld [vmem:[%s13112_s5 + $0x148] sm:$0xff]  ;;  %v2157_v37 = vld [vmem:[#allocation3 + $0x2c0] sm:$0xff] }
 0x268   : > { %2490 = vmatmul.mubr.f32.gmra.mrb[40].mxu1 %v2149_v42  ;;  %v2161_v42 = vld [vmem:[#allocation3 + $0x2e0] sm:$0xff] }
 0x269   : > { %2494 = vmatprep.mubr.f32.mxu1 %v2154_v13  ;;  %v3925_v36 = vpop.permute.xlu1 %3924  ;;  %v11402_v38 = vpop.permute.xlu0 %1846 }
 0x26a   : > { %v4134_v32 = vadd.f32 %v3925_v36, %v3814_v23 }
 0x26b   : > { %4000 = vperm.xlu0 %9136, %v9263_v47   ;;  %9082 = vset.pattern.permute.xlu1 %v13423_v26 }
 0x26c   : > { %1530 = vperm.xlu1 %9082, %v9265_v52   ;;  %2495 = vmatmul.mubr.f32.gmra.mrb[42].mxu1 %v2153_v20  ;;  %v4198_v18 = vmax.f32 %v4134_v32, 0.0 }
 0x26d   : > { %2499 = vmatprep.mubr.f32.mxu1 %v2158_v34  ;;  %v11409_v10 = vpop.permute.xlu0 %1862  ;;  %v9266_v34 = vld [vmem:[%s13112_s5 + $0x150] sm:$0xff] }
 0x26e   : > { %v8406_v47 = vpack.c.bf16 %v4198_v18, %v4197_v24  ;;  %v3613_v54 = vpop.permute.xlu1 %3612  ;;  %v2174_v18 = vld [vmem:[#allocation3 + $0x348] sm:$0xff] }
 0x26f   : > { %4012 = vperm.xlu0 %9136, %v10962_v25   ;;  %v3816_v2 = vmul.f32 %v3613_v54, %v10967_v44  ;;  %v3815_v25 = vmul.f32 %v11196_v55, %v10974_v40 }
 0x270   : > { %9083 = vset.pattern.permute.xlu1 %v13353_v17  ;;  %2500 = vmatmul.mubr.f32.gmra.mrb[44].mxu1 %v2157_v37 }
 0x271   : > { %1850 = vperm.xlu1 %9083, %v9265_v52   ;;  %2504 = vmatprep.mubr.f32.mxu1 %v2162_v5  ;;  %v4136_v13 = vadd.f32 %v11320_v62, %v3816_v2  ;;  %v11420_v36 = vpop.permute.xlu0 %1878  ;;  %v2169_v62 = vld [vmem:[#allocation3 + $0x320] sm:$0xff]  ;;  %v2178_v2 = vld [vmem:[#allocation3 + $0x368] sm:$0xff] }
 0x272   : > { %8407 = vmatpush1.bf16.msra.mxu0 %v8406_v47 }
 0x273   : > { %4016 = vperm.xlu0 %9136, %v9264_v31   ;;  %8408 = vmatprep.subr.bf16.mxu0 %v13346_v43  ;;  %v3929_v20 = vpop.permute.xlu1 %3928  ;;  %v2170_v31 = vld [vmem:[#allocation3 + $0x328] sm:$0xff]  ;;  %v4200_v32 = vmax.f32 %v4136_v13, 0.0 }
 0x274   : > { %2505 = vmatmul.mubr.f32.gmra.mrb[46].mxu1 %v2161_v42  ;;  %v4135_v23 = vadd.f32 %v3929_v20, %v3815_v25  ;;  %v9267_v42 = vld [vmem:[%s13112_s5 + $0x168] sm:$0xff] }
 0x275   : > { %9084 = vset.pattern.permute.xlu1 %v13423_v26  ;;  %2509 = vmatprep.mubr.f32.mxu1 %v2166_v56  ;;  %v11423_v5 = vpop.permute.xlu0 %1894  ;;  %v2177_v56 = vld [vmem:[#allocation3 + $0x360] sm:$0xff]  ;;  %v2182_v20 = vld [vmem:[#allocation3 + $0x388] sm:$0xff] }
 0x276   : > { %1534 = vperm.xlu1 %9084, %v9266_v34   ;;  %v4199_v55 = vmax.f32 %v4135_v23, 0.0  ;;  %v9268_v23 = vld [vmem:[%s13112_s5 + $0x170] sm:$0xff] }
 0x277   : > { %4028 = vperm.xlu0 %9136, %v9265_v52   ;;  %v2173_v52 = vld [vmem:[#allocation3 + $0x340] sm:$0xff] }
 0x278   : > { %2510 = vmatmul.mubr.f32.gmra.mrb[48].mxu1 %v2165_v21  ;;  %v8409_v37 = vpack.c.bf16 %v4200_v32, %v4199_v55  ;;  %v3617_v24 = vpop.permute.xlu1 %3616  ;;  %v2186_v55 = vld [vmem:[#allocation3 + $0x3a8] sm:$0xff] }
 0x279   : > { %2514 = vmatprep.mubr.f32.mxu1 %v2170_v31  ;;  %v3817_v47 = vmul.f32 %v3617_v24, %v10999_v61  ;;  %v11433_v21 = vpop.permute.xlu0 %1910  ;;  %v4296_v61 = vld [vmem:[#allocation5 + $0x188] sm:$0xff] }
 0x27a   : > { %9085 = vset.pattern.permute.xlu1 %v13353_v17  ;;  %8410 = vmatpush1.bf16.msra.mxu0 %v8409_v37 }
 0x27b   : > { %4032 = vperm.xlu0 %9136, %v9266_v34   ;;  %1854 = vperm.xlu1 %9085, %v9266_v34   ;;  %v4137_v25 = vadd.f32 %v11333_v33, %v3817_v47  ;;  %v2185_v47 = vld [vmem:[#allocation3 + $0x3a0] sm:$0xff] }
 0x27c   : > { %2515 = vmatmul.mubr.f32.gmra.mrb[50].mxu1 %v2169_v62  ;;  %8411 = vmatprep.subr.bf16.mxu0 %v13346_v43  ;;  %v3621_v54 = vpop.permute.xlu1 %3620  ;;  %v11442_v62 = vld [vmem:[%s13112_s5 + $0x188] sm:$0xff] }
 0x27d   : > { %2519 = vmatprep.mubr.f32.mxu1 %v2174_v18  ;;  %v3818_v13 = vmul.f32 %v3621_v54, %v10995_v3  ;;  %v4201_v32 = vmax.f32 %v4137_v25, 0.0  ;;  %v11446_v18 = vpop.permute.xlu0 %1926  ;;  %v2190_v54 = vld [vmem:[#allocation3 + $0x3c8] sm:$0xff]  ;;  %v13496_v3 = vmov 5  }
 0x27f   : > { %4044 = vperm.xlu0 %9136, %v9267_v42   ;;  %1858 = vperm.xlu1 %9085, %v11244_v39   ;;  %v2181_v39 = vld [vmem:[#allocation3 + $0x380] sm:$0xff] }
 0x280   : > { %2520 = vmatmul.mubr.f32.gmra.mrb[52].mxu1 %v2173_v52 }
 0x281   : > { %2524 = vmatprep.mubr.f32.mxu1 %v2178_v2  ;;  %v3941_v34 = vpop.permute.xlu1 %3940  ;;  %v11452_v2 = vld [vmem:[%s13112_s5 + $0x190] sm:$0xff] }
 0x282   : > { %v4138_v31 = vadd.f32 %v3941_v34, %v3818_v13 }
 0x283   : > { %4048 = vperm.xlu0 %9136, %v9268_v23   ;;  %9086 = vset.pattern.permute.xlu1 %v13423_v26 }
 0x284   : > { %1546 = vperm.xlu1 %9086, %v9267_v42   ;;  %2525 = vmatmul.mubr.f32.gmra.mrb[54].mxu1 %v2177_v56  ;;  %v4202_v33 = vmax.f32 %v4138_v31, 0.0  ;;  %v13447_v56 = vld [vmem:[#allocation81_spill] sm:$0xff]  ;;  %v2194_v31 = vld [vmem:[#allocation3 + $0x3e8] sm:$0xff] }
 0x285   : > { %2529 = vmatprep.mubr.f32.mxu1 %v2182_v20  ;;  %v3819_v25 = vmul.f32 %v11211_v57, %v13447_v56  ;;  %v2189_v20 = vld [vmem:[#allocation3 + $0x3c0] sm:$0xff] }
 0x286   : > { %v8412_v37 = vpack.c.bf16 %v4202_v33, %v4201_v32  ;;  %v3629_v24 = vpop.permute.xlu1 %3628  ;;  %v11465_v32 = vld [vmem:[%s13112_s5 + $0x1a8] sm:$0xff]  ;;  %v2193_v33 = vld [vmem:[#allocation3 + $0x3e0] sm:$0xff] }
 0x287   : > { %4060 = vperm.xlu0 %9136, %v11442_v62   ;;  %v3820_v52 = vmul.f32 %v3629_v24, %v11024_v58  ;;  %v2198_v24 = vld [vmem:[#allocation3 + $0x408] sm:$0xff] }
 0x288   : > { %9087 = vset.pattern.permute.xlu1 %v13353_v17  ;;  %2530 = vmatmul.mubr.f32.gmra.mrb[56].mxu1 %v2181_v39  ;;  %v11460_v39 = vpop.permute.xlu0 %1498 }
 0x289   : > { %1866 = vperm.xlu1 %9087, %v9267_v42   ;;  %2534 = vmatprep.mubr.f32.mxu1 %v2186_v55  ;;  %v4140_v13 = vadd.f32 %v11342_v29, %v3820_v52  ;;  %v11472_v52 = vld [vmem:[%s13112_s5 + $0x1b0] sm:$0xff] }
 0x28a   : > { %8413 = vmatpush1.bf16.msra.mxu0 %v8412_v37 }
 0x28b   : > { %4064 = vperm.xlu0 %9136, %v11452_v2   ;;  %8414 = vmatprep.subr.bf16.mxu0 %v13346_v43  ;;  %v3945_v42 = vpop.permute.xlu1 %3944  ;;  %v4204_v57 = vmax.f32 %v4140_v13, 0.0 }
 0x28c   : > { %2535 = vmatmul.mubr.f32.gmra.mrb[58].mxu1 %v2185_v47  ;;  %v4139_v34 = vadd.f32 %v3945_v42, %v3819_v25  ;;  %v11475_v47 = vpop.permute.xlu0 %1506  ;;  %v13448_v25 = vld [vmem:[#allocation15_spill] sm:$0xff] }
 0x28d   : > { %9088 = vset.pattern.permute.xlu1 %v13423_v26  ;;  %2539 = vmatprep.mubr.f32.mxu1 %v2190_v54  ;;  %v2197_v54 = vld [vmem:[#allocation3 + $0x400] sm:$0xff] }
 0x28e   : > { %1550 = vperm.xlu1 %9088, %v9268_v23   ;;  %v4203_v29 = vmax.f32 %v4139_v34, 0.0  ;;  %v11482_v34 = vld [vmem:[%s13112_s5 + $0x1c8] sm:$0xff] }
 0x28f   : > { %4076 = vperm.xlu0 %9136, %v11465_v32  }
 0x290   : > { %2540 = vmatmul.mubr.f32.gmra.mrb[60].mxu1 %v2189_v20  ;;  %v8415_v55 = vpack.c.bf16 %v4204_v57, %v4203_v29  ;;  %v3633_v37 = vpop.permute.xlu1 %3632  ;;  %v2202_v20 = vld [vmem:[#allocation3 + $0x428] sm:$0xff] }
 0x291   : > { %2544 = vmatprep.mubr.f32.mxu1 %v2194_v31  ;;  %v3821_v13 = vmul.f32 %v3633_v37, %v13448_v25  ;;  %v2206_v29 = vld [vmem:[#allocation3 + $0x448] sm:$0xff]  ;;  %v13175_v25 = vmov 5  }
 0x292   : > { %9089 = vset.pattern.permute.xlu1 %v13353_v17  ;;  %8416 = vmatpush1.bf16.msra.mxu0 %v8415_v55  ;;  %v11493_v55 = vld [vmem:[%s13112_s5 + $0x1d0] sm:$0xff] }
 0x293   : > { %4080 = vperm.xlu0 %9136, %v11472_v52   ;;  %1870 = vperm.xlu1 %9089, %v9268_v23   ;;  %v2201_v23 = vld [vmem:[#allocation3 + $0x420] sm:$0xff]  ;;  %v4141_v31 = vadd.f32 %v11349_v22, %v3821_v13  ;;  %v2210_v13 = vld [vmem:[#allocation3 + $0x468] sm:$0xff] }
 0x294   : > { %2545 = vmatmul.mubr.f32.gmra.mrb[62].mxu1 %v2193_v33  ;;  %8417 = vmatprep.subr.bf16.mxu0 %v13346_v43  ;;  %v3637_v42 = vpop.permute.xlu1 %3636  ;;  %v11488_v33 = vpop.permute.xlu0 %1514  ;;  %v2205_v22 = vld [vmem:[#allocation3 + $0x440] sm:$0xff] }
 0x295   : > { %2549 = vmatprep.mubr.f32.mxu1 %v2198_v24  ;;  %v3822_v57 = vmul.f32 %v3637_v42, %v11054_v63  ;;  %v4205_v24 = vmax.f32 %v4141_v31, 0.0  ;;  %v11501_v42 = vld [vmem:[%s13112_s5 + $0x1e8] sm:$0xff]  ;;  %v2209_v31 = vld [vmem:[#allocation3 + $0x460] sm:$0xff] }
 0x297   : > { %4092 = vperm.xlu0 %9136, %v11482_v34   ;;  %1874 = vperm.xlu1 %9089, %v11264_v15  }
 0x298   : > { %2550 = vmatmul.mubr.f32.gmra.mrb[64].mxu1 %v2197_v54 }
 0x299   : > { %2554 = vmatprep.mubr.f32.mxu1 %v2202_v20  ;;  %v3957_v15 = vpop.permute.xlu1 %3956 }
 0x29a   : > { %v4142_v37 = vadd.f32 %v3957_v15, %v3822_v57  ;;  %v11505_v57 = vpop.permute.xlu0 %1522  ;;  %v2214_v15 = vld [vmem:[#allocation3 + $0x488] sm:$0xff] }
 0x29b   : > { %4096 = vperm.xlu0 %9136, %v11493_v55   ;;  %9090 = vset.pattern.permute.xlu1 %v13423_v26 }
 0x29c   : > { %1562 = vperm.xlu1 %9090, %v11442_v62   ;;  %2555 = vmatmul.mubr.f32.gmra.mrb[66].mxu1 %v2201_v23  ;;  %v4206_v54 = vmax.f32 %v4142_v37, 0.0  ;;  %v13449_v23 = vld [vmem:[#allocation17_spill] sm:$0xff]  ;;  %v11512_v37 = vld [vmem:[%s13112_s5 + $0x1f0] sm:$0xff] }
 0x29d   : > { %2559 = vmatprep.mubr.f32.mxu1 %v2206_v29 }
 0x29e   : > { %v8418_v20 = vpack.c.bf16 %v4206_v54, %v4205_v24  ;;  %v3645_v63 = vpop.permute.xlu1 %3644  ;;  %v2213_v54 = vld [vmem:[#allocation3 + $0x480] sm:$0xff] }
 0x29f   : > { %4108 = vperm.xlu0 %9136, %v11501_v42   ;;  %v3824_v29 = vmul.f32 %v3645_v63, %v13449_v23  ;;  %v11521_v23 = vpop.permute.xlu0 %1526 }
 0x2a0   : > { %9091 = vset.pattern.permute.xlu1 %v13353_v17  ;;  %2560 = vmatmul.mubr.f32.gmra.mrb[68].mxu1 %v2205_v22  ;;  %v13450_v22 = vld [vmem:[#allocation18_spill] sm:$0xff] }
 0x2a1   : > { %1882 = vperm.xlu1 %9091, %v11442_v62   ;;  %2564 = vmatprep.mubr.f32.mxu1 %v2210_v13  ;;  %v3823_v24 = vmul.f32 %v11226_v49, %v13450_v22  ;;  %v4144_v63 = vadd.f32 %v11356_v53, %v3824_v29  ;;  %v9277_v49 = vld [vmem:[%s13112_s5] sm:$0xff] }
 0x2a2   : > { %8419 = vmatpush1.bf16.msra.mxu0 %v8418_v20  ;;  %v2218_v20 = vld [vmem:[#allocation3 + $0x4a8] sm:$0xff] }
 0x2a3   : > { %4112 = vperm.xlu0 %9136, %v11512_v37   ;;  %8420 = vmatprep.subr.bf16.mxu0 %v13346_v43  ;;  %v3961_v62 = vpop.permute.xlu1 %3960  ;;  %v4208_v56 = vmax.f32 %v4144_v63, 0.0  ;;  %v11532_v63 = vpop.permute.xlu0 %1538 }
 0x2a4   : > { %2565 = vmatmul.mubr.f32.gmra.mrb[70].mxu1 %v2209_v31  ;;  %v4143_v13 = vadd.f32 %v3961_v62, %v3823_v24  ;;  %v2217_v31 = vld [vmem:[#allocation3 + $0x4a0] sm:$0xff]  ;;  %v13451_v62 = vld [vmem:[#allocation87_spill] sm:$0xff] }
 0x2a5   : > { %9092 = vset.pattern.permute.xlu1 %v13423_v26  ;;  %2569 = vmatprep.mubr.f32.mxu1 %v2214_v15  ;;  %v2222_v15 = vld [vmem:[#allocation3 + $0x4c8] sm:$0xff]  ;;  %v9278_v24 = vld [vmem:[%s13112_s5 + $0x20] sm:$0xff] }
 0x2a6   : > { %1566 = vperm.xlu1 %9092, %v11452_v2   ;;  %v4207_v58 = vmax.f32 %v4143_v13, 0.0  ;;  %v9279_v13 = vld [vmem:[%s13112_s5 + $0x40] sm:$0xff] }
 0x2a7   : > { %9141 = vset.pattern.permute.xlu0 %v13175_v25 }
 0x2a8   : > { %5498 = vperm.xlu0 %9141, %v9277_v49   ;;  %2570 = vmatmul.mubr.f32.gmra.mrb[72].mxu1 %v2213_v54  ;;  %v8421_v53 = vpack.c.bf16 %v4208_v56, %v4207_v58  ;;  %v2221_v54 = vld [vmem:[#allocation3 + $0x4c0] sm:$0xff] }
 0x2a9   : > { %2574 = vmatprep.mubr.f32.mxu1 %v2218_v20  ;;  %v3649_v29 = vpop.permute.xlu1 %3648 }
 0x2aa   : > { %9093 = vset.pattern.permute.xlu1 %v13353_v17  ;;  %8422 = vmatpush1.bf16.msra.mxu0 %v8421_v53  ;;  %v3825_v58 = vmul.f32 %v3649_v29, %v13451_v62  ;;  %v2225_v53 = vld [vmem:[#allocation3 + $0x4e0] sm:$0xff]  ;;  %v13469_v62 = vld [vmem:[#allocation31_spill] sm:$0xff] }
 0x2ab   : > { %1886 = vperm.xlu1 %9093, %v11452_v2   ;;  %8423 = vmatprep.subr.bf16.mxu0 %v13346_v43  ;;  %v2226_v2 = vld [vmem:[#allocation3 + $0x4e8] sm:$0xff] }
 0x2ac   : > { %5514 = vperm.xlu0 %9141, %v9278_v24   ;;  %2575 = vmatmul.mubr.f32.gmra.mrb[74].mxu1 %v2217_v31  ;;  %v4145_v20 = vadd.f32 %v11361_v4, %v3825_v58  ;;  %v11542_v31 = vpop.permute.xlu0 %1542  ;;  %v9280_v24 = vld [vmem:[%s13112_s5 + $0x60] sm:$0xff] }
 0x2ad   : > { %v3653_v56 = vpop.permute.xlu1 %3652  ;;  %2579 = vmatprep.mubr.f32.mxu1 %v2222_v15  ;;  %v2230_v15 = vld [vmem:[#allocation3 + $0x508] sm:$0xff] }
 0x2ae   : > { %v3826_v49 = vmul.f32 %v3653_v56, %v11108_v50  ;;  %v4209_v4 = vmax.f32 %v4145_v20, 0.0  ;;  %v2229_v56 = vld [vmem:[#allocation3 + $0x500] sm:$0xff] }
 0x2af   : > { %1890 = vperm.xlu1 %9093, %v11283_v16   ;;  %v2233_v20 = vld [vmem:[#allocation3 + $0x520] sm:$0xff] }
 0x2b0   : > { %5530 = vperm.xlu0 %9141, %v9279_v13   ;;  %2580 = vmatmul.mubr.f32.gmra.mrb[76].mxu1 %v2221_v54  ;;  %v2234_v54 = vld [vmem:[#allocation3 + $0x528] sm:$0xff]  ;;  %v9281_v13 = vld [vmem:[%s13112_s5 + $0x80] sm:$0xff] }
 0x2b1   : > { %2584 = vmatprep.mubr.f32.mxu1 %v2226_v2 }
 0x2b2   : > { %v3973_v29 = vpop.permute.xlu1 %3972 }
 0x2b3   : > { %9094 = vset.pattern.permute.xlu1 %v13423_v26  ;;  %v4146_v16 = vadd.f32 %v3973_v29, %v3826_v49  ;;  %v11553_v29 = vpop.permute.xlu0 %1554 }
 0x2b4   : > { %5546 = vperm.xlu0 %9141, %v9280_v24   ;;  %1578 = vperm.xlu1 %9094, %v11465_v32  }
 0x2b5   : > { %2585 = vmatmul.mubr.f32.gmra.mrb[78].mxu1 %v2225_v53  ;;  %v4210_v58 = vmax.f32 %v4146_v16, 0.0  ;;  %v2238_v53 = vld [vmem:[#allocation3 + $0x548] sm:$0xff]  ;;  %v13453_v16 = vld [vmem:[#allocation111_spill] sm:$0xff] }
 0x2b6   : > { %2589 = vmatprep.mubr.f32.mxu1 %v2230_v15  ;;  %v13452_v15 = vld [vmem:[#allocation19_spill] sm:$0xff] }
 0x2b7   : > { %v8424_v2 = vpack.c.bf16 %v4210_v58, %v4209_v4  ;;  %v3827_v4 = vmul.f32 %v13453_v16, %v13452_v15  ;;  %v4248_v16 = vld [vmem:[#allocation5 + $0x8] sm:$0xff] }
 0x2b8   : > { %5562 = vperm.xlu0 %9141, %v9281_v13   ;;  %9095 = vset.pattern.permute.xlu1 %v13353_v17  ;;  %v3661_v49 = vpop.permute.xlu1 %3660  ;;  %v13454_v13 = vld [vmem:[#allocation72_spill] sm:$0xff] }
 0x2b9   : > { %v3828_v24 = vmul.f32 %v3661_v49, %v11137_v6  ;;  %1898 = vperm.xlu1 %9095, %v11465_v32   ;;  %2590 = vmatmul.mubr.f32.gmra.mrb[80].mxu1 %v2229_v56  ;;  %v2237_v32 = vld [vmem:[#allocation3 + $0x540] sm:$0xff]  ;;  %v11564_v56 = vpop.permute.xlu0 %1558 }
 0x2ba   : > { %8425 = vmatpush1.bf16.msra.mxu0 %v8424_v2  ;;  %2594 = vmatprep.mubr.f32.mxu1 %v2234_v54  ;;  %v2242_v54 = vld [vmem:[#allocation3 + $0x568] sm:$0xff] }
 0x2bb   : > { %8426 = vmatprep.subr.bf16.mxu0 %v13346_v43  ;;  %v4148_v58 = vadd.f32 %v11367_v9, %v3828_v24  ;;  %4567 = vmatprep.mubr.f32.mxu0 %v4248_v16  ;;  %v13459_v16 = vld [vmem:[#allocation69_spill] sm:$0xff] }
 0x2bc   : > { %5578 = vperm.xlu0 %9141, %v13454_v13   ;;  %v2250_v13 = vld [vmem:[#allocation3 + $0x5a8] sm:$0xff] }
 0x2bd   : > { %9096 = vset.pattern.permute.xlu1 %v13423_v26  ;;  %v3977_v25 = vpop.permute.xlu1 %3976  ;;  %2595 = vmatmul.mubr.f32.gmra.mrb[82].mxu1 %v2233_v20  ;;  %v4212_v2 = vmax.f32 %v4148_v58, 0.0  ;;  %v2246_v20 = vld [vmem:[#allocation3 + $0x588] sm:$0xff] }
 0x2be   : > { %v4147_v49 = vadd.f32 %v3977_v25, %v3827_v4  ;;  %1582 = vperm.xlu1 %9096, %v11472_v52   ;;  %2599 = vmatprep.mubr.f32.mxu1 %v2238_v53  ;;  %v2241_v25 = vld [vmem:[#allocation3 + $0x560] sm:$0xff]  ;;  %v11570_v53 = vpop.permute.xlu0 %1570 }
 0x2c0   : > { %v4211_v6 = vmax.f32 %v4147_v49, 0.0  ;;  %5594 = vperm.xlu0 %9141, %v11274_v60   ;;  %v13455_v60 = vld [vmem:[#allocation68_spill] sm:$0xff]  ;;  %v13179_v49 = vmov 6  }
 0x2c1   : > { %2600 = vmatmul.mubr.f32.gmra.mrb[84].mxu1 %v2237_v32  ;;  %v13457_v32 = vld [vmem:[#allocation102_spill] sm:$0xff] }
 0x2c2   : > { %v8427_v9 = vpack.c.bf16 %v4212_v2, %v4211_v6  ;;  %9097 = vset.pattern.permute.xlu1 %v13353_v17  ;;  %v3665_v24 = vpop.permute.xlu1 %3664  ;;  %2604 = vmatprep.mubr.f32.mxu1 %v2242_v54  ;;  %v2245_v6 = vld [vmem:[#allocation3 + $0x580] sm:$0xff]  ;;  %v9282_v54 = vld [vmem:[%s13112_s5 + $0x8] sm:$0xff] }
 0x2c3   : > { %1902 = vperm.xlu1 %9097, %v11472_v52   ;;  %v3829_v4 = vmul.f32 %v3665_v24, %v13455_v60  ;;  %v13456_v52 = vld [vmem:[#allocation28_spill] sm:$0xff]  ;;  %v11585_v24 = vpop.permute.xlu0 %1574 }
 0x2c4   : > { %5610 = vperm.xlu0 %9141, %v11327_v30   ;;  %8428 = vmatpush1.bf16.msra.mxu0 %v8427_v9  ;;  %v11578_v30 = vadd.f32 %v13457_v32, %v13456_v52  ;;  %v13460_v32 = vld [vmem:[#allocation27_spill] sm:$0xff] }
 0x2c5   : > { %8429 = vmatprep.subr.bf16.mxu0 %v13346_v43  ;;  %2605 = vmatmul.mubr.f32.gmra.mrb[86].mxu1 %v2241_v25  ;;  %v4149_v2 = vadd.f32 %v11374_v14, %v3829_v4  ;;  %v13465_v4 = vld [vmem:[#allocation75_spill] sm:$0xff] }
 0x2c6   : > { %v3669_v58 = vpop.permute.xlu1 %3668  ;;  %2609 = vmatprep.mubr.f32.mxu1 %v2246_v20  ;;  %13458 = vst [vmem:[#allocation86_spill] sm:$0xff] %v11578_v30  ;;  %v2254_v20 = vld [vmem:[#allocation3 + $0x5c8] sm:$0xff] }
 0x2c7   : > { %1906 = vperm.xlu1 %9097, %v11300_v51   ;;  %v3830_v9 = vmul.f32 %v3669_v58, %v13459_v16  ;;  %v2249_v51 = vld [vmem:[#allocation3 + $0x5a0] sm:$0xff]  ;;  %v1653_v58 = vmul.f32 %v13465_v4, %v11578_v30  ;;  %v4213_v15 = vmax.f32 %v4149_v2, 0.0  ;;  %v11616_v2 = vpop.permute.xlu0 %1586 }
 0x2c8   : > { %9170 = vset.pattern.permute.xlu0 %v13179_v49  ;;  %v13461_v49 = vld [vmem:[#allocation100_spill] sm:$0xff]  ;;  %v2253_v4 = vld [vmem:[#allocation3 + $0x5c0] sm:$0xff] }
 0x2c9   : > { %5822 = vperm.xlu0 %9170, %v9282_v54   ;;  %2610 = vmatmul.mubr.f32.gmra.mrb[88].mxu1 %v2245_v6  ;;  %v11591_v60 = vadd.f32 %v13461_v49, %v13460_v32  ;;  %v13462_v6 = vld [vmem:[#allocation29_spill] sm:$0xff]  ;;  %v13463_v54 = vld [vmem:[#allocation104_spill] sm:$0xff]  ;;  %v1973_v32 = vadd.f32 %v11386_v28, %v1653_v58  ;;  %v9284_v28 = vld [vmem:[%s13112_s5 + $0x28] sm:$0xff] }
 0x2ca   : > { %2614 = vmatprep.mubr.f32.mxu1 %v2250_v13  ;;  %v11595_v14 = vadd.f32 %v13463_v54, %v13462_v6  ;;  %v9283_v13 = vld [vmem:[%s13112_s5 + $0x10] sm:$0xff] }
 0x2cb   : > { %9098 = vset.pattern.permute.xlu1 %v13423_v26  ;;  %v3989_v25 = vpop.permute.xlu1 %3988  ;;  %v1654_v6 = vmul.f32 %v11460_v39, %v11591_v60  ;;  %v13472_v39 = vld [vmem:[#allocation32_spill] sm:$0xff] }
 0x2cc   : > { %v4150_v52 = vadd.f32 %v3989_v25, %v3830_v9  ;;  %1594 = vperm.xlu1 %9098, %v11482_v34   ;;  %13464 = vst [vmem:[#allocation91_spill] sm:$0xff] %v11595_v14  ;;  %v13466_v9 = vld [vmem:[#allocation30_spill] sm:$0xff]  ;;  %v13467_v25 = vld [vmem:[#allocation105_spill] sm:$0xff]  ;;  %v1656_v54 = vmul.f32 %v11475_v47, %v11595_v14 }
 0x2cd   : > { %5826 = vperm.xlu0 %9170, %v9283_v13   ;;  %2615 = vmatmul.mubr.f32.gmra.mrb[90].mxu1 %v2249_v51  ;;  %v11604_v16 = vadd.f32 %v13467_v25, %v13466_v9  ;;  %v2258_v13 = vld [vmem:[#allocation3 + $0x5e8] sm:$0xff]  ;;  %v13470_v9 = vld [vmem:[#allocation108_spill] sm:$0xff]  ;;  %v13473_v47 = vld [vmem:[#allocation109_spill] sm:$0xff] }
 0x2ce   : > { %v4214_v49 = vmax.f32 %v4150_v52, 0.0  ;;  %2619 = vmatprep.mubr.f32.mxu1 %v2254_v20  ;;  %v11614_v25 = vadd.f32 %v13470_v9, %v13469_v62  ;;  %v13475_v52 = vld [vmem:[#allocation76_spill] sm:$0xff]  ;;  %v2037_v62 = vmax.f32 %v1973_v32, 0.0  ;;  %v2257_v9 = vld [vmem:[#allocation3 + $0x5e0] sm:$0xff] }
 0x2cf   : > { %13468 = vst [vmem:[#allocation111_spill] sm:$0xff] %v11604_v16  ;;  %v1655_v58 = vmul.f32 %v13475_v52, %v11604_v16 }
 0x2d0   : > { %v8430_v50 = vpack.c.bf16 %v4214_v49, %v4213_v15  ;;  %9099 = vset.pattern.permute.xlu1 %v13353_v17  ;;  %v1819_v51 = vpop.permute.xlu1 %1818  ;;  %13471 = vst [vmem:[#allocation72_spill] sm:$0xff] %v11614_v25  ;;  %v11624_v15 = vadd.f32 %v13473_v47, %v13472_v39  ;;  %v1976_v49 = vadd.f32 %v11390_v35, %v1656_v54  ;;  %v4247_v35 = vld [vmem:[#allocation5] sm:$0xff] }
 0x2d1   : > { %v1974_v20 = vadd.f32 %v1819_v51, %v1654_v6  ;;  %5838 = vperm.xlu0 %9170, %v9284_v28   ;;  %1914 = vperm.xlu1 %9099, %v11482_v34   ;;  %v1658_v6 = vmul.f32 %v11488_v33, %v11614_v25  ;;  %v2262_v28 = vld [vmem:[#allocation3 + $0x608] sm:$0xff] }
 0x2d2   : > { %13474 = vst [vmem:[#allocation28_spill] sm:$0xff] %v11624_v15  ;;  %8431 = vmatpush1.bf16.msra.mxu0 %v8430_v50  ;;  %2620 = vmatmul.mubr.f32.gmra.mrb[92].mxu1 %v2253_v4  ;;  %v9285_v50 = vld [vmem:[%s13112_s5 + $0x30] sm:$0xff]  ;;  %v4252_v33 = vld [vmem:[#allocation5 + $0x28] sm:$0xff]  ;;  %v2040_v32 = vmax.f32 %v1976_v49, 0.0  ;;  %v11638_v4 = vpop.permute.xlu0 %1590 }
 0x2d3   : > { %v2038_v51 = vmax.f32 %v1974_v20, 0.0  ;;  %2624 = vmatprep.mubr.f32.mxu1 %v2258_v13  ;;  %8432 = vmatprep.subr.bf16.mxu0 %v13346_v43  ;;  %v1978_v54 = vadd.f32 %v11395_v45, %v1658_v6  ;;  %v13476_v20 = vld [vmem:[#allocation79_spill] sm:$0xff]  ;;  %v9286_v49 = vld [vmem:[%s13112_s5 + $0x48] sm:$0xff]  ;;  %v4251_v6 = vld [vmem:[#allocation5 + $0x20] sm:$0xff] }
 0x2d4   : > { %v1823_v34 = vpop.permute.xlu1 %1822  ;;  %v1657_v52 = vmul.f32 %v13476_v20, %v11624_v15  ;;  %v2266_v45 = vld [vmem:[#allocation3 + $0x628] sm:$0xff] }
 0x2d5   : > { %v8337_v39 = vpack.c.bf16 %v2038_v51, %v2037_v62  ;;  %v1975_v47 = vadd.f32 %v1823_v34, %v1655_v58  ;;  %5842 = vperm.xlu0 %9170, %v9285_v50   ;;  %9100 = vset.pattern.permute.xlu1 %v13423_v26  ;;  %v2261_v58 = vld [vmem:[#allocation3 + $0x600] sm:$0xff]  ;;  %v4260_v20 = vld [vmem:[#allocation5 + $0x68] sm:$0xff] }
 0x2d6   : > { %1598 = vperm.xlu1 %9100, %v11493_v55   ;;  %2625 = vmatmul.mubr.f32.gmra.mrb[94].mxu1 %v2257_v9  ;;  %v2042_v9 = vmax.f32 %v1978_v54, 0.0  ;;  %v11649_v50 = vpop.permute.xlu0 %1602  ;;  %v2270_v54 = vld [vmem:[#allocation3 + $0x648] sm:$0xff] }
 0x2d7   : > { %v2039_v13 = vmax.f32 %v1975_v47, 0.0  ;;  %8338 = vmatpush1.bf16.msra.mxu1 %v8337_v39  ;;  %2629 = vmatprep.mubr.f32.mxu1 %v2262_v28  ;;  %v2265_v39 = vld [vmem:[#allocation3 + $0x620] sm:$0xff]  ;;  %v4256_v47 = vld [vmem:[#allocation5 + $0x48] sm:$0xff] }
 0x2d8   : > { %v1831_v62 = vpop.permute.xlu1 %1830  ;;  %8339 = vmatprep.subr.bf16.mxu1 %v13346_v43  ;;  %4568 = vmatmul.mubr.f32.vlgmr.msra.gmra.mrb[64].mxu0 %v4247_v35 }
 0x2d9   : > { %v8340_v51 = vpack.c.bf16 %v2040_v32, %v2039_v13  ;;  %v1977_v34 = vadd.f32 %v1831_v62, %v1657_v52  ;;  %5854 = vperm.xlu0 %9170, %v9286_v49   ;;  %4572 = vmatprep.mubr.f32.mxu0 %v4252_v33  ;;  %v9287_v33 = vld [vmem:[%s13112_s5 + $0x50] sm:$0xff]  ;;  %v2269_v13 = vld [vmem:[#allocation3 + $0x640] sm:$0xff]  ;;  %v2274_v52 = vld [vmem:[#allocation3 + $0x668] sm:$0xff] }
 0x2da   : > { %9101 = vset.pattern.permute.xlu1 %v13353_v17  ;;  %2630 = vmatmul.mubr.f32.gmra.mrb[96].mxu1 %v2261_v58  ;;  %v13477_v58 = vld [vmem:[#allocation34_spill] sm:$0xff] }
 0x2db   : > { %v2041_v28 = vmax.f32 %v1977_v34, 0.0  ;;  %1918 = vperm.xlu1 %9101, %v11493_v55   ;;  %8341 = vmatpush1.bf16.msra.mxu1 %v8340_v51  ;;  %v4255_v55 = vld [vmem:[#allocation5 + $0x40] sm:$0xff]  ;;  %v13478_v62 = vld [vmem:[#allocation82_spill] sm:$0xff] }
 0x2dc   : > { %8342 = vmatprep.subr.bf16.mxu1 %v13346_v43  ;;  %2634 = vmatprep.mubr.f32.mxu1 %v2266_v45  ;;  %v11658_v51 = vadd.f32 %v13478_v62, %v13477_v58  ;;  %v9288_v34 = vld [vmem:[%s13112_s5 + $0x68] sm:$0xff]  ;;  %v13480_v45 = vld [vmem:[#allocation33_spill] sm:$0xff] }
 0x2dd   : > { %v8343_v35 = vpack.c.bf16 %v2042_v9, %v2041_v28  ;;  %5858 = vperm.xlu0 %9170, %v9287_v33   ;;  %v1519_v32 = vpop.permute.xlu1 %1518  ;;  %4573 = vmatmul.mubr.f32.gmra.mrb[66].mxu0 %v4251_v6  ;;  %v13481_v6 = vld [vmem:[#allocation14_spill] sm:$0xff]  ;;  %v11667_v28 = vpop.permute.xlu0 %1606  ;;  %v4263_v58 = vld [vmem:[#allocation5 + $0x80] sm:$0xff] }
 0x2de   : > { %2635 = vmatmul.mubr.f32.gmra.mrb[98].mxu1 %v2265_v39  ;;  %4577 = vmatprep.mubr.f32.mxu0 %v4256_v47  ;;  %13479 = vst [vmem:[#allocation102_spill] sm:$0xff] %v11658_v51  ;;  %v11665_v9 = vadd.f32 %v13481_v6, %v13480_v45  ;;  %v1659_v39 = vmul.f32 %v1519_v32, %v11658_v51  ;;  %v2273_v47 = vld [vmem:[#allocation3 + $0x660] sm:$0xff]  ;;  %v2278_v33 = vld [vmem:[#allocation3 + $0x688] sm:$0xff]  ;;  %v13483_v45 = vld [vmem:[#allocation36_spill] sm:$0xff] }
 0x2df   : > { %1922 = vperm.xlu1 %9101, %v11316_v7   ;;  %8344 = vmatpush1.bf16.msra.mxu1 %v8343_v35  ;;  %v4259_v7 = vld [vmem:[#allocation5 + $0x60] sm:$0xff]  ;;  %v4264_v35 = vld [vmem:[#allocation5 + $0x88] sm:$0xff] }
 0x2e0   : > { %8345 = vmatprep.subr.bf16.mxu1 %v13346_v43  ;;  %2639 = vmatprep.mubr.f32.mxu1 %v2270_v54  ;;  %13482 = vst [vmem:[#allocation27_spill] sm:$0xff] %v11665_v9  ;;  %v1660_v54 = vmul.f32 %v11505_v57, %v11665_v9  ;;  %v2282_v62 = vld [vmem:[#allocation3 + $0x6a8] sm:$0xff]  ;;  %v13484_v57 = vld [vmem:[#allocation61_spill] sm:$0xff] }
 0x2e1   : > { %5870 = vperm.xlu0 %9170, %v9288_v34   ;;  %4578 = vmatmul.mubr.f32.gmra.mrb[68].mxu0 %v4255_v55  ;;  %v4268_v34 = vld [vmem:[#allocation5 + $0xa8] sm:$0xff]  ;;  %v11682_v6 = vpop.permute.xlu0 %1618 }
 0x2e2   : > { %v1839_v49 = vpop.permute.xlu1 %1838  ;;  %2640 = vmatmul.mubr.f32.gmra.mrb[100].mxu1 %v2269_v13  ;;  %4582 = vmatprep.mubr.f32.mxu0 %v4260_v20  ;;  %v9289_v13 = vld [vmem:[%s13112_s5 + $0x70] sm:$0xff] }
 0x2e3   : > { %9102 = vset.pattern.permute.xlu1 %v13423_v26  ;;  %2644 = vmatprep.mubr.f32.mxu1 %v2274_v52  ;;  %v1979_v55 = vadd.f32 %v1839_v49, %v1659_v39  ;;  %v2277_v52 = vld [vmem:[#allocation3 + $0x680] sm:$0xff]  ;;  %v11680_v49 = vadd.f32 %v13484_v57, %v13483_v45  ;;  %v9291_v45 = vld [vmem:[%s13112_s5 + $0x90] sm:$0xff] }
 0x2e4   : > { %1610 = vperm.xlu1 %9102, %v11501_v42  }
 0x2e5   : > { %5874 = vperm.xlu0 %9170, %v9289_v13   ;;  %4583 = vmatmul.mubr.f32.gmra.mrb[70].mxu0 %v4259_v7  ;;  %v2043_v39 = vmax.f32 %v1979_v55, 0.0  ;;  %v9290_v7 = vld [vmem:[%s13112_s5 + $0x88] sm:$0xff]  ;;  %v13486_v55 = vld [vmem:[#allocation16_spill] sm:$0xff] }
 0x2e6   : > { %v1843_v20 = vpop.permute.xlu1 %1842  ;;  %2645 = vmatmul.mubr.f32.gmra.mrb[102].mxu1 %v2273_v47  ;;  %4587 = vmatprep.mubr.f32.mxu0 %v4264_v35  ;;  %v1661_v47 = vmul.f32 %v11521_v23, %v11680_v49  ;;  %v4272_v23 = vld [vmem:[#allocation5 + $0xc8] sm:$0xff] }
 0x2e7   : > { %v1980_v32 = vadd.f32 %v1843_v20, %v1660_v54  ;;  %2649 = vmatprep.mubr.f32.mxu1 %v2278_v33  ;;  %v2281_v54 = vld [vmem:[#allocation3 + $0x6a0] sm:$0xff]  ;;  %v13485_v20 = vld [vmem:[#allocation35_spill] sm:$0xff] }
 0x2e8   : > { %9104 = vset.pattern.permute.xlu1 %v13353_v17 }
 0x2e9   : > { %v2044_v13 = vmax.f32 %v1980_v32, 0.0  ;;  %5886 = vperm.xlu0 %9170, %v9290_v7   ;;  %1930 = vperm.xlu1 %9104, %v11501_v42   ;;  %v11692_v32 = vadd.f32 %v13486_v55, %v13485_v20  ;;  %v4267_v42 = vld [vmem:[#allocation5 + $0xa0] sm:$0xff]  ;;  %v9293_v55 = vld [vmem:[%s13112_s5 + $0xb0] sm:$0xff] }
 0x2ea   : > { %2650 = vmatmul.mubr.f32.gmra.mrb[104].mxu1 %v2277_v52  ;;  %4588 = vmatmul.mubr.f32.gmra.mrb[72].mxu0 %v4263_v58  ;;  %v2286_v52 = vld [vmem:[#allocation3 + $0x6c8] sm:$0xff]  ;;  %v1981_v58 = vadd.f32 %v11402_v38, %v1661_v47  ;;  %v4271_v7 = vld [vmem:[#allocation5 + $0xc0] sm:$0xff] }
 0x2eb   : > { %v8346_v35 = vpack.c.bf16 %v2044_v13, %v2043_v39  ;;  %v1531_v33 = vpop.permute.xlu1 %1530  ;;  %2654 = vmatprep.mubr.f32.mxu1 %v2282_v62  ;;  %4592 = vmatprep.mubr.f32.mxu0 %v4268_v34  ;;  %v11700_v62 = vpop.permute.xlu0 %3672  ;;  %v2285_v39 = vld [vmem:[#allocation3 + $0x6c0] sm:$0xff]  ;;  %v9292_v13 = vld [vmem:[%s13112_s5 + $0xa8] sm:$0xff] }
 0x2ec   : > { %v1662_v34 = vmul.f32 %v1531_v33, %v11692_v32  ;;  %v2290_v38 = vld [vmem:[#allocation3 + $0x6e8] sm:$0xff] }
 0x2ed   : > { %5890 = vperm.xlu0 %9170, %v9291_v45   ;;  %9105 = vset.pattern.permute.xlu1 %v13423_v26  ;;  %v4276_v47 = vld [vmem:[#allocation5 + $0xe8] sm:$0xff] }
 0x2ee   : > { %8347 = vmatpush1.bf16.msra.mxu1 %v8346_v35  ;;  %1614 = vperm.xlu1 %9105, %v11512_v37   ;;  %v2045_v35 = vmax.f32 %v1981_v58, 0.0  ;;  %v13487_v58 = vld [vmem:[#allocation38_spill] sm:$0xff] }
 0x2ef   : > { %8348 = vmatprep.subr.bf16.mxu1 %v13346_v43  ;;  %2655 = vmatmul.mubr.f32.gmra.mrb[106].mxu1 %v2281_v54  ;;  %v11709_v54 = vpop.permute.xlu0 %3688 }
 0x2f0   : > { %v1851_v57 = vpop.permute.xlu1 %1850  ;;  %4593 = vmatmul.mubr.f32.gmra.mrb[74].mxu0 %v4267_v42  ;;  %2659 = vmatprep.mubr.f32.mxu1 %v2286_v52  ;;  %v2289_v42 = vld [vmem:[#allocation3 + $0x6e0] sm:$0xff]  ;;  %v9294_v52 = vld [vmem:[%s13112_s5 + $0x1f8] sm:$0xff] }
 0x2f1   : > { %v1982_v26 = vadd.f32 %v1851_v57, %v1662_v34  ;;  %5902 = vperm.xlu0 %9170, %v9292_v13   ;;  %4597 = vmatprep.mubr.f32.mxu0 %v4272_v23  ;;  %v4280_v23 = vld [vmem:[#allocation5 + $0x108] sm:$0xff]  ;;  %v13488_v34 = vld [vmem:[#allocation89_spill] sm:$0xff] }
 0x2f2   : > { %9106 = vset.pattern.permute.xlu1 %v13353_v17  ;;  %v4275_v17 = vld [vmem:[#allocation5 + $0xe0] sm:$0xff]  ;;  %v11720_v57 = vadd.f32 %v13488_v34, %v13487_v58 }
 0x2f3   : > { %v2046_v33 = vmax.f32 %v1982_v26, 0.0  ;;  %1934 = vperm.xlu1 %9106, %v11512_v37   ;;  %2660 = vmatmul.mubr.f32.gmra.mrb[108].mxu1 %v2285_v39  ;;  %v2294_v37 = vld [vmem:[#allocation3 + $0x708] sm:$0xff]  ;;  %v2293_v26 = vld [vmem:[#allocation3 + $0x700] sm:$0xff] }
 0x2f4   : > { %4598 = vmatmul.mubr.f32.gmra.mrb[76].mxu0 %v4271_v7  ;;  %2664 = vmatprep.mubr.f32.mxu1 %v2290_v38  ;;  %v9295_v39 = vld [vmem:[%s13112_s5 + $0xc8] sm:$0xff]  ;;  %v4279_v7 = vld [vmem:[#allocation5 + $0x100] sm:$0xff] }
 0x2f5   : > { %v8349_v20 = vpack.c.bf16 %v2046_v33, %v2045_v35  ;;  %5906 = vperm.xlu0 %9170, %v9293_v55   ;;  %v1535_v45 = vpop.permute.xlu1 %1534  ;;  %4602 = vmatprep.mubr.f32.mxu0 %v4276_v47  ;;  %v13489_v38 = vld [vmem:[#allocation37_spill] sm:$0xff]  ;;  %v13490_v47 = vld [vmem:[#allocation63_spill] sm:$0xff]  ;;  %v11729_v33 = vpop.permute.xlu0 %3704  ;;  %v2298_v55 = vld [vmem:[#allocation3 + $0x728] sm:$0xff] }
 0x2f6   : > { %v11727_v35 = vadd.f32 %v13490_v47, %v13489_v38  ;;  %v2302_v38 = vld [vmem:[#allocation3 + $0x748] sm:$0xff]  ;;  %v13491_v47 = vld [vmem:[#allocation40_spill] sm:$0xff] }
 0x2f7   : > { %1938 = vperm.xlu1 %9106, %v9294_v52   ;;  %8350 = vmatpush1.bf16.msra.mxu1 %v8349_v20  ;;  %v1663_v20 = vmul.f32 %v1535_v45, %v11720_v57  ;;  %v9297_v45 = vld [vmem:[%s13112_s5 + $0xd0] sm:$0xff] }
 0x2f8   : > { %8351 = vmatprep.subr.bf16.mxu1 %v13346_v43  ;;  %2665 = vmatmul.mubr.f32.gmra.mrb[110].mxu1 %v2289_v42  ;;  %v4284_v42 = vld [vmem:[#allocation5 + $0x128] sm:$0xff]  ;;  %v1664_v52 = vmul.f32 %v11532_v63, %v11727_v35  ;;  %v13492_v63 = vld [vmem:[#allocation20_spill] sm:$0xff] }
 0x2f9   : > { %5918 = vperm.xlu0 %9170, %v9295_v39   ;;  %4603 = vmatmul.mubr.f32.gmra.mrb[78].mxu0 %v4275_v17  ;;  %v11736_v17 = vld [vmem:[%s13112_s5 + $0x108] sm:$0xff]  ;;  %v4283_v39 = vld [vmem:[#allocation5 + $0x120] sm:$0xff] }
 0x2fa   : > { %v1855_v13 = vpop.permute.xlu1 %1854  ;;  %2669 = vmatprep.mubr.f32.mxu1 %v2294_v37  ;;  %4607 = vmatprep.mubr.f32.mxu0 %v4280_v23  ;;  %v2297_v23 = vld [vmem:[#allocation3 + $0x720] sm:$0xff] }
 0x2fb   : > { %9108 = vset.pattern.permute.xlu1 %v13311_v59  ;;  %v1983_v37 = vadd.f32 %v1855_v13, %v1663_v20  ;;  %v11747_v13 = vadd.f32 %v13492_v63, %v13491_v47  ;;  %v11749_v20 = vpop.permute.xlu0 %3720  ;;  %v13494_v47 = vld [vmem:[#allocation64_spill] sm:$0xff] }
 0x2fc   : > { %3676 = vperm.xlu1 %9108, %v11736_v17   ;;  %2670 = vmatmul.mubr.f32.gmra.mrb[112].mxu1 %v2293_v26  ;;  %v4288_v26 = vld [vmem:[#allocation5 + $0x148] sm:$0xff] }
 0x2fd   : > { %5922 = vperm.xlu0 %9170, %v9297_v45   ;;  %4608 = vmatmul.mubr.f32.gmra.mrb[80].mxu0 %v4279_v7  ;;  %v2047_v22 = vmax.f32 %v1983_v37, 0.0  ;;  %v9298_v7 = vld [vmem:[%s13112_s5 + $0xe8] sm:$0xff]  ;;  %v4287_v37 = vld [vmem:[#allocation5 + $0x140] sm:$0xff] }
 0x2fe   : > { %v1859_v58 = vpop.permute.xlu1 %1858  ;;  %2674 = vmatprep.mubr.f32.mxu1 %v2298_v55  ;;  %4612 = vmatprep.mubr.f32.mxu0 %v4284_v42  ;;  %v9299_v55 = vld [vmem:[%s13112_s5 + $0x100] sm:$0xff] }
 0x2ff   : > { %v1984_v34 = vadd.f32 %v1859_v58, %v1664_v52  ;;  %v2301_v42 = vld [vmem:[#allocation3 + $0x740] sm:$0xff]  ;;  %v1665_v52 = vmul.f32 %v11542_v31, %v11747_v13 }
 0x300   : > { %9109 = vset.pattern.permute.xlu1 %v13320_v12  ;;  %2675 = vmatmul.mubr.f32.gmra.mrb[114].mxu1 %v2297_v23  ;;  %v2305_v31 = vld [vmem:[#allocation3 + $0x760] sm:$0xff] }
 0x301   : > { %v2048_v45 = vmax.f32 %v1984_v34, 0.0  ;;  %5934 = vperm.xlu0 %9170, %v9298_v7   ;;  %3992 = vperm.xlu1 %9109, %v9299_v55   ;;  %v13493_v34 = vld [vmem:[#allocation39_spill] sm:$0xff] }
 0x302   : > { %4613 = vmatmul.mubr.f32.gmra.mrb[82].mxu0 %v4283_v39  ;;  %2679 = vmatprep.mubr.f32.mxu1 %v2302_v38  ;;  %v11761_v63 = vadd.f32 %v13494_v47, %v13493_v34  ;;  %v9300_v7 = vld [vmem:[%s13112_s5 + $0xf0] sm:$0xff]  ;;  %v2306_v39 = vld [vmem:[#allocation3 + $0x768] sm:$0xff] }
 0x303   : > { %v8352_v23 = vpack.c.bf16 %v2048_v45, %v2047_v22  ;;  %v1547_v58 = vpop.permute.xlu1 %1546  ;;  %4617 = vmatprep.mubr.f32.mxu0 %v4288_v26  ;;  %v4292_v38 = vld [vmem:[#allocation5 + $0x168] sm:$0xff]  ;;  %v11770_v22 = vld [vmem:[%s13112_s5 + $0x110] sm:$0xff]  ;;  %v1985_v26 = vadd.f32 %v11409_v10, %v1665_v52  ;;  %v11774_v45 = vpop.permute.xlu0 %3736  ;;  %v9302_v10 = vld [vmem:[%s13112_s5 + $0x118] sm:$0xff] }
 0x304   : > { %2680 = vmatmul.mubr.f32.gmra.mrb[116].mxu1 %v2301_v42  ;;  %13495 = vst [vmem:[#allocation100_spill] sm:$0xff] %v11774_v45  ;;  %v1666_v42 = vmul.f32 %v1547_v58, %v11761_v63  ;;  %v2310_v47 = vld [vmem:[#allocation3 + $0x788] sm:$0xff]  ;;  %v2309_v52 = vld [vmem:[#allocation3 + $0x780] sm:$0xff] }
 0x305   : > { %5938 = vperm.xlu0 %9170, %v9300_v7   ;;  %9110 = vset.pattern.permute.xlu1 %v13311_v59  ;;  %v2049_v58 = vmax.f32 %v1985_v26, 0.0  ;;  %v2313_v26 = vld [vmem:[#allocation3 + $0x7a0] sm:$0xff] }
 0x306   : > { %8353 = vmatpush1.bf16.msra.mxu1 %v8352_v23  ;;  %3680 = vperm.xlu1 %9110, %v11770_v22   ;;  %v4291_v23 = vld [vmem:[#allocation5 + $0x160] sm:$0xff] }
 0x307   : > { %8354 = vmatprep.subr.bf16.mxu1 %v13346_v43  ;;  %4618 = vmatmul.mubr.f32.gmra.mrb[84].mxu0 %v4287_v37  ;;  %v11782_v37 = vpop.permute.xlu0 %3752  ;;  %v13516_v45 = vld [vmem:[#allocation45_spill] sm:$0xff] }
 0x308   : > { %v1867_v34 = vpop.permute.xlu1 %1866  ;;  %2684 = vmatprep.mubr.f32.mxu1 %v2306_v39  ;;  %4622 = vmatprep.mubr.f32.mxu0 %v4292_v38  ;;  %13497 = vst [vmem:[#allocation29_spill] sm:$0xff] %v11782_v37  ;;  %v13515_v37 = vmov 6  }
 0x309   : > { %v1986_v7 = vadd.f32 %v1867_v34, %v1666_v42  ;;  %9175 = vset.pattern.permute.xlu0 %v13496_v3  ;;  %2685 = vmatmul.mubr.f32.gmra.mrb[118].mxu1 %v2305_v31  ;;  %v4295_v42 = vld [vmem:[#allocation5 + $0x180] sm:$0xff]  ;;  %v2314_v31 = vld [vmem:[#allocation3 + $0x7a8] sm:$0xff] }
 0x30a   : > { %5626 = vperm.xlu0 %9175, %v9299_v55   ;;  %3684 = vperm.xlu1 %9110, %v9302_v10   ;;  %v9303_v55 = vld [vmem:[%s13112_s5 + $0x120] sm:$0xff]  ;;  %v4300_v34 = vld [vmem:[#allocation5 + $0x1a8] sm:$0xff] }
 0x30b   : > { %v2050_v40 = vmax.f32 %v1986_v7, 0.0  ;;  %4623 = vmatmul.mubr.f32.gmra.mrb[86].mxu0 %v4291_v23  ;;  %2689 = vmatprep.mubr.f32.mxu1 %v2310_v47  ;;  %v13499_v23 = vld [vmem:[#allocation22_spill] sm:$0xff]  ;;  %v4299_v7 = vld [vmem:[#allocation5 + $0x1a0] sm:$0xff]  ;;  %v11803_v41 = vpop.permute.xlu0 %3768 }
 0x30c   : > { %4627 = vmatprep.mubr.f32.mxu0 %v4296_v61  ;;  %v2318_v61 = vld [vmem:[#allocation3 + $0x7c8] sm:$0xff]  ;;  %13504 = vst [vmem:[#allocation30_spill] sm:$0xff] %v11803_v41 }
 0x30d   : > { %v8355_v39 = vpack.c.bf16 %v2050_v40, %v2049_v58  ;;  %v1551_v38 = vpop.permute.xlu1 %1550  ;;  %2690 = vmatmul.mubr.f32.gmra.mrb[120].mxu1 %v2309_v52  ;;  %v13498_v40 = vld [vmem:[#allocation42_spill] sm:$0xff]  ;;  %v11796_v52 = vld [vmem:[%s13112_s5 + $0x140] sm:$0xff] }
 0x30e   : > { %5642 = vperm.xlu0 %9175, %v9303_v55   ;;  %9111 = vset.pattern.permute.xlu1 %v13320_v12  ;;  %v11791_v47 = vadd.f32 %v13499_v23, %v13498_v40  ;;  %v4304_v58 = vld [vmem:[#allocation5 + $0x1c8] sm:$0xff] }
 0x30f   : > { %4004 = vperm.xlu1 %9111, %v9302_v10   ;;  %8356 = vmatpush1.bf16.msra.mxu1 %v8355_v39  ;;  %v13501_v39 = vld [vmem:[#allocation41_spill] sm:$0xff]  ;;  %v11810_v40 = vld [vmem:[%s13112_s5 + $0x128] sm:$0xff]  ;;  %v11826_v11 = vpop.permute.xlu0 %3784 }
 0x310   : > { %8357 = vmatprep.subr.bf16.mxu1 %v13346_v43  ;;  %4628 = vmatmul.mubr.f32.gmra.mrb[88].mxu0 %v4295_v42  ;;  %13500 = vst [vmem:[#allocation104_spill] sm:$0xff] %v11791_v47  ;;  %v13502_v42 = vld [vmem:[#allocation66_spill] sm:$0xff]  ;;  %13508 = vst [vmem:[#allocation31_spill] sm:$0xff] %v11826_v11 }
 0x311   : > { %2694 = vmatprep.mubr.f32.mxu1 %v2314_v31  ;;  %4632 = vmatprep.mubr.f32.mxu0 %v4300_v34  ;;  %v11801_v44 = vadd.f32 %v13502_v42, %v13501_v39  ;;  %v1667_v31 = vmul.f32 %v1551_v38, %v11791_v47  ;;  %v2317_v34 = vld [vmem:[#allocation3 + $0x7c0] sm:$0xff]  ;;  %v4324_v11 = vld [vmem:[#allocation5 + $0x268] sm:$0xff] }
 0x312   : > { %5658 = vperm.xlu0 %9175, %v11796_v52   ;;  %v1871_v10 = vpop.permute.xlu1 %1870  ;;  %2695 = vmatmul.mubr.f32.gmra.mrb[122].mxu1 %v2313_v26  ;;  %v2322_v26 = vld [vmem:[#allocation3 + $0x7e8] sm:$0xff]  ;;  %v4303_v42 = vld [vmem:[#allocation5 + $0x1c0] sm:$0xff] }
 0x313   : > { %13503 = vst [vmem:[#allocation75_spill] sm:$0xff] %v11801_v44  ;;  %9112 = vset.pattern.permute.xlu1 %v13311_v59  ;;  %2699 = vmatprep.mubr.f32.mxu1 %v2318_v61  ;;  %v1668_v23 = vmul.f32 %v11553_v29, %v11801_v44  ;;  %v1987_v39 = vadd.f32 %v1871_v10, %v1667_v31  ;;  %v11818_v38 = vld [vmem:[%s13112_s5 + $0x160] sm:$0xff]  ;;  %v2072_v29 = vld [vmem:[#allocation3 + $0x18] sm:$0xff]  ;;  %v4328_v41 = vld [vmem:[#allocation5 + $0x288] sm:$0xff] }
 0x314   : > { %3692 = vperm.xlu1 %9112, %v11810_v40   ;;  %4633 = vmatmul.mubr.f32.gmra.mrb[90].mxu0 %v4299_v7  ;;  %v2321_v7 = vld [vmem:[#allocation3 + $0x7e0] sm:$0xff]  ;;  %v13505_v10 = vld [vmem:[#allocation44_spill] sm:$0xff] }
 0x315   : > { %4637 = vmatprep.mubr.f32.mxu0 %v4304_v58  ;;  %v13506_v58 = vld [vmem:[#allocation24_spill] sm:$0xff]  ;;  %v2051_v46 = vmax.f32 %v1987_v39, 0.0  ;;  %v4312_v39 = vld [vmem:[#allocation5 + $0x208] sm:$0xff] }
 0x316   : > { %5674 = vperm.xlu0 %9175, %v11818_v38   ;;  %v1875_v61 = vpop.permute.xlu1 %1874  ;;  %2700 = vmatmul.mubr.f32.gmra.mrb[124].mxu1 %v2317_v34  ;;  %v11824_v31 = vadd.f32 %v13506_v58, %v13505_v10  ;;  %v11831_v34 = vld [vmem:[%s13112_s5 + $0x180] sm:$0xff] }
 0x317   : > { %v1988_v48 = vadd.f32 %v1875_v61, %v1668_v23  ;;  %2704 = vmatprep.mubr.f32.mxu1 %v2322_v26  ;;  %v11840_v61 = vpop.permute.xlu0 %3996  ;;  %v4311_v10 = vld [vmem:[#allocation5 + $0x200] sm:$0xff] }
 0x318   : > { %9113 = vset.pattern.permute.xlu1 %v13320_v12  ;;  %4638 = vmatmul.mubr.f32.gmra.mrb[92].mxu0 %v4303_v42  ;;  %13507 = vst [vmem:[#allocation105_spill] sm:$0xff] %v11824_v31  ;;  %v1669_v26 = vmul.f32 %v11564_v56, %v11824_v31  ;;  %v13517_v31 = vld [vmem:[#allocation23_spill] sm:$0xff] }
 0x319   : > { %v2052_v19 = vmax.f32 %v1988_v48, 0.0  ;;  %4008 = vperm.xlu1 %9113, %v9303_v55   ;;  %4642 = vmatprep.mubr.f32.mxu0 %v4308_v8  ;;  %v13509_v48 = vld [vmem:[#allocation43_spill] sm:$0xff]  ;;  %v13510_v55 = vld [vmem:[#allocation21_spill] sm:$0xff] }
 0x31a   : > { %5690 = vperm.xlu0 %9175, %v11831_v34   ;;  %2705 = vmatmul.mubr.f32.gmra.mrb[126].mxu1 %v2321_v7  ;;  %v11838_v8 = vadd.f32 %v13510_v55, %v13509_v48  ;;  %v11846_v7 = vld [vmem:[%s13112_s5 + $0x1a0] sm:$0xff] }
 0x31b   : > { %v8358_v23 = vpack.c.bf16 %v2052_v19, %v2051_v46  ;;  %v1563_v42 = vpop.permute.xlu1 %1562  ;;  %2774 = vmatprep.mubr.f32.mxu1 %v2072_v29  ;;  %v4316_v19 = vld [vmem:[#allocation5 + $0x228] sm:$0xff]  ;;  %v1989_v46 = vadd.f32 %v11420_v36, %v1669_v26  ;;  %v11861_v48 = vld [vmem:[%s13112_s5 + $0x1c0] sm:$0xff]  ;;  %v9311_v36 = vld [vmem:[%s13112_s5 + $0x138] sm:$0xff] }
 0x31c   : > { %4643 = vmatmul.mubr.f32.gmra.mrb[94].mxu0 %v4307_v0  ;;  %13511 = vst [vmem:[#allocation108_spill] sm:$0xff] %v11838_v8  ;;  %v11852_v0 = vld [vmem:[%s13112_s5 + $0x130] sm:$0xff]  ;;  %v1670_v56 = vmul.f32 %v1563_v42, %v11838_v8  ;;  %v4320_v26 = vld [vmem:[#allocation5 + $0x248] sm:$0xff]  ;;  %v11886_v8 = vadd.f32 %v13517_v31, %v13516_v45 }
 0x31d   : > { %9114 = vset.pattern.permute.xlu1 %v13311_v59  ;;  %8359 = vmatpush1.bf16.msra.mxu1 %v8358_v23  ;;  %v4315_v23 = vld [vmem:[#allocation5 + $0x220] sm:$0xff]  ;;  %v2053_v42 = vmax.f32 %v1989_v46, 0.0  ;;  %v13512_v46 = vld [vmem:[#allocation46_spill] sm:$0xff] }
 0x31e   : > { %5706 = vperm.xlu0 %9175, %v11846_v7   ;;  %3696 = vperm.xlu1 %9114, %v11852_v0   ;;  %13518 = vst [vmem:[#allocation109_spill] sm:$0xff] %v11886_v8  ;;  %v4332_v31 = vld [vmem:[#allocation5 + $0x2a8] sm:$0xff] }
 0x31f   : > { %8360 = vmatprep.subr.bf16.mxu1 %v13346_v43  ;;  %4647 = vmatprep.mubr.f32.mxu0 %v4312_v39  ;;  %v11867_v39 = vpop.permute.xlu0 %4000 }
 0x320   : > { %v1883_v29 = vpop.permute.xlu1 %1882  ;;  %4648 = vmatmul.mubr.f32.gmra.mrb[96].mxu0 %v4311_v10 }
 0x321   : > { %v1990_v58 = vadd.f32 %v1883_v29, %v1670_v56  ;;  %4652 = vmatprep.mubr.f32.mxu0 %v4316_v19  ;;  %v4319_v56 = vld [vmem:[#allocation5 + $0x240] sm:$0xff] }
 0x322   : > { %5722 = vperm.xlu0 %9175, %v11861_v48   ;;  %3700 = vperm.xlu1 %9114, %v9311_v36   ;;  %v11872_v29 = vld [vmem:[%s13112_s5 + $0x1e0] sm:$0xff] }
 0x323   : > { %v2054_v55 = vmax.f32 %v1990_v58, 0.0  ;;  %v13513_v58 = vld [vmem:[#allocation70_spill] sm:$0xff] }
 0x324   : > { %4653 = vmatmul.mubr.f32.gmra.mrb[98].mxu0 %v4315_v23  ;;  %v11879_v23 = vadd.f32 %v13513_v58, %v13512_v46  ;;  %v4327_v46 = vld [vmem:[#allocation5 + $0x280] sm:$0xff] }
 0x325   : > { %v8361_v10 = vpack.c.bf16 %v2054_v55, %v2053_v42  ;;  %v1567_v19 = vpop.permute.xlu1 %1566  ;;  %4657 = vmatprep.mubr.f32.mxu0 %v4320_v26  ;;  %v11881_v26 = vpop.permute.xlu0 %4012  ;;  %v4323_v42 = vld [vmem:[#allocation5 + $0x260] sm:$0xff] }
 0x326   : > { %5738 = vperm.xlu0 %9175, %v11872_v29   ;;  %9115 = vset.pattern.permute.xlu1 %v13320_v12  ;;  %13514 = vst [vmem:[#allocation32_spill] sm:$0xff] %v11879_v23 }
 0x327   : > { %4020 = vperm.xlu1 %9115, %v9311_v36   ;;  %8362 = vmatpush1.bf16.msra.mxu1 %v8361_v10  ;;  %v1671_v36 = vmul.f32 %v1567_v19, %v11879_v23  ;;  %v9313_v10 = vld [vmem:[%s13112_s5 + $0x148] sm:$0xff]  ;;  %v13520_v23 = vld [vmem:[#allocation71_spill] sm:$0xff] }
 0x328   : > { %8363 = vmatprep.subr.bf16.mxu1 %v13346_v43  ;;  %4658 = vmatmul.mubr.f32.gmra.mrb[100].mxu0 %v4319_v56 }
 0x329   : > { %4662 = vmatprep.mubr.f32.mxu0 %v4324_v11  ;;  %v1672_v11 = vmul.f32 %v11570_v53, %v11886_v8  ;;  %v11896_v58 = vpop.permute.xlu0 %4016 }
 0x32a   : > { %v1887_v55 = vpop.permute.xlu1 %1886  ;;  %9204 = vset.pattern.permute.xlu0 %v13515_v37 }
 0x32b   : > { %9116 = vset.pattern.permute.xlu1 %v13311_v59  ;;  %5950 = vperm.xlu0 %9204, %v11736_v17   ;;  %v1991_v56 = vadd.f32 %v1887_v55, %v1671_v36  ;;  %v13519_v17 = vld [vmem:[#allocation48_spill] sm:$0xff] }
 0x32c   : > { %3708 = vperm.xlu1 %9116, %v9313_v10   ;;  %4663 = vmatmul.mubr.f32.gmra.mrb[102].mxu0 %v4323_v42  ;;  %v11902_v44 = vadd.f32 %v13520_v23, %v13519_v17  ;;  %v4339_v17 = vld [vmem:[#allocation5 + $0x2e0] sm:$0xff] }
 0x32d   : > { %4667 = vmatprep.mubr.f32.mxu0 %v4328_v41  ;;  %v2055_v42 = vmax.f32 %v1991_v56, 0.0  ;;  %v4331_v41 = vld [vmem:[#allocation5 + $0x2a0] sm:$0xff]  ;;  %v11912_v23 = vpop.permute.xlu0 %4028 }
 0x32e   : > { %v1891_v45 = vpop.permute.xlu1 %1890  ;;  %13521 = vst [vmem:[#allocation76_spill] sm:$0xff] %v11902_v44  ;;  %v1673_v53 = vmul.f32 %v11585_v24, %v11902_v44  ;;  %v9314_v24 = vld [vmem:[%s13112_s5 + $0x150] sm:$0xff] }
 0x32f   : > { %v1992_v19 = vadd.f32 %v1891_v45, %v1672_v11  ;;  %5954 = vperm.xlu0 %9204, %v11770_v22   ;;  %v4336_v22 = vld [vmem:[#allocation5 + $0x2c8] sm:$0xff]  ;;  %v13522_v11 = vld [vmem:[#allocation47_spill] sm:$0xff] }
 0x330   : > { %9117 = vset.pattern.permute.xlu1 %v13320_v12  ;;  %4668 = vmatmul.mubr.f32.gmra.mrb[104].mxu0 %v4327_v46  ;;  %v13523_v46 = vld [vmem:[#allocation26_spill] sm:$0xff] }
 0x331   : > { %v2056_v47 = vmax.f32 %v1992_v19, 0.0  ;;  %4024 = vperm.xlu1 %9117, %v11796_v52   ;;  %4672 = vmatprep.mubr.f32.mxu0 %v4332_v31  ;;  %v11910_v45 = vadd.f32 %v13523_v46, %v13522_v11  ;;  %v4335_v52 = vld [vmem:[#allocation5 + $0x2c0] sm:$0xff]  ;;  %v11925_v11 = vpop.permute.xlu0 %4032  ;;  %v13525_v46 = vld [vmem:[#allocation50_spill] sm:$0xff] }
 0x333   : > { %v8364_v55 = vpack.c.bf16 %v2056_v47, %v2055_v42  ;;  %v1579_v36 = vpop.permute.xlu1 %1578  ;;  %5966 = vperm.xlu0 %9204, %v11810_v40   ;;  %13524 = vst [vmem:[#allocation79_spill] sm:$0xff] %v11910_v45  ;;  %v4340_v47 = vld [vmem:[#allocation5 + $0x2e8] sm:$0xff]  ;;  %v1993_v40 = vadd.f32 %v11423_v5, %v1673_v53  ;;  %v9315_v42 = vld [vmem:[%s13112_s5 + $0x158] sm:$0xff] }
 0x334   : > { %4673 = vmatmul.mubr.f32.gmra.mrb[106].mxu0 %v4331_v41  ;;  %v1674_v56 = vmul.f32 %v1579_v36, %v11910_v45  ;;  %v4344_v41 = vld [vmem:[#allocation5 + $0x308] sm:$0xff] }
 0x335   : > { %9118 = vset.pattern.permute.xlu1 %v13311_v59  ;;  %8365 = vmatpush1.bf16.msra.mxu1 %v8364_v55  ;;  %v2057_v55 = vmax.f32 %v1993_v40, 0.0  ;;  %v11933_v40 = vpop.permute.xlu0 %4044 }
 0x336   : > { %3712 = vperm.xlu1 %9118, %v9314_v24   ;;  %8366 = vmatprep.subr.bf16.mxu1 %v13346_v43 }
 0x337   : > { %4677 = vmatprep.mubr.f32.mxu0 %v4336_v22  ;;  %5970 = vperm.xlu0 %9204, %v11852_v0   ;;  %v4343_v0 = vld [vmem:[#allocation5 + $0x300] sm:$0xff]  ;;  %v4348_v22 = vld [vmem:[#allocation5 + $0x328] sm:$0xff] }
 0x338   : > { %v1899_v31 = vpop.permute.xlu1 %1898  ;;  %4678 = vmatmul.mubr.f32.gmra.mrb[108].mxu0 %v4335_v52  ;;  %v13526_v52 = vld [vmem:[#allocation73_spill] sm:$0xff] }
 0x339   : > { %v1994_v19 = vadd.f32 %v1899_v31, %v1674_v56  ;;  %4682 = vmatprep.mubr.f32.mxu0 %v4340_v47  ;;  %v11931_v47 = vadd.f32 %v13526_v52, %v13525_v46  ;;  %v4352_v31 = vld [vmem:[#allocation5 + $0x348] sm:$0xff]  ;;  %v11946_v46 = vpop.permute.xlu0 %4048  ;;  %v13531_v52 = vld [vmem:[#allocation52_spill] sm:$0xff] }
 0x33a   : > { %3716 = vperm.xlu1 %9118, %v9315_v42  }
 0x33b   : > { %v2058_v5 = vmax.f32 %v1994_v19, 0.0  ;;  %5982 = vperm.xlu0 %9204, %v9313_v10   ;;  %13527 = vst [vmem:[#allocation34_spill] sm:$0xff] %v11931_v47  ;;  %v4347_v10 = vld [vmem:[#allocation5 + $0x320] sm:$0xff] }
 0x33c   : > { %4683 = vmatmul.mubr.f32.gmra.mrb[110].mxu0 %v4339_v17  ;;  %v13528_v19 = vld [vmem:[#allocation49_spill] sm:$0xff] }
 0x33d   : > { %v8367_v53 = vpack.c.bf16 %v2058_v5, %v2057_v55  ;;  %v1583_v36 = vpop.permute.xlu1 %1582  ;;  %4687 = vmatprep.mubr.f32.mxu0 %v4344_v41  ;;  %v13529_v17 = vld [vmem:[#allocation25_spill] sm:$0xff]  ;;  %v9316_v55 = vld [vmem:[%s13112_s5 + $0x168] sm:$0xff] }
 0x33e   : > { %9119 = vset.pattern.permute.xlu1 %v13320_v12  ;;  %v11937_v41 = vadd.f32 %v13529_v17, %v13528_v19  ;;  %v13532_v19 = vld [vmem:[#allocation80_spill] sm:$0xff] }
 0x33f   : > { %4036 = vperm.xlu1 %9119, %v9315_v42   ;;  %8368 = vmatpush1.bf16.msra.mxu1 %v8367_v53  ;;  %v1675_v42 = vmul.f32 %v1583_v36, %v11931_v47  ;;  %v4351_v53 = vld [vmem:[#allocation5 + $0x340] sm:$0xff]  ;;  %v11951_v17 = vadd.f32 %v13532_v19, %v13531_v52  ;;  %v9318_v52 = vld [vmem:[%s13112_s5 + $0x188] sm:$0xff] }
 0x340   : > { %8369 = vmatprep.subr.bf16.mxu1 %v13346_v43  ;;  %4688 = vmatmul.mubr.f32.gmra.mrb[112].mxu0 %v4343_v0  ;;  %13530 = vst [vmem:[#allocation82_spill] sm:$0xff] %v11937_v41  ;;  %v1676_v5 = vmul.f32 %v11616_v2, %v11937_v41  ;;  %v4355_v2 = vld [vmem:[#allocation5 + $0x360] sm:$0xff]  ;;  %v4388_v41 = vld [vmem:[#allocation5 + $0x468] sm:$0xff] }
 0x341   : > { %4692 = vmatprep.mubr.f32.mxu0 %v4348_v22  ;;  %5986 = vperm.xlu0 %9204, %v9314_v24   ;;  %v4356_v22 = vld [vmem:[#allocation5 + $0x368] sm:$0xff]  ;;  %13533 = vst [vmem:[#allocation33_spill] sm:$0xff] %v11951_v17 }
 0x342   : > { %v1903_v56 = vpop.permute.xlu1 %1902 }
 0x343   : > { %9120 = vset.pattern.permute.xlu1 %v13311_v59  ;;  %v1995_v24 = vadd.f32 %v1903_v56, %v1675_v42  ;;  %v9317_v56 = vld [vmem:[%s13112_s5 + $0x170] sm:$0xff] }
 0x344   : > { %3724 = vperm.xlu1 %9120, %v9316_v55   ;;  %4693 = vmatmul.mubr.f32.gmra.mrb[114].mxu0 %v4347_v10 }
 0x345   : > { %4697 = vmatprep.mubr.f32.mxu0 %v4352_v31  ;;  %5998 = vperm.xlu0 %9204, %v9316_v55   ;;  %v2059_v10 = vmax.f32 %v1995_v24, 0.0  ;;  %v1677_v31 = vmul.f32 %v11638_v4, %v11951_v17  ;;  %v4375_v17 = vld [vmem:[#allocation5 + $0x400] sm:$0xff] }
 0x346   : > { %v1907_v0 = vpop.permute.xlu1 %1906 }
 0x347   : > { %v1996_v36 = vadd.f32 %v1907_v0, %v1676_v5  ;;  %v4360_v5 = vld [vmem:[#allocation5 + $0x388] sm:$0xff]  ;;  %v1997_v4 = vadd.f32 %v11433_v21, %v1677_v31 }
 0x348   : > { %9121 = vset.pattern.permute.xlu1 %v13320_v12  ;;  %4698 = vmatmul.mubr.f32.gmra.mrb[116].mxu0 %v4351_v53  ;;  %v13534_v53 = vld [vmem:[#allocation51_spill] sm:$0xff]  ;;  %v13535_v0 = vld [vmem:[#allocation74_spill] sm:$0xff] }
 0x349   : > { %v2060_v47 = vmax.f32 %v1996_v36, 0.0  ;;  %4040 = vperm.xlu1 %9121, %v11818_v38   ;;  %4702 = vmatprep.mubr.f32.mxu0 %v4356_v22  ;;  %v11961_v24 = vadd.f32 %v13535_v0, %v13534_v53  ;;  %v11963_v36 = vpop.permute.xlu0 %4060  ;;  %v4359_v38 = vld [vmem:[#allocation5 + $0x380] sm:$0xff]  ;;  %v4364_v22 = vld [vmem:[#allocation5 + $0x3a8] sm:$0xff]  ;;  %v2061_v21 = vmax.f32 %v1997_v4, 0.0 }
 0x34a   : > { %6002 = vperm.xlu0 %9204, %v9317_v56   ;;  %v13537_v4 = vld [vmem:[#allocation54_spill] sm:$0xff] }
 0x34b   : > { %v8370_v42 = vpack.c.bf16 %v2060_v47, %v2059_v10  ;;  %v1595_v55 = vpop.permute.xlu1 %1594  ;;  %13536 = vst [vmem:[#allocation14_spill] sm:$0xff] %v11961_v24 }
 0x34c   : > { %4703 = vmatmul.mubr.f32.gmra.mrb[118].mxu0 %v4355_v2  ;;  %v1678_v47 = vmul.f32 %v1595_v55, %v11961_v24  ;;  %v4363_v2 = vld [vmem:[#allocation5 + $0x3a0] sm:$0xff]  ;;  %v12005_v24 = vld [vmem:[%s13112_s5 + $0x1b0] sm:$0xff] }
 0x34d   : > { %9122 = vset.pattern.permute.xlu1 %v13311_v59  ;;  %8371 = vmatpush1.bf16.msra.mxu1 %v8370_v42  ;;  %v4368_v42 = vld [vmem:[#allocation5 + $0x3c8] sm:$0xff]  ;;  %v11975_v31 = vpop.permute.xlu0 %4064 }
 0x34e   : > { %3728 = vperm.xlu1 %9122, %v9317_v56   ;;  %8372 = vmatprep.subr.bf16.mxu1 %v13346_v43  ;;  %v9319_v56 = vld [vmem:[%s13112_s5 + $0x178] sm:$0xff] }
 0x34f   : > { %4707 = vmatprep.mubr.f32.mxu0 %v4360_v5  ;;  %6014 = vperm.xlu0 %9204, %v9318_v52   ;;  %v9320_v5 = vld [vmem:[%s13112_s5 + $0x190] sm:$0xff] }
 0x350   : > { %v1915_v19 = vpop.permute.xlu1 %1914  ;;  %4708 = vmatmul.mubr.f32.gmra.mrb[120].mxu0 %v4359_v38  ;;  %v4367_v38 = vld [vmem:[#allocation5 + $0x3c0] sm:$0xff] }
 0x351   : > { %v1998_v10 = vadd.f32 %v1915_v19, %v1678_v47  ;;  %4712 = vmatprep.mubr.f32.mxu0 %v4364_v22  ;;  %v4372_v22 = vld [vmem:[#allocation5 + $0x3e8] sm:$0xff] }
 0x352   : > { %3732 = vperm.xlu1 %9122, %v9319_v56   ;;  %v13538_v47 = vld [vmem:[#allocation110_spill] sm:$0xff] }
 0x353   : > { %v2062_v55 = vmax.f32 %v1998_v10, 0.0  ;;  %6018 = vperm.xlu0 %9204, %v9320_v5   ;;  %v11984_v19 = vadd.f32 %v13538_v47, %v13537_v4  ;;  %v11986_v10 = vpop.permute.xlu0 %4076 }
 0x354   : > { %4713 = vmatmul.mubr.f32.gmra.mrb[122].mxu0 %v4363_v2  ;;  %v4371_v2 = vld [vmem:[#allocation5 + $0x3e0] sm:$0xff] }
 0x355   : > { %v8373_v53 = vpack.c.bf16 %v2062_v55, %v2061_v21  ;;  %v1599_v0 = vpop.permute.xlu1 %1598  ;;  %4717 = vmatprep.mubr.f32.mxu0 %v4368_v42  ;;  %13539 = vst [vmem:[#allocation36_spill] sm:$0xff] %v11984_v19  ;;  %v11991_v42 = vld [vmem:[%s13112_s5 + $0x1a8] sm:$0xff]  ;;  %v13540_v55 = vld [vmem:[#allocation53_spill] sm:$0xff] }
 0x356   : > { %9123 = vset.pattern.permute.xlu1 %v13320_v12  ;;  %v4376_v21 = vld [vmem:[#allocation5 + $0x408] sm:$0xff]  ;;  %v1679_v4 = vmul.f32 %v1599_v0, %v11984_v19 }
 0x357   : > { %4052 = vperm.xlu1 %9123, %v9319_v56   ;;  %8374 = vmatpush1.bf16.msra.mxu1 %v8373_v53  ;;  %v13541_v53 = vld [vmem:[#allocation83_spill] sm:$0xff]  ;;  %v12008_v0 = vpop.permute.xlu0 %4080 }
 0x358   : > { %8375 = vmatprep.subr.bf16.mxu1 %v13346_v43  ;;  %4718 = vmatmul.mubr.f32.gmra.mrb[124].mxu0 %v4367_v38  ;;  %v11996_v38 = vadd.f32 %v13541_v53, %v13540_v55  ;;  %v4380_v53 = vld [vmem:[#allocation5 + $0x428] sm:$0xff] }
 0x359   : > { %4722 = vmatprep.mubr.f32.mxu0 %v4372_v22  ;;  %6030 = vperm.xlu0 %9204, %v11991_v42  }
 0x35a   : > { %v1919_v56 = vpop.permute.xlu1 %1918  ;;  %13542 = vst [vmem:[#allocation61_spill] sm:$0xff] %v11996_v38  ;;  %v1680_v22 = vmul.f32 %v11649_v50, %v11996_v38  ;;  %v13544_v50 = vld [vmem:[#allocation113_spill] sm:$0xff]  ;;  %v12019_v38 = vld [vmem:[%s13112_s5 + $0x1c8] sm:$0xff] }
 0x35b   : > { %9124 = vset.pattern.permute.xlu1 %v13311_v59  ;;  %v1999_v47 = vadd.f32 %v1919_v56, %v1679_v4  ;;  %v4379_v4 = vld [vmem:[#allocation5 + $0x420] sm:$0xff] }
 0x35c   : > { %3740 = vperm.xlu1 %9124, %v9318_v52   ;;  %4723 = vmatmul.mubr.f32.gmra.mrb[126].mxu0 %v4371_v2  ;;  %v13543_v52 = vld [vmem:[#allocation56_spill] sm:$0xff] }
 0x35d   : > { %4727 = vmatprep.mubr.f32.mxu0 %v4376_v21  ;;  %6034 = vperm.xlu0 %9204, %v12005_v24   ;;  %v12013_v2 = vadd.f32 %v13544_v50, %v13543_v52  ;;  %v2063_v56 = vmax.f32 %v1999_v47, 0.0  ;;  %v4384_v52 = vld [vmem:[#allocation5 + $0x448] sm:$0xff]  ;;  %v13546_v47 = vld [vmem:[#allocation55_spill] sm:$0xff] }
 0x35e   : > { %v1923_v55 = vpop.permute.xlu1 %1922 }
 0x35f   : > { %v2000_v19 = vadd.f32 %v1923_v55, %v1680_v22  ;;  %13545 = vst [vmem:[#allocation35_spill] sm:$0xff] %v12013_v2 }
 0x360   : > { %9125 = vset.pattern.permute.xlu1 %v13320_v12  ;;  %4728 = vmatmul.mubr.f32.gmra.mrb[128].mxu0 %v4375_v17  ;;  %v1681_v17 = vmul.f32 %v11667_v28, %v12013_v2 }
 0x361   : > { %v2064_v21 = vmax.f32 %v2000_v19, 0.0  ;;  %4056 = vperm.xlu1 %9125, %v11831_v34   ;;  %4732 = vmatprep.mubr.f32.mxu0 %v4380_v53  ;;  %v13547_v19 = vld [vmem:[#allocation112_spill] sm:$0xff]  ;;  %v12028_v34 = vpop.permute.xlu0 %4092  ;;  %v4383_v53 = vld [vmem:[#allocation5 + $0x440] sm:$0xff] }
 0x362   : > { %6046 = vperm.xlu0 %9204, %v12019_v38   ;;  %v12026_v50 = vadd.f32 %v13547_v19, %v13546_v47  ;;  %13549 = vst [vmem:[#allocation38_spill] sm:$0xff] %v12028_v34  ;;  %v2001_v28 = vadd.f32 %v11446_v18, %v1681_v17  ;;  %v9325_v47 = vld [vmem:[%s13112_s5 + $0x198] sm:$0xff]  ;;  %v4392_v18 = vld [vmem:[#allocation5 + $0x488] sm:$0xff] }
 0x363   : > { %v8376_v22 = vpack.c.bf16 %v2064_v21, %v2063_v56  ;;  %v1611_v55 = vpop.permute.xlu1 %1610  ;;  %v12037_v21 = vld [vmem:[%s13112_s5 + $0x1d0] sm:$0xff]  ;;  %v12048_v19 = vld [vmem:[%s13112_s5 + $0x1e8] sm:$0xff] }
 0x364   : > { %4733 = vmatmul.mubr.f32.gmra.mrb[130].mxu0 %v4379_v4  ;;  %13548 = vst [vmem:[#allocation16_spill] sm:$0xff] %v12026_v50  ;;  %v1682_v56 = vmul.f32 %v1611_v55, %v12026_v50  ;;  %v2065_v17 = vmax.f32 %v2001_v28, 0.0  ;;  %v13551_v28 = vld [vmem:[#allocation58_spill] sm:$0xff] }
 0x365   : > { %9126 = vset.pattern.permute.xlu1 %v13311_v59  ;;  %8377 = vmatpush1.bf16.msra.mxu1 %v8376_v22  ;;  %v12043_v55 = vpop.permute.xlu0 %4096 }
 0x366   : > { %3744 = vperm.xlu1 %9126, %v9320_v5   ;;  %8378 = vmatprep.subr.bf16.mxu1 %v13346_v43  ;;  %v4387_v5 = vld [vmem:[#allocation5 + $0x460] sm:$0xff]  ;;  %13550 = vst [vmem:[#allocation89_spill] sm:$0xff] %v12043_v55  ;;  %v4404_v55 = vld [vmem:[#allocation5 + $0x4e8] sm:$0xff] }
 0x367   : > { %4737 = vmatprep.mubr.f32.mxu0 %v4384_v52  ;;  %6050 = vperm.xlu0 %9204, %v12037_v21  }
 0x368   : > { %v1931_v4 = vpop.permute.xlu1 %1930  ;;  %4738 = vmatmul.mubr.f32.gmra.mrb[132].mxu0 %v4383_v53 }
 0x369   : > { %v2002_v22 = vadd.f32 %v1931_v4, %v1682_v56  ;;  %4742 = vmatprep.mubr.f32.mxu0 %v4388_v41  ;;  %v4391_v56 = vld [vmem:[#allocation5 + $0x480] sm:$0xff]  ;;  %v4396_v4 = vld [vmem:[#allocation5 + $0x4a8] sm:$0xff]  ;;  %v12057_v2 = vpop.permute.xlu0 %4108 }
 0x36a   : > { %3748 = vperm.xlu1 %9126, %v9325_v47   ;;  %13553 = vst [vmem:[#allocation63_spill] sm:$0xff] %v12057_v2  ;;  %v13556_v2 = vmov 0  }
 0x36b   : > { %v2066_v52 = vmax.f32 %v2002_v22, 0.0  ;;  %6062 = vperm.xlu0 %9204, %v12048_v19   ;;  %v12055_v22 = vadd.f32 %v11256_v27, %v13551_v28  ;;  %v4399_v28 = vld [vmem:[#allocation5 + $0x4c0] sm:$0xff] }
 0x36c   : > { %4743 = vmatmul.mubr.f32.gmra.mrb[134].mxu0 %v4387_v5  ;;  %v4395_v5 = vld [vmem:[#allocation5 + $0x4a0] sm:$0xff] }
 0x36d   : > { %v8379_v41 = vpack.c.bf16 %v2066_v52, %v2065_v17  ;;  %v1615_v53 = vpop.permute.xlu1 %1614  ;;  %4747 = vmatprep.mubr.f32.mxu0 %v4392_v18  ;;  %13552 = vst [vmem:[#allocation37_spill] sm:$0xff] %v12055_v22  ;;  %v12062_v18 = vld [vmem:[%s13112_s5 + $0x1f0] sm:$0xff]  ;;  %v4400_v17 = vld [vmem:[#allocation5 + $0x4c8] sm:$0xff]  ;;  %v13554_v52 = vld [vmem:[#allocation57_spill] sm:$0xff] }
 0x36e   : > { %9127 = vset.pattern.permute.xlu1 %v13320_v12  ;;  %v1683_v27 = vmul.f32 %v1615_v53, %v12055_v22 }
 0x36f   : > { %4068 = vperm.xlu1 %9127, %v9325_v47   ;;  %8380 = vmatpush1.bf16.msra.mxu1 %v8379_v41  ;;  %v12067_v41 = vadd.f32 %v11254_v1, %v13554_v52 }
 0x370   : > { %8381 = vmatprep.subr.bf16.mxu1 %v13346_v43  ;;  %4748 = vmatmul.mubr.f32.gmra.mrb[136].mxu0 %v4391_v56 }
 0x371   : > { %4752 = vmatprep.mubr.f32.mxu0 %v4396_v4  ;;  %6066 = vperm.xlu0 %9204, %v12062_v18   ;;  %13555 = vst [vmem:[#allocation40_spill] sm:$0xff] %v12067_v41  ;;  %v1684_v56 = vmul.f32 %v11682_v6, %v12067_v41  ;;  %v4408_v6 = vld [vmem:[#allocation5 + $0x508] sm:$0xff] }
 0x372   : > { %v1935_v47 = vpop.permute.xlu1 %1934 }
 0x373   : > { %9128 = vset.pattern.permute.xlu1 %v13311_v59  ;;  %v2003_v4 = vadd.f32 %v1935_v47, %v1683_v27  ;;  %v2076_v27 = vld [vmem:[#allocation3 + $0x38] sm:$0xff] }
 0x374   : > { %3756 = vperm.xlu1 %9128, %v11991_v42   ;;  %4753 = vmatmul.mubr.f32.gmra.mrb[138].mxu0 %v4395_v5  ;;  %v4403_v42 = vld [vmem:[#allocation5 + $0x4e0] sm:$0xff] }
 0x375   : > { %4757 = vmatprep.mubr.f32.mxu0 %v4400_v17  ;;  %9209 = vset.pattern.permute.xlu0 %v13556_v2  ;;  %v2067_v1 = vmax.f32 %v2003_v4, 0.0  ;;  %v2071_v17 = vld [vmem:[#allocation3 + $0x10] sm:$0xff] }
 0x376   : > { %v1939_v50 = vpop.permute.xlu1 %1938 }
 0x377   : > { %v2004_v34 = vadd.f32 %v1939_v50, %v1684_v56  ;;  %v4407_v50 = vld [vmem:[#allocation5 + $0x500] sm:$0xff] }
 0x378   : > { %9129 = vset.pattern.permute.xlu1 %v13320_v12  ;;  %4758 = vmatmul.mubr.f32.gmra.mrb[140].mxu0 %v4399_v28  ;;  %v2075_v28 = vld [vmem:[#allocation3 + $0x30] sm:$0xff] }
 0x379   : > { %v2068_v53 = vmax.f32 %v2004_v34, 0.0  ;;  %4072 = vperm.xlu1 %9129, %v11846_v7   ;;  %4762 = vmatprep.mubr.f32.mxu0 %v4404_v55  ;;  %v4412_v34 = vld [vmem:[#allocation5 + $0x528] sm:$0xff]  ;;  %v3831_v7 = vmul.f32 %v11700_v62, %v11578_v30 }
 0x37b   : > { %v8382_v5 = vpack.c.bf16 %v2068_v53, %v2067_v1  ;;  %v3677_v52 = vpop.permute.xlu1 %3676  ;;  %v4411_v1 = vld [vmem:[#allocation5 + $0x520] sm:$0xff]  ;;  %v2080_v53 = vld [vmem:[#allocation3 + $0x58] sm:$0xff] }
 0x37c   : > { %v3832_v47 = vmul.f32 %v3677_v52, %v11591_v60  ;;  %4763 = vmatmul.mubr.f32.gmra.mrb[142].mxu0 %v4403_v42  ;;  %v4416_v42 = vld [vmem:[#allocation5 + $0x548] sm:$0xff] }
 0x37d   : > { %9130 = vset.pattern.permute.xlu1 %v13311_v59  ;;  %8383 = vmatpush1.bf16.msra.mxu1 %v8382_v5 }
 0x37e   : > { %3760 = vperm.xlu1 %9130, %v12005_v24   ;;  %4767 = vmatprep.mubr.f32.mxu0 %v4408_v6  ;;  %v4152_v55 = vadd.f32 %v11840_v61, %v3832_v47  ;;  %v9328_v24 = vld [vmem:[%s13112_s5 + $0x1b8] sm:$0xff]  ;;  %v2079_v6 = vld [vmem:[#allocation3 + $0x50] sm:$0xff] }
 0x37f   : > { %8480 = vmatprep.subr.bf16.mxu1 %v13346_v43  ;;  %v2084_v47 = vld [vmem:[#allocation3 + $0x78] sm:$0xff] }
 0x380   : > { %v3993_v56 = vpop.permute.xlu1 %3992  ;;  %2775 = vmatmul.mubr.f32.vlgmr.msra.gmra.mrb[0].mxu1 %v2071_v17  ;;  %4768 = vmatmul.mubr.f32.gmra.mrb[144].mxu0 %v4407_v50  ;;  %v4216_v62 = vmax.f32 %v4152_v55, 0.0  ;;  %v4415_v17 = vld [vmem:[#allocation5 + $0x540] sm:$0xff]  ;;  %v4420_v50 = vld [vmem:[#allocation5 + $0x568] sm:$0xff]  ;;  %v2088_v55 = vld [vmem:[#allocation3 + $0x98] sm:$0xff] }
 0x381   : > { %v4151_v4 = vadd.f32 %v3993_v56, %v3831_v7  ;;  %2779 = vmatprep.mubr.f32.mxu1 %v2076_v27  ;;  %4772 = vmatprep.mubr.f32.mxu0 %v4412_v34  ;;  %v2083_v7 = vld [vmem:[#allocation3 + $0x70] sm:$0xff]  ;;  %v4419_v56 = vld [vmem:[#allocation5 + $0x560] sm:$0xff] }
 0x382   : > { %3764 = vperm.xlu1 %9130, %v9328_v24  }
 0x383   : > { %v4215_v5 = vmax.f32 %v4151_v4, 0.0  ;;  %v4424_v4 = vld [vmem:[#allocation5 + $0x588] sm:$0xff] }
 0x384   : > { %2780 = vmatmul.mubr.f32.gmra.mrb[2].mxu1 %v2075_v28  ;;  %4773 = vmatmul.mubr.f32.gmra.mrb[146].mxu0 %v4411_v1 }
 0x385   : > { %v8433_v61 = vpack.c.bf16 %v4216_v62, %v4215_v5  ;;  %v3681_v52 = vpop.permute.xlu1 %3680  ;;  %2784 = vmatprep.mubr.f32.mxu1 %v2080_v53  ;;  %4777 = vmatprep.mubr.f32.mxu0 %v4416_v42  ;;  %v2092_v42 = vld [vmem:[#allocation3 + $0xb8] sm:$0xff]  ;;  %v4423_v5 = vld [vmem:[#allocation5 + $0x580] sm:$0xff] }
 0x386   : > { %9131 = vset.pattern.permute.xlu1 %v13320_v12  ;;  %v3833_v27 = vmul.f32 %v3681_v52, %v11604_v16 }
 0x387   : > { %4084 = vperm.xlu1 %9131, %v9328_v24   ;;  %8434 = vmatpush1.bf16.msra.mxu0 %v8433_v61  ;;  %v2087_v24 = vld [vmem:[#allocation3 + $0x90] sm:$0xff]  ;;  %v4428_v61 = vld [vmem:[#allocation5 + $0x5a8] sm:$0xff] }
 0x388   : > { %2785 = vmatmul.mubr.f32.gmra.mrb[4].mxu1 %v2079_v6  ;;  %8435 = vmatprep.subr.bf16.mxu0 %v13346_v43  ;;  %v4153_v28 = vadd.f32 %v11867_v39, %v3833_v27  ;;  %v2091_v39 = vld [vmem:[#allocation3 + $0xb0] sm:$0xff]  ;;  %v4427_v27 = vld [vmem:[#allocation5 + $0x5a0] sm:$0xff] }
 0x389   : > { %v3685_v34 = vpop.permute.xlu1 %3684  ;;  %2789 = vmatprep.mubr.f32.mxu1 %v2084_v47  ;;  %4778 = vmatmul.mubr.f32.gmra.mrb[148].mxu0 %v4415_v17  ;;  %v2096_v17 = vld [vmem:[#allocation3 + $0xd8] sm:$0xff] }
 0x38a   : > { %4782 = vmatprep.mubr.f32.mxu0 %v4420_v50  ;;  %v3834_v1 = vmul.f32 %v3685_v34, %v11595_v14  ;;  %v4217_v52 = vmax.f32 %v4153_v28, 0.0  ;;  %v2095_v34 = vld [vmem:[#allocation3 + $0xd0] sm:$0xff]  ;;  %v4431_v28 = vld [vmem:[#allocation5 + $0x5c0] sm:$0xff] }
 0x38b   : > { %9132 = vset.pattern.permute.xlu1 %v13311_v59 }
 0x38c   : > { %3772 = vperm.xlu1 %9132, %v12019_v38   ;;  %2790 = vmatmul.mubr.f32.gmra.mrb[6].mxu1 %v2083_v7  ;;  %v4432_v7 = vld [vmem:[#allocation5 + $0x5c8] sm:$0xff] }
 0x38d   : > { %2794 = vmatprep.mubr.f32.mxu1 %v2088_v55  ;;  %4783 = vmatmul.mubr.f32.gmra.mrb[150].mxu0 %v4419_v56  ;;  %v3835_v55 = vmul.f32 %v11709_v54, %v11624_v15 }
 0x38e   : > { %v4005_v53 = vpop.permute.xlu1 %4004  ;;  %4787 = vmatprep.mubr.f32.mxu0 %v4424_v4 }
 0x38f   : > { %v4154_v62 = vadd.f32 %v4005_v53, %v3834_v1  ;;  %v4436_v53 = vld [vmem:[#allocation5 + $0x5e8] sm:$0xff] }
 0x390   : > { %9133 = vset.pattern.permute.xlu1 %v13320_v12  ;;  %2795 = vmatmul.mubr.f32.gmra.mrb[8].mxu1 %v2087_v24  ;;  %v2099_v24 = vld [vmem:[#allocation3 + $0xf0] sm:$0xff] }
 0x391   : > { %v4218_v6 = vmax.f32 %v4154_v62, 0.0  ;;  %4088 = vperm.xlu1 %9133, %v11861_v48   ;;  %2799 = vmatprep.mubr.f32.mxu1 %v2092_v42  ;;  %v2100_v48 = vld [vmem:[#allocation3 + $0xf8] sm:$0xff] }
 0x392   : > { %4788 = vmatmul.mubr.f32.gmra.mrb[152].mxu0 %v4423_v5  ;;  %v2104_v42 = vld [vmem:[#allocation3 + $0x118] sm:$0xff] }
 0x393   : > { %v8436_v38 = vpack.c.bf16 %v4218_v6, %v4217_v52  ;;  %v3693_v47 = vpop.permute.xlu1 %3692  ;;  %4792 = vmatprep.mubr.f32.mxu0 %v4428_v61  ;;  %v2103_v61 = vld [vmem:[#allocation3 + $0x110] sm:$0xff]  ;;  %v2108_v52 = vld [vmem:[#allocation3 + $0x138] sm:$0xff]  ;;  %v4435_v6 = vld [vmem:[#allocation5 + $0x5e0] sm:$0xff] }
 0x394   : > { %v3836_v50 = vmul.f32 %v3693_v47, %v11614_v25  ;;  %2800 = vmatmul.mubr.f32.gmra.mrb[10].mxu1 %v2091_v39  ;;  %v4440_v39 = vld [vmem:[#allocation5 + $0x608] sm:$0xff] }
 0x395   : > { %9134 = vset.pattern.permute.xlu1 %v13311_v59  ;;  %8437 = vmatpush1.bf16.msra.mxu0 %v8436_v38 }
 0x396   : > { %3776 = vperm.xlu1 %9134, %v12037_v21   ;;  %2804 = vmatprep.mubr.f32.mxu1 %v2096_v17  ;;  %v4156_v56 = vadd.f32 %v11881_v26, %v3836_v50  ;;  %v9329_v21 = vld [vmem:[%s13112_s5 + $0x1d8] sm:$0xff]  ;;  %v2107_v17 = vld [vmem:[#allocation3 + $0x130] sm:$0xff] }
 0x397   : > { %8438 = vmatprep.subr.bf16.mxu0 %v13346_v43  ;;  %4793 = vmatmul.mubr.f32.gmra.mrb[154].mxu0 %v4427_v27  ;;  %v2112_v50 = vld [vmem:[#allocation3 + $0x158] sm:$0xff]  ;;  %v4439_v27 = vld [vmem:[#allocation5 + $0x600] sm:$0xff] }
 0x398   : > { %v4009_v4 = vpop.permute.xlu1 %4008  ;;  %2805 = vmatmul.mubr.f32.gmra.mrb[12].mxu1 %v2095_v34  ;;  %4797 = vmatprep.mubr.f32.mxu0 %v4432_v7  ;;  %v4220_v54 = vmax.f32 %v4156_v56, 0.0  ;;  %v4444_v34 = vld [vmem:[#allocation5 + $0x628] sm:$0xff] }
 0x399   : > { %v4155_v1 = vadd.f32 %v4009_v4, %v3835_v55  ;;  %2809 = vmatprep.mubr.f32.mxu1 %v2100_v48  ;;  %v2111_v55 = vld [vmem:[#allocation3 + $0x150] sm:$0xff]  ;;  %v2116_v4 = vld [vmem:[#allocation3 + $0x178] sm:$0xff] }
 0x39a   : > { %3780 = vperm.xlu1 %9134, %v9329_v21  }
 0x39b   : > { %v4219_v62 = vmax.f32 %v4155_v1, 0.0  ;;  %4798 = vmatmul.mubr.f32.gmra.mrb[156].mxu0 %v4431_v28  ;;  %v4443_v1 = vld [vmem:[#allocation5 + $0x620] sm:$0xff] }
 0x39c   : > { %2810 = vmatmul.mubr.f32.gmra.mrb[14].mxu1 %v2099_v24  ;;  %4802 = vmatprep.mubr.f32.mxu0 %v4436_v53  ;;  %v4448_v24 = vld [vmem:[#allocation5 + $0x648] sm:$0xff] }
 0x39d   : > { %v8439_v26 = vpack.c.bf16 %v4220_v54, %v4219_v62  ;;  %v3697_v5 = vpop.permute.xlu1 %3696  ;;  %2814 = vmatprep.mubr.f32.mxu1 %v2104_v42  ;;  %v2120_v54 = vld [vmem:[#allocation3 + $0x198] sm:$0xff] }
 0x39e   : > { %9135 = vset.pattern.permute.xlu1 %v13320_v12  ;;  %v3837_v38 = vmul.f32 %v3697_v5, %v11658_v51  ;;  %v2119_v5 = vld [vmem:[#allocation3 + $0x190] sm:$0xff] }
 0x39f   : > { %4100 = vperm.xlu1 %9135, %v9329_v21   ;;  %8440 = vmatpush1.bf16.msra.mxu0 %v8439_v26  ;;  %v4447_v26 = vld [vmem:[#allocation5 + $0x640] sm:$0xff] }
 0x3a0   : > { %2815 = vmatmul.mubr.f32.gmra.mrb[16].mxu1 %v2103_v61  ;;  %8441 = vmatprep.subr.bf16.mxu0 %v13346_v43  ;;  %v4157_v7 = vadd.f32 %v11896_v58, %v3837_v38  ;;  %v2115_v58 = vld [vmem:[#allocation3 + $0x170] sm:$0xff]  ;;  %v4452_v61 = vld [vmem:[#allocation5 + $0x668] sm:$0xff]  ;;  %v4451_v38 = vld [vmem:[#allocation5 + $0x660] sm:$0xff] }
 0x3a1   : > { %v3701_v47 = vpop.permute.xlu1 %3700  ;;  %2819 = vmatprep.mubr.f32.mxu1 %v2108_v52  ;;  %4803 = vmatmul.mubr.f32.gmra.mrb[158].mxu0 %v4435_v6  ;;  %v3839_v52 = vmul.f32 %v11729_v33, %v11680_v49 }
 0x3a2   : > { %4807 = vmatprep.mubr.f32.mxu0 %v4440_v39  ;;  %v3838_v48 = vmul.f32 %v3701_v47, %v11665_v9  ;;  %v4221_v53 = vmax.f32 %v4157_v7, 0.0  ;;  %v2123_v47 = vld [vmem:[#allocation3 + $0x1b0] sm:$0xff] }
 0x3a3   : > { %9137 = vset.pattern.permute.xlu1 %v13311_v59  ;;  %v2127_v7 = vld [vmem:[#allocation3 + $0x1d0] sm:$0xff] }
 0x3a4   : > { %3788 = vperm.xlu1 %9137, %v12048_v19   ;;  %2820 = vmatmul.mubr.f32.gmra.mrb[18].mxu1 %v2107_v17  ;;  %v4456_v17 = vld [vmem:[#allocation5 + $0x688] sm:$0xff] }
 0x3a5   : > { %2824 = vmatprep.mubr.f32.mxu1 %v2112_v50  ;;  %4808 = vmatmul.mubr.f32.gmra.mrb[160].mxu0 %v4439_v27  ;;  %v2128_v50 = vld [vmem:[#allocation3 + $0x1d8] sm:$0xff] }
 0x3a6   : > { %v4021_v56 = vpop.permute.xlu1 %4020  ;;  %4812 = vmatprep.mubr.f32.mxu0 %v4444_v34 }
 0x3a7   : > { %v4158_v28 = vadd.f32 %v4021_v56, %v3838_v48  ;;  %v2132_v48 = vld [vmem:[#allocation3 + $0x1f8] sm:$0xff]  ;;  %v4460_v56 = vld [vmem:[#allocation5 + $0x6a8] sm:$0xff] }
 0x3a8   : > { %9138 = vset.pattern.permute.xlu1 %v13320_v12  ;;  %2825 = vmatmul.mubr.f32.gmra.mrb[20].mxu1 %v2111_v55  ;;  %v4455_v55 = vld [vmem:[#allocation5 + $0x680] sm:$0xff] }
 0x3a9   : > { %v4222_v21 = vmax.f32 %v4158_v28, 0.0  ;;  %4104 = vperm.xlu1 %9138, %v11872_v29   ;;  %2829 = vmatprep.mubr.f32.mxu1 %v2116_v4  ;;  %v2124_v29 = vld [vmem:[#allocation3 + $0x1b8] sm:$0xff] }
 0x3aa   : > { %4813 = vmatmul.mubr.f32.gmra.mrb[162].mxu0 %v4443_v1  ;;  %v2131_v1 = vld [vmem:[#allocation3 + $0x1f0] sm:$0xff] }
 0x3ab   : > { %v8442_v19 = vpack.c.bf16 %v4222_v21, %v4221_v53  ;;  %v3709_v42 = vpop.permute.xlu1 %3708  ;;  %4817 = vmatprep.mubr.f32.mxu0 %v4448_v24  ;;  %v2136_v24 = vld [vmem:[#allocation3 + $0x218] sm:$0xff]  ;;  %v4459_v53 = vld [vmem:[#allocation5 + $0x6a0] sm:$0xff]  ;;  %v9331_v21 = vld [vmem:[%s13112_s5 + $0x8] sm:$0xff] }
 0x3ac   : > { %v3840_v62 = vmul.f32 %v3709_v42, %v11692_v32  ;;  %2830 = vmatmul.mubr.f32.gmra.mrb[22].mxu1 %v2115_v58  ;;  %v2135_v42 = vld [vmem:[#allocation3 + $0x210] sm:$0xff] }
 0x3ad   : > { %9139 = vset.pattern.permute.xlu1 %v13311_v59  ;;  %8443 = vmatpush1.bf16.msra.mxu0 %v8442_v19 }
 0x3ae   : > { %3792 = vperm.xlu1 %9139, %v12062_v18   ;;  %2834 = vmatprep.mubr.f32.mxu1 %v2120_v54  ;;  %v4160_v6 = vadd.f32 %v11912_v23, %v3840_v62  ;;  %v9330_v18 = vld [vmem:[%s13112_s5 + $0x1f8] sm:$0xff] }
 0x3af   : > { %8444 = vmatprep.subr.bf16.mxu0 %v13346_v43  ;;  %4818 = vmatmul.mubr.f32.gmra.mrb[164].mxu0 %v4447_v26  ;;  %v2140_v62 = vld [vmem:[#allocation3 + $0x238] sm:$0xff] }
 0x3b0   : > { %v4025_v39 = vpop.permute.xlu1 %4024  ;;  %2835 = vmatmul.mubr.f32.gmra.mrb[24].mxu1 %v2119_v5  ;;  %4822 = vmatprep.mubr.f32.mxu0 %v4452_v61  ;;  %v4224_v33 = vmax.f32 %v4160_v6, 0.0  ;;  %v4463_v5 = vld [vmem:[#allocation5 + $0x6c0] sm:$0xff]  ;;  %v4468_v61 = vld [vmem:[#allocation5 + $0x6e8] sm:$0xff]  ;;  %v2139_v6 = vld [vmem:[#allocation3 + $0x230] sm:$0xff] }
 0x3b1   : > { %v4159_v59 = vadd.f32 %v4025_v39, %v3839_v52  ;;  %2839 = vmatprep.mubr.f32.mxu1 %v2124_v29 }
 0x3b2   : > { %3796 = vperm.xlu1 %9139, %v9330_v18  }
 0x3b3   : > { %v4223_v27 = vmax.f32 %v4159_v59, 0.0  ;;  %4823 = vmatmul.mubr.f32.gmra.mrb[166].mxu0 %v4451_v38  ;;  %v2144_v59 = vld [vmem:[#allocation3 + $0x258] sm:$0xff] }
 0x3b4   : > { %2840 = vmatmul.mubr.f32.gmra.mrb[26].mxu1 %v2123_v47  ;;  %4827 = vmatprep.mubr.f32.mxu0 %v4456_v17  ;;  %v4467_v17 = vld [vmem:[#allocation5 + $0x6e0] sm:$0xff] }
 0x3b5   : > { %v8445_v23 = vpack.c.bf16 %v4224_v33, %v4223_v27  ;;  %v3713_v34 = vpop.permute.xlu1 %3712  ;;  %2844 = vmatprep.mubr.f32.mxu1 %v2128_v50  ;;  %v4472_v50 = vld [vmem:[#allocation5 + $0x708] sm:$0xff]  ;;  %v9333_v33 = vld [vmem:[%s13112_s5 + $0x10] sm:$0xff]  ;;  %v2148_v27 = vld [vmem:[#allocation3 + $0x278] sm:$0xff] }
 0x3b6   : > { %9140 = vset.pattern.permute.xlu1 %v13320_v12  ;;  %v3841_v4 = vmul.f32 %v3713_v34, %v11720_v57  ;;  %v4464_v12 = vld [vmem:[#allocation5 + $0x6c8] sm:$0xff] }
 0x3b7   : > { %4116 = vperm.xlu1 %9140, %v9330_v18   ;;  %8446 = vmatpush1.bf16.msra.mxu0 %v8445_v23  ;;  %v2143_v18 = vld [vmem:[#allocation3 + $0x250] sm:$0xff]  ;;  %v3843_v23 = vmul.f32 %v11749_v20, %v11747_v13 }
 0x3b8   : > { %2845 = vmatmul.mubr.f32.gmra.mrb[28].mxu1 %v2127_v7  ;;  %8447 = vmatprep.subr.bf16.mxu0 %v13346_v43  ;;  %v4161_v58 = vadd.f32 %v11925_v11, %v3841_v4  ;;  %v9332_v11 = vld [vmem:[%s13112_s5] sm:$0xff]  ;;  %v4476_v4 = vld [vmem:[#allocation5 + $0x728] sm:$0xff] }
 0x3b9   : > { %v3717_v28 = vpop.permute.xlu1 %3716  ;;  %2849 = vmatprep.mubr.f32.mxu1 %v2132_v48  ;;  %4828 = vmatmul.mubr.f32.gmra.mrb[168].mxu0 %v4455_v55  ;;  %v4471_v48 = vld [vmem:[#allocation5 + $0x700] sm:$0xff] }
 0x3ba   : > { %4832 = vmatprep.mubr.f32.mxu0 %v4460_v56  ;;  %v3842_v19 = vmul.f32 %v3717_v28, %v11727_v35  ;;  %v4225_v29 = vmax.f32 %v4161_v58, 0.0  ;;  %v2147_v56 = vld [vmem:[#allocation3 + $0x270] sm:$0xff]  ;;  %v9334_v28 = vld [vmem:[%s13112_s5 + $0x18] sm:$0xff]  ;;  %v4475_v58 = vld [vmem:[#allocation5 + $0x720] sm:$0xff] }
 0x3bb   : > { %9142 = vset.pattern.permute.xlu1 %v13496_v3 }
 0x3bc   : > { %5502 = vperm.xlu1 %9142, %v9331_v21   ;;  %2850 = vmatmul.mubr.f32.gmra.mrb[30].mxu1 %v2131_v1  ;;  %v2152_v1 = vld [vmem:[#allocation3 + $0x298] sm:$0xff] }
 0x3bd   : > { %2854 = vmatprep.mubr.f32.mxu1 %v2136_v24  ;;  %4833 = vmatmul.mubr.f32.gmra.mrb[170].mxu0 %v4459_v53  ;;  %v2156_v21 = vld [vmem:[#allocation3 + $0x2b8] sm:$0xff] }
 0x3be   : > { %v4037_v54 = vpop.permute.xlu1 %4036  ;;  %4837 = vmatprep.mubr.f32.mxu0 %v4464_v12  ;;  %v2151_v12 = vld [vmem:[#allocation3 + $0x290] sm:$0xff] }
 0x3bf   : > { %v4162_v26 = vadd.f32 %v4037_v54, %v3842_v19  ;;  %v4480_v19 = vld [vmem:[#allocation5 + $0x748] sm:$0xff] }
 0x3c0   : > { %9143 = vset.pattern.permute.xlu1 %v13515_v37  ;;  %2855 = vmatmul.mubr.f32.gmra.mrb[32].mxu1 %v2135_v42  ;;  %v13557_v42 = vld [vmem:[#allocation104_spill] sm:$0xff] }
 0x3c1   : > { %v4226_v52 = vmax.f32 %v4162_v26, 0.0  ;;  %5818 = vperm.xlu1 %9143, %v9332_v11   ;;  %2859 = vmatprep.mubr.f32.mxu1 %v2140_v62  ;;  %v2155_v26 = vld [vmem:[#allocation3 + $0x2b0] sm:$0xff] }
 0x3c2   : > { %4838 = vmatmul.mubr.f32.gmra.mrb[172].mxu0 %v4463_v5  ;;  %v2160_v5 = vld [vmem:[#allocation3 + $0x2d8] sm:$0xff] }
 0x3c3   : > { %v8448_v39 = vpack.c.bf16 %v4226_v52, %v4225_v29  ;;  %v3725_v38 = vpop.permute.xlu1 %3724  ;;  %4842 = vmatprep.mubr.f32.mxu0 %v4468_v61  ;;  %v4479_v61 = vld [vmem:[#allocation5 + $0x740] sm:$0xff]  ;;  %v4484_v29 = vld [vmem:[#allocation5 + $0x768] sm:$0xff] }
 0x3c4   : > { %v3844_v47 = vmul.f32 %v3725_v38, %v11761_v63  ;;  %2860 = vmatmul.mubr.f32.gmra.mrb[34].mxu1 %v2139_v6  ;;  %v9335_v52 = vld [vmem:[%s13112_s5 + $0x28] sm:$0xff]  ;;  %v13558_v6 = vld [vmem:[#allocation75_spill] sm:$0xff] }
 0x3c5   : > { %9144 = vset.pattern.permute.xlu1 %v13496_v3  ;;  %8449 = vmatpush1.bf16.msra.mxu0 %v8448_v39  ;;  %v2159_v38 = vld [vmem:[#allocation3 + $0x2d0] sm:$0xff] }
 0x3c6   : > { %5506 = vperm.xlu1 %9144, %v9333_v33   ;;  %2864 = vmatprep.mubr.f32.mxu1 %v2144_v59  ;;  %v4164_v34 = vadd.f32 %v11933_v40, %v3844_v47  ;;  %v2164_v47 = vld [vmem:[#allocation3 + $0x2f8] sm:$0xff] }
 0x3c7   : > { %8450 = vmatprep.subr.bf16.mxu0 %v13346_v43  ;;  %4843 = vmatmul.mubr.f32.gmra.mrb[174].mxu0 %v4467_v17 }
 0x3c8   : > { %v4041_v7 = vpop.permute.xlu1 %4040  ;;  %2865 = vmatmul.mubr.f32.gmra.mrb[36].mxu1 %v2143_v18  ;;  %4847 = vmatprep.mubr.f32.mxu0 %v4472_v50  ;;  %v4228_v20 = vmax.f32 %v4164_v34, 0.0  ;;  %v4483_v18 = vld [vmem:[#allocation5 + $0x760] sm:$0xff]  ;;  %v4488_v50 = vld [vmem:[#allocation5 + $0x788] sm:$0xff] }
 0x3c9   : > { %v4163_v55 = vadd.f32 %v4041_v7, %v3843_v23  ;;  %2869 = vmatprep.mubr.f32.mxu1 %v2148_v27  ;;  %v2163_v23 = vld [vmem:[#allocation3 + $0x2f0] sm:$0xff] }
 0x3ca   : > { %5510 = vperm.xlu1 %9144, %v9334_v28  }
 0x3cb   : > { %v4227_v24 = vmax.f32 %v4163_v55, 0.0  ;;  %4848 = vmatmul.mubr.f32.gmra.mrb[176].mxu0 %v4471_v48  ;;  %v2168_v48 = vld [vmem:[#allocation3 + $0x318] sm:$0xff] }
 0x3cc   : > { %2870 = vmatmul.mubr.f32.gmra.mrb[38].mxu1 %v2147_v56  ;;  %4852 = vmatprep.mubr.f32.mxu0 %v4476_v4  ;;  %v13559_v55 = vld [vmem:[#allocation108_spill] sm:$0xff]  ;;  %v4487_v4 = vld [vmem:[#allocation5 + $0x780] sm:$0xff] }
 0x3cd   : > { %v8451_v40 = vpack.c.bf16 %v4228_v20, %v4227_v24  ;;  %v3729_v53 = vpop.permute.xlu1 %3728  ;;  %2874 = vmatprep.mubr.f32.mxu1 %v2152_v1  ;;  %v4492_v1 = vld [vmem:[#allocation5 + $0x7a8] sm:$0xff]  ;;  %v9337_v20 = vld [vmem:[%s13112_s5 + $0x30] sm:$0xff]  ;;  %v2172_v24 = vld [vmem:[#allocation3 + $0x338] sm:$0xff] }
 0x3ce   : > { %9145 = vset.pattern.permute.xlu1 %v13515_v37  ;;  %v3845_v54 = vmul.f32 %v3729_v53, %v13557_v42  ;;  %v13561_v53 = vld [vmem:[#allocation100_spill] sm:$0xff] }
 0x3cf   : > { %5830 = vperm.xlu1 %9145, %v9334_v28   ;;  %8452 = vmatpush1.bf16.msra.mxu0 %v8451_v40  ;;  %v2167_v28 = vld [vmem:[#allocation3 + $0x310] sm:$0xff]  ;;  %v13560_v40 = vld [vmem:[#allocation105_spill] sm:$0xff] }
 0x3d0   : > { %2875 = vmatmul.mubr.f32.gmra.mrb[40].mxu1 %v2151_v12  ;;  %8453 = vmatprep.subr.bf16.mxu0 %v13346_v43  ;;  %v4165_v11 = vadd.f32 %v11946_v46, %v3845_v54  ;;  %v9336_v46 = vld [vmem:[%s13112_s5 + $0x20] sm:$0xff]  ;;  %v3847_v12 = vmul.f32 %v13561_v53, %v13560_v40 }
 0x3d1   : > { %v3733_v62 = vpop.permute.xlu1 %3732  ;;  %2879 = vmatprep.mubr.f32.mxu1 %v2156_v21  ;;  %4853 = vmatmul.mubr.f32.gmra.mrb[178].mxu0 %v4475_v58  ;;  %v9340_v53 = vld [vmem:[%s13112_s5 + $0x40] sm:$0xff] }
 0x3d2   : > { %4857 = vmatprep.mubr.f32.mxu0 %v4480_v19  ;;  %v3846_v39 = vmul.f32 %v3733_v62, %v13558_v6  ;;  %v4229_v33 = vmax.f32 %v4165_v11, 0.0  ;;  %v4491_v19 = vld [vmem:[#allocation5 + $0x7a0] sm:$0xff]  ;;  %v2171_v62 = vld [vmem:[#allocation3 + $0x330] sm:$0xff] }
 0x3d3   : > { %9146 = vset.pattern.permute.xlu1 %v13496_v3 }
 0x3d4   : > { %5518 = vperm.xlu1 %9146, %v9335_v52   ;;  %2880 = vmatmul.mubr.f32.gmra.mrb[42].mxu1 %v2155_v26  ;;  %v4496_v26 = vld [vmem:[#allocation5 + $0x7c8] sm:$0xff] }
 0x3d5   : > { %2884 = vmatprep.mubr.f32.mxu1 %v2160_v5  ;;  %4858 = vmatmul.mubr.f32.gmra.mrb[180].mxu0 %v4479_v61  ;;  %v9338_v5 = vld [vmem:[%s13112_s5 + $0x38] sm:$0xff] }
 0x3d6   : > { %v4053_v59 = vpop.permute.xlu1 %4052  ;;  %4862 = vmatprep.mubr.f32.mxu0 %v4484_v29  ;;  %v2176_v61 = vld [vmem:[#allocation3 + $0x358] sm:$0xff] }
 0x3d7   : > { %v4166_v17 = vadd.f32 %v4053_v59, %v3846_v39  ;;  %v2175_v39 = vld [vmem:[#allocation3 + $0x350] sm:$0xff]  ;;  %v4495_v59 = vld [vmem:[#allocation5 + $0x7c0] sm:$0xff] }
 0x3d8   : > { %9147 = vset.pattern.permute.xlu1 %v13515_v37  ;;  %2885 = vmatmul.mubr.f32.gmra.mrb[44].mxu1 %v2159_v38  ;;  %v2180_v38 = vld [vmem:[#allocation3 + $0x378] sm:$0xff] }
 0x3d9   : > { %v4230_v27 = vmax.f32 %v4166_v17, 0.0  ;;  %5834 = vperm.xlu1 %9147, %v9336_v46   ;;  %2889 = vmatprep.mubr.f32.mxu1 %v2164_v47  ;;  %v4500_v47 = vld [vmem:[#allocation5 + $0x7e8] sm:$0xff]  ;;  %v13562_v17 = vld [vmem:[#allocation32_spill] sm:$0xff]  ;;  %v4499_v46 = vld [vmem:[#allocation5 + $0x7e0] sm:$0xff] }
 0x3da   : > { %4863 = vmatmul.mubr.f32.gmra.mrb[182].mxu0 %v4483_v18 }
 0x3db   : > { %v8454_v34 = vpack.c.bf16 %v4230_v27, %v4229_v33  ;;  %v3741_v7 = vpop.permute.xlu1 %3740  ;;  %4867 = vmatprep.mubr.f32.mxu0 %v4488_v50  ;;  %v2179_v33 = vld [vmem:[#allocation3 + $0x370] sm:$0xff]  ;;  %v2184_v27 = vld [vmem:[#allocation3 + $0x398] sm:$0xff] }
 0x3dc   : > { %v3848_v56 = vmul.f32 %v3741_v7, %v13559_v55  ;;  %2890 = vmatmul.mubr.f32.gmra.mrb[46].mxu1 %v2163_v23  ;;  %v4250_v23 = vld [vmem:[#allocation5 + $0x18] sm:$0xff] }
 0x3dd   : > { %9148 = vset.pattern.permute.xlu1 %v13496_v3  ;;  %8455 = vmatpush1.bf16.msra.mxu0 %v8454_v34  ;;  %v9339_v34 = vld [vmem:[%s13112_s5 + $0x48] sm:$0xff] }
 0x3de   : > { %5522 = vperm.xlu1 %9148, %v9337_v20   ;;  %2894 = vmatprep.mubr.f32.mxu1 %v2168_v48  ;;  %v4168_v21 = vadd.f32 %v11963_v36, %v3848_v56  ;;  %v2183_v56 = vld [vmem:[#allocation3 + $0x390] sm:$0xff] }
 0x3df   : > { %8456 = vmatprep.subr.bf16.mxu0 %v13346_v43  ;;  %4868 = vmatmul.mubr.f32.gmra.mrb[184].mxu0 %v4487_v4 }
 0x3e0   : > { %v4057_v58 = vpop.permute.xlu1 %4056  ;;  %2895 = vmatmul.mubr.f32.gmra.mrb[48].mxu1 %v2167_v28  ;;  %4872 = vmatprep.mubr.f32.mxu0 %v4492_v1  ;;  %v4232_v29 = vmax.f32 %v4168_v21, 0.0  ;;  %v2188_v28 = vld [vmem:[#allocation3 + $0x3b8] sm:$0xff] }
 0x3e1   : > { %v4167_v54 = vadd.f32 %v4057_v58, %v3847_v12  ;;  %2899 = vmatprep.mubr.f32.mxu1 %v2172_v24  ;;  %v2192_v58 = vld [vmem:[#allocation3 + $0x3d8] sm:$0xff] }
 0x3e2   : > { %5526 = vperm.xlu1 %9148, %v9338_v5  }
 0x3e3   : > { %v4231_v52 = vmax.f32 %v4167_v54, 0.0  ;;  %4873 = vmatmul.mubr.f32.gmra.mrb[186].mxu0 %v4491_v19  ;;  %v2191_v54 = vld [vmem:[#allocation3 + $0x3d0] sm:$0xff] }
 0x3e4   : > { %2900 = vmatmul.mubr.f32.gmra.mrb[50].mxu1 %v2171_v62  ;;  %4877 = vmatprep.mubr.f32.mxu0 %v4496_v26  ;;  %v9341_v62 = vld [vmem:[%s13112_s5 + $0x50] sm:$0xff]  ;;  %v2196_v26 = vld [vmem:[#allocation3 + $0x3f8] sm:$0xff] }
 0x3e5   : > { %v8457_v36 = vpack.c.bf16 %v4232_v29, %v4231_v52  ;;  %v3745_v11 = vpop.permute.xlu1 %3744  ;;  %2904 = vmatprep.mubr.f32.mxu1 %v2176_v61 }
 0x3e6   : > { %9149 = vset.pattern.permute.xlu1 %v13515_v37  ;;  %v3849_v18 = vmul.f32 %v3745_v11, %v13562_v17  ;;  %v2195_v11 = vld [vmem:[#allocation3 + $0x3f0] sm:$0xff] }
 0x3e7   : > { %5846 = vperm.xlu1 %9149, %v9338_v5   ;;  %8458 = vmatpush1.bf16.msra.mxu0 %v8457_v36  ;;  %v13563_v5 = vld [vmem:[#allocation29_spill] sm:$0xff] }
 0x3e8   : > { %2905 = vmatmul.mubr.f32.gmra.mrb[52].mxu1 %v2175_v39  ;;  %8459 = vmatprep.subr.bf16.mxu0 %v13346_v43  ;;  %v4169_v7 = vadd.f32 %v11975_v31, %v3849_v18  ;;  %v2187_v31 = vld [vmem:[#allocation3 + $0x3b0] sm:$0xff]  ;;  %v3851_v61 = vmul.f32 %v13563_v5, %v11902_v44  ;;  %v9342_v39 = vld [vmem:[%s13112_s5 + $0x58] sm:$0xff] }
 0x3e9   : > { %v3749_v50 = vpop.permute.xlu1 %3748  ;;  %2909 = vmatprep.mubr.f32.mxu1 %v2180_v38  ;;  %4878 = vmatmul.mubr.f32.gmra.mrb[188].mxu0 %v4495_v59  ;;  %v2200_v38 = vld [vmem:[#allocation3 + $0x418] sm:$0xff] }
 0x3ea   : > { %4882 = vmatprep.mubr.f32.mxu0 %v4500_v47  ;;  %v3850_v48 = vmul.f32 %v3749_v50, %v11886_v8  ;;  %v4233_v20 = vmax.f32 %v4169_v7, 0.0  ;;  %v2208_v7 = vld [vmem:[#allocation3 + $0x458] sm:$0xff] }
 0x3eb   : > { %9150 = vset.pattern.permute.xlu1 %v13496_v3 }
 0x3ec   : > { %5534 = vperm.xlu1 %9150, %v9339_v34   ;;  %2910 = vmatmul.mubr.f32.gmra.mrb[54].mxu1 %v2179_v33  ;;  %v2204_v33 = vld [vmem:[#allocation3 + $0x438] sm:$0xff]  ;;  %v2203_v34 = vld [vmem:[#allocation3 + $0x430] sm:$0xff] }
 0x3ed   : > { %2914 = vmatprep.mubr.f32.mxu1 %v2184_v27  ;;  %4883 = vmatmul.mubr.f32.gmra.mrb[190].mxu0 %v4499_v46  ;;  %v13564_v27 = vld [vmem:[#allocation34_spill] sm:$0xff] }
 0x3ee   : > { %v4069_v4 = vpop.permute.xlu1 %4068  ;;  %4952 = vmatprep.mubr.f32.mxu0 %v4250_v23 }
 0x3ef   : > { %v4170_v1 = vadd.f32 %v4069_v4, %v3850_v48  ;;  %v9343_v48 = vld [vmem:[%s13112_s5 + $0x68] sm:$0xff] }
 0x3f0   : > { %9151 = vset.pattern.permute.xlu1 %v13515_v37  ;;  %2915 = vmatmul.mubr.f32.gmra.mrb[56].mxu1 %v2183_v56  ;;  %v13565_v4 = vld [vmem:[#allocation82_spill] sm:$0xff] }
 0x3f1   : > { %v4234_v24 = vmax.f32 %v4170_v1, 0.0  ;;  %5850 = vperm.xlu1 %9151, %v9340_v53   ;;  %2919 = vmatprep.mubr.f32.mxu1 %v2188_v28  ;;  %v2207_v1 = vld [vmem:[#allocation3 + $0x450] sm:$0xff] }
 0x3f3   : > { %v8460_v12 = vpack.c.bf16 %v4234_v24, %v4233_v20  ;;  %v3757_v21 = vpop.permute.xlu1 %3756  ;;  %v2212_v24 = vld [vmem:[#allocation3 + $0x478] sm:$0xff] }
 0x3f4   : > { %v3852_v19 = vmul.f32 %v3757_v21, %v11910_v45  ;;  %2920 = vmatmul.mubr.f32.gmra.mrb[58].mxu1 %v2187_v31  ;;  %v9344_v21 = vld [vmem:[%s13112_s5 + $0x60] sm:$0xff] }
 0x3f5   : > { %9152 = vset.pattern.permute.xlu1 %v13496_v3  ;;  %8461 = vmatpush1.bf16.msra.mxu0 %v8460_v12 }
 0x3f6   : > { %5538 = vperm.xlu1 %9152, %v9341_v62   ;;  %2924 = vmatprep.mubr.f32.mxu1 %v2192_v58  ;;  %v4172_v29 = vadd.f32 %v11986_v10, %v3852_v19  ;;  %v2199_v10 = vld [vmem:[#allocation3 + $0x410] sm:$0xff]  ;;  %v2216_v62 = vld [vmem:[#allocation3 + $0x498] sm:$0xff] }
 0x3f7   : > { %8462 = vmatprep.subr.bf16.mxu0 %v13346_v43  ;;  %v2211_v58 = vld [vmem:[#allocation3 + $0x470] sm:$0xff] }
 0x3f8   : > { %v4073_v52 = vpop.permute.xlu1 %4072  ;;  %2925 = vmatmul.mubr.f32.gmra.mrb[60].mxu1 %v2191_v54  ;;  %v4236_v59 = vmax.f32 %v4172_v29, 0.0  ;;  %v9345_v29 = vld [vmem:[%s13112_s5 + $0x70] sm:$0xff] }
 0x3f9   : > { %v4171_v36 = vadd.f32 %v4073_v52, %v3851_v61  ;;  %2929 = vmatprep.mubr.f32.mxu1 %v2196_v26  ;;  %v13566_v26 = vld [vmem:[#allocation14_spill] sm:$0xff]  ;;  %v2215_v61 = vld [vmem:[#allocation3 + $0x490] sm:$0xff]  ;;  %v2220_v52 = vld [vmem:[#allocation3 + $0x4b8] sm:$0xff] }
 0x3fa   : > { %5542 = vperm.xlu1 %9152, %v9342_v39  }
 0x3fb   : > { %v4235_v47 = vmax.f32 %v4171_v36, 0.0  ;;  %v13567_v36 = vld [vmem:[#allocation33_spill] sm:$0xff] }
 0x3fc   : > { %2930 = vmatmul.mubr.f32.gmra.mrb[62].mxu1 %v2195_v11  ;;  %v13568_v11 = vld [vmem:[#allocation30_spill] sm:$0xff] }
 0x3fd   : > { %v8463_v18 = vpack.c.bf16 %v4236_v59, %v4235_v47  ;;  %v3761_v50 = vpop.permute.xlu1 %3760  ;;  %2934 = vmatprep.mubr.f32.mxu1 %v2200_v38  ;;  %v13569_v38 = vld [vmem:[#allocation38_spill] sm:$0xff] }
 0x3fe   : > { %9153 = vset.pattern.permute.xlu1 %v13515_v37  ;;  %v3853_v46 = vmul.f32 %v3761_v50, %v13564_v27 }
 0x3ff   : > { %5862 = vperm.xlu1 %9153, %v9342_v39   ;;  %8464 = vmatpush1.bf16.msra.mxu0 %v8463_v18  ;;  %v3855_v39 = vmul.f32 %v13568_v11, %v13567_v36 }
 0x400   : > { %2935 = vmatmul.mubr.f32.gmra.mrb[64].mxu1 %v2199_v10  ;;  %8465 = vmatprep.subr.bf16.mxu0 %v13346_v43  ;;  %v4173_v56 = vadd.f32 %v12008_v0, %v3853_v46  ;;  %v12213_v0 = vpop.permute.xlu0 %4112  ;;  %v2219_v10 = vld [vmem:[#allocation3 + $0x4b0] sm:$0xff]  ;;  %v2224_v46 = vld [vmem:[#allocation3 + $0x4d8] sm:$0xff] }
 0x401   : > { %v3765_v23 = vpop.permute.xlu1 %3764  ;;  %2939 = vmatprep.mubr.f32.mxu1 %v2204_v33  ;;  %v9346_v33 = vld [vmem:[%s13112_s5 + $0x78] sm:$0xff] }
 0x402   : > { %v3854_v28 = vmul.f32 %v3765_v23, %v13565_v4  ;;  %v4237_v31 = vmax.f32 %v4173_v56, 0.0  ;;  %v2223_v56 = vld [vmem:[#allocation3 + $0x4d0] sm:$0xff] }
 0x403   : > { %9154 = vset.pattern.permute.xlu1 %v13496_v3 }
 0x404   : > { %5550 = vperm.xlu1 %9154, %v9343_v48   ;;  %2940 = vmatmul.mubr.f32.gmra.mrb[66].mxu1 %v2203_v34  ;;  %v12224_v47 = vpop.permute.xlu0 %5498 }
 0x405   : > { %2944 = vmatprep.mubr.f32.mxu1 %v2208_v7 }
 0x406   : > { %v4085_v20 = vpop.permute.xlu1 %4084 }
 0x407   : > { %v4174_v53 = vadd.f32 %v4085_v20, %v3854_v28  ;;  %v13570_v20 = vld [vmem:[#allocation36_spill] sm:$0xff] }
 0x408   : > { %9155 = vset.pattern.permute.xlu1 %v13515_v37  ;;  %2945 = vmatmul.mubr.f32.gmra.mrb[68].mxu1 %v2207_v1  ;;  %v12229_v28 = vpop.permute.xlu0 %5514  ;;  %v2228_v1 = vld [vmem:[#allocation3 + $0x4f8] sm:$0xff] }
 0x409   : > { %v4238_v12 = vmax.f32 %v4174_v53, 0.0  ;;  %5866 = vperm.xlu1 %9155, %v9344_v21   ;;  %2949 = vmatprep.mubr.f32.mxu1 %v2212_v24 }
 0x40b   : > { %v8466_v19 = vpack.c.bf16 %v4238_v12, %v4237_v31  ;;  %v3773_v54 = vpop.permute.xlu1 %3772  ;;  %v2227_v31 = vld [vmem:[#allocation3 + $0x4f0] sm:$0xff]  ;;  %v2232_v12 = vld [vmem:[#allocation3 + $0x518] sm:$0xff] }
 0x40c   : > { %v3856_v5 = vmul.f32 %v3773_v54, %v13566_v26  ;;  %2950 = vmatmul.mubr.f32.gmra.mrb[70].mxu1 %v2211_v58  ;;  %v12235_v21 = vpop.permute.xlu0 %5530  ;;  %v9347_v58 = vld [vmem:[%s13112_s5 + $0x88] sm:$0xff]  ;;  %v4289_v26 = vld [vmem:[#allocation5 + $0x150] sm:$0xff] }
 0x40d   : > { %9156 = vset.pattern.permute.xlu1 %v13496_v3  ;;  %8467 = vmatpush1.bf16.msra.mxu0 %v8466_v19  ;;  %v13571_v19 = vld [vmem:[#allocation89_spill] sm:$0xff] }
 0x40e   : > { %5554 = vperm.xlu1 %9156, %v9345_v29   ;;  %2954 = vmatprep.mubr.f32.mxu1 %v2216_v62  ;;  %v4176_v59 = vadd.f32 %v13569_v38, %v3856_v5  ;;  %v13572_v62 = vld [vmem:[#allocation61_spill] sm:$0xff] }
 0x40f   : > { %8468 = vmatprep.subr.bf16.mxu0 %v13346_v43 }
 0x410   : > { %v4089_v18 = vpop.permute.xlu1 %4088  ;;  %2955 = vmatmul.mubr.f32.gmra.mrb[72].mxu1 %v2215_v61  ;;  %v4240_v23 = vmax.f32 %v4176_v59, 0.0  ;;  %v2231_v61 = vld [vmem:[#allocation3 + $0x510] sm:$0xff]  ;;  %v9348_v59 = vld [vmem:[%s13112_s5 + $0x80] sm:$0xff] }
 0x411   : > { %v4175_v50 = vadd.f32 %v4089_v18, %v3855_v39  ;;  %2959 = vmatprep.mubr.f32.mxu1 %v2220_v52  ;;  %v2236_v52 = vld [vmem:[#allocation3 + $0x538] sm:$0xff]  ;;  %v2235_v18 = vld [vmem:[#allocation3 + $0x530] sm:$0xff] }
 0x412   : > { %5558 = vperm.xlu1 %9156, %v9346_v33  }
 0x413   : > { %v4239_v34 = vmax.f32 %v4175_v50, 0.0  ;;  %v12246_v50 = vpop.permute.xlu0 %5546 }
 0x414   : > { %2960 = vmatmul.mubr.f32.gmra.mrb[74].mxu1 %v2219_v10 }
 0x415   : > { %v8469_v7 = vpack.c.bf16 %v4240_v23, %v4239_v34  ;;  %v3777_v48 = vpop.permute.xlu1 %3776  ;;  %2964 = vmatprep.mubr.f32.mxu1 %v2224_v46  ;;  %v2240_v46 = vld [vmem:[#allocation3 + $0x558] sm:$0xff] }
 0x416   : > { %9157 = vset.pattern.permute.xlu1 %v13515_v37  ;;  %v3857_v24 = vmul.f32 %v3777_v48, %v13570_v20  ;;  %v13573_v23 = vld [vmem:[#allocation16_spill] sm:$0xff]  ;;  %v9349_v48 = vld [vmem:[%s13112_s5 + $0x90] sm:$0xff] }
 0x417   : > { %5878 = vperm.xlu1 %9157, %v9346_v33   ;;  %8470 = vmatpush1.bf16.msra.mxu0 %v8469_v7  ;;  %v2239_v7 = vld [vmem:[#allocation3 + $0x550] sm:$0xff] }
 0x418   : > { %2965 = vmatmul.mubr.f32.gmra.mrb[76].mxu1 %v2223_v56  ;;  %8471 = vmatprep.subr.bf16.mxu0 %v13346_v43  ;;  %v4177_v54 = vadd.f32 %v13571_v19, %v3857_v24  ;;  %v2244_v56 = vld [vmem:[#allocation3 + $0x578] sm:$0xff]  ;;  %v13575_v24 = vld [vmem:[#allocation31_spill] sm:$0xff] }
 0x419   : > { %v3781_v53 = vpop.permute.xlu1 %3780  ;;  %2969 = vmatprep.mubr.f32.mxu1 %v2228_v1  ;;  %v13574_v1 = vld [vmem:[#allocation35_spill] sm:$0xff] }
 0x41a   : > { %v3858_v5 = vmul.f32 %v3781_v53, %v13572_v62  ;;  %v4241_v39 = vmax.f32 %v4177_v54, 0.0  ;;  %v3859_v53 = vmul.f32 %v13575_v24, %v13574_v1  ;;  %v9358_v1 = vld [vmem:[%s13112_s5 + $0xd8] sm:$0xff] }
 0x41b   : > { %9158 = vset.pattern.permute.xlu1 %v13496_v3 }
 0x41c   : > { %5566 = vperm.xlu1 %9158, %v9347_v58   ;;  %2970 = vmatmul.mubr.f32.gmra.mrb[78].mxu1 %v2227_v31  ;;  %v13576_v31 = vld [vmem:[#allocation63_spill] sm:$0xff]  ;;  %v12257_v58 = vpop.permute.xlu0 %5562 }
 0x41d   : > { %2974 = vmatprep.mubr.f32.mxu1 %v2232_v12 }
 0x41e   : > { %v4101_v29 = vpop.permute.xlu1 %4100 }
 0x41f   : > { %v4178_v11 = vadd.f32 %v4101_v29, %v3858_v5  ;;  %v2243_v5 = vld [vmem:[#allocation3 + $0x570] sm:$0xff]  ;;  %v2248_v29 = vld [vmem:[#allocation3 + $0x598] sm:$0xff] }
 0x420   : > { %9159 = vset.pattern.permute.xlu1 %v13515_v37  ;;  %2975 = vmatmul.mubr.f32.gmra.mrb[80].mxu1 %v2231_v61  ;;  %v9350_v61 = vld [vmem:[%s13112_s5 + $0x98] sm:$0xff] }
 0x421   : > { %v4242_v38 = vmax.f32 %v4178_v11, 0.0  ;;  %5882 = vperm.xlu1 %9159, %v9348_v59   ;;  %2979 = vmatprep.mubr.f32.mxu1 %v2236_v52  ;;  %v2247_v59 = vld [vmem:[#allocation3 + $0x590] sm:$0xff] }
 0x423   : > { %v8472_v10 = vpack.c.bf16 %v4242_v38, %v4241_v39  ;;  %v3789_v33 = vpop.permute.xlu1 %3788 }
 0x424   : > { %v3860_v34 = vmul.f32 %v3789_v33, %v13573_v23  ;;  %2980 = vmatmul.mubr.f32.gmra.mrb[82].mxu1 %v2235_v18  ;;  %v12262_v18 = vpop.permute.xlu0 %5578  ;;  %v2300_v23 = vld [vmem:[#allocation3 + $0x738] sm:$0xff] }
 0x425   : > { %9160 = vset.pattern.permute.xlu1 %v13496_v3  ;;  %8473 = vmatpush1.bf16.msra.mxu0 %v8472_v10  ;;  %v2252_v10 = vld [vmem:[#allocation3 + $0x5b8] sm:$0xff] }
 0x426   : > { %5570 = vperm.xlu1 %9160, %v9349_v48   ;;  %2984 = vmatprep.mubr.f32.mxu1 %v2240_v46  ;;  %v4180_v12 = vadd.f32 %v13576_v31, %v3860_v34  ;;  %v2251_v34 = vld [vmem:[#allocation3 + $0x5b0] sm:$0xff] }
 0x427   : > { %8474 = vmatprep.subr.bf16.mxu0 %v13346_v43  ;;  %v2255_v31 = vld [vmem:[#allocation3 + $0x5d0] sm:$0xff] }
 0x428   : > { %v4105_v19 = vpop.permute.xlu1 %4104  ;;  %2985 = vmatmul.mubr.f32.gmra.mrb[84].mxu1 %v2239_v7  ;;  %v4244_v52 = vmax.f32 %v4180_v12, 0.0  ;;  %v2256_v7 = vld [vmem:[#allocation3 + $0x5d8] sm:$0xff]  ;;  %v12268_v48 = vpop.permute.xlu0 %5594 }
 0x429   : > { %v4179_v54 = vadd.f32 %v4105_v19, %v3859_v53  ;;  %2989 = vmatprep.mubr.f32.mxu1 %v2244_v56  ;;  %v9351_v56 = vld [vmem:[%s13112_s5 + $0xa8] sm:$0xff]  ;;  %v2260_v19 = vld [vmem:[#allocation3 + $0x5f8] sm:$0xff] }
 0x42a   : > { %5574 = vperm.xlu1 %9160, %v9350_v61  }
 0x42b   : > { %v4243_v11 = vmax.f32 %v4179_v54, 0.0 }
 0x42c   : > { %2990 = vmatmul.mubr.f32.gmra.mrb[86].mxu1 %v2243_v5 }
 0x42d   : > { %v8475_v39 = vpack.c.bf16 %v4244_v52, %v4243_v11  ;;  %v3793_v38 = vpop.permute.xlu1 %3792  ;;  %2994 = vmatprep.mubr.f32.mxu1 %v2248_v29  ;;  %v9352_v29 = vld [vmem:[%s13112_s5 + $0xa0] sm:$0xff]  ;;  %v2259_v52 = vld [vmem:[#allocation3 + $0x5f0] sm:$0xff] }
 0x42e   : > { %9161 = vset.pattern.permute.xlu1 %v13515_v37  ;;  %v3861_v33 = vmul.f32 %v3793_v38, %v12055_v22  ;;  %v2264_v38 = vld [vmem:[#allocation3 + $0x618] sm:$0xff] }
 0x42f   : > { %5894 = vperm.xlu1 %9161, %v9350_v61   ;;  %8476 = vmatpush1.bf16.msra.mxu0 %v8475_v39 }
 0x430   : > { %2995 = vmatmul.mubr.f32.gmra.mrb[88].mxu1 %v2247_v59  ;;  %8477 = vmatprep.subr.bf16.mxu0 %v13346_v43  ;;  %v4181_v24 = vadd.f32 %v12213_v0, %v3861_v33  ;;  %v12279_v0 = vpop.permute.xlu0 %5610  ;;  %v13577_v59 = vld [vmem:[#allocation77_spill] sm:$0xff]  ;;  %v2263_v33 = vld [vmem:[#allocation3 + $0x610] sm:$0xff] }
 0x431   : > { %v3797_v46 = vpop.permute.xlu1 %3796  ;;  %2999 = vmatprep.mubr.f32.mxu1 %v2252_v10 }
 0x432   : > { %v3862_v53 = vmul.f32 %v3797_v46, %v12067_v41  ;;  %v4245_v5 = vmax.f32 %v4181_v24, 0.0  ;;  %v4249_v46 = vld [vmem:[#allocation5 + $0x10] sm:$0xff]  ;;  %v4254_v24 = vld [vmem:[#allocation5 + $0x38] sm:$0xff] }
 0x433   : > { %9162 = vset.pattern.permute.xlu1 %v13496_v3 }
 0x434   : > { %5582 = vperm.xlu1 %9162, %v9351_v56   ;;  %3000 = vmatmul.mubr.f32.gmra.mrb[90].mxu1 %v2251_v34  ;;  %v5823_v34 = vpop.permute.xlu0 %5822  ;;  %v2268_v56 = vld [vmem:[#allocation3 + $0x638] sm:$0xff] }
 0x435   : > { %3004 = vmatprep.mubr.f32.mxu1 %v2256_v7  ;;  %v9353_v7 = vld [vmem:[%s13112_s5 + $0xb0] sm:$0xff] }
 0x436   : > { %v4117_v12 = vpop.permute.xlu1 %4116 }
 0x437   : > { %v4182_v54 = vadd.f32 %v4117_v12, %v3862_v53  ;;  %v13578_v53 = vld [vmem:[#allocation78_spill] sm:$0xff] }
 0x438   : > { %9163 = vset.pattern.permute.xlu1 %v13515_v37  ;;  %3005 = vmatmul.mubr.f32.gmra.mrb[92].mxu1 %v2255_v31  ;;  %v5753_v31 = vmul.f32 %v12224_v47, %v13578_v53 }
 0x439   : > { %v4246_v61 = vmax.f32 %v4182_v54, 0.0  ;;  %5898 = vperm.xlu1 %9163, %v9352_v29   ;;  %3009 = vmatprep.mubr.f32.mxu1 %v2260_v19  ;;  %v9354_v29 = vld [vmem:[%s13112_s5 + $0xb8] sm:$0xff] }
 0x43b   : > { %v8478_v11 = vpack.c.bf16 %v4246_v61, %v4245_v5  ;;  %v5503_v39 = vpop.permute.xlu1 %5502  ;;  %v2267_v5 = vld [vmem:[#allocation3 + $0x630] sm:$0xff] }
 0x43c   : > { %v5754_v10 = vmul.f32 %v5503_v39, %v13577_v59  ;;  %3010 = vmatmul.mubr.f32.gmra.mrb[94].mxu1 %v2259_v52  ;;  %v4253_v61 = vld [vmem:[#allocation5 + $0x30] sm:$0xff]  ;;  %v2272_v52 = vld [vmem:[#allocation3 + $0x658] sm:$0xff] }
 0x43d   : > { %9164 = vset.pattern.permute.xlu1 %v13496_v3  ;;  %8479 = vmatpush1.bf16.msra.mxu0 %v8478_v11  ;;  %v4258_v11 = vld [vmem:[#allocation5 + $0x58] sm:$0xff] }
 0x43e   : > { %5586 = vperm.xlu1 %9164, %v9353_v7   ;;  %3014 = vmatprep.mubr.f32.mxu1 %v2264_v38  ;;  %v6074_v12 = vadd.f32 %v5823_v34, %v5754_v10  ;;  %v2276_v34 = vld [vmem:[#allocation3 + $0x678] sm:$0xff] }
 0x43f   : > { %8528 = vmatprep.subr.bf16.mxu0 %v13346_v43  ;;  %v4262_v7 = vld [vmem:[#allocation5 + $0x78] sm:$0xff] }
 0x440   : > { %v5819_v19 = vpop.permute.xlu1 %5818  ;;  %3015 = vmatmul.mubr.f32.gmra.mrb[96].mxu1 %v2263_v33  ;;  %4953 = vmatmul.mubr.f32.vlgmr.msra.gmra.mrb[64].mxu0 %v4249_v46  ;;  %v6138_v39 = vmax.f32 %v6074_v12, 0.0  ;;  %v2271_v33 = vld [vmem:[#allocation3 + $0x650] sm:$0xff] }
 0x441   : > { %v6073_v54 = vadd.f32 %v5819_v19, %v5753_v31  ;;  %3019 = vmatprep.mubr.f32.mxu1 %v2268_v56  ;;  %4957 = vmatprep.mubr.f32.mxu0 %v4254_v24  ;;  %v4257_v46 = vld [vmem:[#allocation5 + $0x50] sm:$0xff]  ;;  %v13579_v56 = vld [vmem:[#allocation84_spill] sm:$0xff] }
 0x442   : > { %5590 = vperm.xlu1 %9164, %v9354_v29   ;;  %v2275_v12 = vld [vmem:[#allocation3 + $0x670] sm:$0xff] }
 0x443   : > { %v6137_v47 = vmax.f32 %v6073_v54, 0.0  ;;  %v4261_v19 = vld [vmem:[#allocation5 + $0x70] sm:$0xff]  ;;  %v2280_v54 = vld [vmem:[#allocation3 + $0x698] sm:$0xff] }
 0x444   : > { %3020 = vmatmul.mubr.f32.gmra.mrb[98].mxu1 %v2267_v5  ;;  %4958 = vmatmul.mubr.f32.gmra.mrb[66].mxu0 %v4253_v61  ;;  %v4266_v5 = vld [vmem:[#allocation5 + $0x98] sm:$0xff]  ;;  %v5827_v61 = vpop.permute.xlu0 %5826 }
 0x445   : > { %v8481_v38 = vpack.c.bf16 %v6138_v39, %v6137_v47  ;;  %v5507_v10 = vpop.permute.xlu1 %5506  ;;  %3024 = vmatprep.mubr.f32.mxu1 %v2272_v52  ;;  %4962 = vmatprep.mubr.f32.mxu0 %v4258_v11  ;;  %v13580_v11 = vld [vmem:[#allocation85_spill] sm:$0xff]  ;;  %v2279_v47 = vld [vmem:[#allocation3 + $0x690] sm:$0xff] }
 0x446   : > { %9165 = vset.pattern.permute.xlu1 %v13515_v37  ;;  %v5755_v24 = vmul.f32 %v5507_v10, %v13579_v56  ;;  %v4265_v10 = vld [vmem:[#allocation5 + $0x90] sm:$0xff] }
 0x447   : > { %5910 = vperm.xlu1 %9165, %v9354_v29   ;;  %8482 = vmatpush1.bf16.msra.mxu1 %v8481_v38  ;;  %v9355_v29 = vld [vmem:[%s13112_s5 + $0xc8] sm:$0xff] }
 0x448   : > { %3025 = vmatmul.mubr.f32.gmra.mrb[100].mxu1 %v2271_v33  ;;  %4963 = vmatmul.mubr.f32.gmra.mrb[68].mxu0 %v4257_v46  ;;  %v6075_v52 = vadd.f32 %v5827_v61, %v5755_v24  ;;  %v2284_v46 = vld [vmem:[#allocation3 + $0x6b8] sm:$0xff]  ;;  %v9356_v24 = vld [vmem:[%s13112_s5 + $0xc0] sm:$0xff]  ;;  %v13581_v61 = vld [vmem:[#allocation90_spill] sm:$0xff] }
 0x449   : > { %v5511_v31 = vpop.permute.xlu1 %5510  ;;  %3029 = vmatprep.mubr.f32.mxu1 %v2276_v34  ;;  %4967 = vmatprep.mubr.f32.mxu0 %v4262_v7  ;;  %v4270_v34 = vld [vmem:[#allocation5 + $0xb8] sm:$0xff] }
 0x44a   : > { %8483 = vmatprep.subr.bf16.mxu1 %v13346_v43  ;;  %v5756_v39 = vmul.f32 %v5511_v31, %v13580_v11  ;;  %v6139_v7 = vmax.f32 %v6075_v52, 0.0  ;;  %v2283_v31 = vld [vmem:[#allocation3 + $0x6b0] sm:$0xff] }
 0x44b   : > { %9166 = vset.pattern.permute.xlu1 %v13496_v3 }
 0x44c   : > { %5598 = vperm.xlu1 %9166, %v9355_v29   ;;  %3030 = vmatmul.mubr.f32.gmra.mrb[102].mxu1 %v2275_v12  ;;  %v4269_v12 = vld [vmem:[#allocation5 + $0xb0] sm:$0xff] }
 0x44d   : > { %4968 = vmatmul.mubr.f32.gmra.mrb[70].mxu0 %v4261_v19  ;;  %3034 = vmatprep.mubr.f32.mxu1 %v2280_v54 }
 0x44e   : > { %v5831_v38 = vpop.permute.xlu1 %5830  ;;  %4972 = vmatprep.mubr.f32.mxu0 %v4266_v5 }
 0x44f   : > { %v6076_v33 = vadd.f32 %v5831_v38, %v5756_v39  ;;  %v2288_v39 = vld [vmem:[#allocation3 + $0x6d8] sm:$0xff]  ;;  %v2287_v38 = vld [vmem:[#allocation3 + $0x6d0] sm:$0xff] }
 0x450   : > { %9167 = vset.pattern.permute.xlu1 %v13515_v37  ;;  %3035 = vmatmul.mubr.f32.gmra.mrb[104].mxu1 %v2279_v47  ;;  %v4274_v47 = vld [vmem:[#allocation5 + $0xd8] sm:$0xff] }
 0x451   : > { %v6140_v22 = vmax.f32 %v6076_v33, 0.0  ;;  %4973 = vmatmul.mubr.f32.gmra.mrb[72].mxu0 %v4265_v10  ;;  %5914 = vperm.xlu1 %9167, %v9356_v24   ;;  %v5839_v10 = vpop.permute.xlu0 %5838  ;;  %v9357_v33 = vld [vmem:[%s13112_s5 + $0xd0] sm:$0xff] }
 0x452   : > { %3039 = vmatprep.mubr.f32.mxu1 %v2284_v46  ;;  %4977 = vmatprep.mubr.f32.mxu0 %v4270_v34  ;;  %v2292_v46 = vld [vmem:[#allocation3 + $0x6f8] sm:$0xff] }
 0x453   : > { %v8484_v19 = vpack.c.bf16 %v6140_v22, %v6139_v7  ;;  %v5519_v54 = vpop.permute.xlu1 %5518  ;;  %v2776_v5 = vpop.f32.mrb[0].mxu1  ;;  %v4273_v22 = vld [vmem:[#allocation5 + $0xd0] sm:$0xff]  ;;  %v13582_v34 = vld [vmem:[#allocation88_spill] sm:$0xff] }
 0x454   : > { %v5758_v29 = vmul.f32 %v5519_v54, %v13581_v61  ;;  %3040 = vmatmul.mubr.f32.gmra.mrb[106].mxu1 %v2283_v31  ;;  %v2778_v52 = vpop.f32.mrb[1].mxu1  ;;  %v5757_v7 = vmul.f32 %v12229_v28, %v13582_v34 }
 0x455   : > { %4978 = vmatmul.mubr.f32.gmra.mrb[74].mxu0 %v4269_v12  ;;  %9168 = vset.pattern.permute.xlu1 %v13496_v3  ;;  %v4278_v12 = vld [vmem:[#allocation5 + $0xf8] sm:$0xff] }
 0x456   : > { %8485 = vmatpush1.bf16.msra.mxu1 %v8484_v19  ;;  %5602 = vperm.xlu1 %9168, %v9357_v33   ;;  %v6078_v24 = vadd.f32 %v5839_v10, %v5758_v29  ;;  %v2291_v33 = vld [vmem:[#allocation3 + $0x6f0] sm:$0xff] }
 0x457   : > { %3044 = vmatprep.mubr.f32.mxu1 %v2288_v39  ;;  %4982 = vmatprep.mubr.f32.mxu0 %v4274_v47  ;;  %v2781_v31 = vpop.f32.mrb[2].mxu1  ;;  %v4277_v29 = vld [vmem:[#allocation5 + $0xf0] sm:$0xff]  ;;  %v2296_v39 = vld [vmem:[#allocation3 + $0x718] sm:$0xff] }
 0x458   : > { %v5835_v54 = vpop.permute.xlu1 %5834  ;;  %3045 = vmatmul.mubr.f32.gmra.mrb[108].mxu1 %v2287_v38  ;;  %v3095_v52 = vmax.f32 %v2776_v5, %v2781_v31  ;;  %v2783_v41 = vpop.f32.mrb[3].mxu1  ;;  %8486 = vmatprep.subr.bf16.mxu1 %v13346_v43  ;;  %v6142_v47 = vmax.f32 %v6078_v24, 0.0  ;;  %v4282_v5 = vld [vmem:[#allocation5 + $0x118] sm:$0xff] }
 0x459   : > { %v6077_v19 = vadd.f32 %v5835_v54, %v5757_v7  ;;  %4983 = vmatmul.mubr.f32.gmra.mrb[76].mxu0 %v4273_v22  ;;  %3049 = vmatprep.mubr.f32.mxu1 %v2292_v46  ;;  %v2295_v46 = vld [vmem:[#allocation3 + $0x710] sm:$0xff]  ;;  %v4286_v24 = vld [vmem:[#allocation5 + $0x138] sm:$0xff] }
 0x45a   : > { %5606 = vperm.xlu1 %9168, %v9358_v1   ;;  %v3096_v28 = vrot.slane %v3095_v52, 4  ;;  %4987 = vmatprep.mubr.f32.mxu0 %v4278_v12  ;;  %v4281_v54 = vld [vmem:[#allocation5 + $0x110] sm:$0xff] }
 0x45b   : > { %v6141_v10 = vmax.f32 %v6077_v19, 0.0  ;;  %v2786_v38 = vpop.f32.mrb[4].mxu1 }
 0x45c   : > { %v3097_v41 = vmax.f32 %v3095_v52, %v3096_v28  ;;  %3050 = vmatmul.mubr.f32.gmra.mrb[110].mxu1 %v2291_v33  ;;  %v2788_v31 = vpop.f32.mrb[5].mxu1  ;;  %v13583_v33 = vld [vmem:[#allocation93_spill] sm:$0xff] }
 0x45d   : > { %v8487_v7 = vpack.c.bf16 %v6142_v47, %v6141_v10  ;;  %4988 = vmatmul.mubr.f32.gmra.mrb[78].mxu0 %v4277_v29  ;;  %v5523_v22 = vpop.permute.xlu1 %5522  ;;  %3054 = vmatprep.mubr.f32.mxu1 %v2296_v39  ;;  %v2299_v39 = vld [vmem:[#allocation3 + $0x730] sm:$0xff]  ;;  %v4290_v31 = vld [vmem:[#allocation5 + $0x158] sm:$0xff] }
 0x45e   : > { %9169 = vset.pattern.permute.xlu1 %v13515_v37  ;;  %4992 = vmatprep.mubr.f32.mxu0 %v4282_v5  ;;  %v3098_v19 = vrot.slane %v3097_v41, 2  ;;  %v5759_v28 = vmul.f32 %v5523_v22, %v13583_v33  ;;  %v4285_v10 = vld [vmem:[#allocation5 + $0x130] sm:$0xff]  ;;  %v2304_v5 = vld [vmem:[#allocation3 + $0x758] sm:$0xff] }
 0x45f   : > { %5926 = vperm.xlu1 %9169, %v9358_v1   ;;  %v2791_v12 = vpop.f32.mrb[6].mxu1  ;;  %8488 = vmatpush1.bf16.msra.mxu1 %v8487_v7  ;;  %v5843_v7 = vpop.permute.xlu0 %5842 }
 0x460   : > { %v3102_v62 = vmax.f32 %v2786_v38, %v2791_v12  ;;  %3055 = vmatmul.mubr.f32.gmra.mrb[112].mxu1 %v2295_v46  ;;  %v2793_v52 = vpop.f32.mrb[7].mxu1  ;;  %8489 = vmatprep.subr.bf16.mxu1 %v13346_v43  ;;  %v3099_v38 = vmax.f32 %v3097_v41, %v3098_v19  ;;  %v9359_v12 = vld [vmem:[%s13112_s5 + $0xe8] sm:$0xff]  ;;  %v4294_v19 = vld [vmem:[#allocation5 + $0x178] sm:$0xff] }
 0x461   : > { %4993 = vmatmul.mubr.f32.gmra.mrb[80].mxu0 %v4281_v54  ;;  %v5527_v29 = vpop.permute.xlu1 %5526  ;;  %3059 = vmatprep.mubr.f32.mxu1 %v2300_v23  ;;  %v6079_v23 = vadd.f32 %v5843_v7, %v5759_v28  ;;  %v13584_v54 = vld [vmem:[#allocation92_spill] sm:$0xff]  ;;  %v4293_v7 = vld [vmem:[#allocation5 + $0x170] sm:$0xff] }
 0x462   : > { %v3103_v47 = vrot.slane %v3102_v62, 4  ;;  %4997 = vmatprep.mubr.f32.mxu0 %v4286_v24  ;;  %v5760_v52 = vmul.f32 %v5527_v29, %v13584_v54  ;;  %v2303_v24 = vld [vmem:[#allocation3 + $0x750] sm:$0xff] }
 0x463   : > { %9171 = vset.pattern.permute.xlu1 %v13496_v3  ;;  %v2796_v1 = vpop.f32.mrb[8].mxu1 }
 0x464   : > { %v3104_v46 = vmax.f32 %v3102_v62, %v3103_v47  ;;  %5614 = vperm.xlu1 %9171, %v9359_v12   ;;  %3060 = vmatmul.mubr.f32.gmra.mrb[114].mxu1 %v2299_v39  ;;  %v2798_v22 = vpop.f32.mrb[9].mxu1  ;;  %v2308_v62 = vld [vmem:[#allocation3 + $0x778] sm:$0xff]  ;;  %v3100_v47 = vrot.slane %v3099_v38, 1  ;;  %v6143_v39 = vmax.f32 %v6079_v23, 0.0  ;;  %v13585_v23 = vld [vmem:[#allocation95_spill] sm:$0xff] }
 0x465   : > { %4998 = vmatmul.mubr.f32.gmra.mrb[82].mxu0 %v4285_v10  ;;  %3064 = vmatprep.mubr.f32.mxu1 %v2304_v5  ;;  %v9360_v10 = vld [vmem:[%s13112_s5 + $0xe0] sm:$0xff]  ;;  %v2307_v5 = vld [vmem:[#allocation3 + $0x770] sm:$0xff] }
 0x466   : > { %v3105_v20 = vrot.slane %v3104_v46, 2  ;;  %v5847_v36 = vpop.permute.xlu1 %5846  ;;  %5002 = vmatprep.mubr.f32.mxu0 %v4290_v31  ;;  %v3101_v12 = vmax.f32 %v3099_v38, %v3100_v47  ;;  %v2316_v38 = vld [vmem:[#allocation3 + $0x7b8] sm:$0xff]  ;;  %v13586_v47 = vld [vmem:[#allocation94_spill] sm:$0xff] }
 0x467   : > { %v6080_v4 = vadd.f32 %v5847_v36, %v5760_v52  ;;  %v2801_v41 = vpop.f32.mrb[10].mxu1 }
 0x468   : > { %v3106_v27 = vmax.f32 %v3104_v46, %v3105_v20  ;;  %v3109_v44 = vmax.f32 %v2796_v1, %v2801_v41  ;;  %9172 = vset.pattern.permute.xlu1 %v13515_v37  ;;  %3065 = vmatmul.mubr.f32.gmra.mrb[116].mxu1 %v2303_v24  ;;  %v2803_v28 = vpop.f32.mrb[11].mxu1  ;;  %v2312_v24 = vld [vmem:[#allocation3 + $0x798] sm:$0xff] }
 0x469   : > { %v6144_v29 = vmax.f32 %v6080_v4, 0.0  ;;  %5003 = vmatmul.mubr.f32.gmra.mrb[84].mxu0 %v4289_v26  ;;  %5930 = vperm.xlu1 %9172, %v9360_v10   ;;  %v4298_v41 = vld [vmem:[#allocation5 + $0x198] sm:$0xff]  ;;  %v2311_v28 = vld [vmem:[#allocation3 + $0x790] sm:$0xff] }
 0x46a   : > { %v3107_v36 = vrot.slane %v3106_v27, 1  ;;  %v3110_v31 = vrot.slane %v3109_v44, 4  ;;  %3069 = vmatprep.mubr.f32.mxu1 %v2308_v62  ;;  %5007 = vmatprep.mubr.f32.mxu0 %v4294_v19  ;;  %v5855_v62 = vpop.permute.xlu0 %5854 }
 0x46b   : > { %v8490_v20 = vpack.c.bf16 %v6144_v29, %v6143_v39  ;;  %v5535_v1 = vpop.permute.xlu1 %5534  ;;  %v2806_v46 = vpop.f32.mrb[12].mxu1  ;;  %v5761_v29 = vmul.f32 %v12235_v21, %v13586_v47  ;;  %v9362_v21 = vld [vmem:[%s13112_s5 + $0xf8] sm:$0xff] }
 0x46c   : > { %v3108_v22 = vmax.f32 %v3106_v27, %v3107_v36  ;;  %v3111_v52 = vmax.f32 %v3109_v44, %v3110_v31  ;;  %v5762_v4 = vmul.f32 %v5535_v1, %v13585_v23  ;;  %3070 = vmatmul.mubr.f32.gmra.mrb[118].mxu1 %v2307_v5  ;;  %v2808_v26 = vpop.f32.mrb[13].mxu1  ;;  %v9361_v44 = vld [vmem:[%s13112_s5 + $0xf0] sm:$0xff]  ;;  %v4302_v36 = vld [vmem:[#allocation5 + $0x1b8] sm:$0xff] }
 0x46d   : > { %5008 = vmatmul.mubr.f32.gmra.mrb[86].mxu0 %v4293_v7  ;;  %9173 = vset.pattern.permute.xlu1 %v13496_v3  ;;  %v4297_v27 = vld [vmem:[#allocation5 + $0x190] sm:$0xff] }
 0x46e   : > { %v7484_v19 = vsel %vm7483_vm1, %v3108_v22, %v3101_v12  ;;  %v3112_v39 = vrot.slane %v3111_v52, 2  ;;  %8491 = vmatpush1.bf16.msra.mxu1 %v8490_v20  ;;  %5618 = vperm.xlu1 %9173, %v9361_v44   ;;  %v6082_v10 = vadd.f32 %v5855_v62, %v5762_v4  ;;  %v2315_v22 = vld [vmem:[#allocation3 + $0x7b0] sm:$0xff] }
 0x46f   : > { %v2811_v5 = vpop.f32.mrb[14].mxu1  ;;  %3074 = vmatprep.mubr.f32.mxu1 %v2312_v24  ;;  %5012 = vmatprep.mubr.f32.mxu0 %v4298_v41  ;;  %v4301_v4 = vld [vmem:[#allocation5 + $0x1b0] sm:$0xff] }
 0x470   : > { %v3113_v31 = vmax.f32 %v3111_v52, %v3112_v39  ;;  %v3116_v7 = vmax.f32 %v2806_v46, %v2811_v5  ;;  %v5851_v1 = vpop.permute.xlu1 %5850  ;;  %3075 = vmatmul.mubr.f32.gmra.mrb[120].mxu1 %v2311_v28  ;;  %v2813_v20 = vpop.f32.mrb[15].mxu1  ;;  %8492 = vmatprep.subr.bf16.mxu1 %v13346_v43  ;;  %v2320_v52 = vld [vmem:[#allocation3 + $0x7d8] sm:$0xff]  ;;  %v6146_v46 = vmax.f32 %v6082_v10, 0.0  ;;  %v2319_v5 = vld [vmem:[#allocation3 + $0x7d0] sm:$0xff] }
 0x471   : > { %v6081_v12 = vadd.f32 %v5851_v1, %v5761_v29  ;;  %5013 = vmatmul.mubr.f32.gmra.mrb[88].mxu0 %v4297_v27  ;;  %3079 = vmatprep.mubr.f32.mxu1 %v2316_v38  ;;  %v4306_v28 = vld [vmem:[#allocation5 + $0x1d8] sm:$0xff]  ;;  %v4305_v10 = vld [vmem:[#allocation5 + $0x1d0] sm:$0xff] }
 0x472   : > { %v3114_v26 = vrot.slane %v3113_v31, 1  ;;  %v3117_v44 = vrot.slane %v3116_v7, 4  ;;  %5622 = vperm.xlu1 %9173, %v9362_v21   ;;  %5017 = vmatprep.mubr.f32.mxu0 %v4302_v36  ;;  %v2324_v36 = vld [vmem:[#allocation3 + $0x7f8] sm:$0xff] }
 0x473   : > { %v6145_v24 = vmax.f32 %v6081_v12, 0.0  ;;  %v2816_v41 = vpop.f32.mrb[16].mxu1 }
 0x474   : > { %v3115_v62 = vmax.f32 %v3113_v31, %v3114_v26  ;;  %v3118_v39 = vmax.f32 %v3116_v7, %v3117_v44  ;;  %3080 = vmatmul.mubr.f32.gmra.mrb[122].mxu1 %v2315_v22  ;;  %v2818_v27 = vpop.f32.mrb[17].mxu1  ;;  %v4310_v31 = vld [vmem:[#allocation5 + $0x1f8] sm:$0xff] }
 0x475   : > { %v8493_v38 = vpack.c.bf16 %v6146_v46, %v6145_v24  ;;  %5018 = vmatmul.mubr.f32.gmra.mrb[90].mxu0 %v4301_v4  ;;  %v5539_v29 = vpop.permute.xlu1 %5538  ;;  %3084 = vmatprep.mubr.f32.mxu1 %v2320_v52  ;;  %v13587_v44 = vld [vmem:[#allocation96_spill] sm:$0xff]  ;;  %v2323_v52 = vld [vmem:[#allocation3 + $0x7f0] sm:$0xff] }
 0x476   : > { %v7486_v1 = vsel %vm7485_vm2, %v3115_v62, %v7484_v19  ;;  %v3119_v20 = vrot.slane %v3118_v39, 2  ;;  %9174 = vset.pattern.permute.xlu1 %v13515_v37  ;;  %5022 = vmatprep.mubr.f32.mxu0 %v4306_v28  ;;  %v5763_v4 = vmul.f32 %v5539_v29, %v13587_v44  ;;  %v4309_v28 = vld [vmem:[#allocation5 + $0x1f0] sm:$0xff]  ;;  %v4314_v62 = vld [vmem:[#allocation5 + $0x218] sm:$0xff] }
 0x477   : > { %5942 = vperm.xlu1 %9174, %v9362_v21   ;;  %v2821_v12 = vpop.f32.mrb[18].mxu1  ;;  %8494 = vmatpush1.bf16.msra.mxu1 %v8493_v38  ;;  %v9363_v38 = vld [vmem:[%s13112_s5 + $0x108] sm:$0xff] }
 0x478   : > { %v3120_v7 = vmax.f32 %v3118_v39, %v3119_v20  ;;  %v3123_v22 = vmax.f32 %v2816_v41, %v2821_v12  ;;  %3085 = vmatmul.mubr.f32.gmra.mrb[124].mxu1 %v2319_v5  ;;  %v2823_v26 = vpop.f32.mrb[19].mxu1  ;;  %8495 = vmatprep.subr.bf16.mxu1 %v13346_v43  ;;  %v5859_v39 = vpop.permute.xlu0 %5858  ;;  %v13588_v20 = vld [vmem:[#allocation97_spill] sm:$0xff] }
 0x479   : > { %5023 = vmatmul.mubr.f32.gmra.mrb[92].mxu0 %v4305_v10  ;;  %v5543_v19 = vpop.permute.xlu1 %5542  ;;  %3089 = vmatprep.mubr.f32.mxu1 %v2324_v36  ;;  %v6083_v5 = vadd.f32 %v5859_v39, %v5763_v4  ;;  %v4313_v26 = vld [vmem:[#allocation5 + $0x210] sm:$0xff]  ;;  %v9364_v4 = vld [vmem:[%s13112_s5 + $0x100] sm:$0xff] }
 0x47a   : > { %v3121_v46 = vrot.slane %v3120_v7, 1  ;;  %v3124_v24 = vrot.slane %v3123_v22, 4  ;;  %5027 = vmatprep.mubr.f32.mxu0 %v4310_v31  ;;  %v5764_v10 = vmul.f32 %v5543_v19, %v13588_v20 }
 0x47b   : > { %9176 = vset.pattern.permute.xlu1 %v13496_v3  ;;  %v2826_v21 = vpop.f32.mrb[20].mxu1 }
 0x47c   : > { %v3122_v41 = vmax.f32 %v3120_v7, %v3121_v46  ;;  %v3125_v27 = vmax.f32 %v3123_v22, %v3124_v24  ;;  %5630 = vperm.xlu1 %9176, %v9363_v38   ;;  %3090 = vmatmul.mubr.f32.gmra.mrb[126].mxu1 %v2323_v52  ;;  %v2828_v29 = vpop.f32.mrb[21].mxu1  ;;  %v4318_v46 = vld [vmem:[#allocation5 + $0x238] sm:$0xff]  ;;  %v6147_v38 = vmax.f32 %v6083_v5, 0.0 }
 0x47d   : > { %5028 = vmatmul.mubr.f32.gmra.mrb[94].mxu0 %v4309_v28  ;;  %v4317_v28 = vld [vmem:[#allocation5 + $0x230] sm:$0xff]  ;;  %v4322_v5 = vld [vmem:[#allocation5 + $0x258] sm:$0xff] }
 0x47e   : > { %v7488_v36 = vsel %vm7487_vm3, %v3122_v41, %v7486_v1  ;;  %v3126_v12 = vrot.slane %v3125_v27, 2  ;;  %v5863_v31 = vpop.permute.xlu1 %5862  ;;  %5032 = vmatprep.mubr.f32.mxu0 %v4314_v62 }
 0x47f   : > { %v6084_v7 = vadd.f32 %v5863_v31, %v5764_v10  ;;  %v2831_v22 = vpop.f32.mrb[22].mxu1  ;;  %v13589_v10 = vld [vmem:[#allocation99_spill] sm:$0xff] }
 0x480   : > { %v3127_v24 = vmax.f32 %v3125_v27, %v3126_v12  ;;  %v3130_v45 = vmax.f32 %v2826_v21, %v2831_v22  ;;  %9177 = vset.pattern.permute.xlu1 %v13515_v37  ;;  %v2833_v52 = vpop.f32.mrb[23].mxu1 }
 0x481   : > { %v6148_v29 = vmax.f32 %v6084_v7, 0.0  ;;  %5033 = vmatmul.mubr.f32.gmra.mrb[96].mxu0 %v4313_v26  ;;  %5946 = vperm.xlu1 %9177, %v9364_v4   ;;  %v5871_v26 = vpop.permute.xlu0 %5870  ;;  %v4326_v4 = vld [vmem:[#allocation5 + $0x278] sm:$0xff] }
 0x482   : > { %v3128_v1 = vrot.slane %v3127_v24, 1  ;;  %v3131_v19 = vrot.slane %v3130_v45, 4  ;;  %5037 = vmatprep.mubr.f32.mxu0 %v4318_v46  ;;  %v9365_v46 = vld [vmem:[%s13112_s5 + $0x110] sm:$0xff] }
 0x483   : > { %v8496_v62 = vpack.c.bf16 %v6148_v29, %v6147_v38  ;;  %v5551_v39 = vpop.permute.xlu1 %5550  ;;  %v2836_v41 = vpop.f32.mrb[24].mxu1 }
 0x484   : > { %v3129_v27 = vmax.f32 %v3127_v24, %v3128_v1  ;;  %v3132_v21 = vmax.f32 %v3130_v45, %v3131_v19  ;;  %v5766_v12 = vmul.f32 %v5551_v39, %v13589_v10  ;;  %v2838_v31 = vpop.f32.mrb[25].mxu1  ;;  %v4321_v24 = vld [vmem:[#allocation5 + $0x250] sm:$0xff]  ;;  %v13590_v45 = vld [vmem:[#allocation98_spill] sm:$0xff] }
 0x485   : > { %5038 = vmatmul.mubr.f32.gmra.mrb[98].mxu0 %v4317_v28  ;;  %9178 = vset.pattern.permute.xlu1 %v13496_v3  ;;  %v5765_v52 = vmul.f32 %v12246_v50, %v13590_v45  ;;  %v9366_v31 = vld [vmem:[%s13112_s5 + $0x118] sm:$0xff]  ;;  %v4325_v50 = vld [vmem:[#allocation5 + $0x270] sm:$0xff] }
 0x486   : > { %v7490_v7 = vsel %vm7489_vm4, %v3129_v27, %v7488_v36  ;;  %v3133_v22 = vrot.slane %v3132_v21, 2  ;;  %8497 = vmatpush1.bf16.msra.mxu1 %v8496_v62  ;;  %5634 = vperm.xlu1 %9178, %v9365_v46   ;;  %v6086_v38 = vadd.f32 %v5871_v26, %v5766_v12  ;;  %v4330_v46 = vld [vmem:[#allocation5 + $0x298] sm:$0xff]  ;;  %v4361_v45 = vld [vmem:[#allocation5 + $0x390] sm:$0xff] }
 0x487   : > { %v2841_v29 = vpop.f32.mrb[26].mxu1  ;;  %5042 = vmatprep.mubr.f32.mxu0 %v4322_v5  ;;  %8498 = vmatprep.subr.bf16.mxu1 %v13346_v43 }
 0x488   : > { %v3134_v1 = vmax.f32 %v3132_v21, %v3133_v22  ;;  %v3137_v19 = vmax.f32 %v2836_v41, %v2841_v29  ;;  %v5867_v36 = vpop.permute.xlu1 %5866  ;;  %v2843_v28 = vpop.f32.mrb[27].mxu1  ;;  %v6150_v12 = vmax.f32 %v6086_v38, 0.0  ;;  %v6202_v22 = vld [vmem:[#allocation7 + $0x8] sm:$0xff] }
 0x489   : > { %v6085_v62 = vadd.f32 %v5867_v36, %v5765_v52  ;;  %5043 = vmatmul.mubr.f32.gmra.mrb[100].mxu0 %v4321_v24  ;;  %6521 = vmatprep.mubr.f32.mxu1 %v6202_v22  ;;  %v4329_v36 = vld [vmem:[#allocation5 + $0x290] sm:$0xff]  ;;  %v4334_v28 = vld [vmem:[#allocation5 + $0x2b8] sm:$0xff] }
 0x48a   : > { %v3135_v39 = vrot.slane %v3134_v1, 1  ;;  %v3138_v27 = vrot.slane %v3137_v19, 4  ;;  %5638 = vperm.xlu1 %9178, %v9366_v31   ;;  %5047 = vmatprep.mubr.f32.mxu0 %v4326_v4 }
 0x48b   : > { %v6149_v5 = vmax.f32 %v6085_v62, 0.0  ;;  %v2846_v26 = vpop.f32.mrb[28].mxu1 }
 0x48c   : > { %v3136_v8 = vmax.f32 %v3134_v1, %v3135_v39  ;;  %v3139_v21 = vmax.f32 %v3137_v19, %v3138_v27  ;;  %v2848_v41 = vpop.f32.mrb[29].mxu1  ;;  %v13591_v39 = vld [vmem:[#allocation101_spill] sm:$0xff] }
 0x48d   : > { %v8499_v29 = vpack.c.bf16 %v6150_v12, %v6149_v5  ;;  %5048 = vmatmul.mubr.f32.gmra.mrb[102].mxu0 %v4325_v50  ;;  %v5555_v24 = vpop.permute.xlu1 %5554 }
 0x48e   : > { %v3140_v52 = vrot.slane %v3139_v21, 2  ;;  %9179 = vset.pattern.permute.xlu1 %v13515_v37  ;;  %5052 = vmatprep.mubr.f32.mxu0 %v4330_v46  ;;  %v7492_v4 = vsel %vm7491_vm5, %v3136_v8, %v7490_v7  ;;  %v5767_v27 = vmul.f32 %v5555_v24, %v13591_v39  ;;  %v4333_v46 = vld [vmem:[#allocation5 + $0x2b0] sm:$0xff]  ;;  %v4338_v8 = vld [vmem:[#allocation5 + $0x2d8] sm:$0xff] }
 0x48f   : > { %5958 = vperm.xlu1 %9179, %v9366_v31   ;;  %v2851_v38 = vpop.f32.mrb[30].mxu1  ;;  %8500 = vmatpush1.bf16.msra.mxu1 %v8499_v29  ;;  %v5875_v31 = vpop.permute.xlu0 %5874  ;;  %v13592_v24 = vld [vmem:[#allocation103_spill] sm:$0xff] }
 0x490   : > { %v3141_v1 = vmax.f32 %v3139_v21, %v3140_v52  ;;  %v3144_v19 = vmax.f32 %v2846_v26, %v2851_v38  ;;  %v2853_v62 = vpop.f32.mrb[31].mxu1  ;;  %8501 = vmatprep.subr.bf16.mxu1 %v13346_v43  ;;  %v9367_v26 = vld [vmem:[%s13112_s5 + $0x128] sm:$0xff]  ;;  %v6087_v29 = vadd.f32 %v5875_v31, %v5767_v27 }
 0x491   : > { %5053 = vmatmul.mubr.f32.gmra.mrb[104].mxu0 %v4329_v36  ;;  %v5559_v50 = vpop.permute.xlu1 %5558 }
 0x492   : > { %v3142_v12 = vrot.slane %v3141_v1, 1  ;;  %v3145_v5 = vrot.slane %v3144_v19, 4  ;;  %5057 = vmatprep.mubr.f32.mxu0 %v4334_v28  ;;  %v5768_v52 = vmul.f32 %v5559_v50, %v13592_v24  ;;  %v4337_v28 = vld [vmem:[#allocation5 + $0x2d0] sm:$0xff]  ;;  %v9368_v50 = vld [vmem:[%s13112_s5 + $0x120] sm:$0xff] }
 0x493   : > { %9180 = vset.pattern.permute.xlu1 %v13496_v3  ;;  %v2856_v7 = vpop.f32.mrb[32].mxu1 }
 0x494   : > { %v3143_v41 = vmax.f32 %v3141_v1, %v3142_v12  ;;  %v3146_v22 = vmax.f32 %v3144_v19, %v3145_v5  ;;  %5646 = vperm.xlu1 %9180, %v9367_v26   ;;  %v2858_v21 = vpop.f32.mrb[33].mxu1  ;;  %v4342_v19 = vld [vmem:[#allocation5 + $0x2f8] sm:$0xff] }
 0x495   : > { %5058 = vmatmul.mubr.f32.gmra.mrb[106].mxu0 %v4333_v46  ;;  %v6151_v21 = vmax.f32 %v6087_v29, 0.0  ;;  %v4346_v29 = vld [vmem:[#allocation5 + $0x318] sm:$0xff] }
 0x496   : > { %v3147_v36 = vrot.slane %v3146_v22, 2  ;;  %v5879_v38 = vpop.permute.xlu1 %5878  ;;  %5062 = vmatprep.mubr.f32.mxu0 %v4338_v8  ;;  %v7494_v62 = vsel %vm7493_vm6, %v3143_v41, %v7492_v4  ;;  %v4341_v4 = vld [vmem:[#allocation5 + $0x2f0] sm:$0xff] }
 0x497   : > { %v6088_v39 = vadd.f32 %v5879_v38, %v5768_v52  ;;  %v2861_v1 = vpop.f32.mrb[34].mxu1 }
 0x498   : > { %v3148_v12 = vmax.f32 %v3146_v22, %v3147_v36  ;;  %9181 = vset.pattern.permute.xlu1 %v13515_v37  ;;  %v3151_v5 = vmax.f32 %v2856_v7, %v2861_v1  ;;  %v2863_v26 = vpop.f32.mrb[35].mxu1  ;;  %v13593_v36 = vld [vmem:[#allocation106_spill] sm:$0xff] }
 0x499   : > { %v6152_v27 = vmax.f32 %v6088_v39, 0.0  ;;  %5063 = vmatmul.mubr.f32.gmra.mrb[108].mxu0 %v4337_v28  ;;  %5962 = vperm.xlu1 %9181, %v9368_v50   ;;  %v5887_v39 = vpop.permute.xlu0 %5886  ;;  %v9369_v28 = vld [vmem:[%s13112_s5 + $0x130] sm:$0xff]  ;;  %v4350_v50 = vld [vmem:[#allocation5 + $0x338] sm:$0xff] }
 0x49a   : > { %v3149_v46 = vrot.slane %v3148_v12, 1  ;;  %v3152_v8 = vrot.slane %v3151_v5, 4  ;;  %5067 = vmatprep.mubr.f32.mxu0 %v4342_v19  ;;  %v4345_v19 = vld [vmem:[#allocation5 + $0x310] sm:$0xff] }
 0x49b   : > { %v8502_v31 = vpack.c.bf16 %v6152_v27, %v6151_v21  ;;  %v5567_v41 = vpop.permute.xlu1 %5566  ;;  %v2866_v52 = vpop.f32.mrb[36].mxu1 }
 0x49c   : > { %v3150_v22 = vmax.f32 %v3148_v12, %v3149_v46  ;;  %v5770_v38 = vmul.f32 %v5567_v41, %v13593_v36  ;;  %v3153_v7 = vmax.f32 %v3151_v5, %v3152_v8  ;;  %v2868_v1 = vpop.f32.mrb[37].mxu1  ;;  %v13594_v12 = vld [vmem:[#allocation107_spill] sm:$0xff] }
 0x49d   : > { %5068 = vmatmul.mubr.f32.gmra.mrb[110].mxu0 %v4341_v4  ;;  %9182 = vset.pattern.permute.xlu1 %v13496_v3  ;;  %v5769_v5 = vmul.f32 %v12257_v58, %v13594_v12  ;;  %v4349_v58 = vld [vmem:[#allocation5 + $0x330] sm:$0xff] }
 0x49e   : > { %8503 = vmatpush1.bf16.msra.mxu1 %v8502_v31  ;;  %5650 = vperm.xlu1 %9182, %v9369_v28   ;;  %v12385_v26 = vsel %vm7495_vm7, %v3150_v22, %v7494_v62  ;;  %v6090_v21 = vadd.f32 %v5887_v39, %v5770_v38  ;;  %v3154_v46 = vrot.slane %v3153_v7, 2  ;;  %v9370_v62 = vld [vmem:[%s13112_s5 + $0x138] sm:$0xff]  ;;  %v5891_v28 = vpop.permute.xlu0 %5890 }
 0x49f   : > { %v2871_v27 = vpop.f32.mrb[38].mxu1  ;;  %5072 = vmatprep.mubr.f32.mxu0 %v4346_v29  ;;  %8504 = vmatprep.subr.bf16.mxu1 %v13346_v43  ;;  %v4354_v39 = vld [vmem:[#allocation5 + $0x358] sm:$0xff] }
 0x4a0   : > { %v3158_v8 = vmax.f32 %v2866_v52, %v2871_v27  ;;  %v5883_v4 = vpop.permute.xlu1 %5882  ;;  %v2873_v31 = vpop.f32.mrb[39].mxu1  ;;  %v6154_v22 = vmax.f32 %v6090_v21, 0.0  ;;  %v3155_v12 = vmax.f32 %v3153_v7, %v3154_v46  ;;  %v13595_v7 = vld [vmem:[#allocation13_spill] sm:$0xff] }
 0x4a1   : > { %v6089_v41 = vadd.f32 %v5883_v4, %v5769_v5  ;;  %5073 = vmatmul.mubr.f32.gmra.mrb[112].mxu0 %v4345_v19  ;;  %v4353_v4 = vld [vmem:[#allocation5 + $0x350] sm:$0xff] }
 0x4a2   : > { %v3159_v1 = vrot.slane %v3158_v8, 4  ;;  %5654 = vperm.xlu1 %9182, %v9370_v62   ;;  %5077 = vmatprep.mubr.f32.mxu0 %v4350_v50  ;;  %v4358_v50 = vld [vmem:[#allocation5 + $0x378] sm:$0xff]  ;;  %v3156_v21 = vrot.slane %v3155_v12, 1 }
 0x4a3   : > { %v6153_v38 = vmax.f32 %v6089_v41, 0.0  ;;  %v2876_v29 = vpop.f32.mrb[40].mxu1 }
 0x4a4   : > { %v3160_v36 = vmax.f32 %v3158_v8, %v3159_v1  ;;  %v2878_v52 = vpop.f32.mrb[41].mxu1  ;;  %v5903_v1 = vpop.permute.xlu0 %5902 }
 0x4a5   : > { %v8505_v27 = vpack.c.bf16 %v6154_v22, %v6153_v38  ;;  %5078 = vmatmul.mubr.f32.gmra.mrb[114].mxu0 %v4349_v58  ;;  %v5571_v5 = vpop.permute.xlu1 %5570  ;;  %v4357_v38 = vld [vmem:[#allocation5 + $0x370] sm:$0xff]  ;;  %v3157_v52 = vmax.f32 %v3155_v12, %v3156_v21  ;;  %v4366_v21 = vld [vmem:[#allocation5 + $0x3b8] sm:$0xff] }
 0x4a6   : > { %v3161_v19 = vrot.slane %v3160_v36, 2  ;;  %9183 = vset.pattern.permute.xlu1 %v13515_v37  ;;  %5082 = vmatprep.mubr.f32.mxu0 %v4354_v39  ;;  %v5771_v46 = vmul.f32 %v5571_v5, %v13595_v7  ;;  %v4362_v39 = vld [vmem:[#allocation5 + $0x398] sm:$0xff] }
 0x4a7   : > { %5974 = vperm.xlu1 %9183, %v9370_v62   ;;  %v2881_v31 = vpop.f32.mrb[42].mxu1  ;;  %8506 = vmatpush1.bf16.msra.mxu1 %v8505_v27 }
 0x4a8   : > { %v3162_v41 = vmax.f32 %v3160_v36, %v3161_v19  ;;  %v3165_v24 = vmax.f32 %v2876_v29, %v2881_v31  ;;  %v2883_v17 = vpop.f32.mrb[43].mxu1  ;;  %8507 = vmatprep.subr.bf16.mxu1 %v13346_v43  ;;  %v6091_v5 = vadd.f32 %v5891_v28, %v5771_v46  ;;  %v13596_v19 = vld [vmem:[#allocation60_spill] sm:$0xff] }
 0x4a9   : > { %5083 = vmatmul.mubr.f32.gmra.mrb[116].mxu0 %v4353_v4  ;;  %v5575_v8 = vpop.permute.xlu1 %5574  ;;  %v9371_v17 = vld [vmem:[%s13112_s5 + $0x148] sm:$0xff] }
 0x4aa   : > { %v3163_v58 = vrot.slane %v3162_v41, 1  ;;  %v3166_v22 = vrot.slane %v3165_v24, 4  ;;  %5087 = vmatprep.mubr.f32.mxu0 %v4358_v50  ;;  %v5772_v4 = vmul.f32 %v5575_v8, %v13596_v19  ;;  %v6155_v28 = vmax.f32 %v6091_v5, 0.0  ;;  %v9372_v8 = vld [vmem:[%s13112_s5 + $0x140] sm:$0xff]  ;;  %v4370_v5 = vld [vmem:[#allocation5 + $0x3d8] sm:$0xff] }
 0x4ab   : > { %9184 = vset.pattern.permute.xlu1 %v13496_v3  ;;  %v2886_v62 = vpop.f32.mrb[44].mxu1 }
 0x4ac   : > { %v3164_v27 = vmax.f32 %v3162_v41, %v3163_v58  ;;  %v3167_v36 = vmax.f32 %v3165_v24, %v3166_v22  ;;  %5662 = vperm.xlu1 %9184, %v9371_v17   ;;  %v2888_v29 = vpop.f32.mrb[45].mxu1  ;;  %v12402_v24 = vpop.permute.xlu0 %5906 }
 0x4ad   : > { %5088 = vmatmul.mubr.f32.gmra.mrb[118].mxu0 %v4357_v38  ;;  %v13597_v29 = vld [vmem:[#allocation59_spill] sm:$0xff] }
 0x4ae   : > { %v7497_v31 = vsel %vm7483_vm1, %v3164_v27, %v3157_v52  ;;  %v3168_v50 = vrot.slane %v3167_v36, 2  ;;  %v5895_v7 = vpop.permute.xlu1 %5894  ;;  %5092 = vmatprep.mubr.f32.mxu0 %v4362_v39 }
 0x4af   : > { %v6092_v10 = vadd.f32 %v5895_v7, %v5772_v4  ;;  %v2891_v12 = vpop.f32.mrb[46].mxu1  ;;  %v4365_v7 = vld [vmem:[#allocation5 + $0x3b0] sm:$0xff] }
 0x4b0   : > { %v3169_v41 = vmax.f32 %v3167_v36, %v3168_v50  ;;  %v3172_v58 = vmax.f32 %v2886_v62, %v2891_v12  ;;  %9185 = vset.pattern.permute.xlu1 %v13515_v37  ;;  %v2893_v22 = vpop.f32.mrb[47].mxu1 }
 0x4b1   : > { %v6156_v46 = vmax.f32 %v6092_v10, 0.0  ;;  %5093 = vmatmul.mubr.f32.gmra.mrb[120].mxu0 %v4361_v45  ;;  %5978 = vperm.xlu1 %9185, %v9372_v8   ;;  %v12410_v10 = vpop.permute.xlu0 %5918  ;;  %v4374_v8 = vld [vmem:[#allocation5 + $0x3f8] sm:$0xff] }
 0x4b2   : > { %v3170_v38 = vrot.slane %v3169_v41, 1  ;;  %v3173_v39 = vrot.slane %v3172_v58, 4  ;;  %5097 = vmatprep.mubr.f32.mxu0 %v4366_v21  ;;  %v9373_v21 = vld [vmem:[%s13112_s5 + $0x150] sm:$0xff] }
 0x4b3   : > { %v8508_v52 = vpack.c.bf16 %v6156_v46, %v6155_v28  ;;  %v5583_v27 = vpop.permute.xlu1 %5582  ;;  %v2896_v17 = vpop.f32.mrb[48].mxu1 }
 0x4b4   : > { %v3171_v36 = vmax.f32 %v3169_v41, %v3170_v38  ;;  %v3174_v62 = vmax.f32 %v3172_v58, %v3173_v39  ;;  %v5774_v4 = vmul.f32 %v5583_v27, %v13597_v29  ;;  %v2898_v50 = vpop.f32.mrb[49].mxu1  ;;  %v4369_v41 = vld [vmem:[#allocation5 + $0x3d0] sm:$0xff]  ;;  %v13598_v58 = vld [vmem:[#allocation81_spill] sm:$0xff] }
 0x4b5   : > { %5098 = vmatmul.mubr.f32.gmra.mrb[122].mxu0 %v4365_v7  ;;  %9186 = vset.pattern.permute.xlu1 %v13496_v3  ;;  %v5773_v22 = vmul.f32 %v12262_v18, %v13598_v58  ;;  %v9374_v50 = vld [vmem:[%s13112_s5 + $0x158] sm:$0xff]  ;;  %v4373_v18 = vld [vmem:[#allocation5 + $0x3f0] sm:$0xff]  ;;  %v12422_v58 = vpop.permute.xlu0 %5922 }
 0x4b6   : > { %v7498_v45 = vsel %vm7485_vm2, %v3171_v36, %v7497_v31  ;;  %v3175_v12 = vrot.slane %v3174_v62, 2  ;;  %8509 = vmatpush1.bf16.msra.mxu1 %v8508_v52  ;;  %5666 = vperm.xlu1 %9186, %v9373_v21   ;;  %v6094_v28 = vadd.f32 %v5903_v1, %v5774_v4  ;;  %v4378_v21 = vld [vmem:[#allocation5 + $0x418] sm:$0xff] }
 0x4b7   : > { %v2901_v46 = vpop.f32.mrb[50].mxu1  ;;  %5102 = vmatprep.mubr.f32.mxu0 %v4370_v5  ;;  %8510 = vmatprep.subr.bf16.mxu1 %v13346_v43 }
 0x4b8   : > { %v3176_v38 = vmax.f32 %v3174_v62, %v3175_v12  ;;  %v3179_v39 = vmax.f32 %v2896_v17, %v2901_v46  ;;  %v5899_v31 = vpop.permute.xlu1 %5898  ;;  %v2903_v7 = vpop.f32.mrb[51].mxu1  ;;  %v6158_v1 = vmax.f32 %v6094_v28, 0.0 }
 0x4b9   : > { %v6093_v52 = vadd.f32 %v5899_v31, %v5773_v22  ;;  %5103 = vmatmul.mubr.f32.gmra.mrb[124].mxu0 %v4369_v41  ;;  %v4382_v7 = vld [vmem:[#allocation5 + $0x438] sm:$0xff] }
 0x4ba   : > { %v3177_v27 = vrot.slane %v3176_v38, 1  ;;  %v3180_v36 = vrot.slane %v3179_v39, 4  ;;  %5670 = vperm.xlu1 %9186, %v9374_v50   ;;  %5107 = vmatprep.mubr.f32.mxu0 %v4374_v8  ;;  %v4377_v8 = vld [vmem:[#allocation5 + $0x410] sm:$0xff] }
 0x4bb   : > { %v6157_v4 = vmax.f32 %v6093_v52, 0.0  ;;  %v2906_v5 = vpop.f32.mrb[52].mxu1 }
 0x4bc   : > { %v3178_v17 = vmax.f32 %v3176_v38, %v3177_v27  ;;  %v3181_v62 = vmax.f32 %v3179_v39, %v3180_v36  ;;  %v2908_v12 = vpop.f32.mrb[53].mxu1  ;;  %v13599_v38 = vld [vmem:[#allocation15_spill] sm:$0xff]  ;;  %v12428_v36 = vpop.permute.xlu0 %5934 }
 0x4bd   : > { %v8511_v22 = vpack.c.bf16 %v6158_v1, %v6157_v4  ;;  %5108 = vmatmul.mubr.f32.gmra.mrb[126].mxu0 %v4373_v18  ;;  %v5587_v41 = vpop.permute.xlu1 %5586  ;;  %v4381_v1 = vld [vmem:[#allocation5 + $0x430] sm:$0xff]  ;;  %v4386_v4 = vld [vmem:[#allocation5 + $0x458] sm:$0xff]  ;;  %v13600_v12 = vld [vmem:[#allocation62_spill] sm:$0xff] }
 0x4be   : > { %v7499_v46 = vsel %vm7487_vm3, %v3178_v17, %v7498_v45  ;;  %v3182_v31 = vrot.slane %v3181_v62, 2  ;;  %9187 = vset.pattern.permute.xlu1 %v13515_v37  ;;  %5112 = vmatprep.mubr.f32.mxu0 %v4378_v21  ;;  %v5775_v39 = vmul.f32 %v5587_v41, %v13599_v38 }
 0x4bf   : > { %5990 = vperm.xlu1 %9187, %v9374_v50   ;;  %v2911_v28 = vpop.f32.mrb[54].mxu1  ;;  %8512 = vmatpush1.bf16.msra.mxu1 %v8511_v22 }
 0x4c0   : > { %v3183_v52 = vmax.f32 %v3181_v62, %v3182_v31  ;;  %v3186_v29 = vmax.f32 %v2906_v5, %v2911_v28  ;;  %v2913_v19 = vpop.f32.mrb[55].mxu1  ;;  %8513 = vmatprep.subr.bf16.mxu1 %v13346_v43  ;;  %v6095_v62 = vadd.f32 %v12402_v24, %v5775_v39  ;;  %v4385_v28 = vld [vmem:[#allocation5 + $0x450] sm:$0xff] }
 0x4c1   : > { %5113 = vmatmul.mubr.f32.gmra.mrb[128].mxu0 %v4377_v8  ;;  %v5591_v27 = vpop.permute.xlu1 %5590  ;;  %v9375_v19 = vld [vmem:[%s13112_s5 + $0x168] sm:$0xff] }
 0x4c2   : > { %v3184_v45 = vrot.slane %v3183_v52, 1  ;;  %v3187_v18 = vrot.slane %v3186_v29, 4  ;;  %5117 = vmatprep.mubr.f32.mxu0 %v4382_v7  ;;  %v5776_v22 = vmul.f32 %v5591_v27, %v13600_v12  ;;  %v6159_v24 = vmax.f32 %v6095_v62, 0.0  ;;  %v4394_v62 = vld [vmem:[#allocation5 + $0x498] sm:$0xff] }
 0x4c3   : > { %9188 = vset.pattern.permute.xlu1 %v13496_v3  ;;  %v2916_v50 = vpop.f32.mrb[56].mxu1 }
 0x4c4   : > { %v3185_v21 = vmax.f32 %v3183_v52, %v3184_v45  ;;  %v3188_v17 = vmax.f32 %v3186_v29, %v3187_v18  ;;  %5678 = vperm.xlu1 %9188, %v9375_v19   ;;  %v2918_v5 = vpop.f32.mrb[57].mxu1  ;;  %v4390_v29 = vld [vmem:[#allocation5 + $0x478] sm:$0xff]  ;;  %v12437_v45 = vpop.permute.xlu0 %5938 }
 0x4c5   : > { %5118 = vmatmul.mubr.f32.gmra.mrb[130].mxu0 %v4381_v1 }
 0x4c6   : > { %v7500_v41 = vsel %vm7489_vm4, %v3185_v21, %v7499_v46  ;;  %v3189_v31 = vrot.slane %v3188_v17, 2  ;;  %v5911_v8 = vpop.permute.xlu1 %5910  ;;  %5122 = vmatprep.mubr.f32.mxu0 %v4386_v4  ;;  %v9376_v46 = vld [vmem:[%s13112_s5 + $0x160] sm:$0xff]  ;;  %v4389_v4 = vld [vmem:[#allocation5 + $0x470] sm:$0xff] }
 0x4c7   : > { %v6096_v7 = vadd.f32 %v5911_v8, %v5776_v22  ;;  %v2921_v52 = vpop.f32.mrb[58].mxu1 }
 0x4c8   : > { %v3190_v18 = vmax.f32 %v3188_v17, %v3189_v31  ;;  %v3193_v38 = vmax.f32 %v2916_v50, %v2921_v52  ;;  %9189 = vset.pattern.permute.xlu1 %v13515_v37  ;;  %v2923_v19 = vpop.f32.mrb[59].mxu1  ;;  %v13601_v31 = vld [vmem:[#allocation17_spill] sm:$0xff] }
 0x4c9   : > { %v6160_v39 = vmax.f32 %v6096_v7, 0.0  ;;  %5123 = vmatmul.mubr.f32.gmra.mrb[132].mxu0 %v4385_v28  ;;  %5994 = vperm.xlu1 %9189, %v9376_v46   ;;  %v12445_v28 = vpop.permute.xlu0 %5626  ;;  %v4393_v19 = vld [vmem:[#allocation5 + $0x490] sm:$0xff] }
 0x4ca   : > { %v3191_v27 = vrot.slane %v3190_v18, 1  ;;  %v3194_v1 = vrot.slane %v3193_v38, 4  ;;  %5127 = vmatprep.mubr.f32.mxu0 %v4390_v29  ;;  %v9377_v29 = vld [vmem:[%s13112_s5 + $0x170] sm:$0xff] }
 0x4cb   : > { %v8514_v21 = vpack.c.bf16 %v6160_v39, %v6159_v24  ;;  %v5599_v5 = vpop.permute.xlu1 %5598  ;;  %v2926_v22 = vpop.f32.mrb[60].mxu1 }
 0x4cc   : > { %v3192_v17 = vmax.f32 %v3190_v18, %v3191_v27  ;;  %v3195_v50 = vmax.f32 %v3193_v38, %v3194_v1  ;;  %v5778_v8 = vmul.f32 %v5599_v5, %v13601_v31  ;;  %v2928_v52 = vpop.f32.mrb[61].mxu1  ;;  %v13602_v38 = vld [vmem:[#allocation18_spill] sm:$0xff]  ;;  %v4398_v27 = vld [vmem:[#allocation5 + $0x4b8] sm:$0xff] }
 0x4cd   : > { %5128 = vmatmul.mubr.f32.gmra.mrb[134].mxu0 %v4389_v4  ;;  %9190 = vset.pattern.permute.xlu1 %v13496_v3  ;;  %v5777_v24 = vmul.f32 %v12268_v48, %v13602_v38  ;;  %v4397_v48 = vld [vmem:[#allocation5 + $0x4b0] sm:$0xff]  ;;  %v12458_v38 = vpop.permute.xlu0 %5642 }
 0x4ce   : > { %v3196_v7 = vrot.slane %v3195_v50, 2  ;;  %8515 = vmatpush1.bf16.msra.mxu1 %v8514_v21  ;;  %5682 = vperm.xlu1 %9190, %v9377_v29   ;;  %v7501_v18 = vsel %vm7491_vm5, %v3192_v17, %v7500_v41  ;;  %v6098_v39 = vadd.f32 %v12410_v10, %v5778_v8  ;;  %v9378_v41 = vld [vmem:[%s13112_s5 + $0x178] sm:$0xff] }
 0x4cf   : > { %v2931_v46 = vpop.f32.mrb[62].mxu1  ;;  %5132 = vmatprep.mubr.f32.mxu0 %v4394_v62  ;;  %8516 = vmatprep.subr.bf16.mxu1 %v13346_v43  ;;  %v4402_v8 = vld [vmem:[#allocation5 + $0x4d8] sm:$0xff] }
 0x4d0   : > { %v3197_v1 = vmax.f32 %v3195_v50, %v3196_v7  ;;  %v3200_v4 = vmax.f32 %v2926_v22, %v2931_v46  ;;  %v5915_v21 = vpop.permute.xlu1 %5914  ;;  %v2933_v5 = vpop.f32.mrb[63].mxu1  ;;  %v6162_v10 = vmax.f32 %v6098_v39, 0.0 }
 0x4d1   : > { %v6097_v52 = vadd.f32 %v5915_v21, %v5777_v24  ;;  %5133 = vmatmul.mubr.f32.gmra.mrb[136].mxu0 %v4393_v19  ;;  %v4401_v21 = vld [vmem:[#allocation5 + $0x4d0] sm:$0xff]  ;;  %v4406_v5 = vld [vmem:[#allocation5 + $0x4f8] sm:$0xff] }
 0x4d2   : > { %v3198_v29 = vrot.slane %v3197_v1, 1  ;;  %v3201_v31 = vrot.slane %v3200_v4, 4  ;;  %5686 = vperm.xlu1 %9190, %v9378_v41   ;;  %5137 = vmatprep.mubr.f32.mxu0 %v4398_v27 }
 0x4d3   : > { %v6161_v17 = vmax.f32 %v6097_v52, 0.0  ;;  %v2936_v62 = vpop.f32.mrb[64].mxu1 }
 0x4d4   : > { %v3199_v22 = vmax.f32 %v3197_v1, %v3198_v29  ;;  %v3202_v50 = vmax.f32 %v3200_v4, %v3201_v31  ;;  %v2938_v7 = vpop.f32.mrb[65].mxu1  ;;  %v13603_v31 = vld [vmem:[#allocation87_spill] sm:$0xff]  ;;  %v12464_v29 = vpop.permute.xlu0 %5658 }
 0x4d5   : > { %v8517_v24 = vpack.c.bf16 %v6162_v10, %v6161_v17  ;;  %5138 = vmatmul.mubr.f32.gmra.mrb[138].mxu0 %v4397_v48  ;;  %v5603_v19 = vpop.permute.xlu1 %5602  ;;  %v4405_v17 = vld [vmem:[#allocation5 + $0x4f0] sm:$0xff]  ;;  %v13604_v7 = vld [vmem:[#allocation65_spill] sm:$0xff] }
 0x4d6   : > { %v3203_v46 = vrot.slane %v3202_v50, 2  ;;  %9191 = vset.pattern.permute.xlu1 %v13515_v37  ;;  %5142 = vmatprep.mubr.f32.mxu0 %v4402_v8  ;;  %v7502_v27 = vsel %vm7493_vm6, %v3199_v22, %v7501_v18  ;;  %v5779_v1 = vmul.f32 %v5603_v19, %v13603_v31 }
 0x4d7   : > { %6006 = vperm.xlu1 %9191, %v9378_v41   ;;  %8518 = vmatpush1.bf16.msra.mxu1 %v8517_v24  ;;  %v2941_v39 = vpop.f32.mrb[66].mxu1  ;;  %v4410_v41 = vld [vmem:[#allocation5 + $0x518] sm:$0xff] }
 0x4d8   : > { %v3204_v52 = vmax.f32 %v3202_v50, %v3203_v46  ;;  %v3207_v12 = vmax.f32 %v2936_v62, %v2941_v39  ;;  %v2943_v44 = vpop.f32.mrb[67].mxu1  ;;  %8519 = vmatprep.subr.bf16.mxu1 %v13346_v43  ;;  %v6099_v50 = vadd.f32 %v12422_v58, %v5779_v1  ;;  %v4409_v46 = vld [vmem:[#allocation5 + $0x510] sm:$0xff] }
 0x4d9   : > { %5143 = vmatmul.mubr.f32.gmra.mrb[140].mxu0 %v4401_v21  ;;  %v5607_v4 = vpop.permute.xlu1 %5606  ;;  %v9379_v44 = vld [vmem:[%s13112_s5 + $0x188] sm:$0xff] }
 0x4da   : > { %v3205_v48 = vrot.slane %v3204_v52, 1  ;;  %v3208_v10 = vrot.slane %v3207_v12, 4  ;;  %5147 = vmatprep.mubr.f32.mxu0 %v4406_v5  ;;  %v5780_v24 = vmul.f32 %v5607_v4, %v13604_v7  ;;  %v6163_v1 = vmax.f32 %v6099_v50, 0.0 }
 0x4db   : > { %9192 = vset.pattern.permute.xlu1 %v13496_v3  ;;  %v2946_v18 = vpop.f32.mrb[68].mxu1 }
 0x4dc   : > { %v3206_v8 = vmax.f32 %v3204_v52, %v3205_v48  ;;  %v3209_v22 = vmax.f32 %v3207_v12, %v3208_v10  ;;  %5694 = vperm.xlu1 %9192, %v9379_v44   ;;  %v2948_v62 = vpop.f32.mrb[69].mxu1  ;;  %v4414_v52 = vld [vmem:[#allocation5 + $0x538] sm:$0xff]  ;;  %v12476_v48 = vpop.permute.xlu0 %5674 }
 0x4dd   : > { %5148 = vmatmul.mubr.f32.gmra.mrb[142].mxu0 %v4405_v17 }
 0x4de   : > { %v5927_v19 = vpop.permute.xlu1 %5926  ;;  %5152 = vmatprep.mubr.f32.mxu0 %v4410_v41  ;;  %v7503_v21 = vsel %vm7495_vm7, %v3206_v8, %v7502_v27  ;;  %v3210_v10 = vrot.slane %v3209_v22, 2  ;;  %v9380_v27 = vld [vmem:[%s13112_s5 + $0x180] sm:$0xff]  ;;  %v4413_v41 = vld [vmem:[#allocation5 + $0x530] sm:$0xff] }
 0x4df   : > { %v6100_v39 = vadd.f32 %v5927_v19, %v5780_v24  ;;  %v2951_v5 = vpop.f32.mrb[70].mxu1  ;;  %v12474_v12 = vpack.c.bf16 %v7503_v21, %v12385_v26 }
 0x4e0   : > { %v3214_v44 = vmax.f32 %v2946_v18, %v2951_v5  ;;  %9193 = vset.pattern.permute.xlu1 %v13515_v37  ;;  %v2953_v58 = vpop.f32.mrb[71].mxu1  ;;  %v3211_v24 = vmax.f32 %v3209_v22, %v3210_v10  ;;  %v13606_v18 = vld [vmem:[#allocation67_spill] sm:$0xff]  ;;  %v12484_v50 = vpop.permute.xlu0 %5690 }
 0x4e1   : > { %13605 = vst [vmem:[#allocation20_spill] sm:$0xff] %v12474_v12  ;;  %v6164_v4 = vmax.f32 %v6100_v39, 0.0  ;;  %5153 = vmatmul.mubr.f32.gmra.mrb[144].mxu0 %v4409_v46  ;;  %6010 = vperm.xlu1 %9193, %v9380_v27   ;;  %v4418_v58 = vld [vmem:[#allocation5 + $0x558] sm:$0xff]  ;;  %v9381_v39 = vld [vmem:[%s13112_s5 + $0x190] sm:$0xff] }
 0x4e2   : > { %v3215_v17 = vrot.slane %v3214_v44, 4  ;;  %5157 = vmatprep.mubr.f32.mxu0 %v4414_v52  ;;  %v4417_v52 = vld [vmem:[#allocation5 + $0x550] sm:$0xff]  ;;  %v3212_v27 = vrot.slane %v3211_v24, 1 }
 0x4e3   : > { %v8520_v26 = vpack.c.bf16 %v6164_v4, %v6163_v1  ;;  %v5615_v8 = vpop.permute.xlu1 %5614  ;;  %v2956_v62 = vpop.f32.mrb[72].mxu1  ;;  %v13607_v1 = vld [vmem:[#allocation19_spill] sm:$0xff]  ;;  %v4422_v4 = vld [vmem:[#allocation5 + $0x578] sm:$0xff] }
 0x4e4   : > { %v3216_v19 = vmax.f32 %v3214_v44, %v3215_v17  ;;  %v5782_v21 = vmul.f32 %v5615_v8, %v13606_v18  ;;  %v2958_v5 = vpop.f32.mrb[73].mxu1  ;;  %v5781_v22 = vmul.f32 %v12279_v0, %v13607_v1  ;;  %v9382_v0 = vld [vmem:[%s13112_s5 + $0x198] sm:$0xff]  ;;  %v12496_v31 = vpop.permute.xlu0 %5706 }
 0x4e5   : > { %5158 = vmatmul.mubr.f32.gmra.mrb[146].mxu0 %v4413_v41  ;;  %9194 = vset.pattern.permute.xlu1 %v13496_v3  ;;  %v4426_v18 = vld [vmem:[#allocation5 + $0x598] sm:$0xff]  ;;  %13608 = vst [vmem:[#allocation39_spill] sm:$0xff] %v12496_v31 }
 0x4e6   : > { %v3217_v46 = vrot.slane %v3216_v19, 2  ;;  %8521 = vmatpush1.bf16.msra.mxu1 %v8520_v26  ;;  %5698 = vperm.xlu1 %9194, %v9381_v39   ;;  %v6102_v10 = vadd.f32 %v12428_v36, %v5782_v21  ;;  %v4421_v36 = vld [vmem:[#allocation5 + $0x570] sm:$0xff] }
 0x4e7   : > { %v2961_v44 = vpop.f32.mrb[74].mxu1  ;;  %5162 = vmatprep.mubr.f32.mxu0 %v4418_v58  ;;  %8522 = vmatprep.subr.bf16.mxu1 %v13346_v43 }
 0x4e8   : > { %v3218_v17 = vmax.f32 %v3216_v19, %v3217_v46  ;;  %v3221_v41 = vmax.f32 %v2956_v62, %v2961_v44  ;;  %v5931_v26 = vpop.permute.xlu1 %5930  ;;  %v2963_v8 = vpop.f32.mrb[75].mxu1  ;;  %v6166_v21 = vmax.f32 %v6102_v10, 0.0  ;;  %v3213_v62 = vmax.f32 %v3211_v24, %v3212_v27 }
 0x4e9   : > { %v6101_v5 = vadd.f32 %v5931_v26, %v5781_v22  ;;  %5163 = vmatmul.mubr.f32.gmra.mrb[148].mxu0 %v4417_v52 }
 0x4ea   : > { %v3219_v12 = vrot.slane %v3218_v17, 1  ;;  %v3222_v39 = vrot.slane %v3221_v41, 4  ;;  %5702 = vperm.xlu1 %9194, %v9382_v0   ;;  %5167 = vmatprep.mubr.f32.mxu0 %v4422_v4  ;;  %v4425_v4 = vld [vmem:[#allocation5 + $0x590] sm:$0xff] }
 0x4eb   : > { %v6165_v58 = vmax.f32 %v6101_v5, 0.0  ;;  %v2966_v1 = vpop.f32.mrb[76].mxu1  ;;  %v4430_v5 = vld [vmem:[#allocation5 + $0x5b8] sm:$0xff] }
 0x4ec   : > { %v3220_v19 = vmax.f32 %v3218_v17, %v3219_v12  ;;  %v3223_v46 = vmax.f32 %v3221_v41, %v3222_v39  ;;  %v2968_v22 = vpop.f32.mrb[77].mxu1  ;;  %v13609_v12 = vld [vmem:[#allocation68_spill] sm:$0xff]  ;;  %v12502_v41 = vpop.permute.xlu0 %5722 }
 0x4ed   : > { %v8523_v52 = vpack.c.bf16 %v6166_v21, %v6165_v58  ;;  %5168 = vmatmul.mubr.f32.gmra.mrb[150].mxu0 %v4421_v36  ;;  %v5619_v44 = vpop.permute.xlu1 %5618  ;;  %13610 = vst [vmem:[#allocation64_spill] sm:$0xff] %v12502_v41  ;;  %v4434_v21 = vld [vmem:[#allocation5 + $0x5d8] sm:$0xff]  ;;  %v13611_v22 = vld [vmem:[#allocation69_spill] sm:$0xff] }
 0x4ee   : > { %v7504_v26 = vsel %vm7483_vm1, %v3220_v19, %v3213_v62  ;;  %v3224_v8 = vrot.slane %v3223_v46, 2  ;;  %9195 = vset.pattern.permute.xlu1 %v13515_v37  ;;  %5172 = vmatprep.mubr.f32.mxu0 %v4426_v18  ;;  %v5783_v27 = vmul.f32 %v5619_v44, %v13609_v12  ;;  %v4429_v18 = vld [vmem:[#allocation5 + $0x5b0] sm:$0xff] }
 0x4ef   : > { %6022 = vperm.xlu1 %9195, %v9382_v0   ;;  %v2971_v10 = vpop.f32.mrb[78].mxu1  ;;  %8524 = vmatpush1.bf16.msra.mxu1 %v8523_v52 }
 0x4f0   : > { %v3225_v7 = vmax.f32 %v3223_v46, %v3224_v8  ;;  %v3228_v31 = vmax.f32 %v2966_v1, %v2971_v10  ;;  %v2973_v24 = vpop.f32.mrb[79].mxu1  ;;  %8525 = vmatprep.subr.bf16.mxu1 %v13346_v43  ;;  %v9383_v1 = vld [vmem:[%s13112_s5 + $0x1a8] sm:$0xff]  ;;  %v6103_v46 = vadd.f32 %v12437_v45, %v5783_v27  ;;  %v4433_v10 = vld [vmem:[#allocation5 + $0x5d0] sm:$0xff] }
 0x4f1   : > { %5173 = vmatmul.mubr.f32.gmra.mrb[152].mxu0 %v4425_v4  ;;  %v5623_v17 = vpop.permute.xlu1 %5622  ;;  %v12511_v24 = vpop.permute.xlu0 %5738 }
 0x4f2   : > { %v3226_v39 = vrot.slane %v3225_v7, 1  ;;  %v3229_v36 = vrot.slane %v3228_v31, 4  ;;  %5177 = vmatprep.mubr.f32.mxu0 %v4430_v5  ;;  %v5784_v52 = vmul.f32 %v5623_v17, %v13611_v22  ;;  %13612 = vst [vmem:[#allocation42_spill] sm:$0xff] %v12511_v24  ;;  %v6167_v45 = vmax.f32 %v6103_v46, 0.0  ;;  %v6210_v24 = vld [vmem:[#allocation7 + $0x48] sm:$0xff] }
 0x4f3   : > { %9196 = vset.pattern.permute.xlu1 %v13496_v3  ;;  %v2976_v0 = vpop.f32.mrb[80].mxu1 }
 0x4f4   : > { %v3227_v58 = vmax.f32 %v3225_v7, %v3226_v39  ;;  %v3230_v62 = vmax.f32 %v3228_v31, %v3229_v36  ;;  %5710 = vperm.xlu1 %9196, %v9383_v1   ;;  %v2978_v19 = vpop.f32.mrb[81].mxu1  ;;  %v4438_v31 = vld [vmem:[#allocation5 + $0x5f8] sm:$0xff] }
 0x4f5   : > { %5178 = vmatmul.mubr.f32.gmra.mrb[154].mxu0 %v4429_v18 }
 0x4f6   : > { %v7505_v44 = vsel %vm7485_vm2, %v3227_v58, %v7504_v26  ;;  %v3231_v8 = vrot.slane %v3230_v62, 2  ;;  %v5943_v4 = vpop.permute.xlu1 %5942  ;;  %5182 = vmatprep.mubr.f32.mxu0 %v4434_v21  ;;  %v9384_v26 = vld [vmem:[%s13112_s5 + $0x1a0] sm:$0xff]  ;;  %v4437_v21 = vld [vmem:[#allocation5 + $0x5f0] sm:$0xff] }
 0x4f7   : > { %v6104_v5 = vadd.f32 %v5943_v4, %v5784_v52  ;;  %v2981_v7 = vpop.f32.mrb[82].mxu1 }
 0x4f8   : > { %v3232_v39 = vmax.f32 %v3230_v62, %v3231_v8  ;;  %v3235_v36 = vmax.f32 %v2976_v0, %v2981_v7  ;;  %9197 = vset.pattern.permute.xlu1 %v13515_v37  ;;  %v2983_v1 = vpop.f32.mrb[83].mxu1  ;;  %v5951_v62 = vpop.permute.xlu0 %5950 }
 0x4f9   : > { %v6168_v27 = vmax.f32 %v6104_v5, 0.0  ;;  %5183 = vmatmul.mubr.f32.gmra.mrb[156].mxu0 %v4433_v10  ;;  %6026 = vperm.xlu1 %9197, %v9384_v26   ;;  %v4442_v5 = vld [vmem:[#allocation5 + $0x618] sm:$0xff]  ;;  %v4441_v1 = vld [vmem:[#allocation5 + $0x610] sm:$0xff] }
 0x4fa   : > { %v3233_v17 = vrot.slane %v3232_v39, 1  ;;  %v3236_v18 = vrot.slane %v3235_v36, 4  ;;  %5187 = vmatprep.mubr.f32.mxu0 %v4438_v31  ;;  %v9385_v31 = vld [vmem:[%s13112_s5 + $0x1b0] sm:$0xff]  ;;  %v4446_v26 = vld [vmem:[#allocation5 + $0x638] sm:$0xff] }
 0x4fb   : > { %v8526_v58 = vpack.c.bf16 %v6168_v27, %v6167_v45  ;;  %v5631_v19 = vpop.permute.xlu1 %5630  ;;  %v2986_v52 = vpop.f32.mrb[84].mxu1  ;;  %v6201_v45 = vld [vmem:[#allocation7] sm:$0xff] }
 0x4fc   : > { %v3234_v0 = vmax.f32 %v3232_v39, %v3233_v17  ;;  %v3237_v8 = vmax.f32 %v3235_v36, %v3236_v18  ;;  %v5786_v4 = vmul.f32 %v5631_v19, %v11591_v60  ;;  %v2988_v46 = vpop.f32.mrb[85].mxu1  ;;  %v5785_v39 = vmul.f32 %v12445_v28, %v11578_v30  ;;  %v9386_v28 = vld [vmem:[%s13112_s5 + $0x1b8] sm:$0xff] }
 0x4fd   : > { %5188 = vmatmul.mubr.f32.gmra.mrb[158].mxu0 %v4437_v21  ;;  %9198 = vset.pattern.permute.xlu1 %v13496_v3 }
 0x4fe   : > { %v7506_v10 = vsel %vm7487_vm3, %v3234_v0, %v7505_v44  ;;  %v3238_v7 = vrot.slane %v3237_v8, 2  ;;  %8527 = vmatpush1.bf16.msra.mxu1 %v8526_v58  ;;  %5714 = vperm.xlu1 %9198, %v9385_v31   ;;  %v6106_v36 = vadd.f32 %v5951_v62, %v5786_v4  ;;  %v6206_v58 = vld [vmem:[#allocation7 + $0x28] sm:$0xff]  ;;  %v4445_v62 = vld [vmem:[#allocation5 + $0x630] sm:$0xff]  ;;  %v6205_v4 = vld [vmem:[#allocation7 + $0x20] sm:$0xff] }
 0x4ff   : > { %v2991_v27 = vpop.f32.mrb[86].mxu1  ;;  %5192 = vmatprep.mubr.f32.mxu0 %v4442_v5  ;;  %8608 = vmatprep.subr.bf16.mxu1 %v13346_v43 }
 0x500   : > { %v3239_v17 = vmax.f32 %v3237_v8, %v3238_v7  ;;  %v3242_v44 = vmax.f32 %v2986_v52, %v2991_v27  ;;  %v5947_v18 = vpop.permute.xlu1 %5946  ;;  %v2993_v21 = vpop.f32.mrb[87].mxu1  ;;  %v6170_v5 = vmax.f32 %v6106_v36, 0.0  ;;  %v4450_v52 = vld [vmem:[#allocation5 + $0x658] sm:$0xff] }
 0x501   : > { %v6105_v19 = vadd.f32 %v5947_v18, %v5785_v39  ;;  %5193 = vmatmul.mubr.f32.gmra.mrb[160].mxu0 %v4441_v1  ;;  %6522 = vmatmul.mubr.f32.vlgmr.msra.gmra.mrb[128].mxu1 %v6201_v45 }
 0x502   : > { %v3240_v0 = vrot.slane %v3239_v17, 1  ;;  %v3243_v46 = vrot.slane %v3242_v44, 4  ;;  %5718 = vperm.xlu1 %9198, %v9386_v28   ;;  %5197 = vmatprep.mubr.f32.mxu0 %v4446_v26  ;;  %v4449_v26 = vld [vmem:[#allocation5 + $0x650] sm:$0xff] }
 0x503   : > { %v6169_v31 = vmax.f32 %v6105_v19, 0.0  ;;  %v2996_v8 = vpop.f32.mrb[88].mxu1  ;;  %6526 = vmatprep.mubr.f32.mxu1 %v6206_v58  ;;  %v4454_v19 = vld [vmem:[#allocation5 + $0x678] sm:$0xff] }
 0x504   : > { %v3241_v7 = vmax.f32 %v3239_v17, %v3240_v0  ;;  %v3244_v27 = vmax.f32 %v3242_v44, %v3243_v46  ;;  %v2998_v39 = vpop.f32.mrb[89].mxu1  ;;  %v6209_v0 = vld [vmem:[#allocation7 + $0x40] sm:$0xff] }
 0x505   : > { %v8529_v1 = vpack.c.bf16 %v6170_v5, %v6169_v31  ;;  %5198 = vmatmul.mubr.f32.gmra.mrb[162].mxu0 %v4445_v62  ;;  %v5635_v45 = vpop.permute.xlu1 %5634  ;;  %6527 = vmatmul.mubr.f32.gmra.mrb[130].mxu1 %v6205_v4  ;;  %v6214_v62 = vld [vmem:[#allocation7 + $0x68] sm:$0xff]  ;;  %v5955_v4 = vpop.permute.xlu0 %5954  ;;  %v4453_v31 = vld [vmem:[#allocation5 + $0x670] sm:$0xff] }
 0x506   : > { %v7507_v18 = vsel %vm7489_vm4, %v3241_v7, %v7506_v10  ;;  %v3245_v21 = vrot.slane %v3244_v27, 2  ;;  %9199 = vset.pattern.permute.xlu1 %v13515_v37  ;;  %5202 = vmatprep.mubr.f32.mxu0 %v4450_v52  ;;  %v5787_v46 = vmul.f32 %v5635_v45, %v11604_v16  ;;  %v4458_v52 = vld [vmem:[#allocation5 + $0x698] sm:$0xff]  ;;  %v9387_v39 = vld [vmem:[%s13112_s5 + $0x1c8] sm:$0xff]  ;;  %v6213_v45 = vld [vmem:[#allocation7 + $0x60] sm:$0xff] }
 0x507   : > { %6038 = vperm.xlu1 %9199, %v9386_v28   ;;  %v3001_v36 = vpop.f32.mrb[90].mxu1  ;;  %8530 = vmatpush1.bf16.msra.mxu0 %v8529_v1 }
 0x508   : > { %v3246_v58 = vmax.f32 %v3244_v27, %v3245_v21  ;;  %v3249_v17 = vmax.f32 %v2996_v8, %v3001_v36  ;;  %8624 = vmatpush1.bf16.msra.mxu1 %v8529_v1  ;;  %v3003_v44 = vpop.f32.mrb[91].mxu1  ;;  %8531 = vmatprep.subr.bf16.mxu0 %v13346_v43  ;;  %v6107_v21 = vadd.f32 %v5955_v4, %v5787_v46  ;;  %v6217_v46 = vld [vmem:[#allocation7 + $0x80] sm:$0xff] }
 0x509   : > { %5203 = vmatmul.mubr.f32.gmra.mrb[164].mxu0 %v4449_v26  ;;  %v5639_v10 = vpop.permute.xlu1 %5638  ;;  %8609 = vmatprep.subr.bf16.mxu1 %v13346_v43  ;;  %v4457_v44 = vld [vmem:[#allocation5 + $0x690] sm:$0xff] }
 0x50a   : > { %v3247_v28 = vrot.slane %v3246_v58, 1  ;;  %v3250_v5 = vrot.slane %v3249_v17, 4  ;;  %5207 = vmatprep.mubr.f32.mxu0 %v4454_v19  ;;  %6531 = vmatprep.mubr.f32.mxu1 %v6210_v24  ;;  %v5788_v26 = vmul.f32 %v5639_v10, %v11595_v14  ;;  %v6218_v24 = vld [vmem:[#allocation7 + $0x88] sm:$0xff]  ;;  %v6171_v10 = vmax.f32 %v6107_v21, 0.0 }
 0x50b   : > { %9200 = vset.pattern.permute.xlu1 %v13496_v3  ;;  %v3006_v8 = vpop.f32.mrb[92].mxu1  ;;  %6532 = vmatmul.mubr.f32.gmra.mrb[132].mxu1 %v6209_v0 }
 0x50c   : > { %v3248_v7 = vmax.f32 %v3246_v58, %v3247_v28  ;;  %v3251_v27 = vmax.f32 %v3249_v17, %v3250_v5  ;;  %5726 = vperm.xlu1 %9200, %v9387_v39   ;;  %v3008_v1 = vpop.f32.mrb[93].mxu1  ;;  %6536 = vmatprep.mubr.f32.mxu1 %v6214_v62  ;;  %v4462_v28 = vld [vmem:[#allocation5 + $0x6b8] sm:$0xff] }
 0x50d   : > { %5208 = vmatmul.mubr.f32.gmra.mrb[166].mxu0 %v4453_v31  ;;  %v9388_v31 = vld [vmem:[%s13112_s5 + $0x1c0] sm:$0xff] }
 0x50e   : > { %v3252_v36 = vrot.slane %v3251_v27, 2  ;;  %v5959_v19 = vpop.permute.xlu1 %5958  ;;  %5212 = vmatprep.mubr.f32.mxu0 %v4458_v52  ;;  %v7508_v58 = vsel %vm7491_vm5, %v3248_v7, %v7507_v18  ;;  %v6222_v18 = vld [vmem:[#allocation7 + $0xa8] sm:$0xff]  ;;  %v5967_v52 = vpop.permute.xlu0 %5966 }
 0x50f   : > { %v6108_v17 = vadd.f32 %v5959_v19, %v5788_v26  ;;  %v3011_v0 = vpop.f32.mrb[94].mxu1  ;;  %6537 = vmatmul.mubr.f32.gmra.mrb[134].mxu1 %v6213_v45 }
 0x510   : > { %v3253_v5 = vmax.f32 %v3251_v27, %v3252_v36  ;;  %v3256_v39 = vmax.f32 %v3006_v8, %v3011_v0  ;;  %9201 = vset.pattern.permute.xlu1 %v13515_v37  ;;  %v3013_v62 = vpop.f32.mrb[95].mxu1  ;;  %6541 = vmatprep.mubr.f32.mxu1 %v6218_v24  ;;  %v4461_v27 = vld [vmem:[#allocation5 + $0x6b0] sm:$0xff] }
 0x511   : > { %v6172_v4 = vmax.f32 %v6108_v17, 0.0  ;;  %5213 = vmatmul.mubr.f32.gmra.mrb[168].mxu0 %v4457_v44  ;;  %6042 = vperm.xlu1 %9201, %v9388_v31   ;;  %v4466_v44 = vld [vmem:[#allocation5 + $0x6d8] sm:$0xff] }
 0x512   : > { %v3254_v7 = vrot.slane %v3253_v5, 1  ;;  %v3257_v1 = vrot.slane %v3256_v39, 4  ;;  %5217 = vmatprep.mubr.f32.mxu0 %v4462_v28  ;;  %v4465_v28 = vld [vmem:[#allocation5 + $0x6d0] sm:$0xff] }
 0x513   : > { %v8532_v8 = vpack.c.bf16 %v6172_v4, %v6171_v10  ;;  %v5647_v45 = vpop.permute.xlu1 %5646  ;;  %v4954_v26 = vpop.f32.mrb[64].mxu0  ;;  %6542 = vmatmul.mubr.f32.gmra.mrb[136].mxu1 %v6217_v46  ;;  %v6221_v10 = vld [vmem:[#allocation7 + $0xa0] sm:$0xff]  ;;  %v9389_v46 = vld [vmem:[%s13112_s5 + $0x1d0] sm:$0xff] }
 0x514   : > { %v3255_v24 = vmax.f32 %v3253_v5, %v3254_v7  ;;  %v3258_v36 = vmax.f32 %v3256_v39, %v3257_v1  ;;  %v5790_v21 = vmul.f32 %v5647_v45, %v11614_v25  ;;  %v4956_v19 = vpop.f32.mrb[65].mxu0  ;;  %v3016_v17 = vpop.f32.mrb[96].mxu1  ;;  %6546 = vmatprep.mubr.f32.mxu1 %v6222_v18  ;;  %v5789_v5 = vmul.f32 %v12458_v38, %v11624_v15  ;;  %v4470_v7 = vld [vmem:[#allocation5 + $0x6f8] sm:$0xff]  ;;  %v6226_v1 = vld [vmem:[#allocation7 + $0xc8] sm:$0xff] }
 0x515   : > { %5218 = vmatmul.mubr.f32.gmra.mrb[170].mxu0 %v4461_v27  ;;  %9202 = vset.pattern.permute.xlu1 %v13496_v3  ;;  %v3018_v0 = vpop.f32.mrb[97].mxu1  ;;  %v4478_v15 = vld [vmem:[#allocation5 + $0x738] sm:$0xff] }
 0x516   : > { %v3259_v62 = vrot.slane %v3258_v36, 2  ;;  %8533 = vmatpush1.bf16.msra.mxu0 %v8532_v8  ;;  %8625 = vmatpush1.bf16.msra.mxu1 %v8532_v8  ;;  %v7509_v4 = vsel %vm7493_vm6, %v3255_v24, %v7508_v58  ;;  %v6110_v39 = vadd.f32 %v5967_v52, %v5790_v21 }
 0x517   : > { %5730 = vperm.xlu1 %9202, %v9389_v46   ;;  %v4959_v31 = vpop.f32.mrb[66].mxu0  ;;  %5222 = vmatprep.mubr.f32.mxu0 %v4466_v44  ;;  %v3021_v18 = vpop.f32.mrb[98].mxu1  ;;  %v4469_v44 = vld [vmem:[#allocation5 + $0x6f0] sm:$0xff]  ;;  %v6225_v46 = vld [vmem:[#allocation7 + $0xc0] sm:$0xff] }
 0x518   : > { %v3260_v27 = vmax.f32 %v3258_v36, %v3259_v62  ;;  %v5273_v8 = vmax.f32 %v4954_v26, %v4959_v31  ;;  %v5963_v45 = vpop.permute.xlu1 %5962  ;;  %v4961_v19 = vpop.f32.mrb[67].mxu0  ;;  %v3263_v0 = vmax.f32 %v3016_v17, %v3021_v18  ;;  %8534 = vmatprep.subr.bf16.mxu0 %v13346_v43  ;;  %8610 = vmatprep.subr.bf16.mxu1 %v13346_v43  ;;  %v6174_v36 = vmax.f32 %v6110_v39, 0.0  ;;  %v9390_v17 = vld [vmem:[%s13112_s5 + $0x1d8] sm:$0xff]  ;;  %v4473_v39 = vld [vmem:[#allocation5 + $0x710] sm:$0xff] }
 0x519   : > { %v6109_v38 = vadd.f32 %v5963_v45, %v5789_v5  ;;  %5223 = vmatmul.mubr.f32.gmra.mrb[172].mxu0 %v4465_v28  ;;  %v3023_v58 = vpop.f32.mrb[99].mxu1  ;;  %6547 = vmatmul.mubr.f32.gmra.mrb[138].mxu1 %v6221_v10  ;;  %v4474_v5 = vld [vmem:[#allocation5 + $0x718] sm:$0xff]  ;;  %v6230_v28 = vld [vmem:[#allocation7 + $0xe8] sm:$0xff] }
 0x51a   : > { %v3261_v52 = vrot.slane %v3260_v27, 1  ;;  %v5274_v24 = vrot.slane %v5273_v8, 4  ;;  %v3264_v21 = vrot.slane %v3263_v0, 4  ;;  %5227 = vmatprep.mubr.f32.mxu0 %v4470_v7  ;;  %6551 = vmatprep.mubr.f32.mxu1 %v6226_v1 }
 0x51b   : > { %v6173_v26 = vmax.f32 %v6109_v38, 0.0  ;;  %5734 = vperm.xlu1 %9202, %v9390_v17   ;;  %v4964_v62 = vpop.f32.mrb[68].mxu0  ;;  %v3026_v31 = vpop.f32.mrb[100].mxu1 }
 0x51c   : > { %v3262_v18 = vmax.f32 %v3260_v27, %v3261_v52  ;;  %v5275_v10 = vmax.f32 %v5273_v8, %v5274_v24  ;;  %v3265_v45 = vmax.f32 %v3263_v0, %v3264_v21  ;;  %v4966_v19 = vpop.f32.mrb[69].mxu0  ;;  %v3028_v58 = vpop.f32.mrb[101].mxu1  ;;  %v6229_v21 = vld [vmem:[#allocation7 + $0xe0] sm:$0xff] }
 0x51d   : > { %v8535_v7 = vpack.c.bf16 %v6174_v36, %v6173_v26  ;;  %5228 = vmatmul.mubr.f32.gmra.mrb[174].mxu0 %v4469_v44  ;;  %v5651_v1 = vpop.permute.xlu1 %5650  ;;  %6552 = vmatmul.mubr.f32.gmra.mrb[140].mxu1 %v6225_v46  ;;  %v6234_v26 = vld [vmem:[#allocation7 + $0x108] sm:$0xff] }
 0x51e   : > { %5232 = vmatprep.mubr.f32.mxu0 %v4474_v5  ;;  %6556 = vmatprep.mubr.f32.mxu1 %v6230_v28  ;;  %v12558_v38 = vsel %vm7495_vm7, %v3262_v18, %v7509_v4  ;;  %v5276_v27 = vrot.slane %v5275_v10, 2  ;;  %v3266_v8 = vrot.slane %v3265_v45, 2  ;;  %v5791_v44 = vmul.f32 %v5651_v1, %v11658_v51  ;;  %v5971_v5 = vpop.permute.xlu0 %5970  ;;  %v4477_v18 = vld [vmem:[#allocation5 + $0x730] sm:$0xff] }
 0x51f   : > { %9203 = vset.pattern.permute.xlu1 %v13515_v37  ;;  %v3031_v41 = vpop.f32.mrb[102].mxu1  ;;  %8536 = vmatpush1.bf16.msra.mxu0 %v8535_v7 }
 0x520   : > { %6054 = vperm.xlu1 %9203, %v9390_v17   ;;  %v3270_v0 = vmax.f32 %v3026_v31, %v3031_v41  ;;  %v4969_v52 = vpop.f32.mrb[70].mxu0  ;;  %v3033_v24 = vpop.f32.mrb[103].mxu1  ;;  %8626 = vmatpush1.bf16.msra.mxu1 %v8535_v7  ;;  %v4482_v41 = vld [vmem:[#allocation5 + $0x758] sm:$0xff]  ;;  %v5277_v31 = vmax.f32 %v5275_v10, %v5276_v27  ;;  %v3267_v58 = vmax.f32 %v3265_v45, %v3266_v8  ;;  %v6238_v10 = vld [vmem:[#allocation7 + $0x128] sm:$0xff]  ;;  %v4481_v8 = vld [vmem:[#allocation5 + $0x750] sm:$0xff] }
 0x521   : > { %v5280_v46 = vmax.f32 %v4964_v62, %v4969_v52  ;;  %v4971_v36 = vpop.f32.mrb[71].mxu0  ;;  %5233 = vmatmul.mubr.f32.gmra.mrb[176].mxu0 %v4473_v39  ;;  %v5655_v4 = vpop.permute.xlu1 %5654  ;;  %8537 = vmatprep.subr.bf16.mxu0 %v13346_v43  ;;  %v6233_v39 = vld [vmem:[#allocation7 + $0x100] sm:$0xff]  ;;  %v6111_v52 = vadd.f32 %v5971_v5, %v5791_v44 }
 0x522   : > { %v3271_v28 = vrot.slane %v3270_v0, 4  ;;  %5237 = vmatprep.mubr.f32.mxu0 %v4478_v15  ;;  %8611 = vmatprep.subr.bf16.mxu1 %v13346_v43  ;;  %v5792_v24 = vmul.f32 %v5655_v4, %v11665_v9  ;;  %v9391_v36 = vld [vmem:[%s13112_s5 + $0x1e8] sm:$0xff]  ;;  %v5278_v44 = vrot.slane %v5277_v31, 1 }
 0x523   : > { %v5281_v19 = vrot.slane %v5280_v46, 4  ;;  %v3036_v17 = vpop.f32.mrb[104].mxu1  ;;  %6557 = vmatmul.mubr.f32.gmra.mrb[142].mxu1 %v6229_v21 }
 0x524   : > { %v3272_v62 = vmax.f32 %v3270_v0, %v3271_v28  ;;  %9205 = vset.pattern.permute.xlu1 %v13496_v3  ;;  %v4974_v7 = vpop.f32.mrb[72].mxu0  ;;  %v3038_v1 = vpop.f32.mrb[105].mxu1  ;;  %6561 = vmatprep.mubr.f32.mxu1 %v6234_v26  ;;  %v4486_v28 = vld [vmem:[#allocation5 + $0x778] sm:$0xff]  ;;  %v5279_v14 = vmax.f32 %v5277_v31, %v5278_v44 }
 0x525   : > { %v5282_v15 = vmax.f32 %v5280_v46, %v5281_v19  ;;  %5742 = vperm.xlu1 %9205, %v9391_v36   ;;  %v4976_v51 = vpop.f32.mrb[73].mxu0  ;;  %5238 = vmatmul.mubr.f32.gmra.mrb[178].mxu0 %v4477_v18  ;;  %v3268_v46 = vrot.slane %v3267_v58, 1  ;;  %v6237_v36 = vld [vmem:[#allocation7 + $0x120] sm:$0xff] }
 0x526   : > { %v3273_v45 = vrot.slane %v3272_v62, 2  ;;  %v5975_v27 = vpop.permute.xlu1 %5974  ;;  %5242 = vmatprep.mubr.f32.mxu0 %v4482_v41  ;;  %v6175_v51 = vmax.f32 %v6111_v52, 0.0 }
 0x527   : > { %v5283_v0 = vrot.slane %v5282_v15, 2  ;;  %v6112_v21 = vadd.f32 %v5975_v27, %v5792_v24  ;;  %v3041_v26 = vpop.f32.mrb[106].mxu1  ;;  %6562 = vmatmul.mubr.f32.gmra.mrb[144].mxu1 %v6233_v39  ;;  %v6242_v24 = vld [vmem:[#allocation7 + $0x148] sm:$0xff]  ;;  %v5983_v27 = vpop.permute.xlu0 %5982 }
 0x528   : > { %v3274_v4 = vmax.f32 %v3272_v62, %v3273_v45  ;;  %v3277_v5 = vmax.f32 %v3036_v17, %v3041_v26  ;;  %v4979_v19 = vpop.f32.mrb[74].mxu0  ;;  %v3043_v1 = vpop.f32.mrb[107].mxu1  ;;  %6566 = vmatprep.mubr.f32.mxu1 %v6238_v10  ;;  %v9392_v17 = vld [vmem:[%s13112_s5 + $0x1e0] sm:$0xff]  ;;  %v4485_v62 = vld [vmem:[#allocation5 + $0x770] sm:$0xff] }
 0x529   : > { %v5284_v18 = vmax.f32 %v5282_v15, %v5283_v0  ;;  %v6176_v9 = vmax.f32 %v6112_v21, 0.0  ;;  %v5287_v25 = vmax.f32 %v4974_v7, %v4979_v19  ;;  %9206 = vset.pattern.permute.xlu1 %v13515_v37  ;;  %v4981_v41 = vpop.f32.mrb[75].mxu0  ;;  %5243 = vmatmul.mubr.f32.gmra.mrb[180].mxu0 %v4481_v8  ;;  %v3269_v0 = vmax.f32 %v3267_v58, %v3268_v46  ;;  %v6241_v58 = vld [vmem:[#allocation7 + $0x140] sm:$0xff] }
 0x52a   : > { %v3275_v16 = vrot.slane %v3274_v4, 1  ;;  %v3278_v39 = vrot.slane %v3277_v5, 4  ;;  %6058 = vperm.xlu1 %9206, %v9392_v17   ;;  %5247 = vmatprep.mubr.f32.mxu0 %v4486_v28  ;;  %v4490_v41 = vld [vmem:[#allocation5 + $0x798] sm:$0xff]  ;;  %v5793_v46 = vmul.f32 %v12464_v29, %v11680_v49 }
 0x52b   : > { %v5285_v10 = vrot.slane %v5284_v18, 1  ;;  %v8538_v52 = vpack.c.bf16 %v6176_v9, %v6175_v51  ;;  %v5288_v15 = vrot.slane %v5287_v25, 4  ;;  %v5663_v45 = vpop.permute.xlu1 %5662  ;;  %v3046_v7 = vpop.f32.mrb[108].mxu1  ;;  %6567 = vmatmul.mubr.f32.gmra.mrb[146].mxu1 %v6237_v36  ;;  %v4494_v36 = vld [vmem:[#allocation5 + $0x7b8] sm:$0xff] }
 0x52c   : > { %v3276_v21 = vmax.f32 %v3274_v4, %v3275_v16  ;;  %v3279_v8 = vmax.f32 %v3277_v5, %v3278_v39  ;;  %v5794_v26 = vmul.f32 %v5663_v45, %v11692_v32  ;;  %v4984_v19 = vpop.f32.mrb[76].mxu0  ;;  %v3048_v1 = vpop.f32.mrb[109].mxu1  ;;  %6571 = vmatprep.mubr.f32.mxu1 %v6242_v24  ;;  %v4489_v16 = vld [vmem:[#allocation5 + $0x790] sm:$0xff] }
 0x52d   : > { %v5286_v30 = vmax.f32 %v5284_v18, %v5285_v10  ;;  %v5289_v17 = vmax.f32 %v5287_v25, %v5288_v15  ;;  %v4986_v28 = vpop.f32.mrb[77].mxu0  ;;  %5248 = vmatmul.mubr.f32.gmra.mrb[182].mxu0 %v4485_v62  ;;  %8627 = vmatpush1.bf16.msra.mxu1 %v8538_v52  ;;  %v9393_v25 = vld [vmem:[%s13112_s5 + $0x1f0] sm:$0xff]  ;;  %v6246_v18 = vld [vmem:[#allocation7 + $0x168] sm:$0xff] }
 0x52e   : > { %v7511_v9 = vsel %vm7483_vm1, %v3276_v21, %v3269_v0  ;;  %v3280_v51 = vrot.slane %v3279_v8, 2  ;;  %9207 = vset.pattern.permute.xlu1 %v13496_v3  ;;  %8539 = vmatpush1.bf16.msra.mxu0 %v8538_v52  ;;  %v6114_v31 = vadd.f32 %v5983_v27, %v5794_v26  ;;  %v4493_v45 = vld [vmem:[#allocation5 + $0x7b0] sm:$0xff]  ;;  %v4498_v0 = vld [vmem:[#allocation5 + $0x7d8] sm:$0xff] }
 0x52f   : > { %v7618_v4 = vsel %vm7483_vm1, %v5286_v30, %v5279_v14  ;;  %v5290_v5 = vrot.slane %v5289_v17, 2  ;;  %5746 = vperm.xlu1 %9207, %v9393_v25   ;;  %v3051_v44 = vpop.f32.mrb[110].mxu1  ;;  %5252 = vmatprep.mubr.f32.mxu0 %v4490_v41 }
 0x530   : > { %v3281_v3 = vmax.f32 %v3279_v8, %v3280_v51  ;;  %v3284_v24 = vmax.f32 %v3046_v7, %v3051_v44  ;;  %v4989_v39 = vpop.f32.mrb[78].mxu0  ;;  %v5979_v62 = vpop.permute.xlu1 %5978  ;;  %8540 = vmatprep.subr.bf16.mxu0 %v13346_v43  ;;  %8612 = vmatprep.subr.bf16.mxu1 %v13346_v43  ;;  %v6245_v7 = vld [vmem:[#allocation7 + $0x160] sm:$0xff]  ;;  %v6178_v8 = vmax.f32 %v6114_v31, 0.0 }
 0x531   : > { %v5291_v30 = vmax.f32 %v5289_v17, %v5290_v5  ;;  %v5294_v14 = vmax.f32 %v4984_v19, %v4989_v39  ;;  %v6113_v29 = vadd.f32 %v5979_v62, %v5793_v46  ;;  %v4991_v27 = vpop.f32.mrb[79].mxu0  ;;  %5253 = vmatmul.mubr.f32.gmra.mrb[184].mxu0 %v4489_v16  ;;  %v3053_v10 = vpop.f32.mrb[111].mxu1  ;;  %6572 = vmatmul.mubr.f32.gmra.mrb[148].mxu1 %v6241_v58  ;;  %v9394_v19 = vld [vmem:[%s13112_s5 + $0x1f8] sm:$0xff]  ;;  %v6250_v17 = vld [vmem:[#allocation7 + $0x188] sm:$0xff]  ;;  %v4497_v39 = vld [vmem:[#allocation5 + $0x7d0] sm:$0xff] }
 0x532   : > { %v3282_v52 = vrot.slane %v3281_v3, 1  ;;  %v3285_v15 = vrot.slane %v3284_v24, 4  ;;  %5257 = vmatprep.mubr.f32.mxu0 %v4494_v36  ;;  %6576 = vmatprep.mubr.f32.mxu1 %v6246_v18 }
 0x533   : > { %v5292_v21 = vrot.slane %v5291_v30, 1  ;;  %v5295_v26 = vrot.slane %v5294_v14, 4  ;;  %v6177_v1 = vmax.f32 %v6113_v29, 0.0  ;;  %5750 = vperm.xlu1 %9207, %v9394_v19   ;;  %v3056_v41 = vpop.f32.mrb[112].mxu1 }
 0x534   : > { %v3283_v28 = vmax.f32 %v3281_v3, %v3282_v52  ;;  %v3286_v51 = vmax.f32 %v3284_v24, %v3285_v15  ;;  %v4994_v16 = vpop.f32.mrb[80].mxu0  ;;  %v3058_v58 = vpop.f32.mrb[113].mxu1  ;;  %v4502_v24 = vld [vmem:[#allocation5 + $0x7f8] sm:$0xff]  ;;  %v6249_v52 = vld [vmem:[#allocation7 + $0x180] sm:$0xff] }
 0x535   : > { %v5293_v46 = vmax.f32 %v5291_v30, %v5292_v21  ;;  %v5296_v5 = vmax.f32 %v5294_v14, %v5295_v26  ;;  %v8541_v25 = vpack.c.bf16 %v6178_v8, %v6177_v1  ;;  %v4996_v44 = vpop.f32.mrb[81].mxu0  ;;  %5258 = vmatmul.mubr.f32.gmra.mrb[186].mxu0 %v4493_v45  ;;  %v5667_v36 = vpop.permute.xlu1 %5666  ;;  %6577 = vmatmul.mubr.f32.gmra.mrb[150].mxu1 %v6245_v7  ;;  %v4501_v26 = vld [vmem:[#allocation5 + $0x7f0] sm:$0xff]  ;;  %v6253_v58 = vld [vmem:[#allocation7 + $0x1a0] sm:$0xff] }
 0x536   : > { %v7512_v31 = vsel %vm7485_vm2, %v3283_v28, %v7511_v9  ;;  %v3287_v18 = vrot.slane %v3286_v51, 2  ;;  %5262 = vmatprep.mubr.f32.mxu0 %v4498_v0  ;;  %6581 = vmatprep.mubr.f32.mxu1 %v6250_v17  ;;  %v5795_v15 = vmul.f32 %v5667_v36, %v11720_v57  ;;  %v5987_v7 = vpop.permute.xlu0 %5986 }
 0x537   : > { %v7619_v62 = vsel %vm7485_vm2, %v5293_v46, %v7618_v4  ;;  %v5297_v29 = vrot.slane %v5296_v5, 2  ;;  %9208 = vset.pattern.permute.xlu1 %v13515_v37  ;;  %v3061_v3 = vpop.f32.mrb[114].mxu1  ;;  %8542 = vmatpush1.bf16.msra.mxu0 %v8541_v25  ;;  %v6254_v37 = vld [vmem:[#allocation7 + $0x1a8] sm:$0xff] }
 0x538   : > { %v3288_v30 = vmax.f32 %v3286_v51, %v3287_v18  ;;  %6070 = vperm.xlu1 %9208, %v9394_v19   ;;  %v3291_v14 = vmax.f32 %v3056_v41, %v3061_v3  ;;  %v4999_v27 = vpop.f32.mrb[82].mxu0  ;;  %8628 = vmatpush1.bf16.msra.mxu1 %v8541_v25  ;;  %v3063_v10 = vpop.f32.mrb[115].mxu1  ;;  %v6258_v18 = vld [vmem:[#allocation7 + $0x1c8] sm:$0xff] }
 0x539   : > { %v5298_v9 = vmax.f32 %v5296_v5, %v5297_v29  ;;  %v5301_v45 = vmax.f32 %v4994_v16, %v4999_v27  ;;  %v5001_v0 = vpop.f32.mrb[83].mxu0  ;;  %5263 = vmatmul.mubr.f32.gmra.mrb[188].mxu0 %v4497_v39  ;;  %v5671_v4 = vpop.permute.xlu1 %5670  ;;  %8543 = vmatprep.subr.bf16.mxu0 %v13346_v43  ;;  %v6115_v5 = vadd.f32 %v5987_v7, %v5795_v15  ;;  %v6257_v15 = vld [vmem:[#allocation7 + $0x1c0] sm:$0xff] }
 0x53a   : > { %v3289_v21 = vrot.slane %v3288_v30, 1  ;;  %v3292_v8 = vrot.slane %v3291_v14, 4  ;;  %5267 = vmatprep.mubr.f32.mxu0 %v4502_v24  ;;  %8613 = vmatprep.subr.bf16.mxu1 %v13346_v43  ;;  %v5796_v44 = vmul.f32 %v5671_v4, %v11727_v35 }
 0x53b   : > { %v5299_v1 = vrot.slane %v5298_v9, 1  ;;  %v5302_v19 = vrot.slane %v5301_v45, 4  ;;  %v3066_v41 = vpop.f32.mrb[116].mxu1  ;;  %6582 = vmatmul.mubr.f32.gmra.mrb[152].mxu1 %v6249_v52 }
 0x53c   : > { %v3290_v17 = vmax.f32 %v3288_v30, %v3289_v21  ;;  %v3293_v28 = vmax.f32 %v3291_v14, %v3292_v8  ;;  %v5004_v51 = vpop.f32.mrb[84].mxu0  ;;  %v3068_v16 = vpop.f32.mrb[117].mxu1  ;;  %6586 = vmatprep.mubr.f32.mxu1 %v6254_v37  ;;  %9210 = vset.pattern.permute.xlu1 %v13556_v2 }
 0x53d   : > { %v5300_v46 = vmax.f32 %v5298_v9, %v5299_v1  ;;  %v5303_v25 = vmax.f32 %v5301_v45, %v5302_v19  ;;  %v5006_v36 = vpop.f32.mrb[85].mxu0  ;;  %5268 = vmatmul.mubr.f32.gmra.mrb[190].mxu0 %v4501_v26  ;;  %v6179_v45 = vmax.f32 %v6115_v5, 0.0  ;;  %v5999_v21 = vpop.permute.xlu0 %5998 }
 0x53e   : > { %v7513_v39 = vsel %vm7487_vm3, %v3290_v17, %v7512_v31  ;;  %v3294_v29 = vrot.slane %v3293_v28, 2  ;;  %v5991_v3 = vpop.permute.xlu1 %5990  ;;  %v6262_v31 = vld [vmem:[#allocation7 + $0x1e8] sm:$0xff] }
 0x53f   : > { %v7620_v24 = vsel %vm7487_vm3, %v5300_v46, %v7619_v62  ;;  %v5304_v30 = vrot.slane %v5303_v25, 2  ;;  %v6116_v14 = vadd.f32 %v5991_v3, %v5796_v44  ;;  %v3071_v27 = vpop.f32.mrb[118].mxu1  ;;  %6587 = vmatmul.mubr.f32.gmra.mrb[154].mxu1 %v6253_v58 }
 0x540   : > { %v3295_v10 = vmax.f32 %v3293_v28, %v3294_v29  ;;  %v3298_v2 = vmax.f32 %v3066_v41, %v3071_v27  ;;  %v5009_v52 = vpop.f32.mrb[86].mxu0  ;;  %v3073_v9 = vpop.f32.mrb[119].mxu1  ;;  %6591 = vmatprep.mubr.f32.mxu1 %v6258_v18  ;;  %v6266_v18 = vld [vmem:[#allocation7 + $0x208] sm:$0xff] }
 0x541   : > { %v5305_v0 = vmax.f32 %v5303_v25, %v5304_v30  ;;  %v6180_v4 = vmax.f32 %v6116_v14, 0.0  ;;  %v5308_v37 = vmax.f32 %v5004_v51, %v5009_v52  ;;  %v5011_v7 = vpop.f32.mrb[87].mxu0  ;;  %v6261_v25 = vld [vmem:[#allocation7 + $0x1e0] sm:$0xff]  ;;  %v5797_v30 = vmul.f32 %v12476_v48, %v11747_v13 }
 0x542   : > { %v3296_v8 = vrot.slane %v3295_v10, 1  ;;  %v3299_v26 = vrot.slane %v3298_v2, 4 }
 0x543   : > { %v5306_v62 = vrot.slane %v5305_v0, 1  ;;  %v8544_v1 = vpack.c.bf16 %v6180_v4, %v6179_v45  ;;  %v5309_v19 = vrot.slane %v5308_v37, 4  ;;  %v5679_v17 = vpop.permute.xlu1 %5678  ;;  %v3076_v16 = vpop.f32.mrb[120].mxu1  ;;  %6592 = vmatmul.mubr.f32.gmra.mrb[156].mxu1 %v6257_v15 }
 0x544   : > { %v3297_v41 = vmax.f32 %v3295_v10, %v3296_v8  ;;  %v3300_v28 = vmax.f32 %v3298_v2, %v3299_v26  ;;  %v5798_v58 = vmul.f32 %v5679_v17, %v11761_v63  ;;  %v5014_v46 = vpop.f32.mrb[88].mxu0  ;;  %v3078_v5 = vpop.f32.mrb[121].mxu1  ;;  %6596 = vmatprep.mubr.f32.mxu1 %v6262_v31  ;;  %v6270_v8 = vld [vmem:[#allocation7 + $0x228] sm:$0xff] }
 0x545   : > { %v5307_v51 = vmax.f32 %v5305_v0, %v5306_v62  ;;  %v5310_v44 = vmax.f32 %v5308_v37, %v5309_v19  ;;  %v5016_v36 = vpop.f32.mrb[89].mxu0  ;;  %8545 = vmatpush1.bf16.msra.mxu0 %v8544_v1  ;;  %8629 = vmatpush1.bf16.msra.mxu1 %v8544_v1  ;;  %v6204_v62 = vld [vmem:[#allocation7 + $0x18] sm:$0xff] }
 0x546   : > { %v7514_v29 = vsel %vm7489_vm4, %v3297_v41, %v7513_v39  ;;  %v3301_v3 = vrot.slane %v3300_v28, 2  ;;  %8546 = vmatprep.subr.bf16.mxu0 %v13346_v43  ;;  %8614 = vmatprep.subr.bf16.mxu1 %v13346_v43  ;;  %v6118_v10 = vadd.f32 %v5999_v21, %v5798_v58  ;;  %v6265_v39 = vld [vmem:[#allocation7 + $0x200] sm:$0xff] }
 0x547   : > { %v7621_v14 = vsel %vm7489_vm4, %v5307_v51, %v7620_v24  ;;  %v5311_v27 = vrot.slane %v5310_v44, 2  ;;  %v3081_v2 = vpop.f32.mrb[122].mxu1  ;;  %6597 = vmatmul.mubr.f32.gmra.mrb[158].mxu1 %v6261_v25  ;;  %6906 = vmatprep.mubr.f32.mxu0 %v6204_v62  ;;  %v6278_v62 = vld [vmem:[#allocation7 + $0x268] sm:$0xff] }
 0x548   : > { %v3302_v52 = vmax.f32 %v3300_v28, %v3301_v3  ;;  %v3305_v9 = vmax.f32 %v3076_v16, %v3081_v2  ;;  %v5019_v15 = vpop.f32.mrb[90].mxu0  ;;  %v5995_v45 = vpop.permute.xlu1 %5994  ;;  %6601 = vmatprep.mubr.f32.mxu1 %v6266_v18  ;;  %v6182_v1 = vmax.f32 %v6118_v10, 0.0  ;;  %v6269_v18 = vld [vmem:[#allocation7 + $0x220] sm:$0xff]  ;;  %v6274_v2 = vld [vmem:[#allocation7 + $0x248] sm:$0xff] }
 0x549   : > { %v5312_v0 = vmax.f32 %v5310_v44, %v5311_v27  ;;  %v5315_v4 = vmax.f32 %v5014_v46, %v5019_v15  ;;  %v6117_v37 = vadd.f32 %v5995_v45, %v5797_v30  ;;  %v5021_v7 = vpop.f32.mrb[91].mxu0  ;;  %v3083_v31 = vpop.f32.mrb[123].mxu1  ;;  %v3319_v30 = vmax.f32 %v13578_v53, %v13577_v59 }
 0x54a   : > { %v3303_v26 = vrot.slane %v3302_v52, 1  ;;  %v3306_v48 = vrot.slane %v3305_v9, 4 }
 0x54b   : > { %v5313_v24 = vrot.slane %v5312_v0, 1  ;;  %v5316_v21 = vrot.slane %v5315_v4, 4  ;;  %v6181_v19 = vmax.f32 %v6117_v37, 0.0  ;;  %v3086_v17 = vpop.f32.mrb[124].mxu1  ;;  %6602 = vmatmul.mubr.f32.gmra.mrb[160].mxu1 %v6265_v39  ;;  %v6003_v37 = vpop.permute.xlu0 %6002 }
 0x54c   : > { %v3304_v16 = vmax.f32 %v3302_v52, %v3303_v26  ;;  %v3307_v41 = vmax.f32 %v3305_v9, %v3306_v48  ;;  %v5024_v28 = vpop.f32.mrb[92].mxu0  ;;  %v3088_v58 = vpop.f32.mrb[125].mxu1  ;;  %6606 = vmatprep.mubr.f32.mxu1 %v6270_v8  ;;  %v3320_v8 = vrot.slane %v3319_v30, 4 }
 0x54d   : > { %v5314_v46 = vmax.f32 %v5312_v0, %v5313_v24  ;;  %v5317_v5 = vmax.f32 %v5315_v4, %v5316_v21  ;;  %v8547_v25 = vpack.c.bf16 %v6182_v1, %v6181_v19  ;;  %v5026_v51 = vpop.f32.mrb[93].mxu0  ;;  %v5683_v44 = vpop.permute.xlu1 %5682  ;;  %v3326_v24 = vmax.f32 %v13579_v56, %v13580_v11 }
 0x54e   : > { %v3308_v36 = vrot.slane %v3307_v41, 2  ;;  %v7515_v3 = vsel %vm7491_vm5, %v3304_v16, %v7514_v29  ;;  %v5799_v29 = vmul.f32 %v5683_v44, %v13557_v42  ;;  %v3333_v1 = vmax.f32 %v13582_v34, %v13581_v61  ;;  %v6277_v51 = vld [vmem:[#allocation7 + $0x260] sm:$0xff] }
 0x54f   : > { %v5318_v27 = vrot.slane %v5317_v5, 2  ;;  %v3091_v10 = vpop.f32.mrb[126].mxu1  ;;  %8548 = vmatpush1.bf16.msra.mxu0 %v8547_v25  ;;  %8630 = vmatpush1.bf16.msra.mxu1 %v8547_v25  ;;  %v7622_v52 = vsel %vm7491_vm5, %v5314_v46, %v7621_v14  ;;  %v6273_v14 = vld [vmem:[#allocation7 + $0x240] sm:$0xff]  ;;  %v3321_v34 = vmax.f32 %v3319_v30, %v3320_v8 }
 0x550   : > { %v3309_v9 = vmax.f32 %v3307_v41, %v3308_v36  ;;  %v3312_v15 = vmax.f32 %v3086_v17, %v3091_v10  ;;  %v5029_v45 = vpop.f32.mrb[94].mxu0  ;;  %8549 = vmatprep.subr.bf16.mxu0 %v13346_v43  ;;  %8615 = vmatprep.subr.bf16.mxu1 %v13346_v43  ;;  %v3093_v39 = vpop.f32.mrb[127].mxu1  ;;  %v6119_v41 = vadd.f32 %v6003_v37, %v5799_v29  ;;  %v6282_v36 = vld [vmem:[#allocation7 + $0x288] sm:$0xff] }
 0x551   : > { %v5319_v0 = vmax.f32 %v5317_v5, %v5318_v27  ;;  %v5322_v4 = vmax.f32 %v5024_v28, %v5029_v45  ;;  %v5031_v59 = vpop.f32.mrb[95].mxu0  ;;  %v5687_v53 = vpop.permute.xlu1 %5686  ;;  %6607 = vmatmul.mubr.f32.gmra.mrb[162].mxu1 %v6269_v18  ;;  %v3327_v18 = vrot.slane %v3326_v24, 4  ;;  %v3334_v27 = vrot.slane %v3333_v1, 4 }
 0x552   : > { %v3310_v7 = vrot.slane %v3309_v9, 1  ;;  %v3313_v31 = vrot.slane %v3312_v15, 4  ;;  %6611 = vmatprep.mubr.f32.mxu1 %v6274_v2  ;;  %v5800_v58 = vmul.f32 %v5687_v53, %v13558_v6  ;;  %v3322_v8 = vrot.slane %v3321_v34, 2 }
 0x553   : > { %v5320_v26 = vrot.slane %v5319_v0, 1  ;;  %v5323_v48 = vrot.slane %v5322_v4, 4  ;;  %v3328_v37 = vmax.f32 %v3326_v24, %v3327_v18  ;;  %v3347_v24 = vmax.f32 %v13586_v47, %v13585_v23  ;;  %v6285_v47 = vld [vmem:[#allocation7 + $0x2a0] sm:$0xff] }
 0x554   : > { %v3311_v21 = vmax.f32 %v3309_v9, %v3310_v7  ;;  %v3314_v19 = vmax.f32 %v3312_v15, %v3313_v31  ;;  %v5034_v17 = vpop.f32.mrb[96].mxu0  ;;  %v6183_v9 = vmax.f32 %v6119_v41, 0.0  ;;  %v6015_v7 = vpop.permute.xlu0 %6014 }
 0x555   : > { %v5321_v16 = vmax.f32 %v5319_v0, %v5320_v26  ;;  %v5324_v28 = vmax.f32 %v5322_v4, %v5323_v48  ;;  %v5036_v46 = vpop.f32.mrb[97].mxu0  ;;  %6612 = vmatmul.mubr.f32.gmra.mrb[164].mxu1 %v6273_v14  ;;  %v6281_v14 = vld [vmem:[#allocation7 + $0x280] sm:$0xff]  ;;  %v3335_v26 = vmax.f32 %v3333_v1, %v3334_v27  ;;  %v5801_v1 = vmul.f32 %v12484_v50, %v13560_v40 }
 0x556   : > { %v3315_v5 = vrot.slane %v3314_v19, 2  ;;  %v6007_v25 = vpop.permute.xlu1 %6006  ;;  %6616 = vmatprep.mubr.f32.mxu1 %v6278_v62  ;;  %v7516_v44 = vsel %vm7493_vm6, %v3311_v21, %v7515_v3  ;;  %v3323_v46 = vmax.f32 %v3321_v34, %v3322_v8 }
 0x557   : > { %v5325_v56 = vrot.slane %v5324_v28, 2  ;;  %v6120_v11 = vadd.f32 %v6007_v25, %v5800_v58  ;;  %v7623_v61 = vsel %vm7493_vm6, %v5321_v16, %v7622_v52  ;;  %v3336_v50 = vrot.slane %v3335_v26, 2 }
 0x558   : > { %v3316_v10 = vmax.f32 %v3314_v19, %v3315_v5  ;;  %v5039_v2 = vpop.f32.mrb[98].mxu0  ;;  %v6286_v19 = vld [vmem:[#allocation7 + $0x2a8] sm:$0xff] }
 0x559   : > { %v5326_v15 = vmax.f32 %v5324_v28, %v5325_v56  ;;  %v6184_v45 = vmax.f32 %v6120_v11, 0.0  ;;  %v5329_v39 = vmax.f32 %v5034_v17, %v5039_v2  ;;  %v5041_v0 = vpop.f32.mrb[99].mxu0  ;;  %6617 = vmatmul.mubr.f32.gmra.mrb[166].mxu1 %v6277_v51  ;;  %v3340_v17 = vmax.f32 %v13583_v33, %v13584_v54  ;;  %v13615_v2 = vld [vmem:[#allocation99_spill] sm:$0xff] }
 0x55a   : > { %v3317_v29 = vrot.slane %v3316_v10, 1  ;;  %6621 = vmatprep.mubr.f32.mxu1 %v6282_v36  ;;  %v3329_v56 = vrot.slane %v3328_v37, 2  ;;  %v3348_v36 = vrot.slane %v3347_v24, 4 }
 0x55b   : > { %v5327_v4 = vrot.slane %v5326_v15, 1  ;;  %v8550_v3 = vpack.c.bf16 %v6184_v45, %v6183_v9  ;;  %v5330_v59 = vrot.slane %v5329_v39, 4  ;;  %v5695_v53 = vpop.permute.xlu1 %5694  ;;  %v3341_v11 = vrot.slane %v3340_v17, 4  ;;  %v13616_v9 = vld [vmem:[#allocation98_spill] sm:$0xff] }
 0x55c   : > { %v3318_v52 = vmax.f32 %v3316_v10, %v3317_v29  ;;  %v5802_v30 = vmul.f32 %v5695_v53, %v13559_v55  ;;  %v5044_v31 = vpop.f32.mrb[100].mxu0 }
 0x55d   : > { %v5328_v48 = vmax.f32 %v5326_v15, %v5327_v4  ;;  %v5331_v62 = vmax.f32 %v5329_v39, %v5330_v59  ;;  %v5046_v21 = vpop.f32.mrb[101].mxu0  ;;  %8551 = vmatpush1.bf16.msra.mxu0 %v8550_v3  ;;  %8631 = vmatpush1.bf16.msra.mxu1 %v8550_v3  ;;  %v3361_v15 = vmax.f32 %v13616_v9, %v13615_v2  ;;  %v3324_v39 = vrot.slane %v3323_v46, 1  ;;  %v6019_v2 = vpop.permute.xlu0 %6018 }
 0x55e   : > { %8552 = vmatprep.subr.bf16.mxu0 %v13346_v43  ;;  %8616 = vmatprep.subr.bf16.mxu1 %v13346_v43  ;;  %v7517_v16 = vsel %vm7495_vm7, %v3318_v52, %v7516_v44  ;;  %v6122_v41 = vadd.f32 %v6015_v7, %v5802_v30  ;;  %v6290_v44 = vld [vmem:[#allocation7 + $0x2c8] sm:$0xff]  ;;  %v3330_v59 = vmax.f32 %v3328_v37, %v3329_v56  ;;  %v6289_v7 = vld [vmem:[#allocation7 + $0x2c0] sm:$0xff] }
 0x55f   : > { %6622 = vmatmul.mubr.f32.gmra.mrb[168].mxu1 %v6281_v14  ;;  %v12629_v28 = vpack.c.bf16 %v7517_v16, %v12558_v38  ;;  %v12632_v58 = vsel %vm7495_vm7, %v5328_v48, %v7623_v61  ;;  %v5332_v33 = vrot.slane %v5331_v62, 2  ;;  %v13614_v61 = vld [vmem:[#allocation96_spill] sm:$0xff]  ;;  %v3342_v53 = vmax.f32 %v3340_v17, %v3341_v11  ;;  %v6298_v11 = vld [vmem:[#allocation7 + $0x308] sm:$0xff] }
 0x560   : > { %v5049_v54 = vpop.f32.mrb[102].mxu0  ;;  %v6011_v23 = vpop.permute.xlu1 %6010  ;;  %6626 = vmatprep.mubr.f32.mxu1 %v6286_v19  ;;  %v6186_v18 = vmax.f32 %v6122_v41, 0.0  ;;  %v3354_v10 = vmax.f32 %v13614_v61, %v13588_v20  ;;  %v3337_v52 = vmax.f32 %v3335_v26, %v3336_v50  ;;  %v3349_v30 = vmax.f32 %v3347_v24, %v3348_v36  ;;  %v6294_v20 = vld [vmem:[#allocation7 + $0x2e8] sm:$0xff]  ;;  %v13617_v16 = vld [vmem:[#allocation32_spill] sm:$0xff] }
 0x561   : > { %13613 = vst [vmem:[#allocation22_spill] sm:$0xff] %v12629_v28  ;;  %v5336_v5 = vmax.f32 %v5044_v31, %v5049_v54  ;;  %v6121_v25 = vadd.f32 %v6011_v23, %v5801_v1  ;;  %v5051_v51 = vpop.f32.mrb[103].mxu0  ;;  %v5333_v45 = vmax.f32 %v5331_v62, %v5332_v33  ;;  %v3362_v8 = vrot.slane %v3361_v15, 4  ;;  %v13618_v33 = vld [vmem:[#allocation103_spill] sm:$0xff]  ;;  %v13619_v54 = vld [vmem:[#allocation101_spill] sm:$0xff] }
 0x562   : > { %v3355_v14 = vrot.slane %v3354_v10, 4  ;;  %v3325_v21 = vmax.f32 %v3323_v46, %v3324_v39  ;;  %v3331_v24 = vrot.slane %v3330_v59, 1  ;;  %v3343_v41 = vrot.slane %v3342_v53, 2  ;;  %v6293_v51 = vld [vmem:[#allocation7 + $0x2e0] sm:$0xff] }
 0x563   : > { %v5337_v38 = vrot.slane %v5336_v5, 4  ;;  %v6185_v27 = vmax.f32 %v6121_v25, 0.0  ;;  %6627 = vmatmul.mubr.f32.gmra.mrb[170].mxu1 %v6285_v47  ;;  %v5334_v48 = vrot.slane %v5333_v45, 1  ;;  %v3368_v23 = vmax.f32 %v13619_v54, %v13618_v33  ;;  %v13620_v47 = vld [vmem:[#allocation106_spill] sm:$0xff] }
 0x564   : > { %v5054_v34 = vpop.f32.mrb[104].mxu0  ;;  %6631 = vmatprep.mubr.f32.mxu1 %v6290_v44  ;;  %v3338_v44 = vrot.slane %v3337_v52, 1  ;;  %v3350_v56 = vrot.slane %v3349_v30, 2  ;;  %v3356_v36 = vmax.f32 %v3354_v10, %v3355_v14  ;;  %v6297_v10 = vld [vmem:[#allocation7 + $0x300] sm:$0xff] }
 0x565   : > { %v5338_v0 = vmax.f32 %v5336_v5, %v5337_v38  ;;  %v8553_v29 = vpack.c.bf16 %v6186_v18, %v6185_v27  ;;  %v5056_v4 = vpop.f32.mrb[105].mxu0  ;;  %v5699_v3 = vpop.permute.xlu1 %5698  ;;  %v13621_v5 = vld [vmem:[#allocation107_spill] sm:$0xff]  ;;  %v3363_v18 = vmax.f32 %v3361_v15, %v3362_v8  ;;  %v13622_v38 = vld [vmem:[#allocation60_spill] sm:$0xff]  ;;  %v13623_v27 = vld [vmem:[#allocation13_spill] sm:$0xff]  ;;  %v5335_v9 = vmax.f32 %v5333_v45, %v5334_v48 }
 0x566   : > { %v5803_v37 = vmul.f32 %v5699_v3, %v13617_v16  ;;  %v3375_v25 = vmax.f32 %v13621_v5, %v13620_v47  ;;  %v3382_v61 = vmax.f32 %v13623_v27, %v13622_v38  ;;  %v13624_v4 = vld [vmem:[#allocation109_spill] sm:$0xff]  ;;  %v3339_v15 = vmax.f32 %v3337_v52, %v3338_v44  ;;  %v6302_v48 = vld [vmem:[#allocation7 + $0x328] sm:$0xff] }
 0x567   : > { %v5339_v31 = vrot.slane %v5338_v0, 2  ;;  %8554 = vmatpush1.bf16.msra.mxu0 %v8553_v29  ;;  %8632 = vmatpush1.bf16.msra.mxu1 %v8553_v29 }
 0x568   : > { %v5059_v62 = vpop.f32.mrb[106].mxu0  ;;  %8555 = vmatprep.subr.bf16.mxu0 %v13346_v43  ;;  %8617 = vmatprep.subr.bf16.mxu1 %v13346_v43  ;;  %v3383_v54 = vrot.slane %v3382_v61, 4 }
 0x569   : > { %v5340_v19 = vmax.f32 %v5338_v0, %v5339_v31  ;;  %v5343_v17 = vmax.f32 %v5054_v34, %v5059_v62  ;;  %v5061_v1 = vpop.f32.mrb[107].mxu0  ;;  %v5703_v26 = vpop.permute.xlu1 %5702  ;;  %6632 = vmatmul.mubr.f32.gmra.mrb[172].mxu1 %v6289_v7  ;;  %v6123_v0 = vadd.f32 %v6019_v2, %v5803_v37  ;;  %v3332_v31 = vmax.f32 %v3330_v59, %v3331_v24 }
 0x56a   : > { %6636 = vmatprep.mubr.f32.mxu1 %v6294_v20  ;;  %v5804_v3 = vmul.f32 %v5703_v26, %v13624_v4  ;;  %v3344_v20 = vmax.f32 %v3342_v53, %v3343_v41  ;;  %v3369_v62 = vrot.slane %v3368_v23, 4  ;;  %v3376_v1 = vrot.slane %v3375_v25, 4 }
 0x56b   : > { %v5341_v46 = vrot.slane %v5340_v19, 1  ;;  %v5344_v50 = vrot.slane %v5343_v17, 4  ;;  %v3357_v37 = vrot.slane %v3356_v36, 2  ;;  %v6187_v47 = vmax.f32 %v6123_v0, 0.0  ;;  %v6301_v0 = vld [vmem:[#allocation7 + $0x320] sm:$0xff] }
 0x56c   : > { %v5064_v34 = vpop.f32.mrb[108].mxu0  ;;  %v3345_v41 = vrot.slane %v3344_v20, 1  ;;  %v3370_v52 = vmax.f32 %v3368_v23, %v3369_v62  ;;  %v7554_v44 = vsel %vm7483_vm1, %v3332_v31, %v3325_v21  ;;  %v3384_v2 = vmax.f32 %v3382_v61, %v3383_v54  ;;  %v6306_v23 = vld [vmem:[#allocation7 + $0x348] sm:$0xff]  ;;  %v13626_v31 = vld [vmem:[#allocation59_spill] sm:$0xff]  ;;  %v13627_v62 = vld [vmem:[#allocation81_spill] sm:$0xff] }
 0x56d   : > { %v5342_v39 = vmax.f32 %v5340_v19, %v5341_v46  ;;  %v5345_v29 = vmax.f32 %v5343_v17, %v5344_v50  ;;  %v5066_v7 = vpop.f32.mrb[109].mxu0  ;;  %6637 = vmatmul.mubr.f32.gmra.mrb[174].mxu1 %v6293_v51  ;;  %v3351_v19 = vmax.f32 %v3349_v30, %v3350_v56  ;;  %v3364_v17 = vrot.slane %v3363_v18, 2 }
 0x56e   : > { %v6023_v33 = vpop.permute.xlu1 %6022  ;;  %6641 = vmatprep.mubr.f32.mxu1 %v6298_v11  ;;  %v3377_v51 = vmax.f32 %v3375_v25, %v3376_v1  ;;  %v7555_v56 = vsel %vm7485_vm2, %v3339_v15, %v7554_v44  ;;  %v3358_v27 = vmax.f32 %v3356_v36, %v3357_v37  ;;  %v3389_v1 = vmax.f32 %v13627_v62, %v13626_v31  ;;  %v6031_v36 = vpop.permute.xlu0 %6030 }
 0x56f   : > { %v7625_v14 = vsel %vm7483_vm1, %v5342_v39, %v5335_v9  ;;  %v5346_v8 = vrot.slane %v5345_v29, 2  ;;  %v6124_v45 = vadd.f32 %v6023_v33, %v5804_v3  ;;  %v3352_v38 = vrot.slane %v3351_v19, 1  ;;  %v13625_v9 = vld [vmem:[#allocation79_spill] sm:$0xff]  ;;  %v13628_v33 = vld [vmem:[#allocation62_spill] sm:$0xff] }
 0x570   : > { %v5069_v26 = vpop.f32.mrb[110].mxu0  ;;  %v3365_v21 = vmax.f32 %v3363_v18, %v3364_v17  ;;  %v3378_v7 = vrot.slane %v3377_v51, 2  ;;  %v3371_v61 = vrot.slane %v3370_v52, 2  ;;  %v3346_v17 = vmax.f32 %v3344_v20, %v3345_v41 }
 0x571   : > { %v5347_v5 = vmax.f32 %v5345_v29, %v5346_v8  ;;  %v6188_v59 = vmax.f32 %v6124_v45, 0.0  ;;  %v5350_v53 = vmax.f32 %v5064_v34, %v5069_v26  ;;  %v5071_v24 = vpop.f32.mrb[111].mxu0  ;;  %6642 = vmatmul.mubr.f32.gmra.mrb[176].mxu1 %v6297_v10  ;;  %v13629_v10 = vld [vmem:[#allocation15_spill] sm:$0xff]  ;;  %v13630_v8 = vld [vmem:[#allocation76_spill] sm:$0xff]  ;;  %v3385_v26 = vrot.slane %v3384_v2, 2 }
 0x572   : > { %6646 = vmatprep.mubr.f32.mxu1 %v6302_v48  ;;  %v3396_v15 = vmax.f32 %v13629_v10, %v13628_v33  ;;  %v13631_v45 = vld [vmem:[#allocation39_spill] sm:$0xff]  ;;  %v3359_v24 = vrot.slane %v3358_v27, 1  ;;  %v3379_v31 = vmax.f32 %v3377_v51, %v3378_v7  ;;  %v3390_v62 = vrot.slane %v3389_v1, 4 }
 0x573   : > { %v5348_v46 = vrot.slane %v5347_v5, 1  ;;  %v8556_v50 = vpack.c.bf16 %v6188_v59, %v6187_v47  ;;  %v5351_v11 = vrot.slane %v5350_v53, 4  ;;  %v5711_v30 = vpop.permute.xlu1 %5710  ;;  %v5805_v48 = vmul.f32 %v13631_v45, %v13630_v8  ;;  %v6305_v59 = vld [vmem:[#allocation7 + $0x340] sm:$0xff] }
 0x574   : > { %v5806_v39 = vmul.f32 %v5711_v30, %v13625_v9  ;;  %v5074_v34 = vpop.f32.mrb[112].mxu0  ;;  %v6310_v30 = vld [vmem:[#allocation7 + $0x368] sm:$0xff]  ;;  %v3386_v33 = vmax.f32 %v3384_v2, %v3385_v26  ;;  %v3391_v7 = vmax.f32 %v3389_v1, %v3390_v62  ;;  %v3380_v2 = vrot.slane %v3379_v31, 1 }
 0x575   : > { %v5349_v29 = vmax.f32 %v5347_v5, %v5348_v46  ;;  %v5352_v3 = vmax.f32 %v5350_v53, %v5351_v11  ;;  %v5076_v25 = vpop.f32.mrb[113].mxu0  ;;  %8557 = vmatpush1.bf16.msra.mxu0 %v8556_v50  ;;  %8633 = vmatpush1.bf16.msra.mxu1 %v8556_v50  ;;  %v3353_v53 = vmax.f32 %v3351_v19, %v3352_v38 }
 0x576   : > { %8558 = vmatprep.subr.bf16.mxu0 %v13346_v43  ;;  %8618 = vmatprep.subr.bf16.mxu1 %v13346_v43  ;;  %v6126_v18 = vadd.f32 %v6031_v36, %v5806_v39  ;;  %v3366_v25 = vrot.slane %v3365_v21, 1  ;;  %v3360_v19 = vmax.f32 %v3358_v27, %v3359_v24  ;;  %v7556_v38 = vsel %vm7487_vm3, %v3346_v17, %v7555_v56  ;;  %v6314_v56 = vld [vmem:[#allocation7 + $0x388] sm:$0xff] }
 0x577   : > { %v7626_v37 = vsel %vm7485_vm2, %v5349_v29, %v7625_v14  ;;  %v5353_v54 = vrot.slane %v5352_v3, 2  ;;  %6647 = vmatmul.mubr.f32.gmra.mrb[178].mxu1 %v6301_v0  ;;  %v3397_v14 = vrot.slane %v3396_v15, 4  ;;  %v3372_v29 = vmax.f32 %v3370_v52, %v3371_v61  ;;  %v13633_v52 = vld [vmem:[#allocation18_spill] sm:$0xff] }
 0x578   : > { %v5079_v47 = vpop.f32.mrb[114].mxu0  ;;  %v6027_v5 = vpop.permute.xlu1 %6026  ;;  %6651 = vmatprep.mubr.f32.mxu1 %v6306_v23  ;;  %v6190_v0 = vmax.f32 %v6126_v18, 0.0  ;;  %v3367_v51 = vmax.f32 %v3365_v21, %v3366_v25  ;;  %v3387_v17 = vrot.slane %v3386_v33, 1  ;;  %v13634_v24 = vld [vmem:[#allocation34_spill] sm:$0xff]  ;;  %v13636_v25 = vld [vmem:[#allocation87_spill] sm:$0xff] }
 0x579   : > { %v5354_v44 = vmax.f32 %v5352_v3, %v5353_v54  ;;  %v5357_v46 = vmax.f32 %v5074_v34, %v5079_v47  ;;  %v6125_v50 = vadd.f32 %v6027_v5, %v5805_v48  ;;  %v5081_v11 = vpop.f32.mrb[115].mxu0  ;;  %v13632_v48 = vld [vmem:[#allocation17_spill] sm:$0xff]  ;;  %v3373_v18 = vrot.slane %v3372_v29, 1 }
 0x57a   : > { %v3403_v61 = vmax.f32 %v13633_v52, %v13632_v48  ;;  %v6309_v54 = vld [vmem:[#allocation7 + $0x360] sm:$0xff]  ;;  %v7557_v47 = vsel %vm7489_vm4, %v3353_v53, %v7556_v38  ;;  %v3398_v26 = vmax.f32 %v3396_v15, %v3397_v14  ;;  %v12679_v38 = vmax.f32 %v3386_v33, %v3387_v17  ;;  %v6035_v48 = vpop.permute.xlu0 %6034  ;;  %v13641_v17 = vld [vmem:[#allocation91_spill] sm:$0xff] }
 0x57b   : > { %v5355_v39 = vrot.slane %v5354_v44, 1  ;;  %v5358_v20 = vrot.slane %v5357_v46, 4  ;;  %v6189_v41 = vmax.f32 %v6125_v50, 0.0  ;;  %6652 = vmatmul.mubr.f32.gmra.mrb[180].mxu1 %v6305_v59  ;;  %v7558_v21 = vsel %vm7491_vm5, %v3360_v19, %v7557_v47  ;;  %v6313_v14 = vld [vmem:[#allocation7 + $0x380] sm:$0xff]  ;;  %v6318_v19 = vld [vmem:[#allocation7 + $0x3a8] sm:$0xff] }
 0x57c   : > { %v5084_v23 = vpop.f32.mrb[116].mxu0  ;;  %6656 = vmatprep.mubr.f32.mxu1 %v6310_v30  ;;  %v3392_v50 = vrot.slane %v3391_v7, 2  ;;  %v3404_v11 = vrot.slane %v3403_v61, 4  ;;  %v13635_v30 = vld [vmem:[#allocation65_spill] sm:$0xff] }
 0x57d   : > { %v5356_v34 = vmax.f32 %v5354_v44, %v5355_v39  ;;  %v5359_v3 = vmax.f32 %v5357_v46, %v5358_v20  ;;  %v8559_v10 = vpack.c.bf16 %v6190_v0, %v6189_v41  ;;  %v5086_v36 = vpop.f32.mrb[117].mxu0  ;;  %v5715_v45 = vpop.permute.xlu1 %5714  ;;  %v3410_v62 = vmax.f32 %v13636_v25, %v13635_v30 }
 0x57e   : > { %v5807_v44 = vmul.f32 %v5715_v45, %v13634_v24  ;;  %v12675_v39 = vmax.f32 %v3372_v29, %v3373_v18  ;;  %v12677_v0 = vmax.f32 %v3379_v31, %v3380_v2  ;;  %v3399_v20 = vrot.slane %v3398_v26, 2  ;;  %v13639_v45 = vld [vmem:[#allocation86_spill] sm:$0xff] }
 0x57f   : > { %v7627_v27 = vsel %vm7487_vm3, %v5356_v34, %v7626_v37  ;;  %v5360_v5 = vrot.slane %v5359_v3, 2  ;;  %8560 = vmatpush1.bf16.msra.mxu0 %v8559_v10  ;;  %8634 = vmatpush1.bf16.msra.mxu1 %v8559_v10  ;;  %v12671_v37 = vsel %vm7493_vm6, %v3367_v51, %v7558_v21  ;;  %v13637_v34 = vld [vmem:[#allocation67_spill] sm:$0xff]  ;;  %v3424_v36 = vmax.f32 %v13609_v12, %v13611_v22  ;;  %v13640_v18 = vld [vmem:[#allocation82_spill] sm:$0xff]  ;;  %v6317_v22 = vld [vmem:[#allocation7 + $0x3a0] sm:$0xff] }
 0x580   : > { %v5089_v59 = vpop.f32.mrb[118].mxu0  ;;  %8561 = vmatprep.subr.bf16.mxu0 %v13346_v43  ;;  %8619 = vmatprep.subr.bf16.mxu1 %v13346_v43  ;;  %v3431_v51 = vmax.f32 %v13639_v45, %v11591_v60  ;;  %v6127_v31 = vadd.f32 %v6035_v48, %v5807_v44  ;;  %v12688_v33 = vmax.f32 %v3391_v7, %v3392_v50  ;;  %v13643_v7 = vld [vmem:[#allocation72_spill] sm:$0xff]  ;;  %v13646_v45 = vld [vmem:[#allocation102_spill] sm:$0xff] }
 0x581   : > { %v5361_v1 = vmax.f32 %v5359_v3, %v5360_v5  ;;  %v5364_v53 = vmax.f32 %v5084_v23, %v5089_v59  ;;  %v5091_v46 = vpop.f32.mrb[119].mxu0  ;;  %v5719_v15 = vpop.permute.xlu1 %5718  ;;  %6657 = vmatmul.mubr.f32.gmra.mrb[182].mxu1 %v6309_v54  ;;  %v13638_v3 = vld [vmem:[#allocation19_spill] sm:$0xff]  ;;  %v3405_v5 = vmax.f32 %v3403_v61, %v3404_v11  ;;  %v12692_v60 = vmax.f32 %v3398_v26, %v3399_v20  ;;  %v13644_v50 = vld [vmem:[#allocation28_spill] sm:$0xff] }
 0x582   : > { %6661 = vmatprep.mubr.f32.mxu1 %v6314_v56  ;;  %v3417_v10 = vmax.f32 %v13638_v3, %v13637_v34  ;;  %v5808_v47 = vmul.f32 %v5719_v15, %v13640_v18  ;;  %v3411_v56 = vrot.slane %v3410_v62, 4  ;;  %v13642_v59 = vld [vmem:[#allocation111_spill] sm:$0xff]  ;;  %v6322_v46 = vld [vmem:[#allocation7 + $0x3c8] sm:$0xff]  ;;  %v3425_v30 = vrot.slane %v3424_v36, 4 }
 0x583   : > { %v5362_v41 = vrot.slane %v5361_v1, 1  ;;  %v5365_v23 = vrot.slane %v5364_v53, 4  ;;  %v3438_v21 = vmax.f32 %v13642_v59, %v13641_v17  ;;  %v3432_v25 = vrot.slane %v3431_v51, 4 }
 0x584   : > { %v5094_v29 = vpop.f32.mrb[120].mxu0  ;;  %v3418_v15 = vrot.slane %v3417_v10, 4  ;;  %v3445_v61 = vmax.f32 %v13644_v50, %v13643_v7  ;;  %v3406_v26 = vrot.slane %v3405_v5, 2  ;;  %v3412_v20 = vmax.f32 %v3410_v62, %v3411_v56 }
 0x585   : > { %v5363_v52 = vmax.f32 %v5361_v1, %v5362_v41  ;;  %v5366_v54 = vmax.f32 %v5364_v53, %v5365_v23  ;;  %v5096_v2 = vpop.f32.mrb[121].mxu0  ;;  %6662 = vmatmul.mubr.f32.gmra.mrb[184].mxu1 %v6313_v14  ;;  %v6191_v14 = vmax.f32 %v6127_v31, 0.0  ;;  %v3439_v3 = vrot.slane %v3438_v21, 4 }
 0x586   : > { %v6039_v12 = vpop.permute.xlu1 %6038  ;;  %6666 = vmatprep.mubr.f32.mxu1 %v6318_v19  ;;  %v3433_v31 = vmax.f32 %v3431_v51, %v3432_v25  ;;  %v3401_v62 = vrot.slane %v12692_v60, 1  ;;  %v3446_v56 = vrot.slane %v3445_v61, 4  ;;  %v6047_v51 = vpop.permute.xlu0 %6046 }
 0x587   : > { %v7628_v1 = vsel %vm7489_vm4, %v5363_v52, %v7627_v27  ;;  %v5367_v44 = vrot.slane %v5366_v54, 2  ;;  %v6128_v53 = vadd.f32 %v6039_v12, %v5808_v47  ;;  %v13645_v27 = vld [vmem:[#allocation27_spill] sm:$0xff]  ;;  %v3419_v12 = vmax.f32 %v3417_v10, %v3418_v15  ;;  %v13649_v15 = vld [vmem:[#allocation64_spill] sm:$0xff]  ;;  %v6330_v52 = vld [vmem:[#allocation7 + $0x408] sm:$0xff] }
 0x588   : > { %v5099_v11 = vpop.f32.mrb[122].mxu0  ;;  %v3452_v48 = vmax.f32 %v13646_v45, %v13645_v27  ;;  %v3434_v45 = vrot.slane %v3433_v31, 2 }
 0x589   : > { %v5368_v41 = vmax.f32 %v5366_v54, %v5367_v44  ;;  %v6192_v23 = vmax.f32 %v6128_v53, 0.0  ;;  %v5371_v34 = vmax.f32 %v5094_v29, %v5099_v11  ;;  %v5101_v19 = vpop.f32.mrb[123].mxu0  ;;  %6667 = vmatmul.mubr.f32.gmra.mrb[186].mxu1 %v6317_v22  ;;  %v13647_v54 = vld [vmem:[#allocation14_spill] sm:$0xff]  ;;  %v3426_v53 = vmax.f32 %v3424_v36, %v3425_v30  ;;  %v6321_v22 = vld [vmem:[#allocation7 + $0x3c0] sm:$0xff] }
 0x58a   : > { %6671 = vmatprep.mubr.f32.mxu1 %v6322_v46  ;;  %v6326_v46 = vld [vmem:[#allocation7 + $0x3e8] sm:$0xff]  ;;  %v12702_v19 = vmax.f32 %v3405_v5, %v3406_v26  ;;  %v3453_v10 = vrot.slane %v3452_v48, 4  ;;  %v13648_v36 = vld [vmem:[#allocation33_spill] sm:$0xff]  ;;  %v3420_v27 = vrot.slane %v3419_v12, 2  ;;  %v3459_v5 = vmax.f32 %v11680_v49, %v11692_v32 }
 0x58b   : > { %v5369_v47 = vrot.slane %v5368_v41, 1  ;;  %v8562_v2 = vpack.c.bf16 %v6192_v23, %v6191_v14  ;;  %v5372_v17 = vrot.slane %v5371_v34, 4  ;;  %v5727_v59 = vpop.permute.xlu1 %5726  ;;  %v3413_v14 = vrot.slane %v3412_v20, 2 }
 0x58c   : > { %v5810_v44 = vmul.f32 %v5727_v59, %v13647_v54  ;;  %v5104_v29 = vpop.f32.mrb[124].mxu0  ;;  %v3440_v23 = vmax.f32 %v3438_v21, %v3439_v3  ;;  %v5809_v30 = vmul.f32 %v13649_v15, %v13648_v36  ;;  %v3427_v3 = vrot.slane %v3426_v53, 2 }
 0x58d   : > { %v5370_v7 = vmax.f32 %v5368_v41, %v5369_v47  ;;  %v5373_v50 = vmax.f32 %v5371_v34, %v5372_v17  ;;  %v5106_v11 = vpop.f32.mrb[125].mxu0  ;;  %8563 = vmatpush1.bf16.msra.mxu0 %v8562_v2  ;;  %8635 = vmatpush1.bf16.msra.mxu1 %v8562_v2  ;;  %v6325_v47 = vld [vmem:[#allocation7 + $0x3e0] sm:$0xff]  ;;  %v3447_v2 = vmax.f32 %v3445_v61, %v3446_v56  ;;  %v3460_v54 = vrot.slane %v3459_v5, 4 }
 0x58e   : > { %8564 = vmatprep.subr.bf16.mxu0 %v13346_v43  ;;  %8620 = vmatprep.subr.bf16.mxu1 %v13346_v43  ;;  %v6130_v41 = vadd.f32 %v6047_v51, %v5810_v44  ;;  %v3408_v44 = vrot.slane %v12702_v19, 1  ;;  %v3435_v32 = vmax.f32 %v3433_v31, %v3434_v45  ;;  %v3421_v42 = vmax.f32 %v3419_v12, %v3420_v27  ;;  %v6329_v45 = vld [vmem:[#allocation7 + $0x400] sm:$0xff] }
 0x58f   : > { %v5374_v25 = vrot.slane %v5373_v50, 2  ;;  %6672 = vmatmul.mubr.f32.gmra.mrb[188].mxu1 %v6321_v22  ;;  %v7629_v34 = vsel %vm7491_vm5, %v5370_v7, %v7628_v1  ;;  %v3414_v22 = vmax.f32 %v3412_v20, %v3413_v14  ;;  %v3441_v1 = vrot.slane %v3440_v23, 2 }
 0x590   : > { %v5109_v21 = vpop.f32.mrb[126].mxu0  ;;  %v6043_v26 = vpop.permute.xlu1 %6042  ;;  %6676 = vmatprep.mubr.f32.mxu1 %v6326_v46  ;;  %v3454_v7 = vmax.f32 %v3452_v48, %v3453_v10  ;;  %v6194_v28 = vmax.f32 %v6130_v41, 0.0  ;;  %v3428_v61 = vmax.f32 %v3426_v53, %v3427_v3  ;;  %v13650_v20 = vrot.slane %v12688_v33, 1 }
 0x591   : > { %v5375_v17 = vmax.f32 %v5373_v50, %v5374_v25  ;;  %v5378_v59 = vmax.f32 %v5104_v29, %v5109_v21  ;;  %v6129_v11 = vadd.f32 %v6043_v26, %v5809_v30  ;;  %v5111_v15 = vpop.f32.mrb[127].mxu0  ;;  %v3448_v29 = vrot.slane %v3447_v2, 2 }
 0x592   : > { %v3395_v48 = vmax.f32 %v12688_v33, %v13650_v20  ;;  %v3402_v14 = vmax.f32 %v12692_v60, %v3401_v62  ;;  %v3466_v10 = vmax.f32 %v11720_v57, %v11727_v35  ;;  %v3415_v41 = vrot.slane %v3414_v22, 1 }
 0x593   : > { %v5376_v51 = vrot.slane %v5375_v17, 1  ;;  %v5379_v36 = vrot.slane %v5378_v59, 4  ;;  %v6193_v49 = vmax.f32 %v6129_v11, 0.0  ;;  %6677 = vmatmul.mubr.f32.gmra.mrb[190].mxu1 %v6325_v47  ;;  %v3442_v12 = vmax.f32 %v3440_v23, %v3441_v1  ;;  %v6338_v1 = vld [vmem:[#allocation7 + $0x448] sm:$0xff] }
 0x594   : > { %v5114_v46 = vpop.f32.mrb[128].mxu0  ;;  %6681 = vmatprep.mubr.f32.mxu1 %v6330_v52  ;;  %v3455_v53 = vrot.slane %v3454_v7, 2  ;;  %v3461_v27 = vmax.f32 %v3459_v5, %v3460_v54  ;;  %v3409_v33 = vmax.f32 %v12702_v19, %v3408_v44  ;;  %v3422_v57 = vrot.slane %v3421_v42, 1  ;;  %v6333_v19 = vld [vmem:[#allocation7 + $0x420] sm:$0xff] }
 0x595   : > { %v5377_v56 = vmax.f32 %v5375_v17, %v5376_v51  ;;  %v5380_v50 = vmax.f32 %v5378_v59, %v5379_v36  ;;  %v8565_v30 = vpack.c.bf16 %v6194_v28, %v6193_v49  ;;  %v5116_v25 = vpop.f32.mrb[129].mxu0  ;;  %v6334_v36 = vld [vmem:[#allocation7 + $0x428] sm:$0xff]  ;;  %v3429_v35 = vrot.slane %v3428_v61, 1  ;;  %v13651_v17 = vld [vmem:[#allocation36_spill] sm:$0xff] }
 0x596   : > { %v5731_v31 = vpop.permute.xlu1 %5730  ;;  %v3436_v60 = vrot.slane %v3435_v32, 1  ;;  %v3449_v62 = vmax.f32 %v3447_v2, %v3448_v29  ;;  %v3467_v47 = vrot.slane %v3466_v10, 4  ;;  %v12723_v54 = vmax.f32 %v3414_v22, %v3415_v41 }
 0x597   : > { %v5381_v52 = vrot.slane %v5380_v50, 2  ;;  %8566 = vmatpush1.bf16.msra.mxu0 %v8565_v30  ;;  %8636 = vmatpush1.bf16.msra.mxu1 %v8565_v30  ;;  %v7630_v28 = vsel %vm7493_vm6, %v5377_v56, %v7629_v34  ;;  %v5811_v34 = vmul.f32 %v5731_v31, %v13651_v17  ;;  %v12728_v5 = vsel %vm7495_vm7, %v12675_v39, %v12671_v37  ;;  %v6051_v39 = vpop.permute.xlu0 %6050  ;;  %v13652_v31 = vld [vmem:[#allocation61_spill] sm:$0xff] }
 0x598   : > { %v5119_v21 = vpop.f32.mrb[130].mxu0  ;;  %8567 = vmatprep.subr.bf16.mxu0 %v13346_v43  ;;  %8621 = vmatprep.subr.bf16.mxu1 %v13346_v43  ;;  %v3443_v11 = vrot.slane %v3442_v12, 1  ;;  %v3456_v15 = vmax.f32 %v3454_v7, %v3455_v53  ;;  %v3462_v51 = vrot.slane %v3461_v27, 2  ;;  %v12732_v29 = vmax.f32 %v3428_v61, %v3429_v35  ;;  %v6337_v61 = vld [vmem:[#allocation7 + $0x440] sm:$0xff] }
 0x599   : > { %v5382_v23 = vmax.f32 %v5380_v50, %v5381_v52  ;;  %v5385_v26 = vmax.f32 %v5114_v46, %v5119_v21  ;;  %v5121_v3 = vpop.f32.mrb[131].mxu0  ;;  %6682 = vmatmul.mubr.f32.gmra.mrb[192].mxu1 %v6329_v45  ;;  %v12730_v46 = vmax.f32 %v3421_v42, %v3422_v57  ;;  %v7561_v22 = vsel %vm7483_vm1, %v12679_v38, %v12677_v0 }
 0x59a   : > { %v5735_v59 = vpop.permute.xlu1 %5734  ;;  %6686 = vmatprep.mubr.f32.mxu1 %v6334_v36  ;;  %v3437_v56 = vmax.f32 %v3435_v32, %v3436_v60  ;;  %v3450_v37 = vrot.slane %v3449_v62, 1  ;;  %v3468_v7 = vmax.f32 %v3466_v10, %v3467_v47  ;;  %v6131_v20 = vadd.f32 %v6051_v39, %v5811_v34  ;;  %v6342_v32 = vld [vmem:[#allocation7 + $0x468] sm:$0xff] }
 0x59b   : > { %v5383_v2 = vrot.slane %v5382_v23, 1  ;;  %v5386_v44 = vrot.slane %v5385_v26, 4  ;;  %v5812_v41 = vmul.f32 %v5735_v59, %v13652_v31  ;;  %v7562_v42 = vsel %vm7485_vm2, %v3395_v48, %v7561_v22  ;;  %v6345_v22 = vld [vmem:[#allocation7 + $0x480] sm:$0xff]  ;;  %v13655_v39 = vld [vmem:[#allocation14_spill] sm:$0xff] }
 0x59c   : > { %v5124_v49 = vpop.f32.mrb[132].mxu0  ;;  %v3444_v45 = vmax.f32 %v3442_v12, %v3443_v11  ;;  %v3457_v53 = vrot.slane %v3456_v15, 1  ;;  %v7563_v0 = vsel %vm7487_vm3, %v3402_v14, %v7562_v42  ;;  %v12741_v36 = vmax.f32 %v3461_v27, %v3462_v51  ;;  %v13658_v42 = vld [vmem:[#allocation42_spill] sm:$0xff] }
 0x59d   : > { %v5384_v50 = vmax.f32 %v5382_v23, %v5383_v2  ;;  %v5387_v30 = vmax.f32 %v5385_v26, %v5386_v44  ;;  %v5126_v25 = vpop.f32.mrb[133].mxu0  ;;  %6687 = vmatmul.mubr.f32.gmra.mrb[194].mxu1 %v6333_v19  ;;  %v12745_v10 = vmax.f32 %v11747_v13, %v11761_v63  ;;  %v3451_v35 = vmax.f32 %v3449_v62, %v3450_v37  ;;  %v6341_v13 = vld [vmem:[#allocation7 + $0x460] sm:$0xff] }
 0x59e   : > { %6691 = vmatprep.mubr.f32.mxu1 %v6338_v1  ;;  %v7564_v14 = vsel %vm7489_vm4, %v3409_v33, %v7563_v0  ;;  %v3487_v27 = vmax.f32 %v13560_v40, %v13559_v55  ;;  %v6195_v26 = vmax.f32 %v6131_v20, 0.0  ;;  %v12753_v63 = vmax.f32 %v3456_v15, %v3457_v53  ;;  %v13653_v15 = vld [vmem:[#allocation16_spill] sm:$0xff]  ;;  %v6063_v25 = vpop.permute.xlu0 %6062 }
 0x59f   : > { %v6055_v52 = vpop.permute.xlu1 %6054  ;;  %v7631_v38 = vsel %vm7495_vm7, %v5384_v50, %v7630_v28  ;;  %v5388_v12 = vrot.slane %v5387_v30, 2  ;;  %v3469_v28 = vrot.slane %v3468_v7, 2  ;;  %v7568_v47 = vsel %vm7483_vm1, %v3444_v45, %v3437_v56  ;;  %v13654_v56 = vld [vmem:[#allocation104_spill] sm:$0xff]  ;;  %v13656_v50 = vld [vmem:[#allocation33_spill] sm:$0xff] }
 0x5a0   : > { %v6132_v21 = vadd.f32 %v6055_v52, %v5812_v41  ;;  %v5129_v57 = vpop.f32.mrb[134].mxu0  ;;  %v12748_v48 = vpack.c.bf16 %v7631_v38, %v12632_v58  ;;  %v3494_v58 = vmax.f32 %v13617_v16, %v13624_v4  ;;  %v3464_v34 = vrot.slane %v12741_v36, 1  ;;  %v6346_v4 = vld [vmem:[#allocation7 + $0x488] sm:$0xff]  ;;  %v13657_v41 = vld [vmem:[#allocation35_spill] sm:$0xff] }
 0x5a1   : > { %v5392_v60 = vmax.f32 %v5124_v49, %v5129_v57  ;;  %v5131_v23 = vpop.f32.mrb[135].mxu0  ;;  %6692 = vmatmul.mubr.f32.gmra.mrb[196].mxu1 %v6337_v61  ;;  %v3474_v33 = vrot.slane %v12745_v10, 4  ;;  %v3501_v59 = vmax.f32 %v13630_v8, %v13625_v9  ;;  %v5389_v11 = vmax.f32 %v5387_v30, %v5388_v12  ;;  %v13659_v12 = vld [vmem:[#allocation40_spill] sm:$0xff] }
 0x5a2   : > { %v6196_v3 = vmax.f32 %v6132_v21, 0.0  ;;  %6696 = vmatprep.mubr.f32.mxu1 %v6342_v32  ;;  %v12765_v16 = vsel %vm7491_vm5, %v12723_v54, %v7564_v14  ;;  %v12767_v51 = vmax.f32 %v3468_v7, %v3469_v28  ;;  %v3488_v49 = vrot.slane %v3487_v27, 4  ;;  %v6349_v23 = vld [vmem:[#allocation7 + $0x4a0] sm:$0xff] }
 0x5a3   : > { %v5393_v62 = vrot.slane %v5392_v60, 4  ;;  %v3508_v9 = vmax.f32 %v13634_v24, %v13640_v18  ;;  %v12772_v8 = vsel %vm7485_vm2, %v3451_v35, %v7568_v47  ;;  %v12776_v37 = vmax.f32 %v13654_v56, %v13558_v6  ;;  %v6350_v24 = vld [vmem:[#allocation7 + $0x4a8] sm:$0xff] }
 0x5a4   : > { %v8568_v55 = vpack.c.bf16 %v6196_v3, %v6195_v26  ;;  %v5743_v40 = vpop.permute.xlu1 %5742  ;;  %v5134_v19 = vpop.f32.mrb[136].mxu0  ;;  %v3495_v54 = vrot.slane %v3494_v58, 4  ;;  %v3515_v30 = vmax.f32 %v13656_v50, %v13655_v39  ;;  %v3502_v18 = vrot.slane %v3501_v59, 4 }
 0x5a5   : > { %v5394_v2 = vmax.f32 %v5392_v60, %v5393_v62  ;;  %v5814_v44 = vmul.f32 %v5743_v40, %v13653_v15  ;;  %v5136_v1 = vpop.f32.mrb[137].mxu0  ;;  %6697 = vmatmul.mubr.f32.gmra.mrb[198].mxu1 %v6341_v13  ;;  %v3522_v20 = vmax.f32 %v13651_v17, %v13652_v31  ;;  %v5813_v61 = vmul.f32 %v13658_v42, %v13657_v41  ;;  %v13660_v60 = vld [vmem:[#allocation37_spill] sm:$0xff]  ;;  %v6354_v13 = vld [vmem:[#allocation7 + $0x4c8] sm:$0xff] }
 0x5a6   : > { %8569 = vmatpush1.bf16.msra.mxu0 %v8568_v55  ;;  %8637 = vmatpush1.bf16.msra.mxu1 %v8568_v55  ;;  %v3529_v53 = vmax.f32 %v13657_v41, %v13653_v15  ;;  %v5390_v52 = vrot.slane %v5389_v11, 1  ;;  %v3489_v57 = vmax.f32 %v3487_v27, %v3488_v49  ;;  %v3509_v35 = vrot.slane %v3508_v9, 4 }
 0x5a7   : > { %v5395_v7 = vrot.slane %v5394_v2, 2  ;;  %8570 = vmatprep.subr.bf16.mxu0 %v13346_v43  ;;  %8622 = vmatprep.subr.bf16.mxu1 %v13346_v43  ;;  %v6134_v6 = vadd.f32 %v6063_v25, %v5814_v44  ;;  %v3536_v17 = vmax.f32 %v13660_v60, %v13659_v12  ;;  %v3496_v14 = vmax.f32 %v3494_v58, %v3495_v54  ;;  %v6353_v25 = vld [vmem:[#allocation7 + $0x4c0] sm:$0xff] }
 0x5a8   : > { %v5139_v45 = vpop.f32.mrb[138].mxu0  ;;  %6701 = vmatprep.mubr.f32.mxu1 %v6346_v4  ;;  %v3516_v28 = vrot.slane %v3515_v30, 4  ;;  %v3503_v62 = vmax.f32 %v3501_v59, %v3502_v18  ;;  %v3523_v47 = vrot.slane %v3522_v20, 4  ;;  %v5391_v15 = vmax.f32 %v5389_v11, %v5390_v52 }
 0x5a9   : > { %v5396_v0 = vmax.f32 %v5394_v2, %v5395_v7  ;;  %v5399_v38 = vmax.f32 %v5134_v19, %v5139_v45  ;;  %v6059_v32 = vpop.permute.xlu1 %6058  ;;  %v5141_v21 = vpop.f32.mrb[139].mxu0  ;;  %6702 = vmatmul.mubr.f32.gmra.mrb[200].mxu1 %v6345_v22  ;;  %v6198_v55 = vmax.f32 %v6134_v6, 0.0  ;;  %v3530_v2 = vrot.slane %v3529_v53, 4 }
 0x5aa   : > { %v6133_v31 = vadd.f32 %v6059_v32, %v5813_v61  ;;  %6706 = vmatprep.mubr.f32.mxu1 %v6350_v24  ;;  %v12791_v4 = vmax.f32 %v12745_v10, %v3474_v33  ;;  %v3510_v49 = vmax.f32 %v3508_v9, %v3509_v35  ;;  %v3537_v58 = vrot.slane %v3536_v17, 4  ;;  %v6358_v33 = vld [vmem:[#allocation7 + $0x4e8] sm:$0xff]  ;;  %v6357_v32 = vld [vmem:[#allocation7 + $0x4e0] sm:$0xff] }
 0x5ab   : > { %v5397_v26 = vrot.slane %v5396_v0, 1  ;;  %v5400_v3 = vrot.slane %v5399_v38, 4  ;;  %v3481_v59 = vrot.slane %v12776_v37, 4  ;;  %v3517_v54 = vmax.f32 %v3515_v30, %v3516_v28  ;;  %v6362_v28 = vld [vmem:[#allocation7 + $0x508] sm:$0xff] }
 0x5ac   : > { %v6197_v40 = vmax.f32 %v6133_v31, 0.0  ;;  %v5144_v19 = vpop.f32.mrb[140].mxu0  ;;  %v3490_v11 = vrot.slane %v3489_v57, 2  ;;  %v3497_v7 = vrot.slane %v3496_v14, 2  ;;  %v3524_v24 = vmax.f32 %v3522_v20, %v3523_v47 }
 0x5ad   : > { %v5398_v27 = vmax.f32 %v5396_v0, %v5397_v26  ;;  %v5401_v44 = vmax.f32 %v5399_v38, %v5400_v3  ;;  %v5146_v1 = vpop.f32.mrb[141].mxu0  ;;  %6707 = vmatmul.mubr.f32.gmra.mrb[202].mxu1 %v6349_v23  ;;  %v12798_v10 = vsel %vm7493_vm6, %v12730_v46, %v12765_v16  ;;  %v3504_v9 = vrot.slane %v3503_v62, 2  ;;  %v6067_v3 = vpop.permute.xlu0 %6066 }
 0x5ae   : > { %v8571_v22 = vpack.c.bf16 %v6198_v55, %v6197_v40  ;;  %v5747_v56 = vpop.permute.xlu1 %5746  ;;  %6711 = vmatprep.mubr.f32.mxu1 %v6354_v13  ;;  %v3531_v41 = vmax.f32 %v3529_v53, %v3530_v2  ;;  %v3471_v20 = vrot.slane %v12767_v51, 1  ;;  %v3511_v6 = vrot.slane %v3510_v49, 2 }
 0x5af   : > { %v7632_v39 = vsel %vm7483_vm1, %v5398_v27, %v5391_v15  ;;  %v5402_v50 = vrot.slane %v5401_v44, 2  ;;  %v3538_v45 = vmax.f32 %v3536_v17, %v3537_v58  ;;  %v5815_v52 = vmul.f32 %v5747_v56, %v13660_v60 }
 0x5b0   : > { %v5149_v18 = vpop.f32.mrb[142].mxu0  ;;  %8572 = vmatpush1.bf16.msra.mxu0 %v8571_v22  ;;  %8638 = vmatpush1.bf16.msra.mxu1 %v8571_v22  ;;  %v3482_v46 = vmax.f32 %v12776_v37, %v3481_v59  ;;  %v3518_v16 = vrot.slane %v3517_v54, 2  ;;  %v3476_v21 = vrot.slane %v12791_v4, 2  ;;  %v3491_v35 = vmax.f32 %v3489_v57, %v3490_v11  ;;  %v6366_v59 = vld [vmem:[#allocation7 + $0x528] sm:$0xff] }
 0x5b1   : > { %v5403_v42 = vmax.f32 %v5401_v44, %v5402_v50  ;;  %v5406_v30 = vmax.f32 %v5144_v19, %v5149_v18  ;;  %v5151_v61 = vpop.f32.mrb[143].mxu0  ;;  %8573 = vmatprep.subr.bf16.mxu0 %v13346_v43  ;;  %8623 = vmatprep.subr.bf16.mxu1 %v13346_v43  ;;  %v3498_v31 = vmax.f32 %v3496_v14, %v3497_v7  ;;  %v3525_v43 = vrot.slane %v3524_v24, 2  ;;  %v6361_v44 = vld [vmem:[#allocation7 + $0x500] sm:$0xff] }
 0x5b2   : > { %v5751_v0 = vpop.permute.xlu1 %5750  ;;  %6712 = vmatmul.mubr.f32.gmra.mrb[204].mxu1 %v6353_v25  ;;  %v3505_v26 = vmax.f32 %v3503_v62, %v3504_v9  ;;  %v3532_v17 = vrot.slane %v3531_v41, 2  ;;  %v3512_v55 = vmax.f32 %v3510_v49, %v3511_v6  ;;  %v3539_v37 = vrot.slane %v3538_v45, 2 }
 0x5b3   : > { %v5404_v38 = vrot.slane %v5403_v42, 1  ;;  %v5407_v53 = vrot.slane %v5406_v30, 4  ;;  %6716 = vmatprep.mubr.f32.mxu1 %v6358_v33  ;;  %v6135_v40 = vadd.f32 %v6067_v3, %v5815_v52  ;;  %v5816_v19 = vmul.f32 %v5751_v0, %v13659_v12 }
 0x5b4   : > { %v5154_v23 = vpop.f32.mrb[144].mxu0  ;;  %v3483_v2 = vrot.slane %v3482_v46, 2  ;;  %v3519_v15 = vmax.f32 %v3517_v54, %v3518_v16  ;;  %v3492_v62 = vrot.slane %v3491_v35, 1  ;;  %v3499_v1 = vrot.slane %v3498_v31, 1 }
 0x5b5   : > { %v5405_v60 = vmax.f32 %v5403_v42, %v5404_v38  ;;  %v5408_v13 = vmax.f32 %v5406_v30, %v5407_v53  ;;  %v5156_v47 = vpop.f32.mrb[145].mxu0  ;;  %v3526_v58 = vmax.f32 %v3524_v24, %v3525_v43  ;;  %v3506_v49 = vrot.slane %v3505_v26, 1 }
 0x5b6   : > { %6717 = vmatmul.mubr.f32.gmra.mrb[206].mxu1 %v6357_v32  ;;  %v3533_v50 = vmax.f32 %v3531_v41, %v3532_v17  ;;  %v3513_v7 = vrot.slane %v3512_v55, 1  ;;  %v6199_v18 = vmax.f32 %v6135_v40, 0.0  ;;  %v3540_v33 = vmax.f32 %v3538_v45, %v3539_v37  ;;  %v6365_v41 = vld [vmem:[#allocation7 + $0x520] sm:$0xff] }
 0x5b7   : > { %v7633_v57 = vsel %vm7485_vm2, %v5405_v60, %v7632_v39  ;;  %v5409_v14 = vrot.slane %v5408_v13, 2  ;;  %v6071_v27 = vpop.permute.xlu1 %6070  ;;  %6721 = vmatprep.mubr.f32.mxu1 %v6362_v28  ;;  %v3477_v39 = vmax.f32 %v12791_v4, %v3476_v21  ;;  %v3520_v9 = vrot.slane %v3519_v15, 1  ;;  %v6203_v4 = vld [vmem:[#allocation7 + $0x10] sm:$0xff]  ;;  %v6208_v60 = vld [vmem:[#allocation7 + $0x38] sm:$0xff] }
 0x5b8   : > { %v6136_v22 = vadd.f32 %v6071_v27, %v5816_v19  ;;  %v5159_v56 = vpop.f32.mrb[146].mxu0  ;;  %v3500_v24 = vmax.f32 %v3498_v31, %v3499_v1  ;;  %v3527_v61 = vrot.slane %v3526_v58, 1  ;;  %v3484_v0 = vmax.f32 %v3482_v46, %v3483_v2  ;;  %v6207_v27 = vld [vmem:[#allocation7 + $0x30] sm:$0xff] }
 0x5b9   : > { %v5410_v25 = vmax.f32 %v5408_v13, %v5409_v14  ;;  %v5413_v11 = vmax.f32 %v5154_v23, %v5159_v56  ;;  %v5161_v12 = vpop.f32.mrb[147].mxu0  ;;  %v3507_v16 = vmax.f32 %v3505_v26, %v3506_v49  ;;  %v3534_v43 = vrot.slane %v3533_v50, 1  ;;  %v6370_v23 = vld [vmem:[#allocation7 + $0x548] sm:$0xff]  ;;  %v13661_v26 = vld [vmem:[#allocation20_spill] sm:$0xff] }
 0x5ba   : > { %v6200_v54 = vmax.f32 %v6136_v22, 0.0  ;;  %6722 = vmatmul.mubr.f32.gmra.mrb[208].mxu1 %v6361_v44  ;;  %v3493_v45 = vmax.f32 %v3491_v35, %v3492_v62  ;;  %v3514_v28 = vmax.f32 %v3512_v55, %v3513_v7  ;;  %v7567_v21 = vsel %vm7495_vm7, %v12732_v29, %v12798_v10  ;;  %v6369_v29 = vld [vmem:[#allocation7 + $0x540] sm:$0xff]  ;;  %v6374_v14 = vld [vmem:[#allocation7 + $0x568] sm:$0xff]  ;;  %v6212_v22 = vld [vmem:[#allocation7 + $0x58] sm:$0xff] }
 0x5bb   : > { %v5411_v42 = vrot.slane %v5410_v25, 1  ;;  %v5414_v30 = vrot.slane %v5413_v11, 4  ;;  %6726 = vmatprep.mubr.f32.mxu1 %v6366_v59  ;;  %v3541_v31 = vrot.slane %v3540_v33, 1  ;;  %v3521_v17 = vmax.f32 %v3519_v15, %v3520_v9 }
 0x5bc   : > { %v8574_v6 = vpack.c.bf16 %v6200_v54, %v6199_v18  ;;  %v5164_v52 = vpop.f32.mrb[148].mxu0  ;;  %v3478_v13 = vrot.slane %v3477_v39, 1  ;;  %v3465_v35 = vmax.f32 %v12741_v36, %v3464_v34  ;;  %v3485_v55 = vrot.slane %v3484_v0, 1 }
 0x5bd   : > { %v5412_v38 = vmax.f32 %v5410_v25, %v5411_v42  ;;  %v5415_v53 = vmax.f32 %v5413_v11, %v5414_v30  ;;  %v5166_v32 = vpop.f32.mrb[149].mxu0  ;;  %v3528_v37 = vmax.f32 %v3526_v58, %v3527_v61  ;;  %v7575_v40 = vsel %vm7483_vm1, %v3500_v24, %v3493_v45  ;;  %v13662_v58 = vld [vmem:[#allocation22_spill] sm:$0xff]  ;;  %v6373_v11 = vld [vmem:[#allocation7 + $0x560] sm:$0xff]  ;;  %v6216_v24 = vld [vmem:[#allocation7 + $0x78] sm:$0xff] }
 0x5be   : > { %8575 = vmatpush1.bf16.msra.mxu0 %v8574_v6  ;;  %8639 = vmatpush1.bf16.msra.mxu1 %v8574_v6  ;;  %v3535_v15 = vmax.f32 %v3533_v50, %v3534_v43  ;;  %v3472_v36 = vmax.f32 %v12767_v51, %v3471_v20  ;;  %v3542_v34 = vmax.f32 %v3540_v33, %v3541_v31  ;;  %v6215_v32 = vld [vmem:[#allocation7 + $0x70] sm:$0xff]  ;;  %v6220_v45 = vld [vmem:[#allocation7 + $0x98] sm:$0xff] }
 0x5bf   : > { %v7634_v46 = vsel %vm7487_vm3, %v5412_v38, %v7633_v57  ;;  %v5416_v3 = vrot.slane %v5415_v53, 2  ;;  %8577 = vmatprep.subr.bf16.mxu0 %v13661_v26  ;;  %6727 = vmatmul.mubr.f32.gmra.mrb[210].mxu1 %v6365_v41  ;;  %v7576_v57 = vsel %vm7485_vm2, %v3507_v16, %v7575_v40  ;;  %v3479_v56 = vmax.f32 %v3477_v39, %v3478_v13  ;;  %v6378_v39 = vld [vmem:[#allocation7 + $0x588] sm:$0xff] }
 0x5c0   : > { %v5169_v47 = vpop.f32.mrb[150].mxu0  ;;  %6731 = vmatprep.mubr.f32.mxu1 %v6370_v23  ;;  %v7577_v44 = vsel %vm7487_vm3, %v3514_v28, %v7576_v57  ;;  %v8584_v50 = vpack.c.bf16 %v7567_v21, %v12728_v5  ;;  %v3486_v25 = vmax.f32 %v3484_v0, %v3485_v55  ;;  %v7570_v51 = vsel %vm7487_vm3, %v12753_v63, %v12772_v8  ;;  %v6211_v5 = vld [vmem:[#allocation7 + $0x50] sm:$0xff] }
 0x5c1   : > { %v5417_v10 = vmax.f32 %v5415_v53, %v5416_v3  ;;  %v5420_v19 = vmax.f32 %v5164_v52, %v5169_v47  ;;  %v5171_v2 = vpop.f32.mrb[151].mxu0  ;;  %6907 = vmatmul.mubr.f32.vlgmr.msra.gmra.mrb[192].mxu0 %v6203_v4  ;;  %v7578_v59 = vsel %vm7489_vm4, %v3521_v17, %v7577_v44  ;;  %v7571_v54 = vsel %vm7489_vm4, %v3465_v35, %v7570_v51  ;;  %v6377_v52 = vld [vmem:[#allocation7 + $0x580] sm:$0xff]  ;;  %v6382_v53 = vld [vmem:[#allocation7 + $0x5a8] sm:$0xff]  ;;  %v6219_v3 = vld [vmem:[#allocation7 + $0x90] sm:$0xff] }
 0x5c2   : > { %8579 = vmatpush3.bf16.msra.mxu0 %v13661_v26  ;;  %6911 = vmatprep.mubr.f32.mxu0 %v6208_v60  ;;  %v7579_v20 = vsel %vm7491_vm5, %v3528_v37, %v7578_v59  ;;  %v7572_v9 = vsel %vm7491_vm5, %v3472_v36, %v7571_v54  ;;  %v6381_v4 = vld [vmem:[#allocation7 + $0x5a0] sm:$0xff]  ;;  %v6224_v60 = vld [vmem:[#allocation7 + $0xb8] sm:$0xff] }
 0x5c3   : > { %v5418_v62 = vrot.slane %v5417_v10, 1  ;;  %v5421_v1 = vrot.slane %v5420_v19, 4  ;;  %8581 = vmatprep.subr.bf16.mxu0 %v13662_v58  ;;  %6732 = vmatmul.mubr.f32.gmra.mrb[212].mxu1 %v6369_v29  ;;  %v7580_v33 = vsel %vm7493_vm6, %v3535_v15, %v7579_v20  ;;  %v7573_v30 = vsel %vm7493_vm6, %v3479_v56, %v7572_v9  ;;  %v6385_v35 = vld [vmem:[#allocation7 + $0x5c0] sm:$0xff]  ;;  %v6390_v29 = vld [vmem:[#allocation7 + $0x5e8] sm:$0xff]  ;;  %v6228_v15 = vld [vmem:[#allocation7 + $0xd8] sm:$0xff] }
 0x5c4   : > { %v5174_v49 = vpop.f32.mrb[152].mxu0  ;;  %6736 = vmatprep.mubr.f32.mxu1 %v6374_v14  ;;  %v7581_v63 = vsel %vm7495_vm7, %v3542_v34, %v7580_v33  ;;  %v7574_v6 = vsel %vm7495_vm7, %v3486_v25, %v7573_v30  ;;  %v6389_v14 = vld [vmem:[#allocation7 + $0x5e0] sm:$0xff]  ;;  %v6236_v33 = vld [vmem:[#allocation7 + $0x118] sm:$0xff]  ;;  %v6235_v30 = vld [vmem:[#allocation7 + $0x110] sm:$0xff] }
 0x5c5   : > { %v5419_v12 = vmax.f32 %v5417_v10, %v5418_v62  ;;  %v5422_v7 = vmax.f32 %v5420_v19, %v5421_v1  ;;  %v5176_v18 = vpop.f32.mrb[153].mxu0  ;;  %6912 = vmatmul.mubr.f32.gmra.mrb[194].mxu0 %v6207_v27  ;;  %v8588_v38 = vpack.c.bf16 %v7581_v63, %v7574_v6  ;;  %v6223_v10 = vld [vmem:[#allocation7 + $0xb0] sm:$0xff]  ;;  %v6394_v62 = vld [vmem:[#allocation7 + $0x608] sm:$0xff] }
 0x5c6   : > { %8583 = vmatpush3.bf16.msra.mxu0 %v13662_v58  ;;  %6916 = vmatprep.mubr.f32.mxu0 %v6212_v22  ;;  %v6227_v58 = vld [vmem:[#allocation7 + $0xd0] sm:$0xff]  ;;  %v6232_v22 = vld [vmem:[#allocation7 + $0xf8] sm:$0xff] }
 0x5c7   : > { %v7635_v8 = vsel %vm7489_vm4, %v5419_v12, %v7634_v46  ;;  %v5423_v42 = vrot.slane %v5422_v7, 2  ;;  %8585 = vmatprep.subr.bf16.mxu0 %v8584_v50  ;;  %6737 = vmatmul.mubr.f32.gmra.mrb[214].mxu1 %v6373_v11  ;;  %v6386_v46 = vld [vmem:[#allocation7 + $0x5c8] sm:$0xff] }
 0x5c8   : > { %v5179_v61 = vpop.f32.mrb[154].mxu0  ;;  %6741 = vmatprep.mubr.f32.mxu1 %v6378_v39  ;;  %v6398_v11 = vld [vmem:[#allocation7 + $0x628] sm:$0xff] }
 0x5c9   : > { %v5424_v0 = vmax.f32 %v5422_v7, %v5423_v42  ;;  %v5427_v41 = vmax.f32 %v5174_v49, %v5179_v61  ;;  %v5181_v16 = vpop.f32.mrb[155].mxu0  ;;  %6917 = vmatmul.mubr.f32.gmra.mrb[196].mxu0 %v6211_v5  ;;  %v6393_v49 = vld [vmem:[#allocation7 + $0x600] sm:$0xff]  ;;  %v6231_v7 = vld [vmem:[#allocation7 + $0xf0] sm:$0xff]  ;;  %v6402_v42 = vld [vmem:[#allocation7 + $0x648] sm:$0xff] }
 0x5ca   : > { %8587 = vmatpush3.bf16.msra.mxu0 %v8584_v50  ;;  %6921 = vmatprep.mubr.f32.mxu0 %v6216_v24  ;;  %v6397_v5 = vld [vmem:[#allocation7 + $0x620] sm:$0xff]  ;;  %v6240_v61 = vld [vmem:[#allocation7 + $0x138] sm:$0xff] }
 0x5cb   : > { %v5425_v43 = vrot.slane %v5424_v0, 1  ;;  %v5428_v23 = vrot.slane %v5427_v41, 4  ;;  %8589 = vmatprep.subr.bf16.mxu0 %v8588_v38  ;;  %6742 = vmatmul.mubr.f32.gmra.mrb[216].mxu1 %v6377_v52 }
 0x5cc   : > { %v5184_v28 = vpop.f32.mrb[156].mxu0  ;;  %6746 = vmatprep.mubr.f32.mxu1 %v6382_v53 }
 0x5cd   : > { %v5426_v21 = vmax.f32 %v5424_v0, %v5425_v43  ;;  %v5429_v31 = vmax.f32 %v5427_v41, %v5428_v23  ;;  %v5186_v17 = vpop.f32.mrb[157].mxu0  ;;  %6922 = vmatmul.mubr.f32.gmra.mrb[198].mxu0 %v6215_v32  ;;  %v6401_v41 = vld [vmem:[#allocation7 + $0x640] sm:$0xff]  ;;  %v6406_v32 = vld [vmem:[#allocation7 + $0x668] sm:$0xff]  ;;  %v6239_v43 = vld [vmem:[#allocation7 + $0x130] sm:$0xff] }
 0x5ce   : > { %8591 = vmatpush3.bf16.msra.mxu0 %v8588_v38  ;;  %6926 = vmatprep.mubr.f32.mxu0 %v6220_v45 }
 0x5cf   : > { %v5430_v26 = vrot.slane %v5429_v31, 2  ;;  %8593 = vmatprep.subr.bf16.mxu0 %v12748_v48  ;;  %6747 = vmatmul.mubr.f32.gmra.mrb[218].mxu1 %v6381_v4  ;;  %v7636_v13 = vsel %vm7491_vm5, %v5426_v21, %v7635_v8 }
 0x5d0   : > { %v5189_v47 = vpop.f32.mrb[158].mxu0  ;;  %6751 = vmatprep.mubr.f32.mxu1 %v6386_v46 }
 0x5d1   : > { %v5431_v55 = vmax.f32 %v5429_v31, %v5430_v26  ;;  %v5434_v37 = vmax.f32 %v5184_v28, %v5189_v47  ;;  %v5191_v40 = vpop.f32.mrb[159].mxu0  ;;  %6927 = vmatmul.mubr.f32.gmra.mrb[200].mxu0 %v6219_v3  ;;  %v6244_v28 = vld [vmem:[#allocation7 + $0x158] sm:$0xff]  ;;  %v6405_v31 = vld [vmem:[#allocation7 + $0x660] sm:$0xff]  ;;  %v6410_v26 = vld [vmem:[#allocation7 + $0x688] sm:$0xff] }
 0x5d2   : > { %8595 = vmatpush3.bf16.msra.mxu0 %v12748_v48  ;;  %6931 = vmatprep.mubr.f32.mxu0 %v6224_v60  ;;  %v6243_v60 = vld [vmem:[#allocation7 + $0x150] sm:$0xff]  ;;  %v6409_v40 = vld [vmem:[#allocation7 + $0x680] sm:$0xff] }
 0x5d3   : > { %v5432_v19 = vrot.slane %v5431_v55, 1  ;;  %v5435_v2 = vrot.slane %v5434_v37, 4  ;;  %6752 = vmatmul.mubr.f32.gmra.mrb[220].mxu1 %v6385_v35  ;;  %v6248_v35 = vld [vmem:[#allocation7 + $0x178] sm:$0xff] }
 0x5d4   : > { %v5194_v57 = vpop.f32.mrb[160].mxu0  ;;  %6756 = vmatprep.mubr.f32.mxu1 %v6390_v29  ;;  %v12842_v27 = vpop.f32.mrb[128].mxu1 }
 0x5d5   : > { %v5433_v36 = vmax.f32 %v5431_v55, %v5432_v19  ;;  %v5436_v34 = vmax.f32 %v5434_v37, %v5435_v2  ;;  %v5196_v44 = vpop.f32.mrb[161].mxu0  ;;  %6932 = vmatmul.mubr.f32.gmra.mrb[202].mxu0 %v6223_v10  ;;  %v6525_v1 = vpop.f32.mrb[129].mxu1 }
 0x5d6   : > { %6936 = vmatprep.mubr.f32.mxu0 %v6228_v15  ;;  %v6414_v15 = vld [vmem:[#allocation7 + $0x6a8] sm:$0xff] }
 0x5d7   : > { %v5437_v48 = vrot.slane %v5436_v34, 2  ;;  %6757 = vmatmul.mubr.f32.gmra.mrb[222].mxu1 %v6389_v14  ;;  %v7637_v56 = vsel %vm7493_vm6, %v5433_v36, %v7636_v13 }
 0x5d8   : > { %v5199_v59 = vpop.f32.mrb[162].mxu0  ;;  %6761 = vmatprep.mubr.f32.mxu1 %v6394_v62  ;;  %v12845_v50 = vpop.f32.mrb[130].mxu1  ;;  %v6413_v62 = vld [vmem:[#allocation7 + $0x6a0] sm:$0xff] }
 0x5d9   : > { %v5438_v25 = vmax.f32 %v5436_v34, %v5437_v48  ;;  %v5441_v51 = vmax.f32 %v5194_v57, %v5199_v59  ;;  %v5201_v20 = vpop.f32.mrb[163].mxu0  ;;  %6937 = vmatmul.mubr.f32.gmra.mrb[204].mxu0 %v6227_v58  ;;  %v6530_v12 = vpop.f32.mrb[131].mxu1  ;;  %v6247_v57 = vld [vmem:[#allocation7 + $0x170] sm:$0xff]  ;;  %v6252_v34 = vld [vmem:[#allocation7 + $0x198] sm:$0xff]  ;;  %v6418_v59 = vld [vmem:[#allocation7 + $0x6c8] sm:$0xff] }
 0x5da   : > { %6941 = vmatprep.mubr.f32.mxu0 %v6232_v22 }
 0x5db   : > { %v5439_v18 = vrot.slane %v5438_v25, 1  ;;  %v5442_v54 = vrot.slane %v5441_v51, 4  ;;  %6762 = vmatmul.mubr.f32.gmra.mrb[224].mxu1 %v6393_v49 }
 0x5dc   : > { %v5204_v39 = vpop.f32.mrb[164].mxu0  ;;  %6766 = vmatprep.mubr.f32.mxu1 %v6398_v11  ;;  %v6256_v11 = vld [vmem:[#allocation7 + $0x1b8] sm:$0xff] }
 0x5dd   : > { %v5440_v9 = vmax.f32 %v5438_v25, %v5439_v18  ;;  %v5443_v63 = vmax.f32 %v5441_v51, %v5442_v54  ;;  %v5206_v8 = vpop.f32.mrb[165].mxu0  ;;  %6942 = vmatmul.mubr.f32.gmra.mrb[206].mxu0 %v6231_v7  ;;  %v6251_v25 = vld [vmem:[#allocation7 + $0x190] sm:$0xff]  ;;  %v6417_v7 = vld [vmem:[#allocation7 + $0x6c0] sm:$0xff] }
 0x5de   : > { %6946 = vmatprep.mubr.f32.mxu0 %v6236_v33  ;;  %v12847_v24 = vpop.f32.mrb[132].mxu1 }
 0x5df   : > { %6767 = vmatmul.mubr.f32.gmra.mrb[226].mxu1 %v6397_v5  ;;  %v12850_v6 = vsel %vm7495_vm7, %v5440_v9, %v7637_v56  ;;  %v6535_v52 = vpop.f32.mrb[133].mxu1  ;;  %v5444_v16 = vrot.slane %v5443_v63, 2  ;;  %v6422_v5 = vld [vmem:[#allocation7 + $0x6e8] sm:$0xff] }
 0x5e0   : > { %v5209_v0 = vpop.f32.mrb[166].mxu0  ;;  %6771 = vmatprep.mubr.f32.mxu1 %v6402_v42  ;;  %v6421_v52 = vld [vmem:[#allocation7 + $0x6e0] sm:$0xff] }
 0x5e1   : > { %v5448_v38 = vmax.f32 %v5204_v39, %v5209_v0  ;;  %v5211_v53 = vpop.f32.mrb[167].mxu0  ;;  %6947 = vmatmul.mubr.f32.gmra.mrb[208].mxu0 %v6235_v30  ;;  %v5445_v17 = vmax.f32 %v5443_v63, %v5444_v16  ;;  %v6255_v63 = vld [vmem:[#allocation7 + $0x1b0] sm:$0xff]  ;;  %v6260_v30 = vld [vmem:[#allocation7 + $0x1d8] sm:$0xff] }
 0x5e2   : > { %6951 = vmatprep.mubr.f32.mxu0 %v6240_v61  ;;  %v12852_v23 = vpop.f32.mrb[134].mxu1  ;;  %v6259_v53 = vld [vmem:[#allocation7 + $0x1d0] sm:$0xff] }
 0x5e3   : > { %v5449_v45 = vrot.slane %v5448_v38, 4  ;;  %6772 = vmatmul.mubr.f32.gmra.mrb[228].mxu1 %v6401_v41  ;;  %v6540_v4 = vpop.f32.mrb[135].mxu1  ;;  %v5446_v29 = vrot.slane %v5445_v17, 1 }
 0x5e4   : > { %v5214_v21 = vpop.f32.mrb[168].mxu0  ;;  %6776 = vmatprep.mubr.f32.mxu1 %v6406_v32 }
 0x5e5   : > { %v5450_v46 = vmax.f32 %v5448_v38, %v5449_v45  ;;  %v5216_v3 = vpop.f32.mrb[169].mxu0  ;;  %6952 = vmatmul.mubr.f32.gmra.mrb[210].mxu0 %v6239_v43  ;;  %v5447_v58 = vmax.f32 %v5445_v17, %v5446_v29  ;;  %v6426_v38 = vld [vmem:[#allocation7 + $0x708] sm:$0xff] }
 0x5e6   : > { %6956 = vmatprep.mubr.f32.mxu0 %v6244_v28  ;;  %v12854_v13 = vpop.f32.mrb[136].mxu1  ;;  %v6264_v28 = vld [vmem:[#allocation7 + $0x1f8] sm:$0xff] }
 0x5e7   : > { %v5451_v47 = vrot.slane %v5450_v46, 2  ;;  %6777 = vmatmul.mubr.f32.gmra.mrb[230].mxu1 %v6405_v31  ;;  %v6545_v55 = vpop.f32.mrb[137].mxu1  ;;  %v6425_v31 = vld [vmem:[#allocation7 + $0x700] sm:$0xff] }
 0x5e8   : > { %v5219_v37 = vpop.f32.mrb[170].mxu0  ;;  %6781 = vmatprep.mubr.f32.mxu1 %v6410_v26  ;;  %v6430_v26 = vld [vmem:[#allocation7 + $0x728] sm:$0xff] }
 0x5e9   : > { %v5452_v10 = vmax.f32 %v5450_v46, %v5451_v47  ;;  %v5455_v19 = vmax.f32 %v5214_v21, %v5219_v37  ;;  %v5221_v2 = vpop.f32.mrb[171].mxu0  ;;  %6957 = vmatmul.mubr.f32.gmra.mrb[212].mxu0 %v6243_v60  ;;  %v6263_v60 = vld [vmem:[#allocation7 + $0x1f0] sm:$0xff]  ;;  %v6268_v37 = vld [vmem:[#allocation7 + $0x218] sm:$0xff] }
 0x5ea   : > { %6961 = vmatprep.mubr.f32.mxu0 %v6248_v35 }
 0x5eb   : > { %v5453_v14 = vrot.slane %v5452_v10, 1  ;;  %v5456_v36 = vrot.slane %v5455_v19, 4  ;;  %6782 = vmatmul.mubr.f32.gmra.mrb[232].mxu1 %v6409_v40 }
 0x5ec   : > { %v5224_v44 = vpop.f32.mrb[172].mxu0  ;;  %6786 = vmatprep.mubr.f32.mxu1 %v6414_v15  ;;  %v12856_v1 = vpop.f32.mrb[138].mxu1 }
 0x5ed   : > { %v5454_v48 = vmax.f32 %v5452_v10, %v5453_v14  ;;  %v5457_v22 = vmax.f32 %v5455_v19, %v5456_v36  ;;  %v5226_v56 = vpop.f32.mrb[173].mxu0  ;;  %6962 = vmatmul.mubr.f32.gmra.mrb[214].mxu0 %v6247_v57  ;;  %v6550_v49 = vpop.f32.mrb[139].mxu1  ;;  %v6429_v10 = vld [vmem:[#allocation7 + $0x720] sm:$0xff]  ;;  %v6434_v57 = vld [vmem:[#allocation7 + $0x748] sm:$0xff]  ;;  %v6267_v14 = vld [vmem:[#allocation7 + $0x210] sm:$0xff] }
 0x5ee   : > { %6966 = vmatprep.mubr.f32.mxu0 %v6252_v34 }
 0x5ef   : > { %v7639_v51 = vsel %vm7483_vm1, %v5454_v48, %v5447_v58  ;;  %v5458_v20 = vrot.slane %v5457_v22, 2  ;;  %6787 = vmatmul.mubr.f32.gmra.mrb[234].mxu1 %v6413_v62  ;;  %v6272_v62 = vld [vmem:[#allocation7 + $0x238] sm:$0xff] }
 0x5f0   : > { %v5229_v12 = vpop.f32.mrb[174].mxu0  ;;  %6791 = vmatprep.mubr.f32.mxu1 %v6418_v59  ;;  %v12859_v18 = vpop.f32.mrb[140].mxu1 }
 0x5f1   : > { %v5459_v54 = vmax.f32 %v5457_v22, %v5458_v20  ;;  %v5462_v33 = vmax.f32 %v5224_v44, %v5229_v12  ;;  %v5231_v39 = vpop.f32.mrb[175].mxu0  ;;  %6967 = vmatmul.mubr.f32.gmra.mrb[216].mxu0 %v6251_v25  ;;  %v6555_v9 = vpop.f32.mrb[141].mxu1  ;;  %v6433_v22 = vld [vmem:[#allocation7 + $0x740] sm:$0xff]  ;;  %v6438_v25 = vld [vmem:[#allocation7 + $0x768] sm:$0xff]  ;;  %v6276_v12 = vld [vmem:[#allocation7 + $0x258] sm:$0xff] }
 0x5f2   : > { %6971 = vmatprep.mubr.f32.mxu0 %v6256_v11 }
 0x5f3   : > { %v5460_v8 = vrot.slane %v5459_v54, 1  ;;  %v5463_v42 = vrot.slane %v5462_v33, 4  ;;  %6792 = vmatmul.mubr.f32.gmra.mrb[236].mxu1 %v6417_v7 }
 0x5f4   : > { %v5234_v61 = vpop.f32.mrb[176].mxu0  ;;  %6796 = vmatprep.mubr.f32.mxu1 %v6422_v5 }
 0x5f5   : > { %v5461_v0 = vmax.f32 %v5459_v54, %v5460_v8  ;;  %v5464_v41 = vmax.f32 %v5462_v33, %v5463_v42  ;;  %v5236_v16 = vpop.f32.mrb[177].mxu0  ;;  %6972 = vmatmul.mubr.f32.gmra.mrb[218].mxu0 %v6255_v63  ;;  %v6437_v54 = vld [vmem:[#allocation7 + $0x760] sm:$0xff]  ;;  %v6442_v63 = vld [vmem:[#allocation7 + $0x788] sm:$0xff]  ;;  %v6275_v42 = vld [vmem:[#allocation7 + $0x250] sm:$0xff] }
 0x5f6   : > { %6976 = vmatprep.mubr.f32.mxu0 %v6260_v30  ;;  %v12861_v32 = vpop.f32.mrb[142].mxu1 }
 0x5f7   : > { %v7640_v43 = vsel %vm7485_vm2, %v5461_v0, %v7639_v51  ;;  %v5465_v45 = vrot.slane %v5464_v41, 2  ;;  %6797 = vmatmul.mubr.f32.gmra.mrb[238].mxu1 %v6421_v52  ;;  %v6560_v4 = vpop.f32.mrb[143].mxu1  ;;  %v6271_v51 = vld [vmem:[#allocation7 + $0x230] sm:$0xff]  ;;  %v6280_v52 = vld [vmem:[#allocation7 + $0x278] sm:$0xff] }
 0x5f8   : > { %v5239_v21 = vpop.f32.mrb[178].mxu0  ;;  %6801 = vmatprep.mubr.f32.mxu1 %v6426_v38  ;;  %v6279_v4 = vld [vmem:[#allocation7 + $0x270] sm:$0xff] }
 0x5f9   : > { %v5466_v17 = vmax.f32 %v5464_v41, %v5465_v45  ;;  %v5469_v46 = vmax.f32 %v5234_v61, %v5239_v21  ;;  %v5241_v3 = vpop.f32.mrb[179].mxu0  ;;  %6977 = vmatmul.mubr.f32.gmra.mrb[220].mxu0 %v6259_v53  ;;  %v6441_v41 = vld [vmem:[#allocation7 + $0x780] sm:$0xff]  ;;  %v6446_v45 = vld [vmem:[#allocation7 + $0x7a8] sm:$0xff] }
 0x5fa   : > { %6981 = vmatprep.mubr.f32.mxu0 %v6264_v28  ;;  %v12864_v47 = vpop.f32.mrb[144].mxu1  ;;  %v6445_v3 = vld [vmem:[#allocation7 + $0x7a0] sm:$0xff] }
 0x5fb   : > { %v5467_v35 = vrot.slane %v5466_v17, 1  ;;  %v5470_v55 = vrot.slane %v5469_v46, 4  ;;  %6802 = vmatmul.mubr.f32.gmra.mrb[240].mxu1 %v6425_v31  ;;  %v6565_v40 = vpop.f32.mrb[145].mxu1 }
 0x5fc   : > { %v5244_v29 = vpop.f32.mrb[180].mxu0  ;;  %6806 = vmatprep.mubr.f32.mxu1 %v6430_v26 }
 0x5fd   : > { %v5468_v19 = vmax.f32 %v5466_v17, %v5467_v35  ;;  %v5471_v2 = vmax.f32 %v5469_v46, %v5470_v55  ;;  %v5246_v15 = vpop.f32.mrb[181].mxu0  ;;  %6982 = vmatmul.mubr.f32.gmra.mrb[222].mxu0 %v6263_v60  ;;  %v6284_v17 = vld [vmem:[#allocation7 + $0x298] sm:$0xff]  ;;  %v6450_v55 = vld [vmem:[#allocation7 + $0x7c8] sm:$0xff] }
 0x5fe   : > { %6986 = vmatprep.mubr.f32.mxu0 %v6268_v37  ;;  %v12866_v36 = vpop.f32.mrb[146].mxu1  ;;  %v6283_v37 = vld [vmem:[#allocation7 + $0x290] sm:$0xff] }
 0x5ff   : > { %v7641_v34 = vsel %vm7487_vm3, %v5468_v19, %v7640_v43  ;;  %v5472_v44 = vrot.slane %v5471_v2, 2  ;;  %6807 = vmatmul.mubr.f32.gmra.mrb[242].mxu1 %v6429_v10  ;;  %v6570_v58 = vpop.f32.mrb[147].mxu1  ;;  %v6288_v10 = vld [vmem:[#allocation7 + $0x2b8] sm:$0xff] }
 0x600   : > { %v5249_v48 = vpop.f32.mrb[182].mxu0  ;;  %6811 = vmatprep.mubr.f32.mxu1 %v6434_v57  ;;  %v6449_v57 = vld [vmem:[#allocation7 + $0x7c0] sm:$0xff]  ;;  %v6287_v58 = vld [vmem:[#allocation7 + $0x2b0] sm:$0xff] }
 0x601   : > { %v5473_v56 = vmax.f32 %v5471_v2, %v5472_v44  ;;  %v5476_v59 = vmax.f32 %v5244_v29, %v5249_v48  ;;  %v5251_v49 = vpop.f32.mrb[183].mxu0  ;;  %6987 = vmatmul.mubr.f32.gmra.mrb[224].mxu0 %v6267_v14 }
 0x602   : > { %6991 = vmatprep.mubr.f32.mxu0 %v6272_v62  ;;  %v6454_v62 = vld [vmem:[#allocation7 + $0x7e8] sm:$0xff] }
 0x603   : > { %v5474_v20 = vrot.slane %v5473_v56, 1  ;;  %v5477_v11 = vrot.slane %v5476_v59, 4  ;;  %6812 = vmatmul.mubr.f32.gmra.mrb[244].mxu1 %v6433_v22 }
 0x604   : > { %v5254_v7 = vpop.f32.mrb[184].mxu0  ;;  %6816 = vmatprep.mubr.f32.mxu1 %v6438_v25  ;;  %v12869_v33 = vpop.f32.mrb[148].mxu1  ;;  %v6453_v25 = vld [vmem:[#allocation7 + $0x7e0] sm:$0xff] }
 0x605   : > { %v5475_v39 = vmax.f32 %v5473_v56, %v5474_v20  ;;  %v5478_v5 = vmax.f32 %v5476_v59, %v5477_v11  ;;  %v5256_v9 = vpop.f32.mrb[185].mxu0  ;;  %6992 = vmatmul.mubr.f32.gmra.mrb[226].mxu0 %v6271_v51  ;;  %v6575_v8 = vpop.f32.mrb[149].mxu1  ;;  %v6292_v59 = vld [vmem:[#allocation7 + $0x2d8] sm:$0xff] }
 0x606   : > { %6996 = vmatprep.mubr.f32.mxu0 %v6276_v12  ;;  %v6408_v11 = vld [vmem:[#allocation7 + $0x678] sm:$0xff]  ;;  %v6291_v12 = vld [vmem:[#allocation7 + $0x2d0] sm:$0xff] }
 0x607   : > { %v7642_v30 = vsel %vm7489_vm4, %v5475_v39, %v7641_v34  ;;  %v5479_v61 = vrot.slane %v5478_v5, 2  ;;  %6817 = vmatmul.mubr.f32.gmra.mrb[246].mxu1 %v6437_v54  ;;  %v6296_v39 = vld [vmem:[#allocation7 + $0x2f8] sm:$0xff] }
 0x608   : > { %v5259_v0 = vpop.f32.mrb[186].mxu0  ;;  %6821 = vmatprep.mubr.f32.mxu1 %v6442_v63  ;;  %v12872_v16 = vpop.f32.mrb[150].mxu1  ;;  %v6407_v63 = vld [vmem:[#allocation7 + $0x670] sm:$0xff] }
 0x609   : > { %v5480_v38 = vmax.f32 %v5478_v5, %v5479_v61  ;;  %v5483_v53 = vmax.f32 %v5254_v7, %v5259_v0  ;;  %v5261_v43 = vpop.f32.mrb[187].mxu0  ;;  %6997 = vmatmul.mubr.f32.gmra.mrb[228].mxu0 %v6275_v42  ;;  %v6580_v28 = vpop.f32.mrb[151].mxu1  ;;  %v6412_v42 = vld [vmem:[#allocation7 + $0x698] sm:$0xff] }
 0x60a   : > { %7001 = vmatprep.mubr.f32.mxu0 %v6280_v52  ;;  %v6300_v0 = vld [vmem:[#allocation7 + $0x318] sm:$0xff] }
 0x60b   : > { %v5481_v21 = vrot.slane %v5480_v38, 1  ;;  %v5484_v31 = vrot.slane %v5483_v53, 4  ;;  %6822 = vmatmul.mubr.f32.gmra.mrb[248].mxu1 %v6441_v41  ;;  %v6416_v43 = vld [vmem:[#allocation7 + $0x6b8] sm:$0xff] }
 0x60c   : > { %v5264_v46 = vpop.f32.mrb[188].mxu0  ;;  %6826 = vmatprep.mubr.f32.mxu1 %v6446_v45  ;;  %v6299_v45 = vld [vmem:[#allocation7 + $0x310] sm:$0xff] }
 0x60d   : > { %v5482_v26 = vmax.f32 %v5480_v38, %v5481_v21  ;;  %v5485_v60 = vmax.f32 %v5483_v53, %v5484_v31  ;;  %v5266_v35 = vpop.f32.mrb[189].mxu0  ;;  %7002 = vmatmul.mubr.f32.gmra.mrb[230].mxu0 %v6279_v4  ;;  %v6411_v38 = vld [vmem:[#allocation7 + $0x690] sm:$0xff]  ;;  %v6304_v21 = vld [vmem:[#allocation7 + $0x338] sm:$0xff] }
 0x60e   : > { %7006 = vmatprep.mubr.f32.mxu0 %v6284_v17  ;;  %v12874_v40 = vpop.f32.mrb[152].mxu1  ;;  %v6419_v35 = vld [vmem:[#allocation7 + $0x6d0] sm:$0xff] }
 0x60f   : > { %v5486_v29 = vrot.slane %v5485_v60, 2  ;;  %v7643_v19 = vsel %vm7491_vm5, %v5482_v26, %v7642_v30  ;;  %6827 = vmatmul.mubr.f32.gmra.mrb[250].mxu1 %v6445_v3  ;;  %v6585_v2 = vpop.f32.mrb[153].mxu1  ;;  %v6295_v30 = vld [vmem:[#allocation7 + $0x2f0] sm:$0xff]  ;;  %v6420_v3 = vld [vmem:[#allocation7 + $0x6d8] sm:$0xff] }
 0x610   : > { %v5269_v15 = vpop.f32.mrb[190].mxu0  ;;  %6831 = vmatprep.mubr.f32.mxu1 %v6450_v55  ;;  %v6303_v26 = vld [vmem:[#allocation7 + $0x330] sm:$0xff] }
 0x611   : > { %v5487_v14 = vmax.f32 %v5485_v60, %v5486_v29  ;;  %v5490_v34 = vmax.f32 %v5264_v46, %v5269_v15  ;;  %v5271_v44 = vpop.f32.mrb[191].mxu0  ;;  %7007 = vmatmul.mubr.f32.gmra.mrb[232].mxu0 %v6283_v37  ;;  %v6415_v46 = vld [vmem:[#allocation7 + $0x6b0] sm:$0xff]  ;;  %v6308_v60 = vld [vmem:[#allocation7 + $0x358] sm:$0xff] }
 0x612   : > { %7011 = vmatprep.mubr.f32.mxu0 %v6288_v10  ;;  %v12877_v48 = vpop.f32.mrb[154].mxu1  ;;  %v6424_v37 = vld [vmem:[#allocation7 + $0x6f8] sm:$0xff]  ;;  %v6307_v10 = vld [vmem:[#allocation7 + $0x350] sm:$0xff] }
 0x613   : > { %v5488_v22 = vrot.slane %v5487_v14, 1  ;;  %v5491_v56 = vrot.slane %v5490_v34, 4  ;;  %6832 = vmatmul.mubr.f32.gmra.mrb[252].mxu1 %v6449_v57  ;;  %v6590_v49 = vpop.f32.mrb[155].mxu1  ;;  %v6428_v15 = vld [vmem:[#allocation7 + $0x718] sm:$0xff]  ;;  %v6427_v44 = vld [vmem:[#allocation7 + $0x710] sm:$0xff] }
 0x614   : > { %6836 = vmatprep.mubr.f32.mxu1 %v6454_v62  ;;  %v6431_v49 = vld [vmem:[#allocation7 + $0x730] sm:$0xff] }
 0x615   : > { %v5489_v51 = vmax.f32 %v5487_v14, %v5488_v22  ;;  %v5492_v20 = vmax.f32 %v5490_v34, %v5491_v56  ;;  %7012 = vmatmul.mubr.f32.gmra.mrb[234].mxu0 %v6287_v58  ;;  %v6311_v14 = vld [vmem:[#allocation7 + $0x370] sm:$0xff]  ;;  %v6316_v34 = vld [vmem:[#allocation7 + $0x398] sm:$0xff] }
 0x616   : > { %7016 = vmatprep.mubr.f32.mxu0 %v6292_v59  ;;  %v12879_v7 = vpop.f32.mrb[156].mxu1  ;;  %v6432_v58 = vld [vmem:[#allocation7 + $0x738] sm:$0xff]  ;;  %v6315_v56 = vld [vmem:[#allocation7 + $0x390] sm:$0xff] }
 0x617   : > { %v5493_v54 = vrot.slane %v5492_v20, 2  ;;  %v7644_v5 = vsel %vm7493_vm6, %v5489_v51, %v7643_v19  ;;  %6837 = vmatmul.mubr.f32.gmra.mrb[254].mxu1 %v6453_v25  ;;  %v6595_v9 = vpop.f32.mrb[157].mxu1  ;;  %v6423_v19 = vld [vmem:[#allocation7 + $0x6f0] sm:$0xff]  ;;  %v6320_v59 = vld [vmem:[#allocation7 + $0x3b8] sm:$0xff] }
 0x618   : > { %7161 = vmatprep.mubr.f32.mxu1 %v6408_v11  ;;  %v6436_v25 = vld [vmem:[#allocation7 + $0x758] sm:$0xff]  ;;  %v6319_v51 = vld [vmem:[#allocation7 + $0x3b0] sm:$0xff] }
 0x619   : > { %v5494_v8 = vmax.f32 %v5492_v20, %v5493_v54  ;;  %7017 = vmatmul.mubr.f32.gmra.mrb[236].mxu0 %v6291_v12  ;;  %v6324_v11 = vld [vmem:[#allocation7 + $0x3d8] sm:$0xff]  ;;  %v6435_v54 = vld [vmem:[#allocation7 + $0x750] sm:$0xff] }
 0x61a   : > { %7021 = vmatprep.mubr.f32.mxu0 %v6296_v39  ;;  %v12882_v61 = vpop.f32.mrb[158].mxu1  ;;  %v6440_v39 = vld [vmem:[#allocation7 + $0x778] sm:$0xff] }
 0x61b   : > { %v5495_v52 = vrot.slane %v5494_v8, 1  ;;  %7162 = vmatmul.mubr.f32.vlgmr.msra.gmra.mrb[230].mxu1 %v6407_v63  ;;  %v6600_v41 = vpop.f32.mrb[159].mxu1  ;;  %v6328_v63 = vld [vmem:[#allocation7 + $0x3f8] sm:$0xff] }
 0x61c   : > { %7166 = vmatprep.mubr.f32.mxu1 %v6412_v42  ;;  %v6439_v42 = vld [vmem:[#allocation7 + $0x770] sm:$0xff] }
 0x61d   : > { %v5496_v53 = vmax.f32 %v5494_v8, %v5495_v52  ;;  %7022 = vmatmul.mubr.f32.gmra.mrb[238].mxu0 %v6295_v30  ;;  %v6444_v30 = vld [vmem:[#allocation7 + $0x798] sm:$0xff]  ;;  %v6327_v52 = vld [vmem:[#allocation7 + $0x3f0] sm:$0xff] }
 0x61e   : > { %7026 = vmatprep.mubr.f32.mxu0 %v6300_v0  ;;  %v12884_v28 = vpop.f32.mrb[160].mxu1  ;;  %v6332_v0 = vld [vmem:[#allocation7 + $0x418] sm:$0xff]  ;;  %v6443_v41 = vld [vmem:[#allocation7 + $0x790] sm:$0xff] }
 0x61f   : > { %v7645_v4 = vsel %vm7495_vm7, %v5496_v53, %v7644_v5  ;;  %7167 = vmatmul.mubr.f32.gmra.mrb[232].mxu1 %v6411_v38  ;;  %v6605_v31 = vpop.f32.mrb[161].mxu1  ;;  %v6323_v5 = vld [vmem:[#allocation7 + $0x3d0] sm:$0xff]  ;;  %v6448_v53 = vld [vmem:[#allocation7 + $0x7b8] sm:$0xff] }
 0x620   : > { %v8596_v17 = vpack.c.bf16 %v7645_v4, %v12850_v6  ;;  %7171 = vmatprep.mubr.f32.mxu1 %v6416_v43  ;;  %v6312_v6 = vld [vmem:[#allocation7 + $0x378] sm:$0xff] }
 0x621   : > { %7027 = vmatmul.mubr.f32.gmra.mrb[240].mxu0 %v6299_v45  ;;  %v6331_v45 = vld [vmem:[#allocation7 + $0x410] sm:$0xff]  ;;  %v6336_v4 = vld [vmem:[#allocation7 + $0x438] sm:$0xff] }
 0x622   : > { %8597 = vmatprep.subr.bf16.mxu0 %v8596_v17  ;;  %7031 = vmatprep.mubr.f32.mxu0 %v6304_v21  ;;  %v6447_v21 = vld [vmem:[#allocation7 + $0x7b0] sm:$0xff] }
 0x623   : > { %8599 = vmatpush3.bf16.msra.mxu0 %v8596_v17  ;;  %7172 = vmatmul.mubr.f32.gmra.mrb[234].mxu1 %v6415_v46  ;;  %v6452_v17 = vld [vmem:[#allocation7 + $0x7d8] sm:$0xff] }
 0x624   : > { %7176 = vmatprep.mubr.f32.mxu1 %v6420_v3  ;;  %v12888_v55 = vpop.f32.mrb[162].mxu1  ;;  %v6335_v3 = vld [vmem:[#allocation7 + $0x430] sm:$0xff] }
 0x625   : > { %7032 = vmatmul.mubr.f32.gmra.mrb[242].mxu0 %v6303_v26  ;;  %v6610_v29 = vpop.f32.mrb[163].mxu1  ;;  %v6340_v26 = vld [vmem:[#allocation7 + $0x458] sm:$0xff] }
 0x626   : > { %7036 = vmatprep.mubr.f32.mxu0 %v6308_v60  ;;  %v6451_v60 = vld [vmem:[#allocation7 + $0x7d0] sm:$0xff] }
 0x627   : > { %7177 = vmatmul.mubr.f32.gmra.mrb[236].mxu1 %v6419_v35 }
 0x628   : > { %7181 = vmatprep.mubr.f32.mxu1 %v6424_v37  ;;  %v12890_v2 = vpop.f32.mrb[164].mxu1  ;;  %v6456_v37 = vld [vmem:[#allocation7 + $0x7f8] sm:$0xff] }
 0x629   : > { %7037 = vmatmul.mubr.f32.gmra.mrb[244].mxu0 %v6307_v10  ;;  %v6615_v57 = vpop.f32.mrb[165].mxu1  ;;  %v6339_v10 = vld [vmem:[#allocation7 + $0x450] sm:$0xff] }
 0x62a   : > { %7041 = vmatprep.mubr.f32.mxu0 %v6312_v6  ;;  %v6344_v6 = vld [vmem:[#allocation7 + $0x478] sm:$0xff] }
 0x62b   : > { %7182 = vmatmul.mubr.f32.gmra.mrb[238].mxu1 %v6423_v19  ;;  %v6455_v19 = vld [vmem:[#allocation7 + $0x7f0] sm:$0xff] }
 0x62c   : > { %7186 = vmatprep.mubr.f32.mxu1 %v6428_v15  ;;  %v12892_v62 = vpop.f32.mrb[166].mxu1  ;;  %v6343_v15 = vld [vmem:[#allocation7 + $0x470] sm:$0xff] }
 0x62d   : > { %7042 = vmatmul.mubr.f32.gmra.mrb[246].mxu0 %v6311_v14  ;;  %v6620_v22 = vpop.f32.mrb[167].mxu1  ;;  %v6348_v14 = vld [vmem:[#allocation7 + $0x498] sm:$0xff] }
 0x62e   : > { %7046 = vmatprep.mubr.f32.mxu0 %v6316_v34  ;;  %v6352_v22 = vld [vmem:[#allocation7 + $0x4b8] sm:$0xff] }
 0x62f   : > { %7187 = vmatmul.mubr.f32.gmra.mrb[240].mxu1 %v6427_v44  ;;  %v6347_v44 = vld [vmem:[#allocation7 + $0x490] sm:$0xff] }
 0x630   : > { %7191 = vmatprep.mubr.f32.mxu1 %v6432_v58 }
 0x631   : > { %7047 = vmatmul.mubr.f32.gmra.mrb[248].mxu0 %v6315_v56 }
 0x632   : > { %7051 = vmatprep.mubr.f32.mxu0 %v6320_v59  ;;  %v12894_v20 = vpop.f32.mrb[168].mxu1  ;;  %v6351_v59 = vld [vmem:[#allocation7 + $0x4b0] sm:$0xff] }
 0x633   : > { %7192 = vmatmul.mubr.f32.gmra.mrb[242].mxu1 %v6431_v49  ;;  %v6625_v12 = vpop.f32.mrb[169].mxu1  ;;  %v6356_v49 = vld [vmem:[#allocation7 + $0x4d8] sm:$0xff] }
 0x634   : > { %7196 = vmatprep.mubr.f32.mxu1 %v6436_v25  ;;  %v6360_v12 = vld [vmem:[#allocation7 + $0x4f8] sm:$0xff] }
 0x635   : > { %7052 = vmatmul.mubr.f32.gmra.mrb[250].mxu0 %v6319_v51 }
 0x636   : > { %7056 = vmatprep.mubr.f32.mxu0 %v6324_v11  ;;  %v12896_v9 = vpop.f32.mrb[170].mxu1  ;;  %v6355_v11 = vld [vmem:[#allocation7 + $0x4d0] sm:$0xff] }
 0x637   : > { %7197 = vmatmul.mubr.f32.gmra.mrb[244].mxu1 %v6435_v54  ;;  %v6630_v8 = vpop.f32.mrb[171].mxu1 }
 0x638   : > { %7201 = vmatprep.mubr.f32.mxu1 %v6440_v39 }
 0x639   : > { %7057 = vmatmul.mubr.f32.gmra.mrb[252].mxu0 %v6323_v5  ;;  %v6359_v5 = vld [vmem:[#allocation7 + $0x4f0] sm:$0xff] }
 0x63a   : > { %7061 = vmatprep.mubr.f32.mxu0 %v6328_v63  ;;  %v6364_v63 = vld [vmem:[#allocation7 + $0x518] sm:$0xff] }
 0x63b   : > { %7202 = vmatmul.mubr.f32.gmra.mrb[246].mxu1 %v6439_v42 }
 0x63c   : > { %7206 = vmatprep.mubr.f32.mxu1 %v6444_v30  ;;  %v12898_v38 = vpop.f32.mrb[172].mxu1  ;;  %v6363_v30 = vld [vmem:[#allocation7 + $0x510] sm:$0xff] }
 0x63d   : > { %7062 = vmatmul.mubr.f32.gmra.mrb[254].mxu0 %v6327_v52  ;;  %v6635_v43 = vpop.f32.mrb[173].mxu1  ;;  %v6368_v52 = vld [vmem:[#allocation7 + $0x538] sm:$0xff] }
 0x63e   : > { %7066 = vmatprep.mubr.f32.mxu0 %v6332_v0  ;;  %v6367_v0 = vld [vmem:[#allocation7 + $0x530] sm:$0xff] }
 0x63f   : > { %7207 = vmatmul.mubr.f32.gmra.mrb[248].mxu1 %v6443_v41 }
 0x640   : > { %7211 = vmatprep.mubr.f32.mxu1 %v6448_v53  ;;  %v12900_v31 = vpop.f32.mrb[174].mxu1  ;;  %v6372_v53 = vld [vmem:[#allocation7 + $0x558] sm:$0xff] }
 0x641   : > { %7067 = vmatmul.mubr.f32.gmra.mrb[0].mxu0 %v6331_v45  ;;  %v6640_v46 = vpop.f32.mrb[175].mxu1  ;;  %v6371_v45 = vld [vmem:[#allocation7 + $0x550] sm:$0xff] }
 0x642   : > { %7071 = vmatprep.mubr.f32.mxu0 %v6336_v4  ;;  %v6375_v46 = vld [vmem:[#allocation7 + $0x570] sm:$0xff] }
 0x643   : > { %7212 = vmatmul.mubr.f32.gmra.mrb[250].mxu1 %v6447_v21  ;;  %v6376_v21 = vld [vmem:[#allocation7 + $0x578] sm:$0xff] }
 0x644   : > { %7216 = vmatprep.mubr.f32.mxu1 %v6452_v17  ;;  %v12902_v35 = vpop.f32.mrb[176].mxu1 }
 0x645   : > { %7072 = vmatmul.mubr.f32.gmra.mrb[2].mxu0 %v6335_v3  ;;  %v6645_v29 = vpop.f32.mrb[177].mxu1  ;;  %v6380_v3 = vld [vmem:[#allocation7 + $0x598] sm:$0xff] }
 0x646   : > { %7076 = vmatprep.mubr.f32.mxu0 %v6340_v26  ;;  %v6384_v29 = vld [vmem:[#allocation7 + $0x5b8] sm:$0xff] }
 0x647   : > { %7217 = vmatmul.mubr.f32.gmra.mrb[252].mxu1 %v6451_v60 }
 0x648   : > { %7221 = vmatprep.mubr.f32.mxu1 %v6456_v37  ;;  %v6379_v37 = vld [vmem:[#allocation7 + $0x590] sm:$0xff] }
 0x649   : > { %7077 = vmatmul.mubr.f32.gmra.mrb[4].mxu0 %v6339_v10 }
 0x64a   : > { %7081 = vmatprep.mubr.f32.mxu0 %v6344_v6  ;;  %v12904_v57 = vpop.f32.mrb[178].mxu1 }
 0x64b   : > { %7222 = vmatmul.mubr.f32.gmra.mrb[254].mxu1 %v6455_v19  ;;  %v6650_v34 = vpop.f32.mrb[179].mxu1  ;;  %v6383_v19 = vld [vmem:[#allocation7 + $0x5b0] sm:$0xff] }
 0x64d   : > { %7082 = vmatmul.mubr.f32.gmra.mrb[6].mxu0 %v6343_v15  ;;  %v6388_v15 = vld [vmem:[#allocation7 + $0x5d8] sm:$0xff] }
 0x64e   : > { %7086 = vmatprep.mubr.f32.mxu0 %v6348_v14  ;;  %v12906_v58 = vpop.f32.mrb[180].mxu1 }
 0x64f   : > { %v6655_v56 = vpop.f32.mrb[181].mxu1 }
 0x651   : > { %7087 = vmatmul.mubr.f32.gmra.mrb[8].mxu0 %v6347_v44  ;;  %v6387_v44 = vld [vmem:[#allocation7 + $0x5d0] sm:$0xff] }
 0x652   : > { %7091 = vmatprep.mubr.f32.mxu0 %v6352_v22  ;;  %v6392_v22 = vld [vmem:[#allocation7 + $0x5f8] sm:$0xff] }
 0x654   : > { %v12908_v25 = vpop.f32.mrb[182].mxu1 }
 0x655   : > { %7092 = vmatmul.mubr.f32.gmra.mrb[10].mxu0 %v6351_v59  ;;  %v6660_v51 = vpop.f32.mrb[183].mxu1 }
 0x656   : > { %7096 = vmatprep.mubr.f32.mxu0 %v6356_v49  ;;  %v6391_v49 = vld [vmem:[#allocation7 + $0x5f0] sm:$0xff]  ;;  %v6396_v51 = vld [vmem:[#allocation7 + $0x618] sm:$0xff] }
 0x658   : > { %v12910_v54 = vpop.f32.mrb[184].mxu1 }
 0x659   : > { %7097 = vmatmul.mubr.f32.gmra.mrb[12].mxu0 %v6355_v11  ;;  %v6665_v39 = vpop.f32.mrb[185].mxu1 }
 0x65a   : > { %7101 = vmatprep.mubr.f32.mxu0 %v6360_v12  ;;  %v6395_v39 = vld [vmem:[#allocation7 + $0x610] sm:$0xff] }
 0x65c   : > { %v12912_v8 = vpop.f32.mrb[186].mxu1 }
 0x65d   : > { %7102 = vmatmul.mubr.f32.gmra.mrb[14].mxu0 %v6359_v5  ;;  %v6670_v42 = vpop.f32.mrb[187].mxu1  ;;  %v6400_v5 = vld [vmem:[#allocation7 + $0x638] sm:$0xff] }
 0x65e   : > { %7106 = vmatprep.mubr.f32.mxu0 %v6364_v63 }
 0x661   : > { %7107 = vmatmul.mubr.f32.gmra.mrb[16].mxu0 %v6363_v30  ;;  %v6399_v30 = vld [vmem:[#allocation7 + $0x630] sm:$0xff] }
 0x662   : > { %7111 = vmatprep.mubr.f32.mxu0 %v6368_v52  ;;  %v12914_v41 = vpop.f32.mrb[188].mxu1  ;;  %v6404_v52 = vld [vmem:[#allocation7 + $0x658] sm:$0xff] }
 0x663   : > { %v6675_v43 = vpop.f32.mrb[189].mxu1 }
 0x665   : > { %7112 = vmatmul.mubr.f32.gmra.mrb[18].mxu0 %v6367_v0 }
 0x666   : > { %7116 = vmatprep.mubr.f32.mxu0 %v6372_v53  ;;  %v12916_v4 = vpop.f32.mrb[190].mxu1  ;;  %v6403_v53 = vld [vmem:[#allocation7 + $0x650] sm:$0xff] }
 0x667   : > { %v6680_v17 = vpop.f32.mrb[191].mxu1 }
 0x669   : > { %7117 = vmatmul.mubr.f32.gmra.mrb[20].mxu0 %v6371_v45 }
 0x66a   : > { %7121 = vmatprep.mubr.f32.mxu0 %v6376_v21 }
 0x66c   : > { %v12918_v26 = vpop.f32.mrb[192].mxu1 }
 0x66d   : > { %7122 = vmatmul.mubr.f32.gmra.mrb[22].mxu0 %v6375_v46  ;;  %v6685_v60 = vpop.f32.mrb[193].mxu1 }
 0x66e   : > { %7126 = vmatprep.mubr.f32.mxu0 %v6380_v3 }
 0x670   : > { %v12920_v10 = vpop.f32.mrb[194].mxu1 }
 0x671   : > { %7127 = vmatmul.mubr.f32.gmra.mrb[24].mxu0 %v6379_v37  ;;  %v6690_v6 = vpop.f32.mrb[195].mxu1 }
 0x672   : > { %7131 = vmatprep.mubr.f32.mxu0 %v6384_v29 }
 0x674   : > { %v12922_v14 = vpop.f32.mrb[196].mxu1 }
 0x675   : > { %7132 = vmatmul.mubr.f32.gmra.mrb[26].mxu0 %v6383_v19  ;;  %v6695_v34 = vpop.f32.mrb[197].mxu1 }
 0x676   : > { %7136 = vmatprep.mubr.f32.mxu0 %v6388_v15 }
 0x678   : > { %v12924_v56 = vpop.f32.mrb[198].mxu1 }
 0x679   : > { %7137 = vmatmul.mubr.f32.gmra.mrb[28].mxu0 %v6387_v44  ;;  %v6700_v59 = vpop.f32.mrb[199].mxu1 }
 0x67a   : > { %7141 = vmatprep.mubr.f32.mxu0 %v6392_v22 }
 0x67c   : > { %v12926_v11 = vpop.f32.mrb[200].mxu1 }
 0x67d   : > { %7142 = vmatmul.mubr.f32.gmra.mrb[30].mxu0 %v6391_v49  ;;  %v6705_v12 = vpop.f32.mrb[201].mxu1 }
 0x67e   : > { %7146 = vmatprep.mubr.f32.mxu0 %v6396_v51 }
 0x680   : > { %v12928_v63 = vpop.f32.mrb[202].mxu1 }
 0x681   : > { %7147 = vmatmul.mubr.f32.gmra.mrb[32].mxu0 %v6395_v39  ;;  %v6710_v42 = vpop.f32.mrb[203].mxu1 }
 0x682   : > { %7151 = vmatprep.mubr.f32.mxu0 %v6400_v5 }
 0x685   : > { %7152 = vmatmul.mubr.f32.gmra.mrb[34].mxu0 %v6399_v30  ;;  %v12930_v0 = vpop.f32.mrb[204].mxu1 }
 0x686   : > { %7156 = vmatprep.mubr.f32.mxu0 %v6404_v52  ;;  %v6715_v43 = vpop.f32.mrb[205].mxu1 }
 0x689   : > { %7157 = vmatmul.mubr.f32.gmra.mrb[36].mxu0 %v6403_v53  ;;  %v12932_v45 = vpop.f32.mrb[206].mxu1 }
 0x68a   : > { %v6720_v21 = vpop.f32.mrb[207].mxu1 }
 0x68d   : > { %v12934_v17 = vpop.f32.mrb[208].mxu1 }
 0x68e   : > { %v6725_v46 = vpop.f32.mrb[209].mxu1 }
 0x692   : > { %v12936_v3 = vpop.f32.mrb[210].mxu1 }
 0x693   : > { %v6730_v60 = vpop.f32.mrb[211].mxu1 }
 0x694   : > { %v6908_v37 = vpop.f32.mrb[192].mxu0 }
 0x695   : > { %v6909_v29 = vadd.f32 %v6908_v37, %v12842_v27  ;;  %v6910_v6 = vpop.f32.mrb[193].mxu0 }
 0x696   : > { %v12939_v19 = vpop.f32.mrb[212].mxu1 }
 0x697   : > { %v6735_v15 = vpop.f32.mrb[213].mxu1 }
 0x698   : > { %v6913_v34 = vpop.f32.mrb[194].mxu0 }
 0x699   : > { %v6914_v44 = vadd.f32 %v6913_v34, %v12845_v50  ;;  %v6915_v22 = vpop.f32.mrb[195].mxu0 }
 0x69a   : > { %v12942_v59 = vpop.f32.mrb[214].mxu1 }
 0x69b   : > { %v7227_v49 = vmax.f32 %v6909_v29, %v6914_v44  ;;  %v6740_v51 = vpop.f32.mrb[215].mxu1 }
 0x69c   : > { %v6918_v12 = vpop.f32.mrb[196].mxu0 }
 0x69d   : > { %v7228_v39 = vrot.slane %v7227_v49, 4  ;;  %v6919_v5 = vadd.f32 %v6918_v12, %v12847_v24  ;;  %v6920_v42 = vpop.f32.mrb[197].mxu0 }
 0x69e   : > { %v12945_v30 = vpop.f32.mrb[216].mxu1 }
 0x69f   : > { %v7229_v27 = vmax.f32 %v7227_v49, %v7228_v39  ;;  %v6745_v52 = vpop.f32.mrb[217].mxu1 }
 0x6a0   : > { %v6923_v53 = vpop.f32.mrb[198].mxu0 }
 0x6a1   : > { %v6924_v43 = vadd.f32 %v6923_v53, %v12852_v23  ;;  %v6925_v21 = vpop.f32.mrb[199].mxu0  ;;  %v7230_v50 = vrot.slane %v7229_v27, 2 }
 0x6a2   : > { %v12948_v46 = vpop.f32.mrb[218].mxu1 }
 0x6a3   : > { %v7234_v60 = vmax.f32 %v6919_v5, %v6924_v43  ;;  %v6750_v37 = vpop.f32.mrb[219].mxu1  ;;  %v7231_v44 = vmax.f32 %v7229_v27, %v7230_v50 }
 0x6a4   : > { %v6928_v29 = vpop.f32.mrb[200].mxu0 }
 0x6a5   : > { %v7235_v6 = vrot.slane %v7234_v60, 4  ;;  %v6929_v15 = vadd.f32 %v6928_v29, %v12854_v13  ;;  %v6930_v34 = vpop.f32.mrb[201].mxu0  ;;  %v7232_v52 = vrot.slane %v7231_v44, 1 }
 0x6a6   : > { %v12951_v24 = vpop.f32.mrb[220].mxu1 }
 0x6a7   : > { %v7236_v22 = vmax.f32 %v7234_v60, %v7235_v6  ;;  %v6755_v49 = vpop.f32.mrb[221].mxu1  ;;  %v7233_v50 = vmax.f32 %v7231_v44, %v7232_v52 }
 0x6a8   : > { %v6933_v51 = vpop.f32.mrb[202].mxu0 }
 0x6a9   : > { %v7237_v12 = vrot.slane %v7236_v22, 2  ;;  %v6934_v23 = vadd.f32 %v6933_v51, %v12856_v1  ;;  %v6935_v39 = vpop.f32.mrb[203].mxu0 }
 0x6aa   : > { %v12954_v42 = vpop.f32.mrb[222].mxu1 }
 0x6ab   : > { %13663 = vst [vmem:[#allocation41_spill] sm:$0xff] %v12954_v42  ;;  %v7238_v5 = vmax.f32 %v7236_v22, %v7237_v12  ;;  %v7241_v53 = vmax.f32 %v6929_v15, %v6934_v23  ;;  %v6760_v43 = vpop.f32.mrb[223].mxu1 }
 0x6ac   : > { %v6938_v21 = vpop.f32.mrb[204].mxu0 }
 0x6ad   : > { %v7239_v37 = vrot.slane %v7238_v5, 1  ;;  %v7242_v13 = vrot.slane %v7241_v53, 4  ;;  %v6939_v29 = vadd.f32 %v6938_v21, %v12859_v18  ;;  %v6940_v34 = vpop.f32.mrb[205].mxu0 }
 0x6ae   : > { %v12957_v27 = vpop.f32.mrb[224].mxu1 }
 0x6af   : > { %v7240_v60 = vmax.f32 %v7238_v5, %v7239_v37  ;;  %v7243_v6 = vmax.f32 %v7241_v53, %v7242_v13  ;;  %v6765_v49 = vpop.f32.mrb[225].mxu1 }
 0x6b0   : > { %v6943_v1 = vpop.f32.mrb[206].mxu0 }
 0x6b1   : > { %v7682_v51 = vsel %vm7483_vm1, %v7240_v60, %v7233_v50  ;;  %v7244_v39 = vrot.slane %v7243_v6, 2  ;;  %v6944_v22 = vadd.f32 %v6943_v1, %v12861_v32  ;;  %v6945_v15 = vpop.f32.mrb[207].mxu0 }
 0x6b2   : > { %v12961_v12 = vpop.f32.mrb[226].mxu1 }
 0x6b3   : > { %v7245_v23 = vmax.f32 %v7243_v6, %v7244_v39  ;;  %v7248_v43 = vmax.f32 %v6939_v29, %v6944_v22  ;;  %v6770_v42 = vpop.f32.mrb[227].mxu1 }
 0x6b4   : > { %v6948_v18 = vpop.f32.mrb[208].mxu0 }
 0x6b5   : > { %v7246_v21 = vrot.slane %v7245_v23, 1  ;;  %v7249_v34 = vrot.slane %v7248_v43, 4  ;;  %v6949_v44 = vadd.f32 %v6948_v18, %v12864_v47  ;;  %v6950_v52 = vpop.f32.mrb[209].mxu0 }
 0x6b6   : > { %v12964_v5 = vpop.f32.mrb[228].mxu1 }
 0x6b7   : > { %v7247_v53 = vmax.f32 %v7245_v23, %v7246_v21  ;;  %v7250_v37 = vmax.f32 %v7248_v43, %v7249_v34  ;;  %v6775_v13 = vpop.f32.mrb[229].mxu1 }
 0x6b8   : > { %v6953_v50 = vpop.f32.mrb[210].mxu0 }
 0x6b9   : > { %v7683_v32 = vsel %vm7485_vm2, %v7247_v53, %v7682_v51  ;;  %v7251_v60 = vrot.slane %v7250_v37, 2  ;;  %v6954_v49 = vadd.f32 %v6953_v50, %v12866_v36  ;;  %v6955_v6 = vpop.f32.mrb[211].mxu0 }
 0x6bb   : > { %v7252_v29 = vmax.f32 %v7250_v37, %v7251_v60  ;;  %v7255_v42 = vmax.f32 %v6949_v44, %v6954_v49 }
 0x6bc   : > { %v6958_v1 = vpop.f32.mrb[212].mxu0 }
 0x6bd   : > { %v7253_v39 = vrot.slane %v7252_v29, 1  ;;  %v7256_v22 = vrot.slane %v7255_v42, 4  ;;  %v6959_v47 = vadd.f32 %v6958_v1, %v12869_v33  ;;  %v6960_v15 = vpop.f32.mrb[213].mxu0 }
 0x6bf   : > { %v7254_v18 = vmax.f32 %v7252_v29, %v7253_v39  ;;  %v7257_v52 = vmax.f32 %v7255_v42, %v7256_v22 }
 0x6c0   : > { %v6963_v23 = vpop.f32.mrb[214].mxu0 }
 0x6c1   : > { %v7684_v43 = vsel %vm7487_vm3, %v7254_v18, %v7683_v32  ;;  %v7258_v21 = vrot.slane %v7257_v52, 2  ;;  %v6964_v51 = vadd.f32 %v6963_v23, %v12872_v16  ;;  %v6965_v34 = vpop.f32.mrb[215].mxu0 }
 0x6c3   : > { %v7259_v53 = vmax.f32 %v7257_v52, %v7258_v21  ;;  %v7262_v36 = vmax.f32 %v6959_v47, %v6964_v51 }
 0x6c4   : > { %v6968_v13 = vpop.f32.mrb[216].mxu0 }
 0x6c5   : > { %v7260_v37 = vrot.slane %v7259_v53, 1  ;;  %v7263_v44 = vrot.slane %v7262_v36, 4  ;;  %v6969_v50 = vadd.f32 %v6968_v13, %v12874_v40  ;;  %v6970_v60 = vpop.f32.mrb[217].mxu0 }
 0x6c7   : > { %v7261_v49 = vmax.f32 %v7259_v53, %v7260_v37  ;;  %v7264_v33 = vmax.f32 %v7262_v36, %v7263_v44 }
 0x6c8   : > { %v6973_v6 = vpop.f32.mrb[218].mxu0 }
 0x6c9   : > { %v7265_v29 = vrot.slane %v7264_v33, 2  ;;  %v6974_v42 = vadd.f32 %v6973_v6, %v12877_v48  ;;  %v6975_v1 = vpop.f32.mrb[219].mxu0  ;;  %v7685_v32 = vsel %vm7489_vm4, %v7261_v49, %v7684_v43 }
 0x6cb   : > { %v7266_v39 = vmax.f32 %v7264_v33, %v7265_v29  ;;  %v7269_v16 = vmax.f32 %v6969_v50, %v6974_v42 }
 0x6cc   : > { %v6978_v22 = vpop.f32.mrb[220].mxu0 }
 0x6cd   : > { %v7267_v15 = vrot.slane %v7266_v39, 1  ;;  %v7270_v47 = vrot.slane %v7269_v16, 4  ;;  %v6979_v18 = vadd.f32 %v6978_v22, %v12879_v7  ;;  %v6980_v52 = vpop.f32.mrb[221].mxu0 }
 0x6cf   : > { %v7268_v23 = vmax.f32 %v7266_v39, %v7267_v15  ;;  %v7271_v40 = vmax.f32 %v7269_v16, %v7270_v47 }
 0x6d0   : > { %v6983_v21 = vpop.f32.mrb[222].mxu0 }
 0x6d1   : > { %v7272_v51 = vrot.slane %v7271_v40, 2  ;;  %v6984_v34 = vadd.f32 %v6983_v21, %v12882_v61  ;;  %v6985_v53 = vpop.f32.mrb[223].mxu0  ;;  %v7686_v48 = vsel %vm7491_vm5, %v7268_v23, %v7685_v32 }
 0x6d3   : > { %v7273_v36 = vmax.f32 %v7271_v40, %v7272_v51  ;;  %v7276_v13 = vmax.f32 %v6979_v18, %v6984_v34 }
 0x6d4   : > { %v6988_v43 = vpop.f32.mrb[224].mxu0 }
 0x6d5   : > { %v7274_v37 = vrot.slane %v7273_v36, 1  ;;  %v7277_v44 = vrot.slane %v7276_v13, 4  ;;  %v6989_v50 = vadd.f32 %v6988_v43, %v12884_v28  ;;  %v6990_v60 = vpop.f32.mrb[225].mxu0 }
 0x6d7   : > { %v7275_v49 = vmax.f32 %v7273_v36, %v7274_v37  ;;  %v7278_v7 = vmax.f32 %v7276_v13, %v7277_v44 }
 0x6d8   : > { %v6993_v33 = vpop.f32.mrb[226].mxu0 }
 0x6d9   : > { %v7279_v6 = vrot.slane %v7278_v7, 2  ;;  %v6994_v29 = vadd.f32 %v6993_v33, %v12888_v55  ;;  %v6995_v42 = vpop.f32.mrb[227].mxu0  ;;  %v7687_v61 = vsel %vm7493_vm6, %v7275_v49, %v7686_v48 }
 0x6db   : > { %v7280_v1 = vmax.f32 %v7278_v7, %v7279_v6  ;;  %v7283_v39 = vmax.f32 %v6989_v50, %v6994_v29 }
 0x6dc   : > { %v6998_v32 = vpop.f32.mrb[228].mxu0 }
 0x6dd   : > { %v7281_v16 = vrot.slane %v7280_v1, 1  ;;  %v7284_v22 = vrot.slane %v7283_v39, 4  ;;  %v6999_v15 = vadd.f32 %v6998_v32, %v12890_v2  ;;  %v7000_v47 = vpop.f32.mrb[229].mxu0 }
 0x6df   : > { %v7282_v18 = vmax.f32 %v7280_v1, %v7281_v16  ;;  %v7285_v28 = vmax.f32 %v7283_v39, %v7284_v22 }
 0x6e0   : > { %v7003_v52 = vpop.f32.mrb[230].mxu0 }
 0x6e1   : > { %v7004_v23 = vadd.f32 %v7003_v52, %v12892_v62  ;;  %v7005_v40 = vpop.f32.mrb[231].mxu0  ;;  %v12983_v21 = vsel %vm7495_vm7, %v7282_v18, %v7687_v61  ;;  %v7286_v55 = vrot.slane %v7285_v28, 2 }
 0x6e3   : > { %v7290_v51 = vmax.f32 %v6999_v15, %v7004_v23  ;;  %v7287_v13 = vmax.f32 %v7285_v28, %v7286_v55 }
 0x6e4   : > { %v7008_v34 = vpop.f32.mrb[232].mxu0 }
 0x6e5   : > { %v7291_v53 = vrot.slane %v7290_v51, 4  ;;  %v7009_v48 = vadd.f32 %v7008_v34, %v12894_v20  ;;  %v7010_v36 = vpop.f32.mrb[233].mxu0  ;;  %v7288_v60 = vrot.slane %v7287_v13, 1 }
 0x6e7   : > { %v7292_v43 = vmax.f32 %v7290_v51, %v7291_v53  ;;  %v7289_v20 = vmax.f32 %v7287_v13, %v7288_v60 }
 0x6e8   : > { %v7013_v2 = vpop.f32.mrb[234].mxu0 }
 0x6e9   : > { %v7293_v37 = vrot.slane %v7292_v43, 2  ;;  %v7014_v44 = vadd.f32 %v7013_v2, %v12896_v9  ;;  %v7015_v50 = vpop.f32.mrb[235].mxu0 }
 0x6eb   : > { %v7294_v62 = vmax.f32 %v7292_v43, %v7293_v37  ;;  %v7297_v49 = vmax.f32 %v7009_v48, %v7014_v44 }
 0x6ec   : > { %v7018_v7 = vpop.f32.mrb[236].mxu0 }
 0x6ed   : > { %v7295_v33 = vrot.slane %v7294_v62, 1  ;;  %v7298_v6 = vrot.slane %v7297_v49, 4  ;;  %v7019_v29 = vadd.f32 %v7018_v7, %v12898_v38  ;;  %v7020_v42 = vpop.f32.mrb[237].mxu0 }
 0x6ee   : > { %v12988_v61 = vpop.f32.mrb[230].mxu1 }
 0x6ef   : > { %v7296_v1 = vmax.f32 %v7294_v62, %v7295_v33  ;;  %v7299_v39 = vmax.f32 %v7297_v49, %v7298_v6  ;;  %v7165_v32 = vpop.f32.mrb[231].mxu1 }
 0x6f0   : > { %v7023_v16 = vpop.f32.mrb[238].mxu0 }
 0x6f1   : > { %v7689_v22 = vsel %vm7483_vm1, %v7296_v1, %v7289_v20  ;;  %v7300_v9 = vrot.slane %v7299_v39, 2  ;;  %v7024_v15 = vadd.f32 %v7023_v16, %v12900_v31  ;;  %v7025_v47 = vpop.f32.mrb[239].mxu0  ;;  %v7714_v31 = vld [vmem:[%s13113_s6] sm:$0xff] }
 0x6f2   : > { %v7168_v18 = vpop.f32.mrb[232].mxu1  ;;  %8250 = vmatprep.mubr.f32.mxu0 %v7714_v31 }
 0x6f3   : > { %v7301_v28 = vmax.f32 %v7299_v39, %v7300_v9  ;;  %v7304_v52 = vmax.f32 %v7019_v29, %v7024_v15  ;;  %v7170_v23 = vpop.f32.mrb[233].mxu1  ;;  %v7719_v39 = vld [vmem:[%s13114_s7 + $0x8] sm:$0xff] }
 0x6f4   : > { %v7028_v40 = vpop.f32.mrb[240].mxu0  ;;  %7729 = vperm.xlu1 %9210, %v7719_v39   ;;  %v7721_v23 = vld [vmem:[%s13114_s7 + $0x18] sm:$0xf] }
 0x6f5   : > { %v7302_v38 = vrot.slane %v7301_v28, 1  ;;  %v7305_v55 = vrot.slane %v7304_v52, 4  ;;  %v7029_v51 = vadd.f32 %v7028_v40, %v12902_v35  ;;  %v7030_v34 = vpop.f32.mrb[241].mxu0 }
 0x6f6   : > { %v7173_v53 = vpop.f32.mrb[234].mxu1 }
 0x6f7   : > { %v7303_v48 = vmax.f32 %v7301_v28, %v7302_v38  ;;  %v7306_v36 = vmax.f32 %v7304_v52, %v7305_v55  ;;  %v12993_v13 = vmax.f32 %v7168_v18, %v7173_v53  ;;  %v7175_v43 = vpop.f32.mrb[235].mxu1 }
 0x6f8   : > { %v7033_v2 = vpop.f32.mrb[242].mxu0 }
 0x6f9   : > { %v7690_v37 = vsel %vm7485_vm2, %v7303_v48, %v7689_v22  ;;  %v7307_v44 = vrot.slane %v7306_v36, 2  ;;  %v7034_v50 = vadd.f32 %v7033_v2, %v12904_v57  ;;  %v7035_v60 = vpop.f32.mrb[243].mxu0  ;;  %v7718_v57 = vld [vmem:[%s13114_s7] sm:$0xff] }
 0x6fa   : > { %v7178_v35 = vpop.f32.mrb[236].mxu1  ;;  %7724 = vperm.xlu0 %9209, %v7718_v57  }
 0x6fb   : > { %v7308_v62 = vmax.f32 %v7306_v36, %v7307_v44  ;;  %v7311_v49 = vmax.f32 %v7029_v51, %v7034_v50  ;;  %v7180_v7 = vpop.f32.mrb[237].mxu1 }
 0x6fc   : > { %v7038_v33 = vpop.f32.mrb[244].mxu0 }
 0x6fd   : > { %v7309_v6 = vrot.slane %v7308_v62, 1  ;;  %v7312_v29 = vrot.slane %v7311_v49, 4  ;;  %v7039_v42 = vadd.f32 %v7038_v33, %v12906_v58  ;;  %v7040_v20 = vpop.f32.mrb[245].mxu0  ;;  %v7720_v58 = vld [vmem:[%s13114_s7 + $0x10] sm:$0xff] }
 0x6fe   : > { %v7183_v1 = vpop.f32.mrb[238].mxu1  ;;  %7734 = vperm.xlu1 %9210, %v7720_v58   ;;  %7739 = vperm.xlu0 %9209, %v7721_v23  }
 0x6ff   : > { %v7310_v32 = vmax.f32 %v7308_v62, %v7309_v6  ;;  %v7313_v16 = vmax.f32 %v7311_v49, %v7312_v29  ;;  %v13007_v22 = vmax.f32 %v7178_v35, %v7183_v1  ;;  %v7185_v9 = vpop.f32.mrb[239].mxu1 }
 0x700   : > { %v7043_v15 = vpop.f32.mrb[246].mxu0 }
 0x701   : > { %v7691_v47 = vsel %vm7487_vm3, %v7310_v32, %v7690_v37  ;;  %v7314_v18 = vrot.slane %v7313_v16, 2  ;;  %v7044_v28 = vadd.f32 %v7043_v15, %v12908_v25  ;;  %v7045_v52 = vpop.f32.mrb[247].mxu0 }
 0x702   : > { %v7188_v40 = vpop.f32.mrb[240].mxu1 }
 0x703   : > { %v7315_v38 = vmax.f32 %v7313_v16, %v7314_v18  ;;  %v7318_v55 = vmax.f32 %v7039_v42, %v7044_v28  ;;  %v7190_v51 = vpop.f32.mrb[241].mxu1 }
 0x704   : > { %v7048_v34 = vpop.f32.mrb[248].mxu0 }
 0x705   : > { %v7316_v53 = vrot.slane %v7315_v38, 1  ;;  %v7319_v48 = vrot.slane %v7318_v55, 4  ;;  %v7049_v36 = vadd.f32 %v7048_v34, %v12910_v54  ;;  %v7050_v43 = vpop.f32.mrb[249].mxu0 }
 0x706   : > { %v7193_v31 = vpop.f32.mrb[242].mxu1 }
 0x707   : > { %v7317_v2 = vmax.f32 %v7315_v38, %v7316_v53  ;;  %v7320_v25 = vmax.f32 %v7318_v55, %v7319_v48  ;;  %v13018_v37 = vmax.f32 %v7188_v40, %v7193_v31  ;;  %v7195_v44 = vpop.f32.mrb[243].mxu1 }
 0x708   : > { %v7053_v50 = vpop.f32.mrb[250].mxu0 }
 0x709   : > { %v7321_v60 = vrot.slane %v7320_v25, 2  ;;  %v7054_v35 = vadd.f32 %v7053_v50, %v12912_v8  ;;  %v7055_v62 = vpop.f32.mrb[251].mxu0  ;;  %v7692_v49 = vsel %vm7489_vm4, %v7317_v2, %v7691_v47 }
 0x70a   : > { %v7198_v7 = vpop.f32.mrb[244].mxu1 }
 0x70b   : > { %v7322_v33 = vmax.f32 %v7320_v25, %v7321_v60  ;;  %v7325_v6 = vmax.f32 %v7049_v36, %v7054_v35  ;;  %v7200_v29 = vpop.f32.mrb[245].mxu1 }
 0x70c   : > { %v7058_v42 = vpop.f32.mrb[252].mxu0 }
 0x70d   : > { %v7323_v54 = vrot.slane %v7322_v33, 1  ;;  %v7326_v20 = vrot.slane %v7325_v6, 4  ;;  %v7059_v1 = vadd.f32 %v7058_v42, %v12914_v41  ;;  %v7060_v39 = vpop.f32.mrb[253].mxu0 }
 0x70e   : > { %v7203_v57 = vpop.f32.mrb[246].mxu1 }
 0x70f   : > { %v7324_v32 = vmax.f32 %v7322_v33, %v7323_v54  ;;  %v7327_v16 = vmax.f32 %v7325_v6, %v7326_v20  ;;  %v13023_v9 = vmax.f32 %v7198_v7, %v7203_v57  ;;  %v7205_v15 = vpop.f32.mrb[247].mxu1 }
 0x710   : > { %v7063_v8 = vpop.f32.mrb[254].mxu0 }
 0x711   : > { %v7328_v58 = vrot.slane %v7327_v16, 2  ;;  %v7064_v47 = vadd.f32 %v7063_v8, %v12916_v4  ;;  %v7065_v18 = vpop.f32.mrb[255].mxu0  ;;  %v7693_v28 = vsel %vm7491_vm5, %v7324_v32, %v7692_v49 }
 0x712   : > { %v7208_v52 = vpop.f32.mrb[248].mxu1 }
 0x713   : > { %v7329_v23 = vmax.f32 %v7327_v16, %v7328_v58  ;;  %v7332_v40 = vmax.f32 %v7059_v1, %v7064_v47  ;;  %v7210_v38 = vpop.f32.mrb[249].mxu1 }
 0x714   : > { %v7068_v55 = vpop.f32.mrb[0].mxu0 }
 0x715   : > { %v7330_v41 = vrot.slane %v7329_v23, 1  ;;  %v7333_v51 = vrot.slane %v7332_v40, 4  ;;  %v7069_v34 = vadd.f32 %v7068_v55, %v12918_v26  ;;  %v7070_v53 = vpop.f32.mrb[1].mxu0 }
 0x716   : > { %v7213_v48 = vpop.f32.mrb[250].mxu1 }
 0x717   : > { %v7331_v36 = vmax.f32 %v7329_v23, %v7330_v41  ;;  %v7334_v43 = vmax.f32 %v7332_v40, %v7333_v51  ;;  %v13028_v31 = vmax.f32 %v7208_v52, %v7213_v48  ;;  %v7215_v2 = vpop.f32.mrb[251].mxu1 }
 0x718   : > { %v7073_v4 = vpop.f32.mrb[2].mxu0 }
 0x719   : > { %v7335_v25 = vrot.slane %v7334_v43, 2  ;;  %v7074_v44 = vadd.f32 %v7073_v4, %v12920_v10  ;;  %v7075_v50 = vpop.f32.mrb[3].mxu0  ;;  %v7694_v60 = vsel %vm7493_vm6, %v7331_v36, %v7693_v28 }
 0x71a   : > { %v7218_v35 = vpop.f32.mrb[252].mxu1 }
 0x71b   : > { %v7336_v62 = vmax.f32 %v7334_v43, %v7335_v25  ;;  %v7339_v49 = vmax.f32 %v7069_v34, %v7074_v44  ;;  %v7220_v7 = vpop.f32.mrb[253].mxu1 }
 0x71c   : > { %v7078_v33 = vpop.f32.mrb[4].mxu0 }
 0x71d   : > { %v7337_v26 = vrot.slane %v7336_v62, 1  ;;  %v7340_v6 = vrot.slane %v7339_v49, 4  ;;  %v7079_v29 = vadd.f32 %v7078_v33, %v12922_v14  ;;  %v7080_v42 = vpop.f32.mrb[5].mxu0 }
 0x71e   : > { %v7223_v54 = vpop.f32.mrb[254].mxu1 }
 0x71f   : > { %v7338_v20 = vmax.f32 %v7336_v62, %v7337_v26  ;;  %v7341_v1 = vmax.f32 %v7339_v49, %v7340_v6  ;;  %v13033_v39 = vmax.f32 %v7218_v35, %v7223_v54  ;;  %v7225_v57 = vpop.f32.mrb[255].mxu1 }
 0x720   : > { %v7083_v10 = vpop.f32.mrb[6].mxu0 }
 0x721   : > { %v7084_v32 = vadd.f32 %v7083_v10, %v12924_v56  ;;  %v7085_v16 = vpop.f32.mrb[7].mxu0  ;;  %v7695_v15 = vsel %vm7495_vm7, %v7338_v20, %v7694_v60  ;;  %v7342_v58 = vrot.slane %v7341_v1, 2 }
 0x722   : > { %v8600_v8 = vpack.c.bf16 %v7695_v15, %v12983_v21 }
 0x723   : > { %v7346_v47 = vmax.f32 %v7079_v29, %v7084_v32  ;;  %v7343_v23 = vmax.f32 %v7341_v1, %v7342_v58 }
 0x724   : > { %v7088_v18 = vpop.f32.mrb[8].mxu0  ;;  %8601 = vmatprep.subr.bf16.mxu0 %v8600_v8 }
 0x725   : > { %v7347_v14 = vrot.slane %v7346_v47, 4  ;;  %v7089_v28 = vadd.f32 %v7088_v18, %v12926_v11  ;;  %8603 = vmatpush3.bf16.msra.mxu0 %v8600_v8  ;;  %v7090_v52 = vpop.f32.mrb[9].mxu0  ;;  %v7344_v51 = vrot.slane %v7343_v23, 1 }
 0x727   : > { %v7348_v40 = vmax.f32 %v7346_v47, %v7347_v14  ;;  %v7345_v4 = vmax.f32 %v7343_v23, %v7344_v51 }
 0x728   : > { %v7093_v38 = vpop.f32.mrb[10].mxu0 }
 0x729   : > { %v7349_v55 = vrot.slane %v7348_v40, 2  ;;  %v7094_v56 = vadd.f32 %v7093_v38, %v12928_v63  ;;  %v7095_v41 = vpop.f32.mrb[11].mxu0 }
 0x72b   : > { %v7350_v34 = vmax.f32 %v7348_v40, %v7349_v55  ;;  %v7353_v53 = vmax.f32 %v7089_v28, %v7094_v56 }
 0x72c   : > { %v7098_v21 = vpop.f32.mrb[12].mxu0 }
 0x72d   : > { %v7351_v48 = vrot.slane %v7350_v34, 1  ;;  %v7354_v36 = vrot.slane %v7353_v53, 4  ;;  %v7099_v43 = vadd.f32 %v7098_v21, %v12930_v0  ;;  %v7100_v2 = vpop.f32.mrb[13].mxu0 }
 0x72f   : > { %v7352_v11 = vmax.f32 %v7350_v34, %v7351_v48  ;;  %v7355_v25 = vmax.f32 %v7353_v53, %v7354_v36 }
 0x730   : > { %v7103_v44 = vpop.f32.mrb[14].mxu0 }
 0x731   : > { %v7696_v50 = vsel %vm7483_vm1, %v7352_v11, %v7345_v4  ;;  %v7356_v60 = vrot.slane %v7355_v25, 2  ;;  %v7104_v35 = vadd.f32 %v7103_v44, %v12932_v45  ;;  %v7105_v63 = vpop.f32.mrb[15].mxu0 }
 0x733   : > { %v7357_v62 = vmax.f32 %v7355_v25, %v7356_v60  ;;  %v7360_v49 = vmax.f32 %v7099_v43, %v7104_v35 }
 0x734   : > { %v7108_v7 = vpop.f32.mrb[16].mxu0 }
 0x735   : > { %v7358_v33 = vrot.slane %v7357_v62, 1  ;;  %v7361_v26 = vrot.slane %v7360_v49, 4  ;;  %v7109_v6 = vadd.f32 %v7108_v7, %v12934_v17  ;;  %v7110_v29 = vpop.f32.mrb[17].mxu0 }
 0x737   : > { %v7359_v0 = vmax.f32 %v7357_v62, %v7358_v33  ;;  %v7362_v42 = vmax.f32 %v7360_v49, %v7361_v26  ;;  %v13664_v49 = vld [vmem:[#allocation41_spill] sm:$0xff] }
 0x738   : > { %v7113_v54 = vpop.f32.mrb[18].mxu0 }
 0x739   : > { %v7697_v20 = vsel %vm7485_vm2, %v7359_v0, %v7696_v50  ;;  %v7363_v1 = vrot.slane %v7362_v42, 2  ;;  %v7114_v57 = vadd.f32 %v7113_v54, %v12936_v3  ;;  %v7115_v10 = vpop.f32.mrb[19].mxu0 }
 0x73a   : > { %v7417_v10 = vrot.slane %v13007_v22, 4 }
 0x73b   : > { %v7364_v32 = vmax.f32 %v7362_v42, %v7363_v1  ;;  %v7367_v45 = vmax.f32 %v7109_v6, %v7114_v57  ;;  %v7410_v57 = vrot.slane %v12993_v13, 4 }
 0x73c   : > { %v7118_v16 = vpop.f32.mrb[20].mxu0 }
 0x73d   : > { %v7365_v15 = vrot.slane %v7364_v32, 1  ;;  %v7368_v8 = vrot.slane %v7367_v45, 4  ;;  %v7119_v58 = vadd.f32 %v7118_v16, %v12939_v19  ;;  %v7120_v47 = vpop.f32.mrb[21].mxu0 }
 0x73e   : > { %v7431_v47 = vrot.slane %v13023_v9, 4 }
 0x73f   : > { %v7366_v18 = vmax.f32 %v7364_v32, %v7365_v15  ;;  %v7369_v17 = vmax.f32 %v7367_v45, %v7368_v8 }
 0x740   : > { %v7123_v14 = vpop.f32.mrb[22].mxu0 }
 0x741   : > { %v7698_v28 = vsel %vm7487_vm3, %v7366_v18, %v7697_v20  ;;  %v7370_v52 = vrot.slane %v7369_v17, 2  ;;  %v7124_v23 = vadd.f32 %v7123_v14, %v12942_v59  ;;  %v7125_v40 = vpop.f32.mrb[23].mxu0  ;;  %v7418_v14 = vmax.f32 %v13007_v22, %v7417_v10 }
 0x742   : > { %v7445_v40 = vrot.slane %v13033_v39, 4 }
 0x743   : > { %v7371_v38 = vmax.f32 %v7369_v17, %v7370_v52  ;;  %v7374_v3 = vmax.f32 %v7119_v58, %v7124_v23  ;;  %v7424_v58 = vrot.slane %v13018_v37, 4  ;;  %v7411_v17 = vmax.f32 %v12993_v13, %v7410_v57 }
 0x744   : > { %v7128_v55 = vpop.f32.mrb[24].mxu0  ;;  %v7419_v22 = vrot.slane %v7418_v14, 2 }
 0x745   : > { %v7372_v56 = vrot.slane %v7371_v38, 1  ;;  %v7375_v41 = vrot.slane %v7374_v3, 4  ;;  %v7129_v51 = vadd.f32 %v7128_v55, %v12945_v30  ;;  %v7130_v34 = vpop.f32.mrb[25].mxu0  ;;  %v7425_v55 = vmax.f32 %v13018_v37, %v7424_v58  ;;  %v7716_v58 = vld [vmem:[%s13113_s6 + $0x10] sm:$0xff] }
 0x746   : > { %v7412_v34 = vrot.slane %v7411_v17, 2 }
 0x747   : > { %v7373_v53 = vmax.f32 %v7371_v38, %v7372_v56  ;;  %v7376_v19 = vmax.f32 %v7374_v3, %v7375_v41  ;;  %v7432_v56 = vmax.f32 %v13023_v9, %v7431_v47  ;;  %v7717_v47 = vld [vmem:[%s13113_s6 + $0x18] sm:$0xf] }
 0x748   : > { %v7133_v21 = vpop.f32.mrb[26].mxu0 }
 0x749   : > { %v7377_v48 = vrot.slane %v7376_v19, 2  ;;  %v7134_v36 = vadd.f32 %v7133_v21, %v12948_v46  ;;  %v7135_v43 = vpop.f32.mrb[27].mxu0  ;;  %v7699_v2 = vsel %vm7489_vm4, %v7373_v53, %v7698_v28  ;;  %v7438_v28 = vrot.slane %v13028_v31, 4 }
 0x74a   : > { %v7433_v43 = vrot.slane %v7432_v56, 2 }
 0x74b   : > { %v7378_v4 = vmax.f32 %v7376_v19, %v7377_v48  ;;  %v7381_v59 = vmax.f32 %v7129_v51, %v7134_v36  ;;  %v7439_v53 = vmax.f32 %v13028_v31, %v7438_v28  ;;  %v7446_v19 = vmax.f32 %v13033_v39, %v7445_v40 }
 0x74c   : > { %v7138_v11 = vpop.f32.mrb[28].mxu0 }
 0x74d   : > { %v7379_v25 = vrot.slane %v7378_v4, 1  ;;  %v7382_v44 = vrot.slane %v7381_v59, 4  ;;  %v7139_v50 = vadd.f32 %v7138_v11, %v12951_v24  ;;  %v7140_v60 = vpop.f32.mrb[29].mxu0  ;;  %v7440_v9 = vrot.slane %v7439_v53, 2 }
 0x74e   : > { %v7447_v11 = vrot.slane %v7446_v19, 2 }
 0x74f   : > { %v7380_v35 = vmax.f32 %v7378_v4, %v7379_v25  ;;  %v7383_v30 = vmax.f32 %v7381_v59, %v7382_v44  ;;  %v7413_v4 = vmax.f32 %v7411_v17, %v7412_v34  ;;  %v7420_v59 = vmax.f32 %v7418_v14, %v7419_v22 }
 0x750   : > { %v7143_v63 = vpop.f32.mrb[30].mxu0  ;;  %v7434_v44 = vmax.f32 %v7432_v56, %v7433_v43 }
 0x751   : > { %v7384_v62 = vrot.slane %v7383_v30, 2  ;;  %v7144_v7 = vadd.f32 %v7143_v63, %v13664_v49  ;;  %v7145_v33 = vpop.f32.mrb[31].mxu0  ;;  %v7700_v46 = vsel %vm7491_vm5, %v7380_v35, %v7699_v2  ;;  %v7414_v31 = vrot.slane %v7413_v4, 1 }
 0x752   : > { %v7441_v35 = vmax.f32 %v7439_v53, %v7440_v9  ;;  %v7421_v39 = vrot.slane %v7420_v59, 1  ;;  %v7435_v49 = vrot.slane %v7434_v44, 1 }
 0x753   : > { %v7385_v26 = vmax.f32 %v7383_v30, %v7384_v62  ;;  %v7388_v6 = vmax.f32 %v7139_v50, %v7144_v7  ;;  %v7448_v30 = vmax.f32 %v7446_v19, %v7447_v11 }
 0x754   : > { %v7148_v29 = vpop.f32.mrb[32].mxu0 }
 0x755   : > { %v7386_v0 = vrot.slane %v7385_v26, 1  ;;  %v7389_v42 = vrot.slane %v7388_v6, 4  ;;  %v7149_v54 = vadd.f32 %v7148_v29, %v12957_v27  ;;  %v7150_v20 = vpop.f32.mrb[33].mxu0  ;;  %v7449_v29 = vrot.slane %v7448_v30, 1 }
 0x756   : > { %v7436_v20 = vmax.f32 %v7434_v44, %v7435_v49 }
 0x757   : > { %v7387_v1 = vmax.f32 %v7385_v26, %v7386_v0  ;;  %v7390_v24 = vmax.f32 %v7388_v6, %v7389_v42  ;;  %v7442_v26 = vrot.slane %v7441_v35, 1  ;;  %v7422_v6 = vmax.f32 %v7420_v59, %v7421_v39 }
 0x758   : > { %v7153_v32 = vpop.f32.mrb[34].mxu0  ;;  %v7450_v10 = vmax.f32 %v7448_v30, %v7449_v29 }
 0x759   : > { %v7391_v45 = vrot.slane %v7390_v24, 2  ;;  %v7154_v16 = vadd.f32 %v7153_v32, %v12961_v12  ;;  %v7155_v15 = vpop.f32.mrb[35].mxu0  ;;  %v7701_v8 = vsel %vm7493_vm6, %v7387_v1, %v7700_v46  ;;  %v7415_v46 = vmax.f32 %v7413_v4, %v7414_v31 }
 0x75b   : > { %v7392_v18 = vmax.f32 %v7390_v24, %v7391_v45  ;;  %v7395_v27 = vmax.f32 %v7149_v54, %v7154_v16  ;;  %v7443_v24 = vmax.f32 %v7441_v35, %v7442_v26 }
 0x75c   : > { %v7158_v52 = vpop.f32.mrb[36].mxu0 }
 0x75d   : > { %v7393_v23 = vrot.slane %v7392_v18, 1  ;;  %v7396_v12 = vrot.slane %v7395_v27, 4  ;;  %v7159_v38 = vadd.f32 %v7158_v52, %v12964_v5  ;;  %v7160_v3 = vpop.f32.mrb[37].mxu0  ;;  %v7426_v5 = vrot.slane %v7425_v55, 2 }
 0x75f   : > { %v7394_v41 = vmax.f32 %v7392_v18, %v7393_v23  ;;  %v7397_v51 = vmax.f32 %v7395_v27, %v7396_v12  ;;  %v7402_v13 = vmax.f32 %v7159_v38, %v12988_v61  ;;  %v7427_v61 = vmax.f32 %v7425_v55, %v7426_v5 }
 0x761   : > { %v7398_v21 = vrot.slane %v7397_v51, 2  ;;  %v7403_v48 = vrot.slane %v7402_v13, 4  ;;  %v7702_v36 = vsel %vm7495_vm7, %v7394_v41, %v7701_v8  ;;  %v7428_v62 = vrot.slane %v7427_v61, 1  ;;  %v7715_v8 = vld [vmem:[%s13113_s6 + $0x8] sm:$0xff] }
 0x763   : > { %v7399_v2 = vmax.f32 %v7397_v51, %v7398_v21  ;;  %v7404_v37 = vmax.f32 %v7402_v13, %v7403_v48  ;;  %v7429_v42 = vmax.f32 %v7427_v61, %v7428_v62 }
 0x765   : > { %v7405_v25 = vrot.slane %v7404_v37, 2  ;;  %v7400_v50 = vrot.slane %v7399_v2, 1 }
 0x767   : > { %v7406_v60 = vmax.f32 %v7404_v37, %v7405_v25  ;;  %v7401_v7 = vmax.f32 %v7399_v2, %v7400_v50 }
 0x769   : > { %v7407_v63 = vrot.slane %v7406_v60, 1 }
 0x76b   : > { %v7408_v33 = vmax.f32 %v7406_v60, %v7407_v63 }
 0x76d   : > { %v7703_v0 = vsel %vm7483_vm1, %v7408_v33, %v7401_v7 }
 0x76e   : > { %v7704_v54 = vsel %vm7485_vm2, %v7415_v46, %v7703_v0 }
 0x76f   : > { %v7705_v1 = vsel %vm7487_vm3, %v7422_v6, %v7704_v54 }
 0x770   : > { %v7706_v57 = vsel %vm7489_vm4, %v7429_v42, %v7705_v1 }
 0x771   : > { %v7707_v32 = vsel %vm7491_vm5, %v7436_v20, %v7706_v57 }
 0x772   : > { %v7708_v45 = vsel %vm7493_vm6, %v7443_v24, %v7707_v32 }
 0x773   : > { %v7709_v16 = vsel %vm7495_vm7, %v7450_v10, %v7708_v45  ;;  %v7730_v27 = vpop.permute.xlu1 %7729 }
 0x774   : > { %v8604_v15 = vpack.c.bf16 %v7709_v16, %v7702_v36 }
 0x776   : > { %8605 = vmatprep.subr.bf16.mxu0 %v8604_v15 }
 0x777   : > { %8607 = vmatpush3.bf16.msra.mxu0 %v8604_v15 }
 0x779   : > { %v7725_v18 = vpop.permute.xlu0 %7724 }
 0x77a   : > { %8251 = vmatmul.mubr.f32.vlgmr.msra.gmra.mrb[38].mxu0 %v7715_v8 }
 0x77b   : > { %8253 = vmatprep.mubr.f32.mxu0 %v7716_v58 }
 0x77d   : > { %v7740_v40 = vpop.permute.xlu0 %7739  ;;  %v7735_v12 = vpop.permute.xlu1 %7734 }
 0x77e   : > { %8254 = vmatmul.mubr.f32.gmra.mrb[40].mxu0 %v7717_v47 }
 0x84d   : > { %v8252_v17 = vpop.f32.mrb[38].mxu0 }
 0x84e   : > { %v7814_v14 = vadd.f32 %v8252_v17, %v7730_v27  ;;  %v7808_v28 = vpop.f32.mrb[39].mxu0 }
 0x84f   : > { %v7809_v52 = vadd.f32 %v7808_v28, %v7725_v18  ;;  %7837 = sbr.rel (!%p13665_p6) target bundleno = 2142 (0x85e), region = 106 }
 0x850   : > { %7828 = vst [vmem:[%s437_s20 + $0x8] sm:$0xff] %v7814_v14 }
 0x851   : > { %7827 = vst [vmem:[%s437_s20] sm:$0xff] %v7809_v52  ;;  %v8255_v23 = vpop.f32.mrb[40].mxu0 }
 0x852   : > { %v7824_v38 = vadd.f32 %v8255_v23, %v7740_v40  ;;  %v7818_v3 = vpop.f32.mrb[41].mxu0 }
 0x853   : > { %v7819_v55 = vadd.f32 %v7818_v3, %v7735_v12 }
 0x854   : > { %7830 = vst [vmem:[%s437_s20 + $0x18] sm:$0xf] %v7824_v38 }
 0x855   : > { %7829 = vst [vmem:[%s437_s20 + $0x10] sm:$0xff] %v7819_v55 }
 0x857   : > { %v7875_v41 = vld [vmem:[%s437_s20 + $0x8] sm:$0xff] }
 0x858   : > { %v7873_v56 = vld [vmem:[%s437_s20] sm:$0xff]  ;;  %7876 = vst [vmem:[%s7839_s9 + $0x10] sm:$0xff] %v7875_v41 }
 0x859   : > { %7874 = vst [vmem:[%s7839_s9] sm:$0xff] %v7873_v56 }
 0x85b   : > { %v7879_v13 = vld [vmem:[%s437_s20 + $0x18] sm:$0xff] }
 0x85c   : > { %v7877_v51 = vld [vmem:[%s437_s20 + $0x10] sm:$0xff]  ;;  %7880 = vst [vmem:[%s7839_s9 + $0x30] sm:$0xff] %v7879_v13 }
 0x85d   : > { %7878 = vst [vmem:[%s7839_s9 + $0x20] sm:$0xff] %v7877_v51 }
 0x85e PF: > { %s13667_s29 = sld [smem:[#allocation11_spill]]  ;;  %s13668_s14 = sld [smem:[#allocation12_spill]] }
 0x85f   : > { %s13669_s27 = smov %s9505_s28 }
 0x864   : > { %p17_p7 = scmp.ge.s32.totalorder %s13667_s29, 4   ;;  %s13670_s28 = smov %s13668_s14 }
 0x866   :  { %19 = sbr.rel (!%p17_p7) target bundleno = 5 (0x5), region = 176 }
 0x86d   :  { %7896 = vsyncpa [#allocation4], 1 }
 0x86e   :  { %7898 = vsyncpa [#allocation4 + $0x1], 1 }
 0x86f   :  { %7899 = vsyncpa [#allocation6], 1 }

</bundles_post_ra>
